<compile_context>
chip_gen: v6e
topology: v6e:2x2x1
jax: 0.10.0
libtpu: 0.0.40
codegen_flags: <defaults>
</compile_context>

<pallas_src>
import jax
import jax.numpy as jnp
from jax.experimental import pallas as pl
from jax.experimental.pallas import tpu as pltpu

F32 = jnp.float32
BF16 = jnp.bfloat16
NEG = -1e9          # python float -> jaxpr literal (NOT a captured jax-array constant)
OUT_PAD = 128       # lane-dense packed-output width


def _masked_softmax(logit, mask):
    """Softmax along the last axis with a 0/1 validity mask; safe for all-masked rows."""
    logit = jnp.where(mask > 0.5, logit, NEG)
    m = jnp.max(logit, axis=-1, keepdims=True)
    e = jnp.exp(logit - m) * mask
    denom = jnp.maximum(jnp.sum(e, axis=-1, keepdims=True), 1e-6)
    return e / denom


# --------------------------------------------------------------------------- #
# Fused Seq2SQL forward kernel (one grid step = one batch tile)
# --------------------------------------------------------------------------- #
def seq2sql_fused_kernel(
        # ---- batch-tiled data inputs ----
        q_ref, dec_ref, col_ref, qmask_ref, colmask_ref,
        # ---- weights (full, block-invariant) ----
        ewx_ref, ewh_ref, eb_ref,            # encoder LSTM per-gate: (4,D,H) bf16,(4,H,H) bf16,(4,1,H) f32
        dwx_ref, dwh_ref, db_ref,            # decoder LSTM per-gate
        aatt_ref, aw1_ref, ab1_ref, aw2_ref, ab2_ref,                 # AggregatePredictor
        cencw_ref, cencb_ref, satt_ref, swkc_ref, sb_ref, sout_ref,   # SelectPredictor
        cptr_ref,                                                     # ConditionPredictor
        # ---- outputs ----
        out_ps_ref,                          # (TB, 128)         [agg | sel | zero-pad]
        out_cond_ref,                        # (TB*Tdec, 128)    [pointer scores | zero-pad]
        # ---- VMEM scratch (intermediates never touch HBM) ----
        hq_s,                                # (TB, T, H)     encoder hidden states (batch-major)
        gd_s,                                # (TB, Tdec, H)  decoder hidden states
        xge_s,                               # (4, TB, T, H)  encoder gate pre-activations
        xgd_s):                              # (4, TB, Tdec, H) decoder gate pre-activations
    TB, T, D = q_ref.shape
    Tdec = dec_ref.shape[1]
    C = col_ref.shape[1]
    H = ewh_ref.shape[1]
    NAGG = aw2_ref.shape[1]

    qmask = qmask_ref[...]                   # (TB, T)  1.0 = valid question token
    colmask = colmask_ref[...]               # (TB, C)  1.0 = valid column

    # ------------- Phase 1a: x-path gate pre-activations -> VMEM scratch -------------
    def gate_preact(x_ref, wx_ref, b_ref, xg_s):
        S = x_ref.shape[1]
        xf = x_ref[...].reshape(TB * S, D).astype(BF16)
        for g in range(4):                   # gate-major: no 32-lane gate slicing at H<128
            xg_s[g] = (jnp.dot(xf, wx_ref[g], preferred_element_type=F32)
                       + b_ref[g]).reshape(TB, S, H)

    gate_preact(q_ref, ewx_ref, eb_ref, xge_s)
    gate_preact(dec_ref, dwx_ref, db_ref, xgd_s)

    # ------------- Phase 1b: encoder + decoder recurrences, interleaved -------------
    def lstm_step(xg_s, t, h, c, wh_ref):
        h_bf = h.astype(BF16)                # bf16 MXU operand, f32 accumulate
        pre = [xg_s[g, :, t, :] + jnp.dot(h_bf, wh_ref[g], preferred_element_type=F32)
               for g in range(4)]
        i = jax.nn.sigmoid(pre[0])
        f = jax.nn.sigmoid(pre[1])
        gg = jnp.tanh(pre[2])
        o = jax.nn.sigmoid(pre[3])
        c = f * c + i * gg                   # cell state stays f32
        h = o * jnp.tanh(c)
        return h, c

    h_e = jnp.zeros((TB, H), F32)
    c_e = jnp.zeros((TB, H), F32)
    h_d = jnp.zeros((TB, H), F32)
    c_d = jnp.zeros((TB, H), F32)
    # TODO(synk): at production T/Tdec (>~16) switch to lax.fori_loop(..., unroll=4).
    for t in range(max(T, Tdec)):            # static unroll; the two chains interleave
        if t < T:
            h_e, c_e = lstm_step(xge_s, t, h_e, c_e, ewh_ref)
            hq_s[:, t, :] = h_e              # batch-major per-step store into scratch
        if t < Tdec:
            h_d, c_d = lstm_step(xgd_s, t, h_d, c_d, dwh_ref)
            gd_s[:, t, :] = h_d

    hq = hq_s[...]                           # (TB, T, H) — no transpose needed
    hq_bf = hq.astype(BF16)
    hq_flat_bf = hq_bf.reshape(TB * T, H)    # free contiguous view

    # ------------- Phase 2: AggregatePredictor -> (TB, NAGG) -------------
    agg_logit = jnp.dot(hq_flat_bf, aatt_ref[...],
                        preferred_element_type=F32).reshape(TB, T)            # MXU
    agg_att = _masked_softmax(agg_logit, qmask)                               # (TB, T)
    k_agg = jnp.einsum('bqt,bth->bqh', agg_att[:, None, :].astype(BF16), hq_bf,
                       preferred_element_type=F32)[:, 0, :]                   # (TB, H)
    agg_hid = jnp.tanh(jnp.dot(k_agg.astype(BF16), aw1_ref[...],
                               preferred_element_type=F32) + ab1_ref[...])
    agg_score = (jnp.dot(agg_hid.astype(BF16), aw2_ref[...],
                         preferred_element_type=F32) + ab2_ref[...])          # (TB, NAGG)

    # ------------- Phase 3: SelectPredictor -> (TB, C) -------------
    ecol = jnp.tanh(
        jnp.dot(col_ref[...].reshape(TB * C, D).astype(BF16), cencw_ref[...],
                preferred_element_type=F32) + cencb_ref[...]).reshape(TB, C, H)
    proj_s = jnp.dot(hq_flat_bf, satt_ref[...],
                     preferred_element_type=F32).reshape(TB, T, H)
    sel_logit = jnp.einsum('bch,bth->bct', ecol.astype(BF16), proj_s.astype(BF16),
                           preferred_element_type=F32)
    sel_att = _masked_softmax(sel_logit, qmask[:, None, :])                   # (TB, C, T)
    k_sel = jnp.einsum('bct,bth->bch', sel_att.astype(BF16), hq_bf,
                       preferred_element_type=F32)
    kc = jnp.concatenate([k_sel, ecol], axis=-1).reshape(TB * C, 2 * H)
    sel_hid = jnp.tanh(jnp.dot(kc.astype(BF16), swkc_ref[...],
                               preferred_element_type=F32) + sb_ref[...])     # (TB*C, H)
    sel_score = jnp.dot(sel_hid.astype(BF16), sout_ref[...],
                        preferred_element_type=F32).reshape(TB, C)            # MXU dot-reduce
    sel_score = jnp.where(colmask > 0.5, sel_score, NEG)

    # ------------- Phase 4: ConditionPredictor pointer scores -> (TB, Tdec, T) -------------
    gd = gd_s[...]
    proj_c = jnp.dot(hq_flat_bf, cptr_ref[...],
                     preferred_element_type=F32).reshape(TB, T, H)
    cond_score = jnp.einsum('bsh,bth->bst', gd.astype(BF16), proj_c.astype(BF16),
                            preferred_element_type=F32)
    cond_score = jnp.where(qmask[:, None, :] > 0.5, cond_score, NEG)

    # ------------- Phase 5: lane-dense packed outputs (full-tile stores) -------------
    pad_ps = out_ps_ref.shape[-1] - (NAGG + C)
    out_ps_ref[...] = jnp.concatenate(
        [agg_score, sel_score, jnp.zeros((TB, pad_ps), F32)], axis=-1)
    pad_c = out_cond_ref.shape[-1] - T
    out_cond_ref[...] = jnp.concatenate(
        [cond_score.reshape(TB * Tdec, T), jnp.zeros((TB * Tdec, pad_c), F32)], axis=-1)


# --------------------------------------------------------------------------- #
# Parameters + forward wrapper
# --------------------------------------------------------------------------- #
def init_params(key, D, H, n_agg):
    def nrm(k, shape, scale=0.1):
        return (scale * jax.random.normal(k, shape)).astype(F32)
    ks = jax.random.split(key, 16)
    return {
        'enc_lstm': dict(wx=nrm(ks[0], (D, 4 * H)), wh=nrm(ks[1], (H, 4 * H)),
                         b=jnp.zeros((1, 4 * H), F32)),
        'dec_lstm': dict(wx=nrm(ks[2], (D, 4 * H)), wh=nrm(ks[3], (H, 4 * H)),
                         b=jnp.zeros((1, 4 * H), F32)),
        # AggregatePredictor
        'agg_att': nrm(ks[4], (1, H)),
        'agg_w1': nrm(ks[5], (H, H)), 'agg_b1': jnp.zeros((1, H), F32),
        'agg_w2': nrm(ks[6], (H, n_agg)), 'agg_b2': jnp.zeros((1, n_agg), F32),
        # SelectPredictor
        'col_enc_w': nrm(ks[7], (D, H)), 'col_enc_b': jnp.zeros((1, H), F32),
        'sel_att': nrm(ks[8], (H, H)),
        'sel_wk': nrm(ks[9], (H, H)), 'sel_wcol': nrm(ks[10], (H, H)),
        'sel_b': jnp.zeros((1, H), F32),
        'sel_out': nrm(ks[11], (1, H)),
        # ConditionPredictor pointer
        'cond_ptr': nrm(ks[12], (H, H)),
    }


def _split_gates(wx, wh, b, H):
    """Canonical (D,4H)/(H,4H)/(1,4H) LSTM params -> gate-major layout.
    Wrapper-side layout plumbing so the kernel's recurrent loop works on clean
    per-gate (.,H) tiles instead of 32-lane slices of a 128-lane vreg."""
    wx_g = wx.reshape(wx.shape[0], 4, H).transpose(1, 0, 2)   # (4, D, H)
    wh_g = wh.reshape(H, 4, H).transpose(1, 0, 2)             # (4, H, H)
    b_g = b.reshape(1, 4, H).transpose(1, 0, 2)               # (4, 1, H)
    return wx_g, wh_g, b_g


def seq2sql_forward(params, question_emb, question_len, column_emb, column_num,
                    decoder_emb, *, batch_tile=None):
    B, T, D = question_emb.shape
    C = column_emb.shape[1]
    Tdec = decoder_emb.shape[1]
    H = params['enc_lstm']['wh'].shape[0]
    NAGG = params['agg_w2'].shape[1]
    assert NAGG + C <= OUT_PAD and T <= OUT_PAD

    TB = B if batch_tile is None else batch_tile     # batch tile (grid axis)
    assert B % TB == 0

    # length masks (cheap glue, outside the kernel)
    qmask = (jnp.arange(T)[None, :] < question_len[:, None]).astype(F32)    # (B, T)
    colmask = (jnp.arange(C)[None, :] < column_num[:, None]).astype(F32)    # (B, C)

    ewx, ewh, eb = _split_gates(params['enc_lstm']['wx'], params['enc_lstm']['wh'],
                                params['enc_lstm']['b'], H)
    dwx, dwh, db = _split_gates(params['dec_lstm']['wx'], params['dec_lstm']['wh'],
                                params['dec_lstm']['b'], H)
    # merged select MLP weight: tanh([k ; ecol] @ [wk ; wcol] + b)
    swkc = jnp.concatenate([params['sel_wk'], params['sel_wcol']], axis=0)   # (2H, H)

    bf = lambda w: w.astype(BF16)            # bf16 MXU operands; biases stay f32
    args = (question_emb, decoder_emb, column_emb, qmask, colmask,
            bf(ewx), bf(ewh), eb, bf(dwx), bf(dwh), db,
            bf(params['agg_att'].T),                         # (H, 1)
            bf(params['agg_w1']), params['agg_b1'],
            bf(params['agg_w2']), params['agg_b2'],
            bf(params['col_enc_w']), params['col_enc_b'],
            bf(params['sel_att']), bf(swkc), params['sel_b'],
            bf(params['sel_out'].T),                         # (H, 1)
            bf(params['cond_ptr']))

    # Batch-tiled data specs + block-invariant weight specs (DMA'd once).
    data_specs = [
        pl.BlockSpec((TB, T, D), lambda b: (b, 0, 0)),       # question_emb
        pl.BlockSpec((TB, Tdec, D), lambda b: (b, 0, 0)),    # decoder_emb
        pl.BlockSpec((TB, C, D), lambda b: (b, 0, 0)),       # column_emb
        pl.BlockSpec((TB, T), lambda b: (b, 0)),             # qmask
        pl.BlockSpec((TB, C), lambda b: (b, 0)),             # colmask
    ]
    weight_specs = [pl.BlockSpec(a.shape, lambda b, n=a.ndim: (0,) * n)
                    for a in args[5:]]
    in_specs = data_specs + weight_specs

    out_shapes = (jax.ShapeDtypeStruct((B, OUT_PAD), F32),
                  jax.ShapeDtypeStruct((B * Tdec, OUT_PAD), F32))
    out_specs = (pl.BlockSpec((TB, OUT_PAD), lambda b: (b, 0)),
                 pl.BlockSpec((TB * Tdec, OUT_PAD), lambda b: (b, 0)))

    flops = 2 * B * ((T + Tdec) * 4 * H * (D + H)        # LSTM gate matmuls
                     + 2 * T * H * H                     # select-att / pointer projections
                     + C * (D * H + 2 * H * H)           # column encoder + merged sel MLP
                     + 2 * C * T * H                     # select attention logits + context
                     + Tdec * T * H                      # pointer scores
                     + H * H + H * NAGG                  # aggregate MLP
                     + (T + C) * H)                      # attention dot-reductions
    transcendentals = B * (5 * H * (T + Tdec) + (1 + 2 * C) * H
                           + T + C * T + Tdec * T)
    bytes_accessed = int(sum(int(a.size) * a.dtype.itemsize for a in args)
                         + 4 * (B * OUT_PAD + B * Tdec * OUT_PAD))

    packed, cond_flat = pl.pallas_call(
        seq2sql_fused_kernel,
        grid=(B // TB,),
        out_shape=out_shapes,
        in_specs=in_specs,
        out_specs=out_specs,
        scratch_shapes=[pltpu.VMEM((TB, T, H), F32),          # h_q   (encoder states)
                        pltpu.VMEM((TB, Tdec, H), F32),       # g_dec (decoder states)
                        pltpu.VMEM((4, TB, T, H), F32),       # encoder gate pre-acts
                        pltpu.VMEM((4, TB, Tdec, H), F32)],   # decoder gate pre-acts
        compiler_params=pltpu.CompilerParams(
            dimension_semantics=("parallel",),                # megacore-shardable on v7x
            vmem_limit_bytes=32 * 1024 * 1024),               # above v5e's 16MiB default, safe on v7x
        cost_estimate=pl.CostEstimate(flops=int(flops),
                                      transcendentals=int(transcendentals),
                                      bytes_accessed=bytes_accessed),
    )(*args)

    agg_score = packed[:, :NAGG]
    sel_score = packed[:, NAGG:NAGG + C]
    cond_score = cond_flat.reshape(B, Tdec, OUT_PAD)[:, :, :T]
    return agg_score, sel_score, cond_score


if __name__ == "__main__":
    B, T, D, H, C, TDEC, NAGG = 2, 8, 32, 32, 4, 5, 6
    key = jax.random.PRNGKey(0)
    k_p, k_q, k_c, k_d = jax.random.split(key, 4)

    params = init_params(k_p, D, H, NAGG)

    # Synthetic stand-ins for WordEmbedding.generate_batch / generate_column_batch
    # (string-token lookup is host-side and not translatable to a TPU kernel).
    question_emb = (0.5 * jax.random.normal(k_q, (B, T, D))).astype(F32)
    column_emb = (0.5 * jax.random.normal(k_c, (B, C, D))).astype(F32)
    decoder_emb = (0.5 * jax.random.normal(k_d, (B, TDEC, D))).astype(F32)
    question_len = jnp.array([8, 5], dtype=jnp.int32)
    column_num = jnp.array([4, 3], dtype=jnp.int32)

    agg, sel, cond = seq2sql_forward(params, question_emb, question_len,
                                     column_emb, column_num, decoder_emb)
    jax.block_until_ready((agg, sel, cond))

    assert agg.shape == (B, NAGG)
    assert sel.shape == (B, C)
    assert cond.shape == (B, TDEC, T)
    assert bool(jnp.all(jnp.isfinite(agg)))
    assert bool(jnp.all(jnp.isfinite(sel)))
    assert bool(jnp.all(jnp.isfinite(cond)))
    print("KERNEL_OK")
</pallas_src>

<mosaic_0001>
module attributes {stable_mosaic.version = 11 : i64} {
  func.func @seq2sql_fused_kernel(%arg0: i32, %arg1: memref<2x8x32xf32, #tpu.memory_space<vmem>>, %arg2: memref<2x5x32xf32, #tpu.memory_space<vmem>>, %arg3: memref<2x4x32xf32, #tpu.memory_space<vmem>>, %arg4: memref<2x8xf32, #tpu.memory_space<vmem>>, %arg5: memref<2x4xf32, #tpu.memory_space<vmem>>, %arg6: memref<4x32x32xbf16, #tpu.memory_space<vmem>>, %arg7: memref<4x32x32xbf16, #tpu.memory_space<vmem>>, %arg8: memref<4x1x32xf32, #tpu.memory_space<vmem>>, %arg9: memref<4x32x32xbf16, #tpu.memory_space<vmem>>, %arg10: memref<4x32x32xbf16, #tpu.memory_space<vmem>>, %arg11: memref<4x1x32xf32, #tpu.memory_space<vmem>>, %arg12: memref<32x1xbf16, #tpu.memory_space<vmem>>, %arg13: memref<32x32xbf16, #tpu.memory_space<vmem>>, %arg14: memref<1x32xf32, #tpu.memory_space<vmem>>, %arg15: memref<32x6xbf16, #tpu.memory_space<vmem>>, %arg16: memref<1x6xf32, #tpu.memory_space<vmem>>, %arg17: memref<32x32xbf16, #tpu.memory_space<vmem>>, %arg18: memref<1x32xf32, #tpu.memory_space<vmem>>, %arg19: memref<32x32xbf16, #tpu.memory_space<vmem>>, %arg20: memref<64x32xbf16, #tpu.memory_space<vmem>>, %arg21: memref<1x32xf32, #tpu.memory_space<vmem>>, %arg22: memref<32x1xbf16, #tpu.memory_space<vmem>>, %arg23: memref<32x32xbf16, #tpu.memory_space<vmem>>, %arg24: memref<2x128xf32, #tpu.memory_space<vmem>>, %arg25: memref<10x128xf32, #tpu.memory_space<vmem>>, %arg26: memref<2x8x32xf32, #tpu.memory_space<vmem>>, %arg27: memref<2x5x32xf32, #tpu.memory_space<vmem>>, %arg28: memref<4x2x8x32xf32, #tpu.memory_space<vmem>>, %arg29: memref<4x2x5x32xf32, #tpu.memory_space<vmem>>) attributes {dimension_semantics = [#tpu.dimension_semantics<parallel>], iteration_bounds = array<i64: 1>, scalar_prefetch = 0 : i64, scratch_operands = 4 : i64, tpu.core_type = #tpu.core_type<tc>, window_params = [{transform_indices = @transform_0, window_bounds = array<i64: 2, 8, 32>}, {transform_indices = @transform_1, window_bounds = array<i64: 2, 5, 32>}, {transform_indices = @transform_2, window_bounds = array<i64: 2, 4, 32>}, {transform_indices = @transform_3, window_bounds = array<i64: 2, 8>}, {transform_indices = @transform_4, window_bounds = array<i64: 2, 4>}, {pipeline_mode = #tpu.pipeline_mode<synchronous>, transform_indices = @transform_5, window_bounds = array<i64: 4, 32, 32>}, {pipeline_mode = #tpu.pipeline_mode<synchronous>, transform_indices = @transform_6, window_bounds = array<i64: 4, 32, 32>}, {pipeline_mode = #tpu.pipeline_mode<synchronous>, transform_indices = @transform_7, window_bounds = array<i64: 4, 1, 32>}, {pipeline_mode = #tpu.pipeline_mode<synchronous>, transform_indices = @transform_8, window_bounds = array<i64: 4, 32, 32>}, {pipeline_mode = #tpu.pipeline_mode<synchronous>, transform_indices = @transform_9, window_bounds = array<i64: 4, 32, 32>}, {pipeline_mode = #tpu.pipeline_mode<synchronous>, transform_indices = @transform_10, window_bounds = array<i64: 4, 1, 32>}, {pipeline_mode = #tpu.pipeline_mode<synchronous>, transform_indices = @transform_11, window_bounds = array<i64: 32, 1>}, {pipeline_mode = #tpu.pipeline_mode<synchronous>, transform_indices = @transform_12, window_bounds = array<i64: 32, 32>}, {pipeline_mode = #tpu.pipeline_mode<synchronous>, transform_indices = @transform_13, window_bounds = array<i64: 1, 32>}, {pipeline_mode = #tpu.pipeline_mode<synchronous>, transform_indices = @transform_14, window_bounds = array<i64: 32, 6>}, {pipeline_mode = #tpu.pipeline_mode<synchronous>, transform_indices = @transform_15, window_bounds = array<i64: 1, 6>}, {pipeline_mode = #tpu.pipeline_mode<synchronous>, transform_indices = @transform_16, window_bounds = array<i64: 32, 32>}, {pipeline_mode = #tpu.pipeline_mode<synchronous>, transform_indices = @transform_17, window_bounds = array<i64: 1, 32>}, {pipeline_mode = #tpu.pipeline_mode<synchronous>, transform_indices = @transform_18, window_bounds = array<i64: 32, 32>}, {pipeline_mode = #tpu.pipeline_mode<synchronous>, transform_indices = @transform_19, window_bounds = array<i64: 64, 32>}, {pipeline_mode = #tpu.pipeline_mode<synchronous>, transform_indices = @transform_20, window_bounds = array<i64: 1, 32>}, {pipeline_mode = #tpu.pipeline_mode<synchronous>, transform_indices = @transform_21, window_bounds = array<i64: 32, 1>}, {pipeline_mode = #tpu.pipeline_mode<synchronous>, transform_indices = @transform_22, window_bounds = array<i64: 32, 32>}, {transform_indices = @transform_23, window_bounds = array<i64: 2, 128>}, {transform_indices = @transform_24, window_bounds = array<i64: 10, 128>}]} {
    %c0 = arith.constant 0 : index
    %c0_0 = arith.constant 0 : index
    %0 = vector.load %arg4[%c0, %c0_0] : memref<2x8xf32, #tpu.memory_space<vmem>>, vector<2x8xf32>
    %c0_1 = arith.constant 0 : index
    %c0_2 = arith.constant 0 : index
    %1 = vector.load %arg5[%c0_1, %c0_2] : memref<2x4xf32, #tpu.memory_space<vmem>>, vector<2x4xf32>
    %c0_3 = arith.constant 0 : index
    %c0_4 = arith.constant 0 : index
    %c0_5 = arith.constant 0 : index
    %2 = vector.load %arg1[%c0_3, %c0_4, %c0_5] : memref<2x8x32xf32, #tpu.memory_space<vmem>>, vector<2x8x32xf32>
    %3 = vector.shape_cast %2 : vector<2x8x32xf32> to vector<16x32xf32>
    %4 = arith.truncf %3 : vector<16x32xf32> to vector<16x32xbf16>
    %c0_6 = arith.constant 0 : index
    %c0_7 = arith.constant 0 : index
    %c0_8 = arith.constant 0 : index
    %5 = vector.load %arg6[%c0_6, %c0_7, %c0_8] : memref<4x32x32xbf16, #tpu.memory_space<vmem>>, vector<1x32x32xbf16>
    %6 = vector.shape_cast %5 : vector<1x32x32xbf16> to vector<32x32xbf16>
    %cst = arith.constant dense<0.000000e+00> : vector<16x32xf32>
    %7 = tpu.matmul %4, %6, %cst {dimension_numbers = #tpu.dot_dimension_numbers<[1], [0], [0], [1], [0, 0, 1, 1], [], []>} : vector<16x32xbf16>, vector<32x32xbf16>, vector<16x32xf32> -> vector<16x32xf32>
    %c0_9 = arith.constant 0 : index
    %c0_10 = arith.constant 0 : index
    %c0_11 = arith.constant 0 : index
    %8 = vector.load %arg8[%c0_9, %c0_10, %c0_11] : memref<4x1x32xf32, #tpu.memory_space<vmem>>, vector<1x1x32xf32>
    %9 = vector.shape_cast %8 : vector<1x1x32xf32> to vector<1x32xf32>
    %10 = vector.broadcast %9 : vector<1x32xf32> to vector<16x32xf32>
    %11 = arith.addf %7, %10 : vector<16x32xf32>
    %12 = vector.shape_cast %11 : vector<16x32xf32> to vector<2x8x32xf32>
    %c0_12 = arith.constant 0 : index
    %c0_13 = arith.constant 0 : index
    %c0_14 = arith.constant 0 : index
    %c0_15 = arith.constant 0 : index
    %13 = vector.load %arg28[%c0_12, %c0_13, %c0_14, %c0_15] : memref<4x2x8x32xf32, #tpu.memory_space<vmem>>, vector<1x2x8x32xf32>
    %14 = vector.shape_cast %13 : vector<1x2x8x32xf32> to vector<2x8x32xf32>
    %15 = vector.shape_cast %12 : vector<2x8x32xf32> to vector<1x2x8x32xf32>
    tpu.vector_store %arg28[%c0_12, %c0_13, %c0_14, %c0_15], %15 {strides = array<i32>} : memref<4x2x8x32xf32, #tpu.memory_space<vmem>>, vector<1x2x8x32xf32>,
    %c1 = arith.constant 1 : index
    %c0_16 = arith.constant 0 : index
    %c0_17 = arith.constant 0 : index
    %16 = vector.load %arg6[%c1, %c0_16, %c0_17] : memref<4x32x32xbf16, #tpu.memory_space<vmem>>, vector<1x32x32xbf16>
    %17 = vector.shape_cast %16 : vector<1x32x32xbf16> to vector<32x32xbf16>
    %cst_18 = arith.constant dense<0.000000e+00> : vector<16x32xf32>
    %18 = tpu.matmul %4, %17, %cst_18 {dimension_numbers = #tpu.dot_dimension_numbers<[1], [0], [0], [1], [0, 0, 1, 1], [], []>} : vector<16x32xbf16>, vector<32x32xbf16>, vector<16x32xf32> -> vector<16x32xf32>
    %c1_19 = arith.constant 1 : index
    %c0_20 = arith.constant 0 : index
    %c0_21 = arith.constant 0 : index
    %19 = vector.load %arg8[%c1_19, %c0_20, %c0_21] : memref<4x1x32xf32, #tpu.memory_space<vmem>>, vector<1x1x32xf32>
    %20 = vector.shape_cast %19 : vector<1x1x32xf32> to vector<1x32xf32>
    %21 = vector.broadcast %20 : vector<1x32xf32> to vector<16x32xf32>
    %22 = arith.addf %18, %21 : vector<16x32xf32>
    %23 = vector.shape_cast %22 : vector<16x32xf32> to vector<2x8x32xf32>
    %c1_22 = arith.constant 1 : index
    %c0_23 = arith.constant 0 : index
    %c0_24 = arith.constant 0 : index
    %c0_25 = arith.constant 0 : index
    %24 = vector.load %arg28[%c1_22, %c0_23, %c0_24, %c0_25] : memref<4x2x8x32xf32, #tpu.memory_space<vmem>>, vector<1x2x8x32xf32>
    %25 = vector.shape_cast %24 : vector<1x2x8x32xf32> to vector<2x8x32xf32>
    %26 = vector.shape_cast %23 : vector<2x8x32xf32> to vector<1x2x8x32xf32>
    tpu.vector_store %arg28[%c1_22, %c0_23, %c0_24, %c0_25], %26 {strides = array<i32>} : memref<4x2x8x32xf32, #tpu.memory_space<vmem>>, vector<1x2x8x32xf32>,
    %c2 = arith.constant 2 : index
    %c0_26 = arith.constant 0 : index
    %c0_27 = arith.constant 0 : index
    %27 = vector.load %arg6[%c2, %c0_26, %c0_27] : memref<4x32x32xbf16, #tpu.memory_space<vmem>>, vector<1x32x32xbf16>
    %28 = vector.shape_cast %27 : vector<1x32x32xbf16> to vector<32x32xbf16>
    %cst_28 = arith.constant dense<0.000000e+00> : vector<16x32xf32>
    %29 = tpu.matmul %4, %28, %cst_28 {dimension_numbers = #tpu.dot_dimension_numbers<[1], [0], [0], [1], [0, 0, 1, 1], [], []>} : vector<16x32xbf16>, vector<32x32xbf16>, vector<16x32xf32> -> vector<16x32xf32>
    %c2_29 = arith.constant 2 : index
    %c0_30 = arith.constant 0 : index
    %c0_31 = arith.constant 0 : index
    %30 = vector.load %arg8[%c2_29, %c0_30, %c0_31] : memref<4x1x32xf32, #tpu.memory_space<vmem>>, vector<1x1x32xf32>
    %31 = vector.shape_cast %30 : vector<1x1x32xf32> to vector<1x32xf32>
    %32 = vector.broadcast %31 : vector<1x32xf32> to vector<16x32xf32>
    %33 = arith.addf %29, %32 : vector<16x32xf32>
    %34 = vector.shape_cast %33 : vector<16x32xf32> to vector<2x8x32xf32>
    %c2_32 = arith.constant 2 : index
    %c0_33 = arith.constant 0 : index
    %c0_34 = arith.constant 0 : index
    %c0_35 = arith.constant 0 : index
    %35 = vector.load %arg28[%c2_32, %c0_33, %c0_34, %c0_35] : memref<4x2x8x32xf32, #tpu.memory_space<vmem>>, vector<1x2x8x32xf32>
    %36 = vector.shape_cast %35 : vector<1x2x8x32xf32> to vector<2x8x32xf32>
    %37 = vector.shape_cast %34 : vector<2x8x32xf32> to vector<1x2x8x32xf32>
    tpu.vector_store %arg28[%c2_32, %c0_33, %c0_34, %c0_35], %37 {strides = array<i32>} : memref<4x2x8x32xf32, #tpu.memory_space<vmem>>, vector<1x2x8x32xf32>,
    %c3 = arith.constant 3 : index
    %c0_36 = arith.constant 0 : index
    %c0_37 = arith.constant 0 : index
    %38 = vector.load %arg6[%c3, %c0_36, %c0_37] : memref<4x32x32xbf16, #tpu.memory_space<vmem>>, vector<1x32x32xbf16>
    %39 = vector.shape_cast %38 : vector<1x32x32xbf16> to vector<32x32xbf16>
    %cst_38 = arith.constant dense<0.000000e+00> : vector<16x32xf32>
    %40 = tpu.matmul %4, %39, %cst_38 {dimension_numbers = #tpu.dot_dimension_numbers<[1], [0], [0], [1], [0, 0, 1, 1], [], []>} : vector<16x32xbf16>, vector<32x32xbf16>, vector<16x32xf32> -> vector<16x32xf32>
    %c3_39 = arith.constant 3 : index
    %c0_40 = arith.constant 0 : index
    %c0_41 = arith.constant 0 : index
    %41 = vector.load %arg8[%c3_39, %c0_40, %c0_41] : memref<4x1x32xf32, #tpu.memory_space<vmem>>, vector<1x1x32xf32>
    %42 = vector.shape_cast %41 : vector<1x1x32xf32> to vector<1x32xf32>
    %43 = vector.broadcast %42 : vector<1x32xf32> to vector<16x32xf32>
    %44 = arith.addf %40, %43 : vector<16x32xf32>
    %45 = vector.shape_cast %44 : vector<16x32xf32> to vector<2x8x32xf32>
    %c3_42 = arith.constant 3 : index
    %c0_43 = arith.constant 0 : index
    %c0_44 = arith.constant 0 : index
    %c0_45 = arith.constant 0 : index
    %46 = vector.load %arg28[%c3_42, %c0_43, %c0_44, %c0_45] : memref<4x2x8x32xf32, #tpu.memory_space<vmem>>, vector<1x2x8x32xf32>
    %47 = vector.shape_cast %46 : vector<1x2x8x32xf32> to vector<2x8x32xf32>
    %48 = vector.shape_cast %45 : vector<2x8x32xf32> to vector<1x2x8x32xf32>
    tpu.vector_store %arg28[%c3_42, %c0_43, %c0_44, %c0_45], %48 {strides = array<i32>} : memref<4x2x8x32xf32, #tpu.memory_space<vmem>>, vector<1x2x8x32xf32>,
    %c0_46 = arith.constant 0 : index
    %c0_47 = arith.constant 0 : index
    %c0_48 = arith.constant 0 : index
    %49 = vector.load %arg2[%c0_46, %c0_47, %c0_48] : memref<2x5x32xf32, #tpu.memory_space<vmem>>, vector<2x5x32xf32>
    %50 = vector.shape_cast %49 : vector<2x5x32xf32> to vector<10x32xf32>
    %51 = arith.truncf %50 : vector<10x32xf32> to vector<10x32xbf16>
    %c0_49 = arith.constant 0 : index
    %c0_50 = arith.constant 0 : index
    %c0_51 = arith.constant 0 : index
    %52 = vector.load %arg9[%c0_49, %c0_50, %c0_51] : memref<4x32x32xbf16, #tpu.memory_space<vmem>>, vector<1x32x32xbf16>
    %53 = vector.shape_cast %52 : vector<1x32x32xbf16> to vector<32x32xbf16>
    %cst_52 = arith.constant dense<0.000000e+00> : vector<10x32xf32>
    %54 = tpu.matmul %51, %53, %cst_52 {dimension_numbers = #tpu.dot_dimension_numbers<[1], [0], [0], [1], [0, 0, 1, 1], [], []>} : vector<10x32xbf16>, vector<32x32xbf16>, vector<10x32xf32> -> vector<10x32xf32>
    %c0_53 = arith.constant 0 : index
    %c0_54 = arith.constant 0 : index
    %c0_55 = arith.constant 0 : index
    %55 = vector.load %arg11[%c0_53, %c0_54, %c0_55] : memref<4x1x32xf32, #tpu.memory_space<vmem>>, vector<1x1x32xf32>
    %56 = vector.shape_cast %55 : vector<1x1x32xf32> to vector<1x32xf32>
    %57 = vector.broadcast %56 : vector<1x32xf32> to vector<10x32xf32>
    %58 = arith.addf %54, %57 : vector<10x32xf32>
    %59 = vector.shape_cast %58 : vector<10x32xf32> to vector<2x5x32xf32>
    %c0_56 = arith.constant 0 : index
    %c0_57 = arith.constant 0 : index
    %c0_58 = arith.constant 0 : index
    %c0_59 = arith.constant 0 : index
    %60 = vector.load %arg29[%c0_56, %c0_57, %c0_58, %c0_59] : memref<4x2x5x32xf32, #tpu.memory_space<vmem>>, vector<1x2x5x32xf32>
    %61 = vector.shape_cast %60 : vector<1x2x5x32xf32> to vector<2x5x32xf32>
    %62 = vector.shape_cast %59 : vector<2x5x32xf32> to vector<1x2x5x32xf32>
    tpu.vector_store %arg29[%c0_56, %c0_57, %c0_58, %c0_59], %62 {strides = array<i32>} : memref<4x2x5x32xf32, #tpu.memory_space<vmem>>, vector<1x2x5x32xf32>,
    %c1_60 = arith.constant 1 : index
    %c0_61 = arith.constant 0 : index
    %c0_62 = arith.constant 0 : index
    %63 = vector.load %arg9[%c1_60, %c0_61, %c0_62] : memref<4x32x32xbf16, #tpu.memory_space<vmem>>, vector<1x32x32xbf16>
    %64 = vector.shape_cast %63 : vector<1x32x32xbf16> to vector<32x32xbf16>
    %cst_63 = arith.constant dense<0.000000e+00> : vector<10x32xf32>
    %65 = tpu.matmul %51, %64, %cst_63 {dimension_numbers = #tpu.dot_dimension_numbers<[1], [0], [0], [1], [0, 0, 1, 1], [], []>} : vector<10x32xbf16>, vector<32x32xbf16>, vector<10x32xf32> -> vector<10x32xf32>
    %c1_64 = arith.constant 1 : index
    %c0_65 = arith.constant 0 : index
    %c0_66 = arith.constant 0 : index
    %66 = vector.load %arg11[%c1_64, %c0_65, %c0_66] : memref<4x1x32xf32, #tpu.memory_space<vmem>>, vector<1x1x32xf32>
    %67 = vector.shape_cast %66 : vector<1x1x32xf32> to vector<1x32xf32>
    %68 = vector.broadcast %67 : vector<1x32xf32> to vector<10x32xf32>
    %69 = arith.addf %65, %68 : vector<10x32xf32>
    %70 = vector.shape_cast %69 : vector<10x32xf32> to vector<2x5x32xf32>
    %c1_67 = arith.constant 1 : index
    %c0_68 = arith.constant 0 : index
    %c0_69 = arith.constant 0 : index
    %c0_70 = arith.constant 0 : index
    %71 = vector.load %arg29[%c1_67, %c0_68, %c0_69, %c0_70] : memref<4x2x5x32xf32, #tpu.memory_space<vmem>>, vector<1x2x5x32xf32>
    %72 = vector.shape_cast %71 : vector<1x2x5x32xf32> to vector<2x5x32xf32>
    %73 = vector.shape_cast %70 : vector<2x5x32xf32> to vector<1x2x5x32xf32>
    tpu.vector_store %arg29[%c1_67, %c0_68, %c0_69, %c0_70], %73 {strides = array<i32>} : memref<4x2x5x32xf32, #tpu.memory_space<vmem>>, vector<1x2x5x32xf32>,
    %c2_71 = arith.constant 2 : index
    %c0_72 = arith.constant 0 : index
    %c0_73 = arith.constant 0 : index
    %74 = vector.load %arg9[%c2_71, %c0_72, %c0_73] : memref<4x32x32xbf16, #tpu.memory_space<vmem>>, vector<1x32x32xbf16>
    %75 = vector.shape_cast %74 : vector<1x32x32xbf16> to vector<32x32xbf16>
    %cst_74 = arith.constant dense<0.000000e+00> : vector<10x32xf32>
    %76 = tpu.matmul %51, %75, %cst_74 {dimension_numbers = #tpu.dot_dimension_numbers<[1], [0], [0], [1], [0, 0, 1, 1], [], []>} : vector<10x32xbf16>, vector<32x32xbf16>, vector<10x32xf32> -> vector<10x32xf32>
    %c2_75 = arith.constant 2 : index
    %c0_76 = arith.constant 0 : index
    %c0_77 = arith.constant 0 : index
    %77 = vector.load %arg11[%c2_75, %c0_76, %c0_77] : memref<4x1x32xf32, #tpu.memory_space<vmem>>, vector<1x1x32xf32>
    %78 = vector.shape_cast %77 : vector<1x1x32xf32> to vector<1x32xf32>
    %79 = vector.broadcast %78 : vector<1x32xf32> to vector<10x32xf32>
    %80 = arith.addf %76, %79 : vector<10x32xf32>
    %81 = vector.shape_cast %80 : vector<10x32xf32> to vector<2x5x32xf32>
    %c2_78 = arith.constant 2 : index
    %c0_79 = arith.constant 0 : index
    %c0_80 = arith.constant 0 : index
    %c0_81 = arith.constant 0 : index
    %82 = vector.load %arg29[%c2_78, %c0_79, %c0_80, %c0_81] : memref<4x2x5x32xf32, #tpu.memory_space<vmem>>, vector<1x2x5x32xf32>
    %83 = vector.shape_cast %82 : vector<1x2x5x32xf32> to vector<2x5x32xf32>
    %84 = vector.shape_cast %81 : vector<2x5x32xf32> to vector<1x2x5x32xf32>
    tpu.vector_store %arg29[%c2_78, %c0_79, %c0_80, %c0_81], %84 {strides = array<i32>} : memref<4x2x5x32xf32, #tpu.memory_space<vmem>>, vector<1x2x5x32xf32>,
    %c3_82 = arith.constant 3 : index
    %c0_83 = arith.constant 0 : index
    %c0_84 = arith.constant 0 : index
    %85 = vector.load %arg9[%c3_82, %c0_83, %c0_84] : memref<4x32x32xbf16, #tpu.memory_space<vmem>>, vector<1x32x32xbf16>
    %86 = vector.shape_cast %85 : vector<1x32x32xbf16> to vector<32x32xbf16>
    %cst_85 = arith.constant dense<0.000000e+00> : vector<10x32xf32>
    %87 = tpu.matmul %51, %86, %cst_85 {dimension_numbers = #tpu.dot_dimension_numbers<[1], [0], [0], [1], [0, 0, 1, 1], [], []>} : vector<10x32xbf16>, vector<32x32xbf16>, vector<10x32xf32> -> vector<10x32xf32>
    %c3_86 = arith.constant 3 : index
    %c0_87 = arith.constant 0 : index
    %c0_88 = arith.constant 0 : index
    %88 = vector.load %arg11[%c3_86, %c0_87, %c0_88] : memref<4x1x32xf32, #tpu.memory_space<vmem>>, vector<1x1x32xf32>
    %89 = vector.shape_cast %88 : vector<1x1x32xf32> to vector<1x32xf32>
    %90 = vector.broadcast %89 : vector<1x32xf32> to vector<10x32xf32>
    %91 = arith.addf %87, %90 : vector<10x32xf32>
    %92 = vector.shape_cast %91 : vector<10x32xf32> to vector<2x5x32xf32>
    %c3_89 = arith.constant 3 : index
    %c0_90 = arith.constant 0 : index
    %c0_91 = arith.constant 0 : index
    %c0_92 = arith.constant 0 : index
    %93 = vector.load %arg29[%c3_89, %c0_90, %c0_91, %c0_92] : memref<4x2x5x32xf32, #tpu.memory_space<vmem>>, vector<1x2x5x32xf32>
    %94 = vector.shape_cast %93 : vector<1x2x5x32xf32> to vector<2x5x32xf32>
    %95 = vector.shape_cast %92 : vector<2x5x32xf32> to vector<1x2x5x32xf32>
    tpu.vector_store %arg29[%c3_89, %c0_90, %c0_91, %c0_92], %95 {strides = array<i32>} : memref<4x2x5x32xf32, #tpu.memory_space<vmem>>, vector<1x2x5x32xf32>,
    %cst_93 = arith.constant 0.000000e+00 : f32
    %96 = vector.broadcast %cst_93 : f32 to vector<2x32xf32>
    %cst_94 = arith.constant 0.000000e+00 : f32
    %97 = vector.broadcast %cst_94 : f32 to vector<2x32xf32>
    %cst_95 = arith.constant 0.000000e+00 : f32
    %98 = vector.broadcast %cst_95 : f32 to vector<2x32xf32>
    %cst_96 = arith.constant 0.000000e+00 : f32
    %99 = vector.broadcast %cst_96 : f32 to vector<2x32xf32>
    %100 = arith.truncf %96 : vector<2x32xf32> to vector<2x32xbf16>
    %c0_97 = arith.constant 0 : index
    %c0_98 = arith.constant 0 : index
    %c0_99 = arith.constant 0 : index
    %c0_100 = arith.constant 0 : index
    %101 = vector.load %arg28[%c0_97, %c0_98, %c0_99, %c0_100] : memref<4x2x8x32xf32, #tpu.memory_space<vmem>>, vector<1x2x1x32xf32>
    %102 = vector.shape_cast %101 : vector<1x2x1x32xf32> to vector<2x32xf32>
    %c0_101 = arith.constant 0 : index
    %c0_102 = arith.constant 0 : index
    %c0_103 = arith.constant 0 : index
    %103 = vector.load %arg7[%c0_101, %c0_102, %c0_103] : memref<4x32x32xbf16, #tpu.memory_space<vmem>>, vector<1x32x32xbf16>
    %104 = vector.shape_cast %103 : vector<1x32x32xbf16> to vector<32x32xbf16>
    %cst_104 = arith.constant dense<0.000000e+00> : vector<2x32xf32>
    %105 = tpu.matmul %100, %104, %cst_104 {dimension_numbers = #tpu.dot_dimension_numbers<[1], [0], [0], [1], [0, 0, 1, 1], [], []>} : vector<2x32xbf16>, vector<32x32xbf16>, vector<2x32xf32> -> vector<2x32xf32>
    %106 = arith.addf %102, %105 : vector<2x32xf32>
    %c1_105 = arith.constant 1 : index
    %c0_106 = arith.constant 0 : index
    %c0_107 = arith.constant 0 : index
    %c0_108 = arith.constant 0 : index
    %107 = vector.load %arg28[%c1_105, %c0_106, %c0_107, %c0_108] : memref<4x2x8x32xf32, #tpu.memory_space<vmem>>, vector<1x2x1x32xf32>
    %108 = vector.shape_cast %107 : vector<1x2x1x32xf32> to vector<2x32xf32>
    %c1_109 = arith.constant 1 : index
    %c0_110 = arith.constant 0 : index
    %c0_111 = arith.constant 0 : index
    %109 = vector.load %arg7[%c1_109, %c0_110, %c0_111] : memref<4x32x32xbf16, #tpu.memory_space<vmem>>, vector<1x32x32xbf16>
    %110 = vector.shape_cast %109 : vector<1x32x32xbf16> to vector<32x32xbf16>
    %cst_112 = arith.constant dense<0.000000e+00> : vector<2x32xf32>
    %111 = tpu.matmul %100, %110, %cst_112 {dimension_numbers = #tpu.dot_dimension_numbers<[1], [0], [0], [1], [0, 0, 1, 1], [], []>} : vector<2x32xbf16>, vector<32x32xbf16>, vector<2x32xf32> -> vector<2x32xf32>
    %112 = arith.addf %108, %111 : vector<2x32xf32>
    %c2_113 = arith.constant 2 : index
    %c0_114 = arith.constant 0 : index
    %c0_115 = arith.constant 0 : index
    %c0_116 = arith.constant 0 : index
    %113 = vector.load %arg28[%c2_113, %c0_114, %c0_115, %c0_116] : memref<4x2x8x32xf32, #tpu.memory_space<vmem>>, vector<1x2x1x32xf32>
    %114 = vector.shape_cast %113 : vector<1x2x1x32xf32> to vector<2x32xf32>
    %c2_117 = arith.constant 2 : index
    %c0_118 = arith.constant 0 : index
    %c0_119 = arith.constant 0 : index
    %115 = vector.load %arg7[%c2_117, %c0_118, %c0_119] : memref<4x32x32xbf16, #tpu.memory_space<vmem>>, vector<1x32x32xbf16>
    %116 = vector.shape_cast %115 : vector<1x32x32xbf16> to vector<32x32xbf16>
    %cst_120 = arith.constant dense<0.000000e+00> : vector<2x32xf32>
    %117 = tpu.matmul %100, %116, %cst_120 {dimension_numbers = #tpu.dot_dimension_numbers<[1], [0], [0], [1], [0, 0, 1, 1], [], []>} : vector<2x32xbf16>, vector<32x32xbf16>, vector<2x32xf32> -> vector<2x32xf32>
    %118 = arith.addf %114, %117 : vector<2x32xf32>
    %c3_121 = arith.constant 3 : index
    %c0_122 = arith.constant 0 : index
    %c0_123 = arith.constant 0 : index
    %c0_124 = arith.constant 0 : index
    %119 = vector.load %arg28[%c3_121, %c0_122, %c0_123, %c0_124] : memref<4x2x8x32xf32, #tpu.memory_space<vmem>>, vector<1x2x1x32xf32>
    %120 = vector.shape_cast %119 : vector<1x2x1x32xf32> to vector<2x32xf32>
    %c3_125 = arith.constant 3 : index
    %c0_126 = arith.constant 0 : index
    %c0_127 = arith.constant 0 : index
    %121 = vector.load %arg7[%c3_125, %c0_126, %c0_127] : memref<4x32x32xbf16, #tpu.memory_space<vmem>>, vector<1x32x32xbf16>
    %122 = vector.shape_cast %121 : vector<1x32x32xbf16> to vector<32x32xbf16>
    %cst_128 = arith.constant dense<0.000000e+00> : vector<2x32xf32>
    %123 = tpu.matmul %100, %122, %cst_128 {dimension_numbers = #tpu.dot_dimension_numbers<[1], [0], [0], [1], [0, 0, 1, 1], [], []>} : vector<2x32xbf16>, vector<32x32xbf16>, vector<2x32xf32> -> vector<2x32xf32>
    %124 = arith.addf %120, %123 : vector<2x32xf32>
    %125 = arith.negf %106 : vector<2x32xf32>
    %126 = math.exp %125 : vector<2x32xf32>
    %cst_129 = arith.constant 1.000000e+00 : f32
    %127 = vector.broadcast %cst_129 : f32 to vector<2x32xf32>
    %128 = arith.addf %127, %126 : vector<2x32xf32>
    %129 = arith.divf %127, %128 : vector<2x32xf32>
    %130 = arith.negf %112 : vector<2x32xf32>
    %131 = math.exp %130 : vector<2x32xf32>
    %cst_130 = arith.constant 1.000000e+00 : f32
    %132 = vector.broadcast %cst_130 : f32 to vector<2x32xf32>
    %133 = arith.addf %132, %131 : vector<2x32xf32>
    %134 = arith.divf %132, %133 : vector<2x32xf32>
    %135 = math.tanh %118 : vector<2x32xf32>
    %136 = arith.negf %124 : vector<2x32xf32>
    %137 = math.exp %136 : vector<2x32xf32>
    %cst_131 = arith.constant 1.000000e+00 : f32
    %138 = vector.broadcast %cst_131 : f32 to vector<2x32xf32>
    %139 = arith.addf %138, %137 : vector<2x32xf32>
    %140 = arith.divf %138, %139 : vector<2x32xf32>
    %141 = arith.mulf %134, %97 : vector<2x32xf32>
    %142 = arith.mulf %129, %135 : vector<2x32xf32>
    %143 = arith.addf %141, %142 : vector<2x32xf32>
    %144 = math.tanh %143 : vector<2x32xf32>
    %145 = arith.mulf %140, %144 : vector<2x32xf32>
    %c0_132 = arith.constant 0 : index
    %c0_133 = arith.constant 0 : index
    %c0_134 = arith.constant 0 : index
    %146 = vector.load %arg26[%c0_132, %c0_133, %c0_134] : memref<2x8x32xf32, #tpu.memory_space<vmem>>, vector<2x1x32xf32>
    %147 = vector.shape_cast %146 : vector<2x1x32xf32> to vector<2x32xf32>
    %148 = vector.shape_cast %145 : vector<2x32xf32> to vector<2x1x32xf32>
    tpu.vector_store %arg26[%c0_132, %c0_133, %c0_134], %148 {strides = array<i32>} : memref<2x8x32xf32, #tpu.memory_space<vmem>>, vector<2x1x32xf32>,
    %149 = arith.truncf %98 : vector<2x32xf32> to vector<2x32xbf16>
    %c0_135 = arith.constant 0 : index
    %c0_136 = arith.constant 0 : index
    %c0_137 = arith.constant 0 : index
    %c0_138 = arith.constant 0 : index
    %150 = vector.load %arg29[%c0_135, %c0_136, %c0_137, %c0_138] : memref<4x2x5x32xf32, #tpu.memory_space<vmem>>, vector<1x2x1x32xf32>
    %151 = vector.shape_cast %150 : vector<1x2x1x32xf32> to vector<2x32xf32>
    %c0_139 = arith.constant 0 : index
    %c0_140 = arith.constant 0 : index
    %c0_141 = arith.constant 0 : index
    %152 = vector.load %arg10[%c0_139, %c0_140, %c0_141] : memref<4x32x32xbf16, #tpu.memory_space<vmem>>, vector<1x32x32xbf16>
    %153 = vector.shape_cast %152 : vector<1x32x32xbf16> to vector<32x32xbf16>
    %cst_142 = arith.constant dense<0.000000e+00> : vector<2x32xf32>
    %154 = tpu.matmul %149, %153, %cst_142 {dimension_numbers = #tpu.dot_dimension_numbers<[1], [0], [0], [1], [0, 0, 1, 1], [], []>} : vector<2x32xbf16>, vector<32x32xbf16>, vector<2x32xf32> -> vector<2x32xf32>
    %155 = arith.addf %151, %154 : vector<2x32xf32>
    %c1_143 = arith.constant 1 : index
    %c0_144 = arith.constant 0 : index
    %c0_145 = arith.constant 0 : index
    %c0_146 = arith.constant 0 : index
    %156 = vector.load %arg29[%c1_143, %c0_144, %c0_145, %c0_146] : memref<4x2x5x32xf32, #tpu.memory_space<vmem>>, vector<1x2x1x32xf32>
    %157 = vector.shape_cast %156 : vector<1x2x1x32xf32> to vector<2x32xf32>
    %c1_147 = arith.constant 1 : index
    %c0_148 = arith.constant 0 : index
    %c0_149 = arith.constant 0 : index
    %158 = vector.load %arg10[%c1_147, %c0_148, %c0_149] : memref<4x32x32xbf16, #tpu.memory_space<vmem>>, vector<1x32x32xbf16>
    %159 = vector.shape_cast %158 : vector<1x32x32xbf16> to vector<32x32xbf16>
    %cst_150 = arith.constant dense<0.000000e+00> : vector<2x32xf32>
    %160 = tpu.matmul %149, %159, %cst_150 {dimension_numbers = #tpu.dot_dimension_numbers<[1], [0], [0], [1], [0, 0, 1, 1], [], []>} : vector<2x32xbf16>, vector<32x32xbf16>, vector<2x32xf32> -> vector<2x32xf32>
    %161 = arith.addf %157, %160 : vector<2x32xf32>
    %c2_151 = arith.constant 2 : index
    %c0_152 = arith.constant 0 : index
    %c0_153 = arith.constant 0 : index
    %c0_154 = arith.constant 0 : index
    %162 = vector.load %arg29[%c2_151, %c0_152, %c0_153, %c0_154] : memref<4x2x5x32xf32, #tpu.memory_space<vmem>>, vector<1x2x1x32xf32>
    %163 = vector.shape_cast %162 : vector<1x2x1x32xf32> to vector<2x32xf32>
    %c2_155 = arith.constant 2 : index
    %c0_156 = arith.constant 0 : index
    %c0_157 = arith.constant 0 : index
    %164 = vector.load %arg10[%c2_155, %c0_156, %c0_157] : memref<4x32x32xbf16, #tpu.memory_space<vmem>>, vector<1x32x32xbf16>
    %165 = vector.shape_cast %164 : vector<1x32x32xbf16> to vector<32x32xbf16>
    %cst_158 = arith.constant dense<0.000000e+00> : vector<2x32xf32>
    %166 = tpu.matmul %149, %165, %cst_158 {dimension_numbers = #tpu.dot_dimension_numbers<[1], [0], [0], [1], [0, 0, 1, 1], [], []>} : vector<2x32xbf16>, vector<32x32xbf16>, vector<2x32xf32> -> vector<2x32xf32>
    %167 = arith.addf %163, %166 : vector<2x32xf32>
    %c3_159 = arith.constant 3 : index
    %c0_160 = arith.constant 0 : index
    %c0_161 = arith.constant 0 : index
    %c0_162 = arith.constant 0 : index
    %168 = vector.load %arg29[%c3_159, %c0_160, %c0_161, %c0_162] : memref<4x2x5x32xf32, #tpu.memory_space<vmem>>, vector<1x2x1x32xf32>
    %169 = vector.shape_cast %168 : vector<1x2x1x32xf32> to vector<2x32xf32>
    %c3_163 = arith.constant 3 : index
    %c0_164 = arith.constant 0 : index
    %c0_165 = arith.constant 0 : index
    %170 = vector.load %arg10[%c3_163, %c0_164, %c0_165] : memref<4x32x32xbf16, #tpu.memory_space<vmem>>, vector<1x32x32xbf16>
    %171 = vector.shape_cast %170 : vector<1x32x32xbf16> to vector<32x32xbf16>
    %cst_166 = arith.constant dense<0.000000e+00> : vector<2x32xf32>
    %172 = tpu.matmul %149, %171, %cst_166 {dimension_numbers = #tpu.dot_dimension_numbers<[1], [0], [0], [1], [0, 0, 1, 1], [], []>} : vector<2x32xbf16>, vector<32x32xbf16>, vector<2x32xf32> -> vector<2x32xf32>
    %173 = arith.addf %169, %172 : vector<2x32xf32>
    %174 = arith.negf %155 : vector<2x32xf32>
    %175 = math.exp %174 : vector<2x32xf32>
    %cst_167 = arith.constant 1.000000e+00 : f32
    %176 = vector.broadcast %cst_167 : f32 to vector<2x32xf32>
    %177 = arith.addf %176, %175 : vector<2x32xf32>
    %178 = arith.divf %176, %177 : vector<2x32xf32>
    %179 = arith.negf %161 : vector<2x32xf32>
    %180 = math.exp %179 : vector<2x32xf32>
    %cst_168 = arith.constant 1.000000e+00 : f32
    %181 = vector.broadcast %cst_168 : f32 to vector<2x32xf32>
    %182 = arith.addf %181, %180 : vector<2x32xf32>
    %183 = arith.divf %181, %182 : vector<2x32xf32>
    %184 = math.tanh %167 : vector<2x32xf32>
    %185 = arith.negf %173 : vector<2x32xf32>
    %186 = math.exp %185 : vector<2x32xf32>
    %cst_169 = arith.constant 1.000000e+00 : f32
    %187 = vector.broadcast %cst_169 : f32 to vector<2x32xf32>
    %188 = arith.addf %187, %186 : vector<2x32xf32>
    %189 = arith.divf %187, %188 : vector<2x32xf32>
    %190 = arith.mulf %183, %99 : vector<2x32xf32>
    %191 = arith.mulf %178, %184 : vector<2x32xf32>
    %192 = arith.addf %190, %191 : vector<2x32xf32>
    %193 = math.tanh %192 : vector<2x32xf32>
    %194 = arith.mulf %189, %193 : vector<2x32xf32>
    %c0_170 = arith.constant 0 : index
    %c0_171 = arith.constant 0 : index
    %c0_172 = arith.constant 0 : index
    %195 = vector.load %arg27[%c0_170, %c0_171, %c0_172] : memref<2x5x32xf32, #tpu.memory_space<vmem>>, vector<2x1x32xf32>
    %196 = vector.shape_cast %195 : vector<2x1x32xf32> to vector<2x32xf32>
    %197 = vector.shape_cast %194 : vector<2x32xf32> to vector<2x1x32xf32>
    tpu.vector_store %arg27[%c0_170, %c0_171, %c0_172], %197 {strides = array<i32>} : memref<2x5x32xf32, #tpu.memory_space<vmem>>, vector<2x1x32xf32>,
    %198 = arith.truncf %145 : vector<2x32xf32> to vector<2x32xbf16>
    %c0_173 = arith.constant 0 : index
    %c0_174 = arith.constant 0 : index
    %c1_175 = arith.constant 1 : index
    %c0_176 = arith.constant 0 : index
    %199 = vector.load %arg28[%c0_173, %c0_174, %c1_175, %c0_176] : memref<4x2x8x32xf32, #tpu.memory_space<vmem>>, vector<1x2x1x32xf32>
    %200 = vector.shape_cast %199 : vector<1x2x1x32xf32> to vector<2x32xf32>
    %c0_177 = arith.constant 0 : index
    %c0_178 = arith.constant 0 : index
    %c0_179 = arith.constant 0 : index
    %201 = vector.load %arg7[%c0_177, %c0_178, %c0_179] : memref<4x32x32xbf16, #tpu.memory_space<vmem>>, vector<1x32x32xbf16>
    %202 = vector.shape_cast %201 : vector<1x32x32xbf16> to vector<32x32xbf16>
    %cst_180 = arith.constant dense<0.000000e+00> : vector<2x32xf32>
    %203 = tpu.matmul %198, %202, %cst_180 {dimension_numbers = #tpu.dot_dimension_numbers<[1], [0], [0], [1], [0, 0, 1, 1], [], []>} : vector<2x32xbf16>, vector<32x32xbf16>, vector<2x32xf32> -> vector<2x32xf32>
    %204 = arith.addf %200, %203 : vector<2x32xf32>
    %c1_181 = arith.constant 1 : index
    %c0_182 = arith.constant 0 : index
    %c1_183 = arith.constant 1 : index
    %c0_184 = arith.constant 0 : index
    %205 = vector.load %arg28[%c1_181, %c0_182, %c1_183, %c0_184] : memref<4x2x8x32xf32, #tpu.memory_space<vmem>>, vector<1x2x1x32xf32>
    %206 = vector.shape_cast %205 : vector<1x2x1x32xf32> to vector<2x32xf32>
    %c1_185 = arith.constant 1 : index
    %c0_186 = arith.constant 0 : index
    %c0_187 = arith.constant 0 : index
    %207 = vector.load %arg7[%c1_185, %c0_186, %c0_187] : memref<4x32x32xbf16, #tpu.memory_space<vmem>>, vector<1x32x32xbf16>
    %208 = vector.shape_cast %207 : vector<1x32x32xbf16> to vector<32x32xbf16>
    %cst_188 = arith.constant dense<0.000000e+00> : vector<2x32xf32>
    %209 = tpu.matmul %198, %208, %cst_188 {dimension_numbers = #tpu.dot_dimension_numbers<[1], [0], [0], [1], [0, 0, 1, 1], [], []>} : vector<2x32xbf16>, vector<32x32xbf16>, vector<2x32xf32> -> vector<2x32xf32>
    %210 = arith.addf %206, %209 : vector<2x32xf32>
    %c2_189 = arith.constant 2 : index
    %c0_190 = arith.constant 0 : index
    %c1_191 = arith.constant 1 : index
    %c0_192 = arith.constant 0 : index
    %211 = vector.load %arg28[%c2_189, %c0_190, %c1_191, %c0_192] : memref<4x2x8x32xf32, #tpu.memory_space<vmem>>, vector<1x2x1x32xf32>
    %212 = vector.shape_cast %211 : vector<1x2x1x32xf32> to vector<2x32xf32>
    %c2_193 = arith.constant 2 : index
    %c0_194 = arith.constant 0 : index
    %c0_195 = arith.constant 0 : index
    %213 = vector.load %arg7[%c2_193, %c0_194, %c0_195] : memref<4x32x32xbf16, #tpu.memory_space<vmem>>, vector<1x32x32xbf16>
    %214 = vector.shape_cast %213 : vector<1x32x32xbf16> to vector<32x32xbf16>
    %cst_196 = arith.constant dense<0.000000e+00> : vector<2x32xf32>
    %215 = tpu.matmul %198, %214, %cst_196 {dimension_numbers = #tpu.dot_dimension_numbers<[1], [0], [0], [1], [0, 0, 1, 1], [], []>} : vector<2x32xbf16>, vector<32x32xbf16>, vector<2x32xf32> -> vector<2x32xf32>
    %216 = arith.addf %212, %215 : vector<2x32xf32>
    %c3_197 = arith.constant 3 : index
    %c0_198 = arith.constant 0 : index
    %c1_199 = arith.constant 1 : index
    %c0_200 = arith.constant 0 : index
    %217 = vector.load %arg28[%c3_197, %c0_198, %c1_199, %c0_200] : memref<4x2x8x32xf32, #tpu.memory_space<vmem>>, vector<1x2x1x32xf32>
    %218 = vector.shape_cast %217 : vector<1x2x1x32xf32> to vector<2x32xf32>
    %c3_201 = arith.constant 3 : index
    %c0_202 = arith.constant 0 : index
    %c0_203 = arith.constant 0 : index
    %219 = vector.load %arg7[%c3_201, %c0_202, %c0_203] : memref<4x32x32xbf16, #tpu.memory_space<vmem>>, vector<1x32x32xbf16>
    %220 = vector.shape_cast %219 : vector<1x32x32xbf16> to vector<32x32xbf16>
    %cst_204 = arith.constant dense<0.000000e+00> : vector<2x32xf32>
    %221 = tpu.matmul %198, %220, %cst_204 {dimension_numbers = #tpu.dot_dimension_numbers<[1], [0], [0], [1], [0, 0, 1, 1], [], []>} : vector<2x32xbf16>, vector<32x32xbf16>, vector<2x32xf32> -> vector<2x32xf32>
    %222 = arith.addf %218, %221 : vector<2x32xf32>
    %223 = arith.negf %204 : vector<2x32xf32>
    %224 = math.exp %223 : vector<2x32xf32>
    %cst_205 = arith.constant 1.000000e+00 : f32
    %225 = vector.broadcast %cst_205 : f32 to vector<2x32xf32>
    %226 = arith.addf %225, %224 : vector<2x32xf32>
    %227 = arith.divf %225, %226 : vector<2x32xf32>
    %228 = arith.negf %210 : vector<2x32xf32>
    %229 = math.exp %228 : vector<2x32xf32>
    %cst_206 = arith.constant 1.000000e+00 : f32
    %230 = vector.broadcast %cst_206 : f32 to vector<2x32xf32>
    %231 = arith.addf %230, %229 : vector<2x32xf32>
    %232 = arith.divf %230, %231 : vector<2x32xf32>
    %233 = math.tanh %216 : vector<2x32xf32>
    %234 = arith.negf %222 : vector<2x32xf32>
    %235 = math.exp %234 : vector<2x32xf32>
    %cst_207 = arith.constant 1.000000e+00 : f32
    %236 = vector.broadcast %cst_207 : f32 to vector<2x32xf32>
    %237 = arith.addf %236, %235 : vector<2x32xf32>
    %238 = arith.divf %236, %237 : vector<2x32xf32>
    %239 = arith.mulf %232, %143 : vector<2x32xf32>
    %240 = arith.mulf %227, %233 : vector<2x32xf32>
    %241 = arith.addf %239, %240 : vector<2x32xf32>
    %242 = math.tanh %241 : vector<2x32xf32>
    %243 = arith.mulf %238, %242 : vector<2x32xf32>
    %c0_208 = arith.constant 0 : index
    %c1_209 = arith.constant 1 : index
    %c0_210 = arith.constant 0 : index
    %244 = vector.load %arg26[%c0_208, %c1_209, %c0_210] : memref<2x8x32xf32, #tpu.memory_space<vmem>>, vector<2x1x32xf32>
    %245 = vector.shape_cast %244 : vector<2x1x32xf32> to vector<2x32xf32>
    %246 = vector.shape_cast %243 : vector<2x32xf32> to vector<2x1x32xf32>
    tpu.vector_store %arg26[%c0_208, %c1_209, %c0_210], %246 {strides = array<i32>} : memref<2x8x32xf32, #tpu.memory_space<vmem>>, vector<2x1x32xf32>,
    %247 = arith.truncf %194 : vector<2x32xf32> to vector<2x32xbf16>
    %c0_211 = arith.constant 0 : index
    %c0_212 = arith.constant 0 : index
    %c1_213 = arith.constant 1 : index
    %c0_214 = arith.constant 0 : index
    %248 = vector.load %arg29[%c0_211, %c0_212, %c1_213, %c0_214] : memref<4x2x5x32xf32, #tpu.memory_space<vmem>>, vector<1x2x1x32xf32>
    %249 = vector.shape_cast %248 : vector<1x2x1x32xf32> to vector<2x32xf32>
    %c0_215 = arith.constant 0 : index
    %c0_216 = arith.constant 0 : index
    %c0_217 = arith.constant 0 : index
    %250 = vector.load %arg10[%c0_215, %c0_216, %c0_217] : memref<4x32x32xbf16, #tpu.memory_space<vmem>>, vector<1x32x32xbf16>
    %251 = vector.shape_cast %250 : vector<1x32x32xbf16> to vector<32x32xbf16>
    %cst_218 = arith.constant dense<0.000000e+00> : vector<2x32xf32>
    %252 = tpu.matmul %247, %251, %cst_218 {dimension_numbers = #tpu.dot_dimension_numbers<[1], [0], [0], [1], [0, 0, 1, 1], [], []>} : vector<2x32xbf16>, vector<32x32xbf16>, vector<2x32xf32> -> vector<2x32xf32>
    %253 = arith.addf %249, %252 : vector<2x32xf32>
    %c1_219 = arith.constant 1 : index
    %c0_220 = arith.constant 0 : index
    %c1_221 = arith.constant 1 : index
    %c0_222 = arith.constant 0 : index
    %254 = vector.load %arg29[%c1_219, %c0_220, %c1_221, %c0_222] : memref<4x2x5x32xf32, #tpu.memory_space<vmem>>, vector<1x2x1x32xf32>
    %255 = vector.shape_cast %254 : vector<1x2x1x32xf32> to vector<2x32xf32>
    %c1_223 = arith.constant 1 : index
    %c0_224 = arith.constant 0 : index
    %c0_225 = arith.constant 0 : index
    %256 = vector.load %arg10[%c1_223, %c0_224, %c0_225] : memref<4x32x32xbf16, #tpu.memory_space<vmem>>, vector<1x32x32xbf16>
    %257 = vector.shape_cast %256 : vector<1x32x32xbf16> to vector<32x32xbf16>
    %cst_226 = arith.constant dense<0.000000e+00> : vector<2x32xf32>
    %258 = tpu.matmul %247, %257, %cst_226 {dimension_numbers = #tpu.dot_dimension_numbers<[1], [0], [0], [1], [0, 0, 1, 1], [], []>} : vector<2x32xbf16>, vector<32x32xbf16>, vector<2x32xf32> -> vector<2x32xf32>
    %259 = arith.addf %255, %258 : vector<2x32xf32>
    %c2_227 = arith.constant 2 : index
    %c0_228 = arith.constant 0 : index
    %c1_229 = arith.constant 1 : index
    %c0_230 = arith.constant 0 : index
    %260 = vector.load %arg29[%c2_227, %c0_228, %c1_229, %c0_230] : memref<4x2x5x32xf32, #tpu.memory_space<vmem>>, vector<1x2x1x32xf32>
    %261 = vector.shape_cast %260 : vector<1x2x1x32xf32> to vector<2x32xf32>
    %c2_231 = arith.constant 2 : index
    %c0_232 = arith.constant 0 : index
    %c0_233 = arith.constant 0 : index
    %262 = vector.load %arg10[%c2_231, %c0_232, %c0_233] : memref<4x32x32xbf16, #tpu.memory_space<vmem>>, vector<1x32x32xbf16>
    %263 = vector.shape_cast %262 : vector<1x32x32xbf16> to vector<32x32xbf16>
    %cst_234 = arith.constant dense<0.000000e+00> : vector<2x32xf32>
    %264 = tpu.matmul %247, %263, %cst_234 {dimension_numbers = #tpu.dot_dimension_numbers<[1], [0], [0], [1], [0, 0, 1, 1], [], []>} : vector<2x32xbf16>, vector<32x32xbf16>, vector<2x32xf32> -> vector<2x32xf32>
    %265 = arith.addf %261, %264 : vector<2x32xf32>
    %c3_235 = arith.constant 3 : index
    %c0_236 = arith.constant 0 : index
    %c1_237 = arith.constant 1 : index
    %c0_238 = arith.constant 0 : index
    %266 = vector.load %arg29[%c3_235, %c0_236, %c1_237, %c0_238] : memref<4x2x5x32xf32, #tpu.memory_space<vmem>>, vector<1x2x1x32xf32>
    %267 = vector.shape_cast %266 : vector<1x2x1x32xf32> to vector<2x32xf32>
    %c3_239 = arith.constant 3 : index
    %c0_240 = arith.constant 0 : index
    %c0_241 = arith.constant 0 : index
    %268 = vector.load %arg10[%c3_239, %c0_240, %c0_241] : memref<4x32x32xbf16, #tpu.memory_space<vmem>>, vector<1x32x32xbf16>
    %269 = vector.shape_cast %268 : vector<1x32x32xbf16> to vector<32x32xbf16>
    %cst_242 = arith.constant dense<0.000000e+00> : vector<2x32xf32>
    %270 = tpu.matmul %247, %269, %cst_242 {dimension_numbers = #tpu.dot_dimension_numbers<[1], [0], [0], [1], [0, 0, 1, 1], [], []>} : vector<2x32xbf16>, vector<32x32xbf16>, vector<2x32xf32> -> vector<2x32xf32>
    %271 = arith.addf %267, %270 : vector<2x32xf32>
    %272 = arith.negf %253 : vector<2x32xf32>
    %273 = math.exp %272 : vector<2x32xf32>
    %cst_243 = arith.constant 1.000000e+00 : f32
    %274 = vector.broadcast %cst_243 : f32 to vector<2x32xf32>
    %275 = arith.addf %274, %273 : vector<2x32xf32>
    %276 = arith.divf %274, %275 : vector<2x32xf32>
    %277 = arith.negf %259 : vector<2x32xf32>
    %278 = math.exp %277 : vector<2x32xf32>
    %cst_244 = arith.constant 1.000000e+00 : f32
    %279 = vector.broadcast %cst_244 : f32 to vector<2x32xf32>
    %280 = arith.addf %279, %278 : vector<2x32xf32>
    %281 = arith.divf %279, %280 : vector<2x32xf32>
    %282 = math.tanh %265 : vector<2x32xf32>
    %283 = arith.negf %271 : vector<2x32xf32>
    %284 = math.exp %283 : vector<2x32xf32>
    %cst_245 = arith.constant 1.000000e+00 : f32
    %285 = vector.broadcast %cst_245 : f32 to vector<2x32xf32>
    %286 = arith.addf %285, %284 : vector<2x32xf32>
    %287 = arith.divf %285, %286 : vector<2x32xf32>
    %288 = arith.mulf %281, %192 : vector<2x32xf32>
    %289 = arith.mulf %276, %282 : vector<2x32xf32>
    %290 = arith.addf %288, %289 : vector<2x32xf32>
    %291 = math.tanh %290 : vector<2x32xf32>
    %292 = arith.mulf %287, %291 : vector<2x32xf32>
    %c0_246 = arith.constant 0 : index
    %c1_247 = arith.constant 1 : index
    %c0_248 = arith.constant 0 : index
    %293 = vector.load %arg27[%c0_246, %c1_247, %c0_248] : memref<2x5x32xf32, #tpu.memory_space<vmem>>, vector<2x1x32xf32>
    %294 = vector.shape_cast %293 : vector<2x1x32xf32> to vector<2x32xf32>
    %295 = vector.shape_cast %292 : vector<2x32xf32> to vector<2x1x32xf32>
    tpu.vector_store %arg27[%c0_246, %c1_247, %c0_248], %295 {strides = array<i32>} : memref<2x5x32xf32, #tpu.memory_space<vmem>>, vector<2x1x32xf32>,
    %296 = arith.truncf %243 : vector<2x32xf32> to vector<2x32xbf16>
    %c0_249 = arith.constant 0 : index
    %c0_250 = arith.constant 0 : index
    %c2_251 = arith.constant 2 : index
    %c0_252 = arith.constant 0 : index
    %297 = vector.load %arg28[%c0_249, %c0_250, %c2_251, %c0_252] : memref<4x2x8x32xf32, #tpu.memory_space<vmem>>, vector<1x2x1x32xf32>
    %298 = vector.shape_cast %297 : vector<1x2x1x32xf32> to vector<2x32xf32>
    %c0_253 = arith.constant 0 : index
    %c0_254 = arith.constant 0 : index
    %c0_255 = arith.constant 0 : index
    %299 = vector.load %arg7[%c0_253, %c0_254, %c0_255] : memref<4x32x32xbf16, #tpu.memory_space<vmem>>, vector<1x32x32xbf16>
    %300 = vector.shape_cast %299 : vector<1x32x32xbf16> to vector<32x32xbf16>
    %cst_256 = arith.constant dense<0.000000e+00> : vector<2x32xf32>
    %301 = tpu.matmul %296, %300, %cst_256 {dimension_numbers = #tpu.dot_dimension_numbers<[1], [0], [0], [1], [0, 0, 1, 1], [], []>} : vector<2x32xbf16>, vector<32x32xbf16>, vector<2x32xf32> -> vector<2x32xf32>
    %302 = arith.addf %298, %301 : vector<2x32xf32>
    %c1_257 = arith.constant 1 : index
    %c0_258 = arith.constant 0 : index
    %c2_259 = arith.constant 2 : index
    %c0_260 = arith.constant 0 : index
    %303 = vector.load %arg28[%c1_257, %c0_258, %c2_259, %c0_260] : memref<4x2x8x32xf32, #tpu.memory_space<vmem>>, vector<1x2x1x32xf32>
    %304 = vector.shape_cast %303 : vector<1x2x1x32xf32> to vector<2x32xf32>
    %c1_261 = arith.constant 1 : index
    %c0_262 = arith.constant 0 : index
    %c0_263 = arith.constant 0 : index
    %305 = vector.load %arg7[%c1_261, %c0_262, %c0_263] : memref<4x32x32xbf16, #tpu.memory_space<vmem>>, vector<1x32x32xbf16>
    %306 = vector.shape_cast %305 : vector<1x32x32xbf16> to vector<32x32xbf16>
    %cst_264 = arith.constant dense<0.000000e+00> : vector<2x32xf32>
    %307 = tpu.matmul %296, %306, %cst_264 {dimension_numbers = #tpu.dot_dimension_numbers<[1], [0], [0], [1], [0, 0, 1, 1], [], []>} : vector<2x32xbf16>, vector<32x32xbf16>, vector<2x32xf32> -> vector<2x32xf32>
    %308 = arith.addf %304, %307 : vector<2x32xf32>
    %c2_265 = arith.constant 2 : index
    %c0_266 = arith.constant 0 : index
    %c2_267 = arith.constant 2 : index
    %c0_268 = arith.constant 0 : index
    %309 = vector.load %arg28[%c2_265, %c0_266, %c2_267, %c0_268] : memref<4x2x8x32xf32, #tpu.memory_space<vmem>>, vector<1x2x1x32xf32>
    %310 = vector.shape_cast %309 : vector<1x2x1x32xf32> to vector<2x32xf32>
    %c2_269 = arith.constant 2 : index
    %c0_270 = arith.constant 0 : index
    %c0_271 = arith.constant 0 : index
    %311 = vector.load %arg7[%c2_269, %c0_270, %c0_271] : memref<4x32x32xbf16, #tpu.memory_space<vmem>>, vector<1x32x32xbf16>
    %312 = vector.shape_cast %311 : vector<1x32x32xbf16> to vector<32x32xbf16>
    %cst_272 = arith.constant dense<0.000000e+00> : vector<2x32xf32>
    %313 = tpu.matmul %296, %312, %cst_272 {dimension_numbers = #tpu.dot_dimension_numbers<[1], [0], [0], [1], [0, 0, 1, 1], [], []>} : vector<2x32xbf16>, vector<32x32xbf16>, vector<2x32xf32> -> vector<2x32xf32>
    %314 = arith.addf %310, %313 : vector<2x32xf32>
    %c3_273 = arith.constant 3 : index
    %c0_274 = arith.constant 0 : index
    %c2_275 = arith.constant 2 : index
    %c0_276 = arith.constant 0 : index
    %315 = vector.load %arg28[%c3_273, %c0_274, %c2_275, %c0_276] : memref<4x2x8x32xf32, #tpu.memory_space<vmem>>, vector<1x2x1x32xf32>
    %316 = vector.shape_cast %315 : vector<1x2x1x32xf32> to vector<2x32xf32>
    %c3_277 = arith.constant 3 : index
    %c0_278 = arith.constant 0 : index
    %c0_279 = arith.constant 0 : index
    %317 = vector.load %arg7[%c3_277, %c0_278, %c0_279] : memref<4x32x32xbf16, #tpu.memory_space<vmem>>, vector<1x32x32xbf16>
    %318 = vector.shape_cast %317 : vector<1x32x32xbf16> to vector<32x32xbf16>
    %cst_280 = arith.constant dense<0.000000e+00> : vector<2x32xf32>
    %319 = tpu.matmul %296, %318, %cst_280 {dimension_numbers = #tpu.dot_dimension_numbers<[1], [0], [0], [1], [0, 0, 1, 1], [], []>} : vector<2x32xbf16>, vector<32x32xbf16>, vector<2x32xf32> -> vector<2x32xf32>
    %320 = arith.addf %316, %319 : vector<2x32xf32>
    %321 = arith.negf %302 : vector<2x32xf32>
    %322 = math.exp %321 : vector<2x32xf32>
    %cst_281 = arith.constant 1.000000e+00 : f32
    %323 = vector.broadcast %cst_281 : f32 to vector<2x32xf32>
    %324 = arith.addf %323, %322 : vector<2x32xf32>
    %325 = arith.divf %323, %324 : vector<2x32xf32>
    %326 = arith.negf %308 : vector<2x32xf32>
    %327 = math.exp %326 : vector<2x32xf32>
    %cst_282 = arith.constant 1.000000e+00 : f32
    %328 = vector.broadcast %cst_282 : f32 to vector<2x32xf32>
    %329 = arith.addf %328, %327 : vector<2x32xf32>
    %330 = arith.divf %328, %329 : vector<2x32xf32>
    %331 = math.tanh %314 : vector<2x32xf32>
    %332 = arith.negf %320 : vector<2x32xf32>
    %333 = math.exp %332 : vector<2x32xf32>
    %cst_283 = arith.constant 1.000000e+00 : f32
    %334 = vector.broadcast %cst_283 : f32 to vector<2x32xf32>
    %335 = arith.addf %334, %333 : vector<2x32xf32>
    %336 = arith.divf %334, %335 : vector<2x32xf32>
    %337 = arith.mulf %330, %241 : vector<2x32xf32>
    %338 = arith.mulf %325, %331 : vector<2x32xf32>
    %339 = arith.addf %337, %338 : vector<2x32xf32>
    %340 = math.tanh %339 : vector<2x32xf32>
    %341 = arith.mulf %336, %340 : vector<2x32xf32>
    %c0_284 = arith.constant 0 : index
    %c2_285 = arith.constant 2 : index
    %c0_286 = arith.constant 0 : index
    %342 = vector.load %arg26[%c0_284, %c2_285, %c0_286] : memref<2x8x32xf32, #tpu.memory_space<vmem>>, vector<2x1x32xf32>
    %343 = vector.shape_cast %342 : vector<2x1x32xf32> to vector<2x32xf32>
    %344 = vector.shape_cast %341 : vector<2x32xf32> to vector<2x1x32xf32>
    tpu.vector_store %arg26[%c0_284, %c2_285, %c0_286], %344 {strides = array<i32>} : memref<2x8x32xf32, #tpu.memory_space<vmem>>, vector<2x1x32xf32>,
    %345 = arith.truncf %292 : vector<2x32xf32> to vector<2x32xbf16>
    %c0_287 = arith.constant 0 : index
    %c0_288 = arith.constant 0 : index
    %c2_289 = arith.constant 2 : index
    %c0_290 = arith.constant 0 : index
    %346 = vector.load %arg29[%c0_287, %c0_288, %c2_289, %c0_290] : memref<4x2x5x32xf32, #tpu.memory_space<vmem>>, vector<1x2x1x32xf32>
    %347 = vector.shape_cast %346 : vector<1x2x1x32xf32> to vector<2x32xf32>
    %c0_291 = arith.constant 0 : index
    %c0_292 = arith.constant 0 : index
    %c0_293 = arith.constant 0 : index
    %348 = vector.load %arg10[%c0_291, %c0_292, %c0_293] : memref<4x32x32xbf16, #tpu.memory_space<vmem>>, vector<1x32x32xbf16>
    %349 = vector.shape_cast %348 : vector<1x32x32xbf16> to vector<32x32xbf16>
    %cst_294 = arith.constant dense<0.000000e+00> : vector<2x32xf32>
    %350 = tpu.matmul %345, %349, %cst_294 {dimension_numbers = #tpu.dot_dimension_numbers<[1], [0], [0], [1], [0, 0, 1, 1], [], []>} : vector<2x32xbf16>, vector<32x32xbf16>, vector<2x32xf32> -> vector<2x32xf32>
    %351 = arith.addf %347, %350 : vector<2x32xf32>
    %c1_295 = arith.constant 1 : index
    %c0_296 = arith.constant 0 : index
    %c2_297 = arith.constant 2 : index
    %c0_298 = arith.constant 0 : index
    %352 = vector.load %arg29[%c1_295, %c0_296, %c2_297, %c0_298] : memref<4x2x5x32xf32, #tpu.memory_space<vmem>>, vector<1x2x1x32xf32>
    %353 = vector.shape_cast %352 : vector<1x2x1x32xf32> to vector<2x32xf32>
    %c1_299 = arith.constant 1 : index
    %c0_300 = arith.constant 0 : index
    %c0_301 = arith.constant 0 : index
    %354 = vector.load %arg10[%c1_299, %c0_300, %c0_301] : memref<4x32x32xbf16, #tpu.memory_space<vmem>>, vector<1x32x32xbf16>
    %355 = vector.shape_cast %354 : vector<1x32x32xbf16> to vector<32x32xbf16>
    %cst_302 = arith.constant dense<0.000000e+00> : vector<2x32xf32>
    %356 = tpu.matmul %345, %355, %cst_302 {dimension_numbers = #tpu.dot_dimension_numbers<[1], [0], [0], [1], [0, 0, 1, 1], [], []>} : vector<2x32xbf16>, vector<32x32xbf16>, vector<2x32xf32> -> vector<2x32xf32>
    %357 = arith.addf %353, %356 : vector<2x32xf32>
    %c2_303 = arith.constant 2 : index
    %c0_304 = arith.constant 0 : index
    %c2_305 = arith.constant 2 : index
    %c0_306 = arith.constant 0 : index
    %358 = vector.load %arg29[%c2_303, %c0_304, %c2_305, %c0_306] : memref<4x2x5x32xf32, #tpu.memory_space<vmem>>, vector<1x2x1x32xf32>
    %359 = vector.shape_cast %358 : vector<1x2x1x32xf32> to vector<2x32xf32>
    %c2_307 = arith.constant 2 : index
    %c0_308 = arith.constant 0 : index
    %c0_309 = arith.constant 0 : index
    %360 = vector.load %arg10[%c2_307, %c0_308, %c0_309] : memref<4x32x32xbf16, #tpu.memory_space<vmem>>, vector<1x32x32xbf16>
    %361 = vector.shape_cast %360 : vector<1x32x32xbf16> to vector<32x32xbf16>
    %cst_310 = arith.constant dense<0.000000e+00> : vector<2x32xf32>
    %362 = tpu.matmul %345, %361, %cst_310 {dimension_numbers = #tpu.dot_dimension_numbers<[1], [0], [0], [1], [0, 0, 1, 1], [], []>} : vector<2x32xbf16>, vector<32x32xbf16>, vector<2x32xf32> -> vector<2x32xf32>
    %363 = arith.addf %359, %362 : vector<2x32xf32>
    %c3_311 = arith.constant 3 : index
    %c0_312 = arith.constant 0 : index
    %c2_313 = arith.constant 2 : index
    %c0_314 = arith.constant 0 : index
    %364 = vector.load %arg29[%c3_311, %c0_312, %c2_313, %c0_314] : memref<4x2x5x32xf32, #tpu.memory_space<vmem>>, vector<1x2x1x32xf32>
    %365 = vector.shape_cast %364 : vector<1x2x1x32xf32> to vector<2x32xf32>
    %c3_315 = arith.constant 3 : index
    %c0_316 = arith.constant 0 : index
    %c0_317 = arith.constant 0 : index
    %366 = vector.load %arg10[%c3_315, %c0_316, %c0_317] : memref<4x32x32xbf16, #tpu.memory_space<vmem>>, vector<1x32x32xbf16>
    %367 = vector.shape_cast %366 : vector<1x32x32xbf16> to vector<32x32xbf16>
    %cst_318 = arith.constant dense<0.000000e+00> : vector<2x32xf32>
    %368 = tpu.matmul %345, %367, %cst_318 {dimension_numbers = #tpu.dot_dimension_numbers<[1], [0], [0], [1], [0, 0, 1, 1], [], []>} : vector<2x32xbf16>, vector<32x32xbf16>, vector<2x32xf32> -> vector<2x32xf32>
    %369 = arith.addf %365, %368 : vector<2x32xf32>
    %370 = arith.negf %351 : vector<2x32xf32>
    %371 = math.exp %370 : vector<2x32xf32>
    %cst_319 = arith.constant 1.000000e+00 : f32
    %372 = vector.broadcast %cst_319 : f32 to vector<2x32xf32>
    %373 = arith.addf %372, %371 : vector<2x32xf32>
    %374 = arith.divf %372, %373 : vector<2x32xf32>
    %375 = arith.negf %357 : vector<2x32xf32>
    %376 = math.exp %375 : vector<2x32xf32>
    %cst_320 = arith.constant 1.000000e+00 : f32
    %377 = vector.broadcast %cst_320 : f32 to vector<2x32xf32>
    %378 = arith.addf %377, %376 : vector<2x32xf32>
    %379 = arith.divf %377, %378 : vector<2x32xf32>
    %380 = math.tanh %363 : vector<2x32xf32>
    %381 = arith.negf %369 : vector<2x32xf32>
    %382 = math.exp %381 : vector<2x32xf32>
    %cst_321 = arith.constant 1.000000e+00 : f32
    %383 = vector.broadcast %cst_321 : f32 to vector<2x32xf32>
    %384 = arith.addf %383, %382 : vector<2x32xf32>
    %385 = arith.divf %383, %384 : vector<2x32xf32>
    %386 = arith.mulf %379, %290 : vector<2x32xf32>
    %387 = arith.mulf %374, %380 : vector<2x32xf32>
    %388 = arith.addf %386, %387 : vector<2x32xf32>
    %389 = math.tanh %388 : vector<2x32xf32>
    %390 = arith.mulf %385, %389 : vector<2x32xf32>
    %c0_322 = arith.constant 0 : index
    %c2_323 = arith.constant 2 : index
    %c0_324 = arith.constant 0 : index
    %391 = vector.load %arg27[%c0_322, %c2_323, %c0_324] : memref<2x5x32xf32, #tpu.memory_space<vmem>>, vector<2x1x32xf32>
    %392 = vector.shape_cast %391 : vector<2x1x32xf32> to vector<2x32xf32>
    %393 = vector.shape_cast %390 : vector<2x32xf32> to vector<2x1x32xf32>
    tpu.vector_store %arg27[%c0_322, %c2_323, %c0_324], %393 {strides = array<i32>} : memref<2x5x32xf32, #tpu.memory_space<vmem>>, vector<2x1x32xf32>,
    %394 = arith.truncf %341 : vector<2x32xf32> to vector<2x32xbf16>
    %c0_325 = arith.constant 0 : index
    %c0_326 = arith.constant 0 : index
    %c3_327 = arith.constant 3 : index
    %c0_328 = arith.constant 0 : index
    %395 = vector.load %arg28[%c0_325, %c0_326, %c3_327, %c0_328] : memref<4x2x8x32xf32, #tpu.memory_space<vmem>>, vector<1x2x1x32xf32>
    %396 = vector.shape_cast %395 : vector<1x2x1x32xf32> to vector<2x32xf32>
    %c0_329 = arith.constant 0 : index
    %c0_330 = arith.constant 0 : index
    %c0_331 = arith.constant 0 : index
    %397 = vector.load %arg7[%c0_329, %c0_330, %c0_331] : memref<4x32x32xbf16, #tpu.memory_space<vmem>>, vector<1x32x32xbf16>
    %398 = vector.shape_cast %397 : vector<1x32x32xbf16> to vector<32x32xbf16>
    %cst_332 = arith.constant dense<0.000000e+00> : vector<2x32xf32>
    %399 = tpu.matmul %394, %398, %cst_332 {dimension_numbers = #tpu.dot_dimension_numbers<[1], [0], [0], [1], [0, 0, 1, 1], [], []>} : vector<2x32xbf16>, vector<32x32xbf16>, vector<2x32xf32> -> vector<2x32xf32>
    %400 = arith.addf %396, %399 : vector<2x32xf32>
    %c1_333 = arith.constant 1 : index
    %c0_334 = arith.constant 0 : index
    %c3_335 = arith.constant 3 : index
    %c0_336 = arith.constant 0 : index
    %401 = vector.load %arg28[%c1_333, %c0_334, %c3_335, %c0_336] : memref<4x2x8x32xf32, #tpu.memory_space<vmem>>, vector<1x2x1x32xf32>
    %402 = vector.shape_cast %401 : vector<1x2x1x32xf32> to vector<2x32xf32>
    %c1_337 = arith.constant 1 : index
    %c0_338 = arith.constant 0 : index
    %c0_339 = arith.constant 0 : index
    %403 = vector.load %arg7[%c1_337, %c0_338, %c0_339] : memref<4x32x32xbf16, #tpu.memory_space<vmem>>, vector<1x32x32xbf16>
    %404 = vector.shape_cast %403 : vector<1x32x32xbf16> to vector<32x32xbf16>
    %cst_340 = arith.constant dense<0.000000e+00> : vector<2x32xf32>
    %405 = tpu.matmul %394, %404, %cst_340 {dimension_numbers = #tpu.dot_dimension_numbers<[1], [0], [0], [1], [0, 0, 1, 1], [], []>} : vector<2x32xbf16>, vector<32x32xbf16>, vector<2x32xf32> -> vector<2x32xf32>
    %406 = arith.addf %402, %405 : vector<2x32xf32>
    %c2_341 = arith.constant 2 : index
    %c0_342 = arith.constant 0 : index
    %c3_343 = arith.constant 3 : index
    %c0_344 = arith.constant 0 : index
    %407 = vector.load %arg28[%c2_341, %c0_342, %c3_343, %c0_344] : memref<4x2x8x32xf32, #tpu.memory_space<vmem>>, vector<1x2x1x32xf32>
    %408 = vector.shape_cast %407 : vector<1x2x1x32xf32> to vector<2x32xf32>
    %c2_345 = arith.constant 2 : index
    %c0_346 = arith.constant 0 : index
    %c0_347 = arith.constant 0 : index
    %409 = vector.load %arg7[%c2_345, %c0_346, %c0_347] : memref<4x32x32xbf16, #tpu.memory_space<vmem>>, vector<1x32x32xbf16>
    %410 = vector.shape_cast %409 : vector<1x32x32xbf16> to vector<32x32xbf16>
    %cst_348 = arith.constant dense<0.000000e+00> : vector<2x32xf32>
    %411 = tpu.matmul %394, %410, %cst_348 {dimension_numbers = #tpu.dot_dimension_numbers<[1], [0], [0], [1], [0, 0, 1, 1], [], []>} : vector<2x32xbf16>, vector<32x32xbf16>, vector<2x32xf32> -> vector<2x32xf32>
    %412 = arith.addf %408, %411 : vector<2x32xf32>
    %c3_349 = arith.constant 3 : index
    %c0_350 = arith.constant 0 : index
    %c3_351 = arith.constant 3 : index
    %c0_352 = arith.constant 0 : index
    %413 = vector.load %arg28[%c3_349, %c0_350, %c3_351, %c0_352] : memref<4x2x8x32xf32, #tpu.memory_space<vmem>>, vector<1x2x1x32xf32>
    %414 = vector.shape_cast %413 : vector<1x2x1x32xf32> to vector<2x32xf32>
    %c3_353 = arith.constant 3 : index
    %c0_354 = arith.constant 0 : index
    %c0_355 = arith.constant 0 : index
    %415 = vector.load %arg7[%c3_353, %c0_354, %c0_355] : memref<4x32x32xbf16, #tpu.memory_space<vmem>>, vector<1x32x32xbf16>
    %416 = vector.shape_cast %415 : vector<1x32x32xbf16> to vector<32x32xbf16>
    %cst_356 = arith.constant dense<0.000000e+00> : vector<2x32xf32>
    %417 = tpu.matmul %394, %416, %cst_356 {dimension_numbers = #tpu.dot_dimension_numbers<[1], [0], [0], [1], [0, 0, 1, 1], [], []>} : vector<2x32xbf16>, vector<32x32xbf16>, vector<2x32xf32> -> vector<2x32xf32>
    %418 = arith.addf %414, %417 : vector<2x32xf32>
    %419 = arith.negf %400 : vector<2x32xf32>
    %420 = math.exp %419 : vector<2x32xf32>
    %cst_357 = arith.constant 1.000000e+00 : f32
    %421 = vector.broadcast %cst_357 : f32 to vector<2x32xf32>
    %422 = arith.addf %421, %420 : vector<2x32xf32>
    %423 = arith.divf %421, %422 : vector<2x32xf32>
    %424 = arith.negf %406 : vector<2x32xf32>
    %425 = math.exp %424 : vector<2x32xf32>
    %cst_358 = arith.constant 1.000000e+00 : f32
    %426 = vector.broadcast %cst_358 : f32 to vector<2x32xf32>
    %427 = arith.addf %426, %425 : vector<2x32xf32>
    %428 = arith.divf %426, %427 : vector<2x32xf32>
    %429 = math.tanh %412 : vector<2x32xf32>
    %430 = arith.negf %418 : vector<2x32xf32>
    %431 = math.exp %430 : vector<2x32xf32>
    %cst_359 = arith.constant 1.000000e+00 : f32
    %432 = vector.broadcast %cst_359 : f32 to vector<2x32xf32>
    %433 = arith.addf %432, %431 : vector<2x32xf32>
    %434 = arith.divf %432, %433 : vector<2x32xf32>
    %435 = arith.mulf %428, %339 : vector<2x32xf32>
    %436 = arith.mulf %423, %429 : vector<2x32xf32>
    %437 = arith.addf %435, %436 : vector<2x32xf32>
    %438 = math.tanh %437 : vector<2x32xf32>
    %439 = arith.mulf %434, %438 : vector<2x32xf32>
    %c0_360 = arith.constant 0 : index
    %c3_361 = arith.constant 3 : index
    %c0_362 = arith.constant 0 : index
    %440 = vector.load %arg26[%c0_360, %c3_361, %c0_362] : memref<2x8x32xf32, #tpu.memory_space<vmem>>, vector<2x1x32xf32>
    %441 = vector.shape_cast %440 : vector<2x1x32xf32> to vector<2x32xf32>
    %442 = vector.shape_cast %439 : vector<2x32xf32> to vector<2x1x32xf32>
    tpu.vector_store %arg26[%c0_360, %c3_361, %c0_362], %442 {strides = array<i32>} : memref<2x8x32xf32, #tpu.memory_space<vmem>>, vector<2x1x32xf32>,
    %443 = arith.truncf %390 : vector<2x32xf32> to vector<2x32xbf16>
    %c0_363 = arith.constant 0 : index
    %c0_364 = arith.constant 0 : index
    %c3_365 = arith.constant 3 : index
    %c0_366 = arith.constant 0 : index
    %444 = vector.load %arg29[%c0_363, %c0_364, %c3_365, %c0_366] : memref<4x2x5x32xf32, #tpu.memory_space<vmem>>, vector<1x2x1x32xf32>
    %445 = vector.shape_cast %444 : vector<1x2x1x32xf32> to vector<2x32xf32>
    %c0_367 = arith.constant 0 : index
    %c0_368 = arith.constant 0 : index
    %c0_369 = arith.constant 0 : index
    %446 = vector.load %arg10[%c0_367, %c0_368, %c0_369] : memref<4x32x32xbf16, #tpu.memory_space<vmem>>, vector<1x32x32xbf16>
    %447 = vector.shape_cast %446 : vector<1x32x32xbf16> to vector<32x32xbf16>
    %cst_370 = arith.constant dense<0.000000e+00> : vector<2x32xf32>
    %448 = tpu.matmul %443, %447, %cst_370 {dimension_numbers = #tpu.dot_dimension_numbers<[1], [0], [0], [1], [0, 0, 1, 1], [], []>} : vector<2x32xbf16>, vector<32x32xbf16>, vector<2x32xf32> -> vector<2x32xf32>
    %449 = arith.addf %445, %448 : vector<2x32xf32>
    %c1_371 = arith.constant 1 : index
    %c0_372 = arith.constant 0 : index
    %c3_373 = arith.constant 3 : index
    %c0_374 = arith.constant 0 : index
    %450 = vector.load %arg29[%c1_371, %c0_372, %c3_373, %c0_374] : memref<4x2x5x32xf32, #tpu.memory_space<vmem>>, vector<1x2x1x32xf32>
    %451 = vector.shape_cast %450 : vector<1x2x1x32xf32> to vector<2x32xf32>
    %c1_375 = arith.constant 1 : index
    %c0_376 = arith.constant 0 : index
    %c0_377 = arith.constant 0 : index
    %452 = vector.load %arg10[%c1_375, %c0_376, %c0_377] : memref<4x32x32xbf16, #tpu.memory_space<vmem>>, vector<1x32x32xbf16>
    %453 = vector.shape_cast %452 : vector<1x32x32xbf16> to vector<32x32xbf16>
    %cst_378 = arith.constant dense<0.000000e+00> : vector<2x32xf32>
    %454 = tpu.matmul %443, %453, %cst_378 {dimension_numbers = #tpu.dot_dimension_numbers<[1], [0], [0], [1], [0, 0, 1, 1], [], []>} : vector<2x32xbf16>, vector<32x32xbf16>, vector<2x32xf32> -> vector<2x32xf32>
    %455 = arith.addf %451, %454 : vector<2x32xf32>
    %c2_379 = arith.constant 2 : index
    %c0_380 = arith.constant 0 : index
    %c3_381 = arith.constant 3 : index
    %c0_382 = arith.constant 0 : index
    %456 = vector.load %arg29[%c2_379, %c0_380, %c3_381, %c0_382] : memref<4x2x5x32xf32, #tpu.memory_space<vmem>>, vector<1x2x1x32xf32>
    %457 = vector.shape_cast %456 : vector<1x2x1x32xf32> to vector<2x32xf32>
    %c2_383 = arith.constant 2 : index
    %c0_384 = arith.constant 0 : index
    %c0_385 = arith.constant 0 : index
    %458 = vector.load %arg10[%c2_383, %c0_384, %c0_385] : memref<4x32x32xbf16, #tpu.memory_space<vmem>>, vector<1x32x32xbf16>
    %459 = vector.shape_cast %458 : vector<1x32x32xbf16> to vector<32x32xbf16>
    %cst_386 = arith.constant dense<0.000000e+00> : vector<2x32xf32>
    %460 = tpu.matmul %443, %459, %cst_386 {dimension_numbers = #tpu.dot_dimension_numbers<[1], [0], [0], [1], [0, 0, 1, 1], [], []>} : vector<2x32xbf16>, vector<32x32xbf16>, vector<2x32xf32> -> vector<2x32xf32>
    %461 = arith.addf %457, %460 : vector<2x32xf32>
    %c3_387 = arith.constant 3 : index
    %c0_388 = arith.constant 0 : index
    %c3_389 = arith.constant 3 : index
    %c0_390 = arith.constant 0 : index
    %462 = vector.load %arg29[%c3_387, %c0_388, %c3_389, %c0_390] : memref<4x2x5x32xf32, #tpu.memory_space<vmem>>, vector<1x2x1x32xf32>
    %463 = vector.shape_cast %462 : vector<1x2x1x32xf32> to vector<2x32xf32>
    %c3_391 = arith.constant 3 : index
    %c0_392 = arith.constant 0 : index
    %c0_393 = arith.constant 0 : index
    %464 = vector.load %arg10[%c3_391, %c0_392, %c0_393] : memref<4x32x32xbf16, #tpu.memory_space<vmem>>, vector<1x32x32xbf16>
    %465 = vector.shape_cast %464 : vector<1x32x32xbf16> to vector<32x32xbf16>
    %cst_394 = arith.constant dense<0.000000e+00> : vector<2x32xf32>
    %466 = tpu.matmul %443, %465, %cst_394 {dimension_numbers = #tpu.dot_dimension_numbers<[1], [0], [0], [1], [0, 0, 1, 1], [], []>} : vector<2x32xbf16>, vector<32x32xbf16>, vector<2x32xf32> -> vector<2x32xf32>
    %467 = arith.addf %463, %466 : vector<2x32xf32>
    %468 = arith.negf %449 : vector<2x32xf32>
    %469 = math.exp %468 : vector<2x32xf32>
    %cst_395 = arith.constant 1.000000e+00 : f32
    %470 = vector.broadcast %cst_395 : f32 to vector<2x32xf32>
    %471 = arith.addf %470, %469 : vector<2x32xf32>
    %472 = arith.divf %470, %471 : vector<2x32xf32>
    %473 = arith.negf %455 : vector<2x32xf32>
    %474 = math.exp %473 : vector<2x32xf32>
    %cst_396 = arith.constant 1.000000e+00 : f32
    %475 = vector.broadcast %cst_396 : f32 to vector<2x32xf32>
    %476 = arith.addf %475, %474 : vector<2x32xf32>
    %477 = arith.divf %475, %476 : vector<2x32xf32>
    %478 = math.tanh %461 : vector<2x32xf32>
    %479 = arith.negf %467 : vector<2x32xf32>
    %480 = math.exp %479 : vector<2x32xf32>
    %cst_397 = arith.constant 1.000000e+00 : f32
    %481 = vector.broadcast %cst_397 : f32 to vector<2x32xf32>
    %482 = arith.addf %481, %480 : vector<2x32xf32>
    %483 = arith.divf %481, %482 : vector<2x32xf32>
    %484 = arith.mulf %477, %388 : vector<2x32xf32>
    %485 = arith.mulf %472, %478 : vector<2x32xf32>
    %486 = arith.addf %484, %485 : vector<2x32xf32>
    %487 = math.tanh %486 : vector<2x32xf32>
    %488 = arith.mulf %483, %487 : vector<2x32xf32>
    %c0_398 = arith.constant 0 : index
    %c3_399 = arith.constant 3 : index
    %c0_400 = arith.constant 0 : index
    %489 = vector.load %arg27[%c0_398, %c3_399, %c0_400] : memref<2x5x32xf32, #tpu.memory_space<vmem>>, vector<2x1x32xf32>
    %490 = vector.shape_cast %489 : vector<2x1x32xf32> to vector<2x32xf32>
    %491 = vector.shape_cast %488 : vector<2x32xf32> to vector<2x1x32xf32>
    tpu.vector_store %arg27[%c0_398, %c3_399, %c0_400], %491 {strides = array<i32>} : memref<2x5x32xf32, #tpu.memory_space<vmem>>, vector<2x1x32xf32>,
    %492 = arith.truncf %439 : vector<2x32xf32> to vector<2x32xbf16>
    %c0_401 = arith.constant 0 : index
    %c0_402 = arith.constant 0 : index
    %c4 = arith.constant 4 : index
    %c0_403 = arith.constant 0 : index
    %493 = vector.load %arg28[%c0_401, %c0_402, %c4, %c0_403] : memref<4x2x8x32xf32, #tpu.memory_space<vmem>>, vector<1x2x1x32xf32>
    %494 = vector.shape_cast %493 : vector<1x2x1x32xf32> to vector<2x32xf32>
    %c0_404 = arith.constant 0 : index
    %c0_405 = arith.constant 0 : index
    %c0_406 = arith.constant 0 : index
    %495 = vector.load %arg7[%c0_404, %c0_405, %c0_406] : memref<4x32x32xbf16, #tpu.memory_space<vmem>>, vector<1x32x32xbf16>
    %496 = vector.shape_cast %495 : vector<1x32x32xbf16> to vector<32x32xbf16>
    %cst_407 = arith.constant dense<0.000000e+00> : vector<2x32xf32>
    %497 = tpu.matmul %492, %496, %cst_407 {dimension_numbers = #tpu.dot_dimension_numbers<[1], [0], [0], [1], [0, 0, 1, 1], [], []>} : vector<2x32xbf16>, vector<32x32xbf16>, vector<2x32xf32> -> vector<2x32xf32>
    %498 = arith.addf %494, %497 : vector<2x32xf32>
    %c1_408 = arith.constant 1 : index
    %c0_409 = arith.constant 0 : index
    %c4_410 = arith.constant 4 : index
    %c0_411 = arith.constant 0 : index
    %499 = vector.load %arg28[%c1_408, %c0_409, %c4_410, %c0_411] : memref<4x2x8x32xf32, #tpu.memory_space<vmem>>, vector<1x2x1x32xf32>
    %500 = vector.shape_cast %499 : vector<1x2x1x32xf32> to vector<2x32xf32>
    %c1_412 = arith.constant 1 : index
    %c0_413 = arith.constant 0 : index
    %c0_414 = arith.constant 0 : index
    %501 = vector.load %arg7[%c1_412, %c0_413, %c0_414] : memref<4x32x32xbf16, #tpu.memory_space<vmem>>, vector<1x32x32xbf16>
    %502 = vector.shape_cast %501 : vector<1x32x32xbf16> to vector<32x32xbf16>
    %cst_415 = arith.constant dense<0.000000e+00> : vector<2x32xf32>
    %503 = tpu.matmul %492, %502, %cst_415 {dimension_numbers = #tpu.dot_dimension_numbers<[1], [0], [0], [1], [0, 0, 1, 1], [], []>} : vector<2x32xbf16>, vector<32x32xbf16>, vector<2x32xf32> -> vector<2x32xf32>
    %504 = arith.addf %500, %503 : vector<2x32xf32>
    %c2_416 = arith.constant 2 : index
    %c0_417 = arith.constant 0 : index
    %c4_418 = arith.constant 4 : index
    %c0_419 = arith.constant 0 : index
    %505 = vector.load %arg28[%c2_416, %c0_417, %c4_418, %c0_419] : memref<4x2x8x32xf32, #tpu.memory_space<vmem>>, vector<1x2x1x32xf32>
    %506 = vector.shape_cast %505 : vector<1x2x1x32xf32> to vector<2x32xf32>
    %c2_420 = arith.constant 2 : index
    %c0_421 = arith.constant 0 : index
    %c0_422 = arith.constant 0 : index
    %507 = vector.load %arg7[%c2_420, %c0_421, %c0_422] : memref<4x32x32xbf16, #tpu.memory_space<vmem>>, vector<1x32x32xbf16>
    %508 = vector.shape_cast %507 : vector<1x32x32xbf16> to vector<32x32xbf16>
    %cst_423 = arith.constant dense<0.000000e+00> : vector<2x32xf32>
    %509 = tpu.matmul %492, %508, %cst_423 {dimension_numbers = #tpu.dot_dimension_numbers<[1], [0], [0], [1], [0, 0, 1, 1], [], []>} : vector<2x32xbf16>, vector<32x32xbf16>, vector<2x32xf32> -> vector<2x32xf32>
    %510 = arith.addf %506, %509 : vector<2x32xf32>
    %c3_424 = arith.constant 3 : index
    %c0_425 = arith.constant 0 : index
    %c4_426 = arith.constant 4 : index
    %c0_427 = arith.constant 0 : index
    %511 = vector.load %arg28[%c3_424, %c0_425, %c4_426, %c0_427] : memref<4x2x8x32xf32, #tpu.memory_space<vmem>>, vector<1x2x1x32xf32>
    %512 = vector.shape_cast %511 : vector<1x2x1x32xf32> to vector<2x32xf32>
    %c3_428 = arith.constant 3 : index
    %c0_429 = arith.constant 0 : index
    %c0_430 = arith.constant 0 : index
    %513 = vector.load %arg7[%c3_428, %c0_429, %c0_430] : memref<4x32x32xbf16, #tpu.memory_space<vmem>>, vector<1x32x32xbf16>
    %514 = vector.shape_cast %513 : vector<1x32x32xbf16> to vector<32x32xbf16>
    %cst_431 = arith.constant dense<0.000000e+00> : vector<2x32xf32>
    %515 = tpu.matmul %492, %514, %cst_431 {dimension_numbers = #tpu.dot_dimension_numbers<[1], [0], [0], [1], [0, 0, 1, 1], [], []>} : vector<2x32xbf16>, vector<32x32xbf16>, vector<2x32xf32> -> vector<2x32xf32>
    %516 = arith.addf %512, %515 : vector<2x32xf32>
    %517 = arith.negf %498 : vector<2x32xf32>
    %518 = math.exp %517 : vector<2x32xf32>
    %cst_432 = arith.constant 1.000000e+00 : f32
    %519 = vector.broadcast %cst_432 : f32 to vector<2x32xf32>
    %520 = arith.addf %519, %518 : vector<2x32xf32>
    %521 = arith.divf %519, %520 : vector<2x32xf32>
    %522 = arith.negf %504 : vector<2x32xf32>
    %523 = math.exp %522 : vector<2x32xf32>
    %cst_433 = arith.constant 1.000000e+00 : f32
    %524 = vector.broadcast %cst_433 : f32 to vector<2x32xf32>
    %525 = arith.addf %524, %523 : vector<2x32xf32>
    %526 = arith.divf %524, %525 : vector<2x32xf32>
    %527 = math.tanh %510 : vector<2x32xf32>
    %528 = arith.negf %516 : vector<2x32xf32>
    %529 = math.exp %528 : vector<2x32xf32>
    %cst_434 = arith.constant 1.000000e+00 : f32
    %530 = vector.broadcast %cst_434 : f32 to vector<2x32xf32>
    %531 = arith.addf %530, %529 : vector<2x32xf32>
    %532 = arith.divf %530, %531 : vector<2x32xf32>
    %533 = arith.mulf %526, %437 : vector<2x32xf32>
    %534 = arith.mulf %521, %527 : vector<2x32xf32>
    %535 = arith.addf %533, %534 : vector<2x32xf32>
    %536 = math.tanh %535 : vector<2x32xf32>
    %537 = arith.mulf %532, %536 : vector<2x32xf32>
    %c0_435 = arith.constant 0 : index
    %c4_436 = arith.constant 4 : index
    %c0_437 = arith.constant 0 : index
    %538 = vector.load %arg26[%c0_435, %c4_436, %c0_437] : memref<2x8x32xf32, #tpu.memory_space<vmem>>, vector<2x1x32xf32>
    %539 = vector.shape_cast %538 : vector<2x1x32xf32> to vector<2x32xf32>
    %540 = vector.shape_cast %537 : vector<2x32xf32> to vector<2x1x32xf32>
    tpu.vector_store %arg26[%c0_435, %c4_436, %c0_437], %540 {strides = array<i32>} : memref<2x8x32xf32, #tpu.memory_space<vmem>>, vector<2x1x32xf32>,
    %541 = arith.truncf %488 : vector<2x32xf32> to vector<2x32xbf16>
    %c0_438 = arith.constant 0 : index
    %c0_439 = arith.constant 0 : index
    %c4_440 = arith.constant 4 : index
    %c0_441 = arith.constant 0 : index
    %542 = vector.load %arg29[%c0_438, %c0_439, %c4_440, %c0_441] : memref<4x2x5x32xf32, #tpu.memory_space<vmem>>, vector<1x2x1x32xf32>
    %543 = vector.shape_cast %542 : vector<1x2x1x32xf32> to vector<2x32xf32>
    %c0_442 = arith.constant 0 : index
    %c0_443 = arith.constant 0 : index
    %c0_444 = arith.constant 0 : index
    %544 = vector.load %arg10[%c0_442, %c0_443, %c0_444] : memref<4x32x32xbf16, #tpu.memory_space<vmem>>, vector<1x32x32xbf16>
    %545 = vector.shape_cast %544 : vector<1x32x32xbf16> to vector<32x32xbf16>
    %cst_445 = arith.constant dense<0.000000e+00> : vector<2x32xf32>
    %546 = tpu.matmul %541, %545, %cst_445 {dimension_numbers = #tpu.dot_dimension_numbers<[1], [0], [0], [1], [0, 0, 1, 1], [], []>} : vector<2x32xbf16>, vector<32x32xbf16>, vector<2x32xf32> -> vector<2x32xf32>
    %547 = arith.addf %543, %546 : vector<2x32xf32>
    %c1_446 = arith.constant 1 : index
    %c0_447 = arith.constant 0 : index
    %c4_448 = arith.constant 4 : index
    %c0_449 = arith.constant 0 : index
    %548 = vector.load %arg29[%c1_446, %c0_447, %c4_448, %c0_449] : memref<4x2x5x32xf32, #tpu.memory_space<vmem>>, vector<1x2x1x32xf32>
    %549 = vector.shape_cast %548 : vector<1x2x1x32xf32> to vector<2x32xf32>
    %c1_450 = arith.constant 1 : index
    %c0_451 = arith.constant 0 : index
    %c0_452 = arith.constant 0 : index
    %550 = vector.load %arg10[%c1_450, %c0_451, %c0_452] : memref<4x32x32xbf16, #tpu.memory_space<vmem>>, vector<1x32x32xbf16>
    %551 = vector.shape_cast %550 : vector<1x32x32xbf16> to vector<32x32xbf16>
    %cst_453 = arith.constant dense<0.000000e+00> : vector<2x32xf32>
    %552 = tpu.matmul %541, %551, %cst_453 {dimension_numbers = #tpu.dot_dimension_numbers<[1], [0], [0], [1], [0, 0, 1, 1], [], []>} : vector<2x32xbf16>, vector<32x32xbf16>, vector<2x32xf32> -> vector<2x32xf32>
    %553 = arith.addf %549, %552 : vector<2x32xf32>
    %c2_454 = arith.constant 2 : index
    %c0_455 = arith.constant 0 : index
    %c4_456 = arith.constant 4 : index
    %c0_457 = arith.constant 0 : index
    %554 = vector.load %arg29[%c2_454, %c0_455, %c4_456, %c0_457] : memref<4x2x5x32xf32, #tpu.memory_space<vmem>>, vector<1x2x1x32xf32>
    %555 = vector.shape_cast %554 : vector<1x2x1x32xf32> to vector<2x32xf32>
    %c2_458 = arith.constant 2 : index
    %c0_459 = arith.constant 0 : index
    %c0_460 = arith.constant 0 : index
    %556 = vector.load %arg10[%c2_458, %c0_459, %c0_460] : memref<4x32x32xbf16, #tpu.memory_space<vmem>>, vector<1x32x32xbf16>
    %557 = vector.shape_cast %556 : vector<1x32x32xbf16> to vector<32x32xbf16>
    %cst_461 = arith.constant dense<0.000000e+00> : vector<2x32xf32>
    %558 = tpu.matmul %541, %557, %cst_461 {dimension_numbers = #tpu.dot_dimension_numbers<[1], [0], [0], [1], [0, 0, 1, 1], [], []>} : vector<2x32xbf16>, vector<32x32xbf16>, vector<2x32xf32> -> vector<2x32xf32>
    %559 = arith.addf %555, %558 : vector<2x32xf32>
    %c3_462 = arith.constant 3 : index
    %c0_463 = arith.constant 0 : index
    %c4_464 = arith.constant 4 : index
    %c0_465 = arith.constant 0 : index
    %560 = vector.load %arg29[%c3_462, %c0_463, %c4_464, %c0_465] : memref<4x2x5x32xf32, #tpu.memory_space<vmem>>, vector<1x2x1x32xf32>
    %561 = vector.shape_cast %560 : vector<1x2x1x32xf32> to vector<2x32xf32>
    %c3_466 = arith.constant 3 : index
    %c0_467 = arith.constant 0 : index
    %c0_468 = arith.constant 0 : index
    %562 = vector.load %arg10[%c3_466, %c0_467, %c0_468] : memref<4x32x32xbf16, #tpu.memory_space<vmem>>, vector<1x32x32xbf16>
    %563 = vector.shape_cast %562 : vector<1x32x32xbf16> to vector<32x32xbf16>
    %cst_469 = arith.constant dense<0.000000e+00> : vector<2x32xf32>
    %564 = tpu.matmul %541, %563, %cst_469 {dimension_numbers = #tpu.dot_dimension_numbers<[1], [0], [0], [1], [0, 0, 1, 1], [], []>} : vector<2x32xbf16>, vector<32x32xbf16>, vector<2x32xf32> -> vector<2x32xf32>
    %565 = arith.addf %561, %564 : vector<2x32xf32>
    %566 = arith.negf %547 : vector<2x32xf32>
    %567 = math.exp %566 : vector<2x32xf32>
    %cst_470 = arith.constant 1.000000e+00 : f32
    %568 = vector.broadcast %cst_470 : f32 to vector<2x32xf32>
    %569 = arith.addf %568, %567 : vector<2x32xf32>
    %570 = arith.divf %568, %569 : vector<2x32xf32>
    %571 = arith.negf %553 : vector<2x32xf32>
    %572 = math.exp %571 : vector<2x32xf32>
    %cst_471 = arith.constant 1.000000e+00 : f32
    %573 = vector.broadcast %cst_471 : f32 to vector<2x32xf32>
    %574 = arith.addf %573, %572 : vector<2x32xf32>
    %575 = arith.divf %573, %574 : vector<2x32xf32>
    %576 = math.tanh %559 : vector<2x32xf32>
    %577 = arith.negf %565 : vector<2x32xf32>
    %578 = math.exp %577 : vector<2x32xf32>
    %cst_472 = arith.constant 1.000000e+00 : f32
    %579 = vector.broadcast %cst_472 : f32 to vector<2x32xf32>
    %580 = arith.addf %579, %578 : vector<2x32xf32>
    %581 = arith.divf %579, %580 : vector<2x32xf32>
    %582 = arith.mulf %575, %486 : vector<2x32xf32>
    %583 = arith.mulf %570, %576 : vector<2x32xf32>
    %584 = arith.addf %582, %583 : vector<2x32xf32>
    %585 = math.tanh %584 : vector<2x32xf32>
    %586 = arith.mulf %581, %585 : vector<2x32xf32>
    %c0_473 = arith.constant 0 : index
    %c4_474 = arith.constant 4 : index
    %c0_475 = arith.constant 0 : index
    %587 = vector.load %arg27[%c0_473, %c4_474, %c0_475] : memref<2x5x32xf32, #tpu.memory_space<vmem>>, vector<2x1x32xf32>
    %588 = vector.shape_cast %587 : vector<2x1x32xf32> to vector<2x32xf32>
    %589 = vector.shape_cast %586 : vector<2x32xf32> to vector<2x1x32xf32>
    tpu.vector_store %arg27[%c0_473, %c4_474, %c0_475], %589 {strides = array<i32>} : memref<2x5x32xf32, #tpu.memory_space<vmem>>, vector<2x1x32xf32>,
    %590 = arith.truncf %537 : vector<2x32xf32> to vector<2x32xbf16>
    %c0_476 = arith.constant 0 : index
    %c0_477 = arith.constant 0 : index
    %c5 = arith.constant 5 : index
    %c0_478 = arith.constant 0 : index
    %591 = vector.load %arg28[%c0_476, %c0_477, %c5, %c0_478] : memref<4x2x8x32xf32, #tpu.memory_space<vmem>>, vector<1x2x1x32xf32>
    %592 = vector.shape_cast %591 : vector<1x2x1x32xf32> to vector<2x32xf32>
    %c0_479 = arith.constant 0 : index
    %c0_480 = arith.constant 0 : index
    %c0_481 = arith.constant 0 : index
    %593 = vector.load %arg7[%c0_479, %c0_480, %c0_481] : memref<4x32x32xbf16, #tpu.memory_space<vmem>>, vector<1x32x32xbf16>
    %594 = vector.shape_cast %593 : vector<1x32x32xbf16> to vector<32x32xbf16>
    %cst_482 = arith.constant dense<0.000000e+00> : vector<2x32xf32>
    %595 = tpu.matmul %590, %594, %cst_482 {dimension_numbers = #tpu.dot_dimension_numbers<[1], [0], [0], [1], [0, 0, 1, 1], [], []>} : vector<2x32xbf16>, vector<32x32xbf16>, vector<2x32xf32> -> vector<2x32xf32>
    %596 = arith.addf %592, %595 : vector<2x32xf32>
    %c1_483 = arith.constant 1 : index
    %c0_484 = arith.constant 0 : index
    %c5_485 = arith.constant 5 : index
    %c0_486 = arith.constant 0 : index
    %597 = vector.load %arg28[%c1_483, %c0_484, %c5_485, %c0_486] : memref<4x2x8x32xf32, #tpu.memory_space<vmem>>, vector<1x2x1x32xf32>
    %598 = vector.shape_cast %597 : vector<1x2x1x32xf32> to vector<2x32xf32>
    %c1_487 = arith.constant 1 : index
    %c0_488 = arith.constant 0 : index
    %c0_489 = arith.constant 0 : index
    %599 = vector.load %arg7[%c1_487, %c0_488, %c0_489] : memref<4x32x32xbf16, #tpu.memory_space<vmem>>, vector<1x32x32xbf16>
    %600 = vector.shape_cast %599 : vector<1x32x32xbf16> to vector<32x32xbf16>
    %cst_490 = arith.constant dense<0.000000e+00> : vector<2x32xf32>
    %601 = tpu.matmul %590, %600, %cst_490 {dimension_numbers = #tpu.dot_dimension_numbers<[1], [0], [0], [1], [0, 0, 1, 1], [], []>} : vector<2x32xbf16>, vector<32x32xbf16>, vector<2x32xf32> -> vector<2x32xf32>
    %602 = arith.addf %598, %601 : vector<2x32xf32>
    %c2_491 = arith.constant 2 : index
    %c0_492 = arith.constant 0 : index
    %c5_493 = arith.constant 5 : index
    %c0_494 = arith.constant 0 : index
    %603 = vector.load %arg28[%c2_491, %c0_492, %c5_493, %c0_494] : memref<4x2x8x32xf32, #tpu.memory_space<vmem>>, vector<1x2x1x32xf32>
    %604 = vector.shape_cast %603 : vector<1x2x1x32xf32> to vector<2x32xf32>
    %c2_495 = arith.constant 2 : index
    %c0_496 = arith.constant 0 : index
    %c0_497 = arith.constant 0 : index
    %605 = vector.load %arg7[%c2_495, %c0_496, %c0_497] : memref<4x32x32xbf16, #tpu.memory_space<vmem>>, vector<1x32x32xbf16>
    %606 = vector.shape_cast %605 : vector<1x32x32xbf16> to vector<32x32xbf16>
    %cst_498 = arith.constant dense<0.000000e+00> : vector<2x32xf32>
    %607 = tpu.matmul %590, %606, %cst_498 {dimension_numbers = #tpu.dot_dimension_numbers<[1], [0], [0], [1], [0, 0, 1, 1], [], []>} : vector<2x32xbf16>, vector<32x32xbf16>, vector<2x32xf32> -> vector<2x32xf32>
    %608 = arith.addf %604, %607 : vector<2x32xf32>
    %c3_499 = arith.constant 3 : index
    %c0_500 = arith.constant 0 : index
    %c5_501 = arith.constant 5 : index
    %c0_502 = arith.constant 0 : index
    %609 = vector.load %arg28[%c3_499, %c0_500, %c5_501, %c0_502] : memref<4x2x8x32xf32, #tpu.memory_space<vmem>>, vector<1x2x1x32xf32>
    %610 = vector.shape_cast %609 : vector<1x2x1x32xf32> to vector<2x32xf32>
    %c3_503 = arith.constant 3 : index
    %c0_504 = arith.constant 0 : index
    %c0_505 = arith.constant 0 : index
    %611 = vector.load %arg7[%c3_503, %c0_504, %c0_505] : memref<4x32x32xbf16, #tpu.memory_space<vmem>>, vector<1x32x32xbf16>
    %612 = vector.shape_cast %611 : vector<1x32x32xbf16> to vector<32x32xbf16>
    %cst_506 = arith.constant dense<0.000000e+00> : vector<2x32xf32>
    %613 = tpu.matmul %590, %612, %cst_506 {dimension_numbers = #tpu.dot_dimension_numbers<[1], [0], [0], [1], [0, 0, 1, 1], [], []>} : vector<2x32xbf16>, vector<32x32xbf16>, vector<2x32xf32> -> vector<2x32xf32>
    %614 = arith.addf %610, %613 : vector<2x32xf32>
    %615 = arith.negf %596 : vector<2x32xf32>
    %616 = math.exp %615 : vector<2x32xf32>
    %cst_507 = arith.constant 1.000000e+00 : f32
    %617 = vector.broadcast %cst_507 : f32 to vector<2x32xf32>
    %618 = arith.addf %617, %616 : vector<2x32xf32>
    %619 = arith.divf %617, %618 : vector<2x32xf32>
    %620 = arith.negf %602 : vector<2x32xf32>
    %621 = math.exp %620 : vector<2x32xf32>
    %cst_508 = arith.constant 1.000000e+00 : f32
    %622 = vector.broadcast %cst_508 : f32 to vector<2x32xf32>
    %623 = arith.addf %622, %621 : vector<2x32xf32>
    %624 = arith.divf %622, %623 : vector<2x32xf32>
    %625 = math.tanh %608 : vector<2x32xf32>
    %626 = arith.negf %614 : vector<2x32xf32>
    %627 = math.exp %626 : vector<2x32xf32>
    %cst_509 = arith.constant 1.000000e+00 : f32
    %628 = vector.broadcast %cst_509 : f32 to vector<2x32xf32>
    %629 = arith.addf %628, %627 : vector<2x32xf32>
    %630 = arith.divf %628, %629 : vector<2x32xf32>
    %631 = arith.mulf %624, %535 : vector<2x32xf32>
    %632 = arith.mulf %619, %625 : vector<2x32xf32>
    %633 = arith.addf %631, %632 : vector<2x32xf32>
    %634 = math.tanh %633 : vector<2x32xf32>
    %635 = arith.mulf %630, %634 : vector<2x32xf32>
    %c0_510 = arith.constant 0 : index
    %c5_511 = arith.constant 5 : index
    %c0_512 = arith.constant 0 : index
    %636 = vector.load %arg26[%c0_510, %c5_511, %c0_512] : memref<2x8x32xf32, #tpu.memory_space<vmem>>, vector<2x1x32xf32>
    %637 = vector.shape_cast %636 : vector<2x1x32xf32> to vector<2x32xf32>
    %638 = vector.shape_cast %635 : vector<2x32xf32> to vector<2x1x32xf32>
    tpu.vector_store %arg26[%c0_510, %c5_511, %c0_512], %638 {strides = array<i32>} : memref<2x8x32xf32, #tpu.memory_space<vmem>>, vector<2x1x32xf32>,
    %639 = arith.truncf %635 : vector<2x32xf32> to vector<2x32xbf16>
    %c0_513 = arith.constant 0 : index
    %c0_514 = arith.constant 0 : index
    %c6 = arith.constant 6 : index
    %c0_515 = arith.constant 0 : index
    %640 = vector.load %arg28[%c0_513, %c0_514, %c6, %c0_515] : memref<4x2x8x32xf32, #tpu.memory_space<vmem>>, vector<1x2x1x32xf32>
    %641 = vector.shape_cast %640 : vector<1x2x1x32xf32> to vector<2x32xf32>
    %c0_516 = arith.constant 0 : index
    %c0_517 = arith.constant 0 : index
    %c0_518 = arith.constant 0 : index
    %642 = vector.load %arg7[%c0_516, %c0_517, %c0_518] : memref<4x32x32xbf16, #tpu.memory_space<vmem>>, vector<1x32x32xbf16>
    %643 = vector.shape_cast %642 : vector<1x32x32xbf16> to vector<32x32xbf16>
    %cst_519 = arith.constant dense<0.000000e+00> : vector<2x32xf32>
    %644 = tpu.matmul %639, %643, %cst_519 {dimension_numbers = #tpu.dot_dimension_numbers<[1], [0], [0], [1], [0, 0, 1, 1], [], []>} : vector<2x32xbf16>, vector<32x32xbf16>, vector<2x32xf32> -> vector<2x32xf32>
    %645 = arith.addf %641, %644 : vector<2x32xf32>
    %c1_520 = arith.constant 1 : index
    %c0_521 = arith.constant 0 : index
    %c6_522 = arith.constant 6 : index
    %c0_523 = arith.constant 0 : index
    %646 = vector.load %arg28[%c1_520, %c0_521, %c6_522, %c0_523] : memref<4x2x8x32xf32, #tpu.memory_space<vmem>>, vector<1x2x1x32xf32>
    %647 = vector.shape_cast %646 : vector<1x2x1x32xf32> to vector<2x32xf32>
    %c1_524 = arith.constant 1 : index
    %c0_525 = arith.constant 0 : index
    %c0_526 = arith.constant 0 : index
    %648 = vector.load %arg7[%c1_524, %c0_525, %c0_526] : memref<4x32x32xbf16, #tpu.memory_space<vmem>>, vector<1x32x32xbf16>
    %649 = vector.shape_cast %648 : vector<1x32x32xbf16> to vector<32x32xbf16>
    %cst_527 = arith.constant dense<0.000000e+00> : vector<2x32xf32>
    %650 = tpu.matmul %639, %649, %cst_527 {dimension_numbers = #tpu.dot_dimension_numbers<[1], [0], [0], [1], [0, 0, 1, 1], [], []>} : vector<2x32xbf16>, vector<32x32xbf16>, vector<2x32xf32> -> vector<2x32xf32>
    %651 = arith.addf %647, %650 : vector<2x32xf32>
    %c2_528 = arith.constant 2 : index
    %c0_529 = arith.constant 0 : index
    %c6_530 = arith.constant 6 : index
    %c0_531 = arith.constant 0 : index
    %652 = vector.load %arg28[%c2_528, %c0_529, %c6_530, %c0_531] : memref<4x2x8x32xf32, #tpu.memory_space<vmem>>, vector<1x2x1x32xf32>
    %653 = vector.shape_cast %652 : vector<1x2x1x32xf32> to vector<2x32xf32>
    %c2_532 = arith.constant 2 : index
    %c0_533 = arith.constant 0 : index
    %c0_534 = arith.constant 0 : index
    %654 = vector.load %arg7[%c2_532, %c0_533, %c0_534] : memref<4x32x32xbf16, #tpu.memory_space<vmem>>, vector<1x32x32xbf16>
    %655 = vector.shape_cast %654 : vector<1x32x32xbf16> to vector<32x32xbf16>
    %cst_535 = arith.constant dense<0.000000e+00> : vector<2x32xf32>
    %656 = tpu.matmul %639, %655, %cst_535 {dimension_numbers = #tpu.dot_dimension_numbers<[1], [0], [0], [1], [0, 0, 1, 1], [], []>} : vector<2x32xbf16>, vector<32x32xbf16>, vector<2x32xf32> -> vector<2x32xf32>
    %657 = arith.addf %653, %656 : vector<2x32xf32>
    %c3_536 = arith.constant 3 : index
    %c0_537 = arith.constant 0 : index
    %c6_538 = arith.constant 6 : index
    %c0_539 = arith.constant 0 : index
    %658 = vector.load %arg28[%c3_536, %c0_537, %c6_538, %c0_539] : memref<4x2x8x32xf32, #tpu.memory_space<vmem>>, vector<1x2x1x32xf32>
    %659 = vector.shape_cast %658 : vector<1x2x1x32xf32> to vector<2x32xf32>
    %c3_540 = arith.constant 3 : index
    %c0_541 = arith.constant 0 : index
    %c0_542 = arith.constant 0 : index
    %660 = vector.load %arg7[%c3_540, %c0_541, %c0_542] : memref<4x32x32xbf16, #tpu.memory_space<vmem>>, vector<1x32x32xbf16>
    %661 = vector.shape_cast %660 : vector<1x32x32xbf16> to vector<32x32xbf16>
    %cst_543 = arith.constant dense<0.000000e+00> : vector<2x32xf32>
    %662 = tpu.matmul %639, %661, %cst_543 {dimension_numbers = #tpu.dot_dimension_numbers<[1], [0], [0], [1], [0, 0, 1, 1], [], []>} : vector<2x32xbf16>, vector<32x32xbf16>, vector<2x32xf32> -> vector<2x32xf32>
    %663 = arith.addf %659, %662 : vector<2x32xf32>
    %664 = arith.negf %645 : vector<2x32xf32>
    %665 = math.exp %664 : vector<2x32xf32>
    %cst_544 = arith.constant 1.000000e+00 : f32
    %666 = vector.broadcast %cst_544 : f32 to vector<2x32xf32>
    %667 = arith.addf %666, %665 : vector<2x32xf32>
    %668 = arith.divf %666, %667 : vector<2x32xf32>
    %669 = arith.negf %651 : vector<2x32xf32>
    %670 = math.exp %669 : vector<2x32xf32>
    %cst_545 = arith.constant 1.000000e+00 : f32
    %671 = vector.broadcast %cst_545 : f32 to vector<2x32xf32>
    %672 = arith.addf %671, %670 : vector<2x32xf32>
    %673 = arith.divf %671, %672 : vector<2x32xf32>
    %674 = math.tanh %657 : vector<2x32xf32>
    %675 = arith.negf %663 : vector<2x32xf32>
    %676 = math.exp %675 : vector<2x32xf32>
    %cst_546 = arith.constant 1.000000e+00 : f32
    %677 = vector.broadcast %cst_546 : f32 to vector<2x32xf32>
    %678 = arith.addf %677, %676 : vector<2x32xf32>
    %679 = arith.divf %677, %678 : vector<2x32xf32>
    %680 = arith.mulf %673, %633 : vector<2x32xf32>
    %681 = arith.mulf %668, %674 : vector<2x32xf32>
    %682 = arith.addf %680, %681 : vector<2x32xf32>
    %683 = math.tanh %682 : vector<2x32xf32>
    %684 = arith.mulf %679, %683 : vector<2x32xf32>
    %c0_547 = arith.constant 0 : index
    %c6_548 = arith.constant 6 : index
    %c0_549 = arith.constant 0 : index
    %685 = vector.load %arg26[%c0_547, %c6_548, %c0_549] : memref<2x8x32xf32, #tpu.memory_space<vmem>>, vector<2x1x32xf32>
    %686 = vector.shape_cast %685 : vector<2x1x32xf32> to vector<2x32xf32>
    %687 = vector.shape_cast %684 : vector<2x32xf32> to vector<2x1x32xf32>
    tpu.vector_store %arg26[%c0_547, %c6_548, %c0_549], %687 {strides = array<i32>} : memref<2x8x32xf32, #tpu.memory_space<vmem>>, vector<2x1x32xf32>,
    %688 = arith.truncf %684 : vector<2x32xf32> to vector<2x32xbf16>
    %c0_550 = arith.constant 0 : index
    %c0_551 = arith.constant 0 : index
    %c7 = arith.constant 7 : index
    %c0_552 = arith.constant 0 : index
    %689 = vector.load %arg28[%c0_550, %c0_551, %c7, %c0_552] : memref<4x2x8x32xf32, #tpu.memory_space<vmem>>, vector<1x2x1x32xf32>
    %690 = vector.shape_cast %689 : vector<1x2x1x32xf32> to vector<2x32xf32>
    %c0_553 = arith.constant 0 : index
    %c0_554 = arith.constant 0 : index
    %c0_555 = arith.constant 0 : index
    %691 = vector.load %arg7[%c0_553, %c0_554, %c0_555] : memref<4x32x32xbf16, #tpu.memory_space<vmem>>, vector<1x32x32xbf16>
    %692 = vector.shape_cast %691 : vector<1x32x32xbf16> to vector<32x32xbf16>
    %cst_556 = arith.constant dense<0.000000e+00> : vector<2x32xf32>
    %693 = tpu.matmul %688, %692, %cst_556 {dimension_numbers = #tpu.dot_dimension_numbers<[1], [0], [0], [1], [0, 0, 1, 1], [], []>} : vector<2x32xbf16>, vector<32x32xbf16>, vector<2x32xf32> -> vector<2x32xf32>
    %694 = arith.addf %690, %693 : vector<2x32xf32>
    %c1_557 = arith.constant 1 : index
    %c0_558 = arith.constant 0 : index
    %c7_559 = arith.constant 7 : index
    %c0_560 = arith.constant 0 : index
    %695 = vector.load %arg28[%c1_557, %c0_558, %c7_559, %c0_560] : memref<4x2x8x32xf32, #tpu.memory_space<vmem>>, vector<1x2x1x32xf32>
    %696 = vector.shape_cast %695 : vector<1x2x1x32xf32> to vector<2x32xf32>
    %c1_561 = arith.constant 1 : index
    %c0_562 = arith.constant 0 : index
    %c0_563 = arith.constant 0 : index
    %697 = vector.load %arg7[%c1_561, %c0_562, %c0_563] : memref<4x32x32xbf16, #tpu.memory_space<vmem>>, vector<1x32x32xbf16>
    %698 = vector.shape_cast %697 : vector<1x32x32xbf16> to vector<32x32xbf16>
    %cst_564 = arith.constant dense<0.000000e+00> : vector<2x32xf32>
    %699 = tpu.matmul %688, %698, %cst_564 {dimension_numbers = #tpu.dot_dimension_numbers<[1], [0], [0], [1], [0, 0, 1, 1], [], []>} : vector<2x32xbf16>, vector<32x32xbf16>, vector<2x32xf32> -> vector<2x32xf32>
    %700 = arith.addf %696, %699 : vector<2x32xf32>
    %c2_565 = arith.constant 2 : index
    %c0_566 = arith.constant 0 : index
    %c7_567 = arith.constant 7 : index
    %c0_568 = arith.constant 0 : index
    %701 = vector.load %arg28[%c2_565, %c0_566, %c7_567, %c0_568] : memref<4x2x8x32xf32, #tpu.memory_space<vmem>>, vector<1x2x1x32xf32>
    %702 = vector.shape_cast %701 : vector<1x2x1x32xf32> to vector<2x32xf32>
    %c2_569 = arith.constant 2 : index
    %c0_570 = arith.constant 0 : index
    %c0_571 = arith.constant 0 : index
    %703 = vector.load %arg7[%c2_569, %c0_570, %c0_571] : memref<4x32x32xbf16, #tpu.memory_space<vmem>>, vector<1x32x32xbf16>
    %704 = vector.shape_cast %703 : vector<1x32x32xbf16> to vector<32x32xbf16>
    %cst_572 = arith.constant dense<0.000000e+00> : vector<2x32xf32>
    %705 = tpu.matmul %688, %704, %cst_572 {dimension_numbers = #tpu.dot_dimension_numbers<[1], [0], [0], [1], [0, 0, 1, 1], [], []>} : vector<2x32xbf16>, vector<32x32xbf16>, vector<2x32xf32> -> vector<2x32xf32>
    %706 = arith.addf %702, %705 : vector<2x32xf32>
    %c3_573 = arith.constant 3 : index
    %c0_574 = arith.constant 0 : index
    %c7_575 = arith.constant 7 : index
    %c0_576 = arith.constant 0 : index
    %707 = vector.load %arg28[%c3_573, %c0_574, %c7_575, %c0_576] : memref<4x2x8x32xf32, #tpu.memory_space<vmem>>, vector<1x2x1x32xf32>
    %708 = vector.shape_cast %707 : vector<1x2x1x32xf32> to vector<2x32xf32>
    %c3_577 = arith.constant 3 : index
    %c0_578 = arith.constant 0 : index
    %c0_579 = arith.constant 0 : index
    %709 = vector.load %arg7[%c3_577, %c0_578, %c0_579] : memref<4x32x32xbf16, #tpu.memory_space<vmem>>, vector<1x32x32xbf16>
    %710 = vector.shape_cast %709 : vector<1x32x32xbf16> to vector<32x32xbf16>
    %cst_580 = arith.constant dense<0.000000e+00> : vector<2x32xf32>
    %711 = tpu.matmul %688, %710, %cst_580 {dimension_numbers = #tpu.dot_dimension_numbers<[1], [0], [0], [1], [0, 0, 1, 1], [], []>} : vector<2x32xbf16>, vector<32x32xbf16>, vector<2x32xf32> -> vector<2x32xf32>
    %712 = arith.addf %708, %711 : vector<2x32xf32>
    %713 = arith.negf %694 : vector<2x32xf32>
    %714 = math.exp %713 : vector<2x32xf32>
    %cst_581 = arith.constant 1.000000e+00 : f32
    %715 = vector.broadcast %cst_581 : f32 to vector<2x32xf32>
    %716 = arith.addf %715, %714 : vector<2x32xf32>
    %717 = arith.divf %715, %716 : vector<2x32xf32>
    %718 = arith.negf %700 : vector<2x32xf32>
    %719 = math.exp %718 : vector<2x32xf32>
    %cst_582 = arith.constant 1.000000e+00 : f32
    %720 = vector.broadcast %cst_582 : f32 to vector<2x32xf32>
    %721 = arith.addf %720, %719 : vector<2x32xf32>
    %722 = arith.divf %720, %721 : vector<2x32xf32>
    %723 = math.tanh %706 : vector<2x32xf32>
    %724 = arith.negf %712 : vector<2x32xf32>
    %725 = math.exp %724 : vector<2x32xf32>
    %cst_583 = arith.constant 1.000000e+00 : f32
    %726 = vector.broadcast %cst_583 : f32 to vector<2x32xf32>
    %727 = arith.addf %726, %725 : vector<2x32xf32>
    %728 = arith.divf %726, %727 : vector<2x32xf32>
    %729 = arith.mulf %722, %682 : vector<2x32xf32>
    %730 = arith.mulf %717, %723 : vector<2x32xf32>
    %731 = arith.addf %729, %730 : vector<2x32xf32>
    %732 = math.tanh %731 : vector<2x32xf32>
    %733 = arith.mulf %728, %732 : vector<2x32xf32>
    %c0_584 = arith.constant 0 : index
    %c7_585 = arith.constant 7 : index
    %c0_586 = arith.constant 0 : index
    %734 = vector.load %arg26[%c0_584, %c7_585, %c0_586] : memref<2x8x32xf32, #tpu.memory_space<vmem>>, vector<2x1x32xf32>
    %735 = vector.shape_cast %734 : vector<2x1x32xf32> to vector<2x32xf32>
    %736 = vector.shape_cast %733 : vector<2x32xf32> to vector<2x1x32xf32>
    tpu.vector_store %arg26[%c0_584, %c7_585, %c0_586], %736 {strides = array<i32>} : memref<2x8x32xf32, #tpu.memory_space<vmem>>, vector<2x1x32xf32>,
    %c0_587 = arith.constant 0 : index
    %c0_588 = arith.constant 0 : index
    %c0_589 = arith.constant 0 : index
    %737 = vector.load %arg26[%c0_587, %c0_588, %c0_589] : memref<2x8x32xf32, #tpu.memory_space<vmem>>, vector<2x8x32xf32>
    %738 = arith.truncf %737 : vector<2x8x32xf32> to vector<2x8x32xbf16>
    %739 = vector.shape_cast %738 : vector<2x8x32xbf16> to vector<16x32xbf16>
    %c0_590 = arith.constant 0 : index
    %c0_591 = arith.constant 0 : index
    %740 = vector.load %arg12[%c0_590, %c0_591] : memref<32x1xbf16, #tpu.memory_space<vmem>>, vector<32x1xbf16>
    %cst_592 = arith.constant dense<0.000000e+00> : vector<16x1xf32>
    %741 = tpu.matmul %739, %740, %cst_592 {dimension_numbers = #tpu.dot_dimension_numbers<[1], [0], [0], [1], [0, 0, 1, 1], [], []>} : vector<16x32xbf16>, vector<32x1xbf16>, vector<16x1xf32> -> vector<16x1xf32>
    %742 = vector.shape_cast %741 : vector<16x1xf32> to vector<2x8xf32>
    %cst_593 = arith.constant 5.000000e-01 : f32
    %743 = vector.broadcast %cst_593 : f32 to vector<2x8xf32>
    %744 = arith.cmpf ogt, %0, %743 : vector<2x8xf32>
    %cst_594 = arith.constant -1.000000e+09 : f32
    %745 = vector.broadcast %cst_594 : f32 to vector<2x8xf32>
    %746 = arith.select %744, %742, %745 : vector<2x8xi1>, vector<2x8xf32>
    %cst_595 = arith.constant dense<0xFF800000> : vector<2xf32>
    %747 = vector.multi_reduction <maximumf>, %746, %cst_595 [1] : vector<2x8xf32> to vector<2xf32>
    %748 = vector.shape_cast %747 : vector<2xf32> to vector<2x1xf32>
    %749 = vector.broadcast %748 : vector<2x1xf32> to vector<2x8xf32>
    %750 = arith.subf %746, %749 : vector<2x8xf32>
    %751 = math.exp %750 : vector<2x8xf32>
    %752 = arith.mulf %751, %0 : vector<2x8xf32>
    %cst_596 = arith.constant dense<0.000000e+00> : vector<2xf32>
    %753 = vector.multi_reduction <add>, %752, %cst_596 [1] : vector<2x8xf32> to vector<2xf32>
    %754 = vector.shape_cast %753 : vector<2xf32> to vector<2x1xf32>
    %cst_597 = arith.constant 9.99999997E-7 : f32
    %755 = vector.broadcast %cst_597 : f32 to vector<2x1xf32>
    %756 = arith.maximumf %754, %755 : vector<2x1xf32>
    %757 = vector.broadcast %756 : vector<2x1xf32> to vector<2x8xf32>
    %758 = arith.divf %752, %757 : vector<2x8xf32>
    %759 = vector.shape_cast %758 : vector<2x8xf32> to vector<2x1x8xf32>
    %760 = arith.truncf %759 : vector<2x1x8xf32> to vector<2x1x8xbf16>
    "tpu.trace_start"() <{level = 10 : i32, message = "bqt,bth->bqh"}> : () -> ()
    %cst_598 = arith.constant dense<0.000000e+00> : vector<2x1x32xf32>
    %761 = tpu.matmul %760, %738, %cst_598 {dimension_numbers = #tpu.dot_dimension_numbers<[2], [1], [1], [2], [0, 0, 0, 1, 1, 2], [0], [0]>} : vector<2x1x8xbf16>, vector<2x8x32xbf16>, vector<2x1x32xf32> -> vector<2x1x32xf32>
    "tpu.trace_stop"() : () -> ()
    %762 = vector.shape_cast %761 : vector<2x1x32xf32> to vector<2x32xf32>
    %763 = arith.truncf %762 : vector<2x32xf32> to vector<2x32xbf16>
    %c0_599 = arith.constant 0 : index
    %c0_600 = arith.constant 0 : index
    %764 = vector.load %arg13[%c0_599, %c0_600] : memref<32x32xbf16, #tpu.memory_space<vmem>>, vector<32x32xbf16>
    %cst_601 = arith.constant dense<0.000000e+00> : vector<2x32xf32>
    %765 = tpu.matmul %763, %764, %cst_601 {dimension_numbers = #tpu.dot_dimension_numbers<[1], [0], [0], [1], [0, 0, 1, 1], [], []>} : vector<2x32xbf16>, vector<32x32xbf16>, vector<2x32xf32> -> vector<2x32xf32>
    %c0_602 = arith.constant 0 : index
    %c0_603 = arith.constant 0 : index
    %766 = vector.load %arg14[%c0_602, %c0_603] : memref<1x32xf32, #tpu.memory_space<vmem>>, vector<1x32xf32>
    %767 = vector.broadcast %766 : vector<1x32xf32> to vector<2x32xf32>
    %768 = arith.addf %765, %767 : vector<2x32xf32>
    %769 = math.tanh %768 : vector<2x32xf32>
    %770 = arith.truncf %769 : vector<2x32xf32> to vector<2x32xbf16>
    %c0_604 = arith.constant 0 : index
    %c0_605 = arith.constant 0 : index
    %771 = vector.load %arg15[%c0_604, %c0_605] : memref<32x6xbf16, #tpu.memory_space<vmem>>, vector<32x6xbf16>
    %cst_606 = arith.constant dense<0.000000e+00> : vector<2x6xf32>
    %772 = tpu.matmul %770, %771, %cst_606 {dimension_numbers = #tpu.dot_dimension_numbers<[1], [0], [0], [1], [0, 0, 1, 1], [], []>} : vector<2x32xbf16>, vector<32x6xbf16>, vector<2x6xf32> -> vector<2x6xf32>
    %c0_607 = arith.constant 0 : index
    %c0_608 = arith.constant 0 : index
    %773 = vector.load %arg16[%c0_607, %c0_608] : memref<1x6xf32, #tpu.memory_space<vmem>>, vector<1x6xf32>
    %774 = vector.broadcast %773 : vector<1x6xf32> to vector<2x6xf32>
    %775 = arith.addf %772, %774 : vector<2x6xf32>
    %c0_609 = arith.constant 0 : index
    %c0_610 = arith.constant 0 : index
    %c0_611 = arith.constant 0 : index
    %776 = vector.load %arg3[%c0_609, %c0_610, %c0_611] : memref<2x4x32xf32, #tpu.memory_space<vmem>>, vector<2x4x32xf32>
    %777 = vector.shape_cast %776 : vector<2x4x32xf32> to vector<8x32xf32>
    %778 = arith.truncf %777 : vector<8x32xf32> to vector<8x32xbf16>
    %c0_612 = arith.constant 0 : index
    %c0_613 = arith.constant 0 : index
    %779 = vector.load %arg17[%c0_612, %c0_613] : memref<32x32xbf16, #tpu.memory_space<vmem>>, vector<32x32xbf16>
    %cst_614 = arith.constant dense<0.000000e+00> : vector<8x32xf32>
    %780 = tpu.matmul %778, %779, %cst_614 {dimension_numbers = #tpu.dot_dimension_numbers<[1], [0], [0], [1], [0, 0, 1, 1], [], []>} : vector<8x32xbf16>, vector<32x32xbf16>, vector<8x32xf32> -> vector<8x32xf32>
    %c0_615 = arith.constant 0 : index
    %c0_616 = arith.constant 0 : index
    %781 = vector.load %arg18[%c0_615, %c0_616] : memref<1x32xf32, #tpu.memory_space<vmem>>, vector<1x32xf32>
    %782 = vector.broadcast %781 : vector<1x32xf32> to vector<8x32xf32>
    %783 = arith.addf %780, %782 : vector<8x32xf32>
    %784 = math.tanh %783 : vector<8x32xf32>
    %785 = vector.shape_cast %784 : vector<8x32xf32> to vector<2x4x32xf32>
    %c0_617 = arith.constant 0 : index
    %c0_618 = arith.constant 0 : index
    %786 = vector.load %arg19[%c0_617, %c0_618] : memref<32x32xbf16, #tpu.memory_space<vmem>>, vector<32x32xbf16>
    %cst_619 = arith.constant dense<0.000000e+00> : vector<16x32xf32>
    %787 = tpu.matmul %739, %786, %cst_619 {dimension_numbers = #tpu.dot_dimension_numbers<[1], [0], [0], [1], [0, 0, 1, 1], [], []>} : vector<16x32xbf16>, vector<32x32xbf16>, vector<16x32xf32> -> vector<16x32xf32>
    %788 = vector.shape_cast %787 : vector<16x32xf32> to vector<2x8x32xf32>
    %789 = arith.truncf %785 : vector<2x4x32xf32> to vector<2x4x32xbf16>
    %790 = arith.truncf %788 : vector<2x8x32xf32> to vector<2x8x32xbf16>
    "tpu.trace_start"() <{level = 10 : i32, message = "bch,bth->bct"}> : () -> ()
    %cst_620 = arith.constant dense<0.000000e+00> : vector<2x4x8xf32>
    %791 = tpu.matmul %789, %790, %cst_620 {dimension_numbers = #tpu.dot_dimension_numbers<[2], [2], [1], [1], [0, 0, 0, 1, 1, 1], [0], [0]>} : vector<2x4x32xbf16>, vector<2x8x32xbf16>, vector<2x4x8xf32> -> vector<2x4x8xf32>
    "tpu.trace_stop"() : () -> ()
    %792 = vector.shape_cast %0 : vector<2x8xf32> to vector<2x1x8xf32>
    %cst_621 = arith.constant 5.000000e-01 : f32
    %793 = vector.broadcast %cst_621 : f32 to vector<2x1x8xf32>
    %794 = arith.cmpf ogt, %792, %793 : vector<2x1x8xf32>
    %cst_622 = arith.constant -1.000000e+09 : f32
    %795 = vector.shape_cast %794 : vector<2x1x8xi1> to vector<2x1x8xi1>
    %796 = vector.broadcast %795 : vector<2x1x8xi1> to vector<2x4x8xi1>
    %797 = vector.broadcast %cst_622 : f32 to vector<2x4x8xf32>
    %798 = arith.select %796, %791, %797 : vector<2x4x8xi1>, vector<2x4x8xf32>
    %cst_623 = arith.constant dense<0xFF800000> : vector<2x4xf32>
    %799 = vector.multi_reduction <maximumf>, %798, %cst_623 [2] : vector<2x4x8xf32> to vector<2x4xf32>
    %800 = vector.shape_cast %799 : vector<2x4xf32> to vector<2x4x1xf32>
    %801 = vector.broadcast %800 : vector<2x4x1xf32> to vector<2x4x8xf32>
    %802 = arith.subf %798, %801 : vector<2x4x8xf32>
    %803 = math.exp %802 : vector<2x4x8xf32>
    %804 = vector.broadcast %792 : vector<2x1x8xf32> to vector<2x4x8xf32>
    %805 = arith.mulf %803, %804 : vector<2x4x8xf32>
    %cst_624 = arith.constant dense<0.000000e+00> : vector<2x4xf32>
    %806 = vector.multi_reduction <add>, %805, %cst_624 [2] : vector<2x4x8xf32> to vector<2x4xf32>
    %807 = vector.shape_cast %806 : vector<2x4xf32> to vector<2x4x1xf32>
    %cst_625 = arith.constant 9.99999997E-7 : f32
    %808 = vector.broadcast %cst_625 : f32 to vector<2x4x1xf32>
    %809 = arith.maximumf %807, %808 : vector<2x4x1xf32>
    %810 = vector.broadcast %809 : vector<2x4x1xf32> to vector<2x4x8xf32>
    %811 = arith.divf %805, %810 : vector<2x4x8xf32>
    %812 = arith.truncf %811 : vector<2x4x8xf32> to vector<2x4x8xbf16>
    "tpu.trace_start"() <{level = 10 : i32, message = "bct,bth->bch"}> : () -> ()
    %cst_626 = arith.constant dense<0.000000e+00> : vector<2x4x32xf32>
    %813 = tpu.matmul %812, %738, %cst_626 {dimension_numbers = #tpu.dot_dimension_numbers<[2], [1], [1], [2], [0, 0, 0, 1, 1, 2], [0], [0]>} : vector<2x4x8xbf16>, vector<2x8x32xbf16>, vector<2x4x32xf32> -> vector<2x4x32xf32>
    "tpu.trace_stop"() : () -> ()
    %814 = tpu.concatenate %813, %785 in 2 : vector<2x4x32xf32>, vector<2x4x32xf32> -> vector<2x4x64xf32>
    %815 = vector.shape_cast %814 : vector<2x4x64xf32> to vector<8x64xf32>
    %816 = arith.truncf %815 : vector<8x64xf32> to vector<8x64xbf16>
    %c0_627 = arith.constant 0 : index
    %c0_628 = arith.constant 0 : index
    %817 = vector.load %arg20[%c0_627, %c0_628] : memref<64x32xbf16, #tpu.memory_space<vmem>>, vector<64x32xbf16>
    %cst_629 = arith.constant dense<0.000000e+00> : vector<8x32xf32>
    %818 = tpu.matmul %816, %817, %cst_629 {dimension_numbers = #tpu.dot_dimension_numbers<[1], [0], [0], [1], [0, 0, 1, 1], [], []>} : vector<8x64xbf16>, vector<64x32xbf16>, vector<8x32xf32> -> vector<8x32xf32>
    %c0_630 = arith.constant 0 : index
    %c0_631 = arith.constant 0 : index
    %819 = vector.load %arg21[%c0_630, %c0_631] : memref<1x32xf32, #tpu.memory_space<vmem>>, vector<1x32xf32>
    %820 = vector.broadcast %819 : vector<1x32xf32> to vector<8x32xf32>
    %821 = arith.addf %818, %820 : vector<8x32xf32>
    %822 = math.tanh %821 : vector<8x32xf32>
    %823 = arith.truncf %822 : vector<8x32xf32> to vector<8x32xbf16>
    %c0_632 = arith.constant 0 : index
    %c0_633 = arith.constant 0 : index
    %824 = vector.load %arg22[%c0_632, %c0_633] : memref<32x1xbf16, #tpu.memory_space<vmem>>, vector<32x1xbf16>
    %cst_634 = arith.constant dense<0.000000e+00> : vector<8x1xf32>
    %825 = tpu.matmul %823, %824, %cst_634 {dimension_numbers = #tpu.dot_dimension_numbers<[1], [0], [0], [1], [0, 0, 1, 1], [], []>} : vector<8x32xbf16>, vector<32x1xbf16>, vector<8x1xf32> -> vector<8x1xf32>
    %826 = vector.shape_cast %825 : vector<8x1xf32> to vector<2x4xf32>
    %cst_635 = arith.constant 5.000000e-01 : f32
    %827 = vector.broadcast %cst_635 : f32 to vector<2x4xf32>
    %828 = arith.cmpf ogt, %1, %827 : vector<2x4xf32>
    %cst_636 = arith.constant -1.000000e+09 : f32
    %829 = vector.broadcast %cst_636 : f32 to vector<2x4xf32>
    %830 = arith.select %828, %826, %829 : vector<2x4xi1>, vector<2x4xf32>
    %c0_637 = arith.constant 0 : index
    %c0_638 = arith.constant 0 : index
    %c0_639 = arith.constant 0 : index
    %831 = vector.load %arg27[%c0_637, %c0_638, %c0_639] : memref<2x5x32xf32, #tpu.memory_space<vmem>>, vector<2x5x32xf32>
    %c0_640 = arith.constant 0 : index
    %c0_641 = arith.constant 0 : index
    %832 = vector.load %arg23[%c0_640, %c0_641] : memref<32x32xbf16, #tpu.memory_space<vmem>>, vector<32x32xbf16>
    %cst_642 = arith.constant dense<0.000000e+00> : vector<16x32xf32>
    %833 = tpu.matmul %739, %832, %cst_642 {dimension_numbers = #tpu.dot_dimension_numbers<[1], [0], [0], [1], [0, 0, 1, 1], [], []>} : vector<16x32xbf16>, vector<32x32xbf16>, vector<16x32xf32> -> vector<16x32xf32>
    %834 = vector.shape_cast %833 : vector<16x32xf32> to vector<2x8x32xf32>
    %835 = arith.truncf %831 : vector<2x5x32xf32> to vector<2x5x32xbf16>
    %836 = arith.truncf %834 : vector<2x8x32xf32> to vector<2x8x32xbf16>
    "tpu.trace_start"() <{level = 10 : i32, message = "bsh,bth->bst"}> : () -> ()
    %cst_643 = arith.constant dense<0.000000e+00> : vector<2x5x8xf32>
    %837 = tpu.matmul %835, %836, %cst_643 {dimension_numbers = #tpu.dot_dimension_numbers<[2], [2], [1], [1], [0, 0, 0, 1, 1, 1], [0], [0]>} : vector<2x5x32xbf16>, vector<2x8x32xbf16>, vector<2x5x8xf32> -> vector<2x5x8xf32>
    "tpu.trace_stop"() : () -> ()
    %838 = vector.shape_cast %0 : vector<2x8xf32> to vector<2x1x8xf32>
    %cst_644 = arith.constant 5.000000e-01 : f32
    %839 = vector.broadcast %cst_644 : f32 to vector<2x1x8xf32>
    %840 = arith.cmpf ogt, %838, %839 : vector<2x1x8xf32>
    %cst_645 = arith.constant -1.000000e+09 : f32
    %841 = vector.shape_cast %840 : vector<2x1x8xi1> to vector<2x1x8xi1>
    %842 = vector.broadcast %841 : vector<2x1x8xi1> to vector<2x5x8xi1>
    %843 = vector.broadcast %cst_645 : f32 to vector<2x5x8xf32>
    %844 = arith.select %842, %837, %843 : vector<2x5x8xi1>, vector<2x5x8xf32>
    %cst_646 = arith.constant 0.000000e+00 : f32
    %845 = vector.broadcast %cst_646 : f32 to vector<2x118xf32>
    %846 = tpu.concatenate %775, %830, %845 in 1 : vector<2x6xf32>, vector<2x4xf32>, vector<2x118xf32> -> vector<2x128xf32>
    %c0_647 = arith.constant 0 : index
    %c0_648 = arith.constant 0 : index
    %847 = vector.load %arg24[%c0_647, %c0_648] : memref<2x128xf32, #tpu.memory_space<vmem>>, vector<2x128xf32>
    tpu.vector_store %arg24[%c0_647, %c0_648], %846 {strides = array<i32>} : memref<2x128xf32, #tpu.memory_space<vmem>>, vector<2x128xf32>,
    %848 = vector.shape_cast %844 : vector<2x5x8xf32> to vector<10x8xf32>
    %cst_649 = arith.constant 0.000000e+00 : f32
    %849 = vector.broadcast %cst_649 : f32 to vector<10x120xf32>
    %850 = tpu.concatenate %848, %849 in 1 : vector<10x8xf32>, vector<10x120xf32> -> vector<10x128xf32>
    %c0_650 = arith.constant 0 : index
    %c0_651 = arith.constant 0 : index
    %851 = vector.load %arg25[%c0_650, %c0_651] : memref<10x128xf32, #tpu.memory_space<vmem>>, vector<10x128xf32>
    tpu.vector_store %arg25[%c0_650, %c0_651], %850 {strides = array<i32>} : memref<10x128xf32, #tpu.memory_space<vmem>>, vector<10x128xf32>,
    return
  }
  func.func @transform_0(%arg0: i32) -> (i32, i32, i32) {
    %c0_i32 = arith.constant 0 : i32
    %c0_i32_0 = arith.constant 0 : i32
    %c0_i32_1 = arith.constant 0 : i32
    return %arg0, %c0_i32, %c0_i32_0 : i32, i32, i32
  }
  func.func @transform_1(%arg0: i32) -> (i32, i32, i32) {
    %c0_i32 = arith.constant 0 : i32
    %c0_i32_0 = arith.constant 0 : i32
    %c0_i32_1 = arith.constant 0 : i32
    return %arg0, %c0_i32, %c0_i32_0 : i32, i32, i32
  }
  func.func @transform_2(%arg0: i32) -> (i32, i32, i32) {
    %c0_i32 = arith.constant 0 : i32
    %c0_i32_0 = arith.constant 0 : i32
    %c0_i32_1 = arith.constant 0 : i32
    return %arg0, %c0_i32, %c0_i32_0 : i32, i32, i32
  }
  func.func @transform_3(%arg0: i32) -> (i32, i32) {
    %c0_i32 = arith.constant 0 : i32
    %c0_i32_0 = arith.constant 0 : i32
    return %arg0, %c0_i32 : i32, i32
  }
  func.func @transform_4(%arg0: i32) -> (i32, i32) {
    %c0_i32 = arith.constant 0 : i32
    %c0_i32_0 = arith.constant 0 : i32
    return %arg0, %c0_i32 : i32, i32
  }
  func.func @transform_5(%arg0: i32) -> (i32, i32, i32) {
    %c0_i32 = arith.constant 0 : i32
    %c0_i32_0 = arith.constant 0 : i32
    %c0_i32_1 = arith.constant 0 : i32
    %c0_i32_2 = arith.constant 0 : i32
    return %c0_i32, %c0_i32_0, %c0_i32_1 : i32, i32, i32
  }
  func.func @transform_6(%arg0: i32) -> (i32, i32, i32) {
    %c0_i32 = arith.constant 0 : i32
    %c0_i32_0 = arith.constant 0 : i32
    %c0_i32_1 = arith.constant 0 : i32
    %c0_i32_2 = arith.constant 0 : i32
    return %c0_i32, %c0_i32_0, %c0_i32_1 : i32, i32, i32
  }
  func.func @transform_7(%arg0: i32) -> (i32, i32, i32) {
    %c0_i32 = arith.constant 0 : i32
    %c0_i32_0 = arith.constant 0 : i32
    %c0_i32_1 = arith.constant 0 : i32
    %c0_i32_2 = arith.constant 0 : i32
    return %c0_i32, %c0_i32_0, %c0_i32_1 : i32, i32, i32
  }
  func.func @transform_8(%arg0: i32) -> (i32, i32, i32) {
    %c0_i32 = arith.constant 0 : i32
    %c0_i32_0 = arith.constant 0 : i32
    %c0_i32_1 = arith.constant 0 : i32
    %c0_i32_2 = arith.constant 0 : i32
    return %c0_i32, %c0_i32_0, %c0_i32_1 : i32, i32, i32
  }
  func.func @transform_9(%arg0: i32) -> (i32, i32, i32) {
    %c0_i32 = arith.constant 0 : i32
    %c0_i32_0 = arith.constant 0 : i32
    %c0_i32_1 = arith.constant 0 : i32
    %c0_i32_2 = arith.constant 0 : i32
    return %c0_i32, %c0_i32_0, %c0_i32_1 : i32, i32, i32
  }
  func.func @transform_10(%arg0: i32) -> (i32, i32, i32) {
    %c0_i32 = arith.constant 0 : i32
    %c0_i32_0 = arith.constant 0 : i32
    %c0_i32_1 = arith.constant 0 : i32
    %c0_i32_2 = arith.constant 0 : i32
    return %c0_i32, %c0_i32_0, %c0_i32_1 : i32, i32, i32
  }
  func.func @transform_11(%arg0: i32) -> (i32, i32) {
    %c0_i32 = arith.constant 0 : i32
    %c0_i32_0 = arith.constant 0 : i32
    %c0_i32_1 = arith.constant 0 : i32
    return %c0_i32, %c0_i32_0 : i32, i32
  }
  func.func @transform_12(%arg0: i32) -> (i32, i32) {
    %c0_i32 = arith.constant 0 : i32
    %c0_i32_0 = arith.constant 0 : i32
    %c0_i32_1 = arith.constant 0 : i32
    return %c0_i32, %c0_i32_0 : i32, i32
  }
  func.func @transform_13(%arg0: i32) -> (i32, i32) {
    %c0_i32 = arith.constant 0 : i32
    %c0_i32_0 = arith.constant 0 : i32
    %c0_i32_1 = arith.constant 0 : i32
    return %c0_i32, %c0_i32_0 : i32, i32
  }
  func.func @transform_14(%arg0: i32) -> (i32, i32) {
    %c0_i32 = arith.constant 0 : i32
    %c0_i32_0 = arith.constant 0 : i32
    %c0_i32_1 = arith.constant 0 : i32
    return %c0_i32, %c0_i32_0 : i32, i32
  }
  func.func @transform_15(%arg0: i32) -> (i32, i32) {
    %c0_i32 = arith.constant 0 : i32
    %c0_i32_0 = arith.constant 0 : i32
    %c0_i32_1 = arith.constant 0 : i32
    return %c0_i32, %c0_i32_0 : i32, i32
  }
  func.func @transform_16(%arg0: i32) -> (i32, i32) {
    %c0_i32 = arith.constant 0 : i32
    %c0_i32_0 = arith.constant 0 : i32
    %c0_i32_1 = arith.constant 0 : i32
    return %c0_i32, %c0_i32_0 : i32, i32
  }
  func.func @transform_17(%arg0: i32) -> (i32, i32) {
    %c0_i32 = arith.constant 0 : i32
    %c0_i32_0 = arith.constant 0 : i32
    %c0_i32_1 = arith.constant 0 : i32
    return %c0_i32, %c0_i32_0 : i32, i32
  }
  func.func @transform_18(%arg0: i32) -> (i32, i32) {
    %c0_i32 = arith.constant 0 : i32
    %c0_i32_0 = arith.constant 0 : i32
    %c0_i32_1 = arith.constant 0 : i32
    return %c0_i32, %c0_i32_0 : i32, i32
  }
  func.func @transform_19(%arg0: i32) -> (i32, i32) {
    %c0_i32 = arith.constant 0 : i32
    %c0_i32_0 = arith.constant 0 : i32
    %c0_i32_1 = arith.constant 0 : i32
    return %c0_i32, %c0_i32_0 : i32, i32
  }
  func.func @transform_20(%arg0: i32) -> (i32, i32) {
    %c0_i32 = arith.constant 0 : i32
    %c0_i32_0 = arith.constant 0 : i32
    %c0_i32_1 = arith.constant 0 : i32
    return %c0_i32, %c0_i32_0 : i32, i32
  }
  func.func @transform_21(%arg0: i32) -> (i32, i32) {
    %c0_i32 = arith.constant 0 : i32
    %c0_i32_0 = arith.constant 0 : i32
    %c0_i32_1 = arith.constant 0 : i32
    return %c0_i32, %c0_i32_0 : i32, i32
  }
  func.func @transform_22(%arg0: i32) -> (i32, i32) {
    %c0_i32 = arith.constant 0 : i32
    %c0_i32_0 = arith.constant 0 : i32
    %c0_i32_1 = arith.constant 0 : i32
    return %c0_i32, %c0_i32_0 : i32, i32
  }
  func.func @transform_23(%arg0: i32) -> (i32, i32) {
    %c0_i32 = arith.constant 0 : i32
    %c0_i32_0 = arith.constant 0 : i32
    return %arg0, %c0_i32 : i32, i32
  }
  func.func @transform_24(%arg0: i32) -> (i32, i32) {
    %c0_i32 = arith.constant 0 : i32
    %c0_i32_0 = arith.constant 0 : i32
    return %arg0, %c0_i32 : i32, i32
  }
}

</mosaic_0001>

<bundles_post_ra>
// kernel: tpu_custom_call.1
= control target key start
LH: loop header
LB: loop body
LE: loop exit
PB: predicated region body
PF: predicated region fallthrough
CT: control target
= control target key end

     0   :  { %s10422_s0 = inlined_call_operand.hbm [shape: f32[2,8,32], index: 0, kind: input, shape index: {}]   ;;  %s10423_s1 = inlined_call_operand.vmem [shape: f32[2,5,32], index: 1, kind: input, shape index: {}]   ;;  %s10424_s2 = inlined_call_operand.hbm [shape: f32[2,4,32], index: 2, kind: input, shape index: {}]   ;;  %s10425_s3 = inlined_call_operand.hbm [shape: f32[2,8], index: 3, kind: input, shape index: {}]   ;;  %s10426_s4 = inlined_call_operand.hbm [shape: f32[2,4], index: 4, kind: input, shape index: {}]   ;;  %s10427_s5 = inlined_call_operand.vmem [shape: bf16[4,32,32], index: 5, kind: input, shape index: {}]   ;;  %s10428_s6 = inlined_call_operand.vmem [shape: bf16[4,32,32], index: 6, kind: input, shape index: {}]   ;;  %s10429_s7 = inlined_call_operand.hbm [shape: f32[4,1,32], index: 7, kind: input, shape index: {}]   ;;  %s10430_s8 = inlined_call_operand.hbm [shape: bf16[4,32,32], index: 8, kind: input, shape index: {}]   ;;  %s10431_s9 = inlined_call_operand.hbm [shape: bf16[4,32,32], index: 9, kind: input, shape index: {}]   ;;  %s10432_s10 = inlined_call_operand.hbm [shape: f32[4,1,32], index: 10, kind: input, shape index: {}]   ;;  %s10433_s11 = inlined_call_operand.vmem [shape: bf16[32,1], index: 11, kind: input, shape index: {}]   ;;  %s10434_s12 = inlined_call_operand.hbm [shape: bf16[32,32], index: 12, kind: input, shape index: {}]   ;;  %s10435_s13 = inlined_call_operand.hbm [shape: f32[1,32], index: 13, kind: input, shape index: {}]   ;;  %s10436_s14 = inlined_call_operand.vmem [shape: bf16[32,6], index: 14, kind: input, shape index: {}]   ;;  %s10437_s15 = inlined_call_operand.hbm [shape: f32[1,6], index: 15, kind: input, shape index: {}]   ;;  %s10438_s16 = inlined_call_operand.hbm [shape: bf16[32,32], index: 16, kind: input, shape index: {}]   ;;  %s10439_s17 = inlined_call_operand.hbm [shape: f32[1,32], index: 17, kind: input, shape index: {}]   ;;  %s10440_s18 = inlined_call_operand.vmem [shape: bf16[32,32], index: 18, kind: input, shape index: {}]   ;;  %s10441_s19 = inlined_call_operand.vmem [shape: bf16[64,32], index: 19, kind: input, shape index: {}]   ;;  %s10442_s20 = inlined_call_operand.vmem [shape: f32[1,32], index: 20, kind: input, shape index: {}]   ;;  %s10443_s21 = inlined_call_operand.vmem [shape: bf16[32,1], index: 21, kind: input, shape index: {}]   ;;  %s10444_s22 = inlined_call_operand.hbm [shape: bf16[32,32], index: 22, kind: input, shape index: {}]   ;;  %s10445_s23 = inlined_call_operand.hbm [shape: f32[2,128], index: 23, kind: output, shape index: {0}]   ;;  %s10446_s24 = inlined_call_operand.hbm [shape: f32[10,128], index: 24, kind: output, shape index: {1}]  }
   0x1   :  { %10454 = sst [smem:[#allocation42_spill]] %s10422_s0 }
   0x2   :  { %10455 = sst [smem:[#allocation43_spill]] %s10423_s1 }
   0x3   :  { %10456 = sst [smem:[#allocation44_spill]] %s10424_s2 }
   0x4   :  { %10457 = sst [smem:[#allocation45_spill]] %s10425_s3 }
   0x5   :  { %10458 = sst [smem:[#allocation46_spill]] %s10426_s4 }
   0x6   :  { %10459 = sst [smem:[#allocation47_spill]] %s10427_s5 }
   0x7   :  { %10460 = sst [smem:[#allocation48_spill]] %s10428_s6 }
   0x8   :  { %10461 = sst [smem:[#allocation49_spill]] %s10429_s7 }
   0x9   :  { %10462 = sst [smem:[#allocation50_spill]] %s10430_s8 }
   0xa   :  { %30 = vsyncpa [#allocation7], 0 }
   0xb   :  { %31 = vsyncpa [#allocation10], 0 }
   0xc   :  { %32 = vsyncpa [#allocation13], 0 }
   0xd   :  { %33 = vsyncpa [#allocation16], 0 }
   0xe   :  { %34 = vsyncpa [#allocation19], 0 }
   0xf   :  { %35 = vsyncpa [#allocation22], 0 }
  0x10   :  { %36 = vsyncpa [#allocation25], 0 }
  0x11   :  { %37 = vsyncpa [#allocation28], 0 }
  0x12   :  { %38 = vsyncpa [#allocation8], 0 }
  0x13   :  { %39 = vsyncpa [#allocation31], 0  ;;  %s9171_s5 = smov [#allocation9]  }
  0x14   :  { %s59_s26 = sshll.u32 %s9171_s5, 4  ;;  %s60_s26 = int_to_ptr.vmem [resolvable:$true] %s59_s26 }
  0x15   :  { %s8839_s27 = scalar_lea.vmem %s60_s26, 128  ;;  %p8844_p1 = scmp.lt.s32.totalorder %s60_s26, %s60_s26 }
  0x16   :  { %p8840_p0 = scmp.ne.s32.totalorder %s60_s26, %s8839_s27  ;;  %p8845_p2 = scmp.lt.s32.totalorder %s8839_s27, %s8839_s27 }
  0x18   :  { %p8846_p3 = por %p8845_p2, %p8844_p1 }
  0x1a   :  { %p8847_p4 = pnand %p8846_p3, %p8840_p0 }
  0x1c   :  { %8850 = shalt.err (!%p8847_p4)
}
  0x1d   :  { %s10450_s28 = smov 64   ;;  %s10452_s6 = smov 4  }
  0x1e   :  { %s10463_s0 = sld [smem:[#allocation44_spill]]  ;;  %s9174_s7 = smov [#allocation12]  }
  0x1f   :  { %s82_s30 = sshll.u32 %s9174_s7, 4  ;;  %s9175_s3 = smov [#allocation15]   ;;  %s83_s30 = int_to_ptr.vmem [resolvable:$true] %s82_s30 }
  0x20   :  { %s107_s25 = sshll.u32 %s9175_s3, 4  ;;  %s8859_s8 = scalar_lea.vmem %s83_s30, 32  ;;  %s108_s25 = int_to_ptr.vmem [resolvable:$true] %s107_s25 }
  0x21   :  { %p8860_p5 = scmp.ne.s32.totalorder %s83_s30, %s8859_s8  ;;  %p8864_p6 = scmp.lt.s32.totalorder %s83_s30, %s83_s30 }
  0x22   :  { %p8865_p7 = scmp.lt.s32.totalorder %s8859_s8, %s8859_s8 }
  0x24   :  { %65 = dma.hbm_to_vmem [thread:$0]  %s10463_s0, 128, %s60_s26, [#allocation10], %s10450_s28, %s10450_s28, %s10452_s6  }
  0x25   :  { %p8866_p8 = por %p8865_p7, %p8864_p6 }
  0x27   :  { %p8867_p9 = pnand %p8866_p8, %p8860_p5 }
  0x29   :  { %8870 = shalt.err (!%p8867_p9)
}
  0x2a   :  { %s10464_s5 = sld [smem:[#allocation46_spill]]  ;;  %s8879_s27 = scalar_lea.vmem %s108_s25, 1024 }
  0x2b   :  { %p8880_p10 = scmp.ne.s32.totalorder %s108_s25, %s8879_s27  ;;  %p8884_p11 = scmp.lt.s32.totalorder %s108_s25, %s108_s25 }
  0x2c   :  { %p8885_p12 = scmp.lt.s32.totalorder %s8879_s27, %s8879_s27 }
  0x2e   :  { %p8886_p13 = por %p8885_p12, %p8884_p11 }
  0x30   :  { %85 = dma.hbm_to_vmem [thread:$0]  %s10464_s5, 32, %s83_s30, [#allocation13]  }
  0x31   :  { %p8887_p0 = pnand %p8886_p13, %p8880_p10 }
  0x33   :  { %8890 = shalt.err (!%p8887_p0)
}
  0x34   :  { %s10465_s29 = sld [smem:[#allocation50_spill]]  ;;  %s9176_s0 = smov [#allocation18]  }
  0x35   :  { %s131_s7 = sshll.u32 %s9176_s0, 4  ;;  %s9177_s3 = smov [#allocation21]   ;;  %s132_s7 = int_to_ptr.vmem [resolvable:$true] %s131_s7 }
  0x36   :  { %s158_s30 = sshll.u32 %s9177_s3, 4  ;;  %s8899_s8 = scalar_lea.vmem %s132_s7, 64  ;;  %s159_s30 = int_to_ptr.vmem [resolvable:$true] %s158_s30 }
  0x37   :  { %p8900_p1 = scmp.ne.s32.totalorder %s132_s7, %s8899_s8  ;;  %p8904_p2 = scmp.lt.s32.totalorder %s132_s7, %s132_s7 }
  0x38   :  { %p8905_p3 = scmp.lt.s32.totalorder %s8899_s8, %s8899_s8 }
  0x3a   :  { %113 = dma.hbm_to_vmem [thread:$0]  %s10465_s29, 1024, %s108_s25, [#allocation16], %s10450_s28, %s10450_s28, %s10452_s6  }
  0x3b   :  { %p8906_p4 = por %p8905_p3, %p8904_p2 }
  0x3d   :  { %p8907_p5 = pnand %p8906_p4, %p8900_p1 }
  0x3f   :  { %8910 = shalt.err (!%p8907_p5)
}
  0x40   :  { %s9178_s4 = smov 16   ;;  %s9179_s1 = smov 1  }
  0x41   :  { %137 = dma.hbm_to_vmem [thread:$0]  %s10432_s10, 64, %s132_s7, [#allocation19], %s9178_s4, %s9178_s4, %s9179_s1  }
  0x42   :  { %s8919_s25 = scalar_lea.vmem %s159_s30, 16  ;;  %s8923_s26 = scalar_lea.vmem %s159_s30, 32 }
  0x43   :  { %p8920_p6 = scmp.ne.s32.totalorder %s159_s30, %s8919_s25  ;;  %p8924_p7 = scmp.lt.s32.totalorder %s159_s30, %s159_s30 }
  0x44   :  { %p8925_p8 = scmp.lt.s32.totalorder %s8923_s26, %s8919_s25 }
  0x46   :  { %p8926_p9 = por %p8925_p8, %p8924_p7 }
  0x48   :  { %p8927_p10 = pnand %p8926_p9, %p8920_p6 }
  0x4a   :  { %8930 = shalt.err (!%p8927_p10)
}
  0x4b   :  { %161 = dma.hbm_to_vmem [thread:$0]  %s10435_s13, 16, %s159_s30, [#allocation22]  }
  0x4c   :  { %s9180_s0 = smov [#allocation24]   ;;  %s9181_s8 = smov [#allocation6]  }
  0x4d   :  { %s179_s3 = sshll.u32 %s9180_s0, 4  ;;  %s45_s28 = sshll.u32 %s9181_s8, 4  ;;  %s180_s3 = int_to_ptr.vmem [resolvable:$true] %s179_s3  ;;  %s46_s28 = int_to_ptr.vmem [resolvable:$true] %s45_s28 }
  0x4e   :  { %s8939_s5 = scalar_lea.vmem %s180_s3, 256  ;;  %p8944_p12 = scmp.lt.s32.totalorder %s180_s3, %s180_s3 }
  0x4f   :  { %p8940_p11 = scmp.ne.s32.totalorder %s180_s3, %s8939_s5  ;;  %p8945_p13 = scmp.lt.s32.totalorder %s8939_s5, %s8939_s5 }
  0x51   :  { %p8946_p0 = por %p8945_p13, %p8944_p12 }
  0x53   :  { %p8947_p1 = pnand %p8946_p0, %p8940_p11 }
  0x55   :  { %8950 = shalt.err (!%p8947_p1)
}
  0x56   :  { %s10466_s10 = smov 64   ;;  %s8959_s13 = scalar_lea.vmem %s46_s28, 256 }
  0x57   :  { %185 = dma.hbm_to_vmem [thread:$0]  %s10438_s16, 256, %s180_s3, [#allocation25], %s10466_s10, %s10466_s10, %s10452_s6  }
  0x58   :  { %p8960_p2 = scmp.ne.s32.totalorder %s46_s28, %s8959_s13  ;;  %p8964_p3 = scmp.lt.s32.totalorder %s46_s28, %s46_s28 }
  0x59   :  { %p8965_p4 = scmp.lt.s32.totalorder %s8959_s13, %s8959_s13 }
  0x5b   :  { %p8966_p5 = por %p8965_p4, %p8964_p3 }
  0x5d   :  { %p8967_p6 = pnand %p8966_p5, %p8960_p2 }
  0x5f   :  { %8970 = shalt.err (!%p8967_p6)
}
  0x60   :  { %s9182_s30 = smov 128   ;;  %s9183_s25 = smov 8  }
  0x61   :  { %s10467_s29 = sld [smem:[#allocation42_spill]]  ;;  %s9184_s0 = smov [#allocation11]  }
  0x62   :  { %s72_s8 = sshll.u32 %s9184_s0, 4  ;;  %s9185_s16 = smov [#allocation14]   ;;  %s73_s8 = int_to_ptr.vmem [resolvable:$true] %s72_s8 }
  0x63   :  { %s95_s3 = sshll.u32 %s9185_s16, 4  ;;  %s8979_s5 = scalar_lea.vmem %s73_s8, 32  ;;  %s96_s3 = int_to_ptr.vmem [resolvable:$true] %s95_s3 }
  0x64   :  { %p8980_p7 = scmp.ne.s32.totalorder %s73_s8, %s8979_s5  ;;  %p8984_p8 = scmp.lt.s32.totalorder %s73_s8, %s73_s8 }
  0x65   :  { %p8985_p9 = scmp.lt.s32.totalorder %s8979_s5, %s8979_s5 }
  0x67   :  { %51 = dma.hbm_to_vmem [thread:$0]  %s10467_s29, 256, %s46_s28, [#allocation7], %s9182_s30, %s9182_s30, %s9183_s25  }
  0x68   :  { %p8986_p10 = por %p8985_p9, %p8984_p8 }
  0x6a   :  { %p8987_p11 = pnand %p8986_p10, %p8980_p7 }
  0x6c   :  { %8990 = shalt.err (!%p8987_p11)
}
  0x6d   :  { %s10468_s13 = sld [smem:[#allocation45_spill]]  ;;  %s8999_s6 = scalar_lea.vmem %s96_s3, 64 }
  0x6e   :  { %p9000_p12 = scmp.ne.s32.totalorder %s96_s3, %s8999_s6  ;;  %p9004_p13 = scmp.lt.s32.totalorder %s96_s3, %s96_s3 }
  0x6f   :  { %p9005_p0 = scmp.lt.s32.totalorder %s8999_s6, %s8999_s6 }
  0x71   :  { %p9006_p1 = por %p9005_p0, %p9004_p13 }
  0x73   :  { %75 = dma.hbm_to_vmem [thread:$0]  %s10468_s13, 32, %s73_s8, [#allocation10]  }
  0x74   :  { %p9007_p2 = pnand %p9006_p1, %p9000_p12 }
  0x76   :  { %9010 = shalt.err (!%p9007_p2)
}
  0x77   :  { %s10469_s2 = sld [smem:[#allocation49_spill]]  ;;  %s9186_s29 = smov [#allocation17]  }
  0x78   :  { %s119_s0 = sshll.u32 %s9186_s29, 4  ;;  %s9187_s16 = smov [#allocation20]   ;;  %s120_s0 = int_to_ptr.vmem [resolvable:$true] %s119_s0 }
  0x79   :  { %s145_s8 = sshll.u32 %s9187_s16, 4  ;;  %s9019_s5 = scalar_lea.vmem %s120_s0, 1024  ;;  %s146_s8 = int_to_ptr.vmem [resolvable:$true] %s145_s8 }
  0x7a   :  { %p9020_p3 = scmp.ne.s32.totalorder %s120_s0, %s9019_s5  ;;  %p9024_p4 = scmp.lt.s32.totalorder %s120_s0, %s120_s0 }
  0x7b   :  { %p9025_p5 = scmp.lt.s32.totalorder %s9019_s5, %s9019_s5 }
  0x7d   :  { %101 = dma.hbm_to_vmem [thread:$0]  %s10469_s2, 64, %s96_s3, [#allocation13], %s9178_s4, %s9178_s4, %s9179_s1  }
  0x7e   :  { %p9026_p6 = por %p9025_p5, %p9024_p4 }
  0x80   :  { %p9027_p7 = pnand %p9026_p6, %p9020_p3 }
  0x82   :  { %9030 = shalt.err (!%p9027_p7)
}
  0x83   :  { %s10470_s6 = smov 4   ;;  %s9039_s4 = scalar_lea.vmem %s146_s8, 256 }
  0x84   :  { %125 = dma.hbm_to_vmem [thread:$0]  %s10431_s9, 1024, %s120_s0, [#allocation16], %s10466_s10, %s10466_s10, %s10470_s6  }
  0x85   :  { %p9040_p8 = scmp.ne.s32.totalorder %s146_s8, %s9039_s4  ;;  %p9044_p9 = scmp.lt.s32.totalorder %s146_s8, %s146_s8 }
  0x86   :  { %p9045_p10 = scmp.lt.s32.totalorder %s9039_s4, %s9039_s4 }
  0x88   :  { %p9046_p11 = por %p9045_p10, %p9044_p9 }
  0x8a   :  { %p9047_p12 = pnand %p9046_p11, %p9040_p8 }
  0x8c   :  { %9050 = shalt.err (!%p9047_p12)
}
  0x8d   :  { %151 = dma.hbm_to_vmem [thread:$0]  %s10434_s12, 256, %s146_s8, [#allocation19], %s10466_s10, %s10466_s10, %s10470_s6  }
  0x8e   :  { %s9188_s13 = smov [#allocation23]   ;;  %s9189_s26 = smov [#allocation26]  }
  0x8f   :  { %s170_s28 = sshll.u32 %s9188_s13, 4  ;;  %s192_s9 = sshll.u32 %s9189_s26, 4  ;;  %s171_s28 = int_to_ptr.vmem [resolvable:$true] %s170_s28  ;;  %s193_s9 = int_to_ptr.vmem [resolvable:$true] %s192_s9 }
  0x90   :  { %s9059_s2 = scalar_lea.vmem %s171_s28, 16  ;;  %s9063_s29 = scalar_lea.vmem %s171_s28, 32 }
  0x91   :  { %p9060_p13 = scmp.ne.s32.totalorder %s171_s28, %s9059_s2  ;;  %p9064_p0 = scmp.lt.s32.totalorder %s171_s28, %s171_s28 }
  0x92   :  { %p9065_p1 = scmp.lt.s32.totalorder %s9063_s29, %s9059_s2 }
  0x94   :  { %p9066_p2 = por %p9065_p1, %p9064_p0 }
  0x96   :  { %p9067_p3 = pnand %p9066_p2, %p9060_p13 }
  0x98   :  { %9070 = shalt.err (!%p9067_p3)
}
  0x99   :  { %173 = dma.hbm_to_vmem [thread:$0]  %s10437_s15, 16, %s171_s28, [#allocation22]  }
  0x9a   :  { %s9079_s5 = scalar_lea.vmem %s193_s9, 16  ;;  %s9083_s12 = scalar_lea.vmem %s193_s9, 32 }
  0x9b   :  { %p9080_p4 = scmp.ne.s32.totalorder %s193_s9, %s9079_s5  ;;  %p9084_p5 = scmp.lt.s32.totalorder %s193_s9, %s193_s9 }
  0x9c   :  { %p9085_p6 = scmp.lt.s32.totalorder %s9083_s12, %s9079_s5 }
  0x9e   :  { %p9086_p7 = por %p9085_p6, %p9084_p5 }
  0xa0   :  { %p9087_p8 = pnand %p9086_p7, %p9080_p4 }
  0xa2   :  { %9090 = shalt.err (!%p9087_p8)
}
  0xa3   :  { %195 = dma.hbm_to_vmem [thread:$0]  %s10439_s17, 16, %s193_s9, [#allocation25]  }
  0xa4   :  { %s9190_s27 = smov [#allocation27]  }
  0xa5   :  { %s209_s4 = sshll.u32 %s9190_s27, 4  ;;  %s210_s4 = int_to_ptr.vmem [resolvable:$true] %s209_s4 }
  0xa6   :  { %s9099_s1 = scalar_lea.vmem %s210_s4, 256  ;;  %p9104_p10 = scmp.lt.s32.totalorder %s210_s4, %s210_s4 }
  0xa7   :  { %p9100_p9 = scmp.ne.s32.totalorder %s210_s4, %s9099_s1  ;;  %p9105_p11 = scmp.lt.s32.totalorder %s9099_s1, %s9099_s1 }
  0xa9   :  { %p9106_p12 = por %p9105_p11, %p9104_p10 }
  0xab   :  { %p9107_p13 = pnand %p9106_p12, %p9100_p9 }
  0xad   :  { %9110 = shalt.err (!%p9107_p13)
}
  0xae   :  { %215 = dma.hbm_to_vmem [thread:$0]  %s10444_s22, 256, %s210_s4, [#allocation28], %s10466_s10, %s10466_s10, %s10470_s6  }
  0xaf   :  { %9151 = dma.done.wait [#allocation7], 256  }
  0xb0   :  { %9152 = vsyncadd [#allocation7], 4294967040 }
  0xb1   :  { %9153 = dma.done.wait [#allocation10], 160  }
  0xb2   :  { %9154 = vsyncadd [#allocation10], 4294967136 }
  0xb3   :  { %9155 = dma.done.wait [#allocation13], 96  }
  0xb4   :  { %9156 = vsyncadd [#allocation13], 4294967200 }
  0xb5   :  { %9157 = dma.done.wait [#allocation16], 2048  }
  0xb6   :  { %9158 = vsyncadd [#allocation16], 4294965248 }
  0xb7   :  { %9159 = dma.done.wait [#allocation19], 320  }
  0xb8   :  { %9160 = vsyncadd [#allocation19], 4294966976 }
  0xb9   :  { %9161 = dma.done.wait [#allocation22], 32  }
  0xba   :  { %9162 = vsyncadd [#allocation22], 4294967264 }
  0xbb   :  { %9163 = dma.done.wait [#allocation25], 272  }
  0xbc   :  { %9164 = vsyncadd [#allocation25], 4294967024 }
  0xbd   :  { %9165 = dma.done.wait [#allocation28], 256  }
  0xbe   :  { %9166 = vsyncadd [#allocation28], 4294967040  ;;  %v9191_v0 = vmov 0.0   ;;  %vm9192_vm0 = vmmov 0   ;;  %v9193_v1 = vmov 0   ;;  %s10471_s10 = sld [smem:[#allocation47_spill]]  ;;  %v549_v6 = vlaneseq }
  0xbf   :  { %7630 = vmatprep.subr.bf16.mxu0 %v9191_v0  ;;  %7638 = vmatprep.subr.bf16.mxu1 %v9191_v0  ;;  %v9194_v4 = vmov 1966171168   ;;  %v261_v9 = vld [vmem:[#allocation6] sm:$0xff]  ;;  %v262_v10 = vld [vmem:[#allocation6 + $0x8] sm:$0xff]  ;;  %vm287_vm1 = vcmask 261120   ;;  %s10472_s15 = sld [smem:[#allocation43_spill]] }
  0xc0   :  { %7634 = vmatprep.mubr.msk.bf16.mxu0 %vm9192_vm0, %v9191_v0  ;;  %7642 = vmatprep.mubr.msk.bf16.mxu1 %vm9192_vm0, %v9191_v0  ;;  %v547_v5 = vunpack.c.l.s4 %v9194_v4  ;;  %v263_v11 = vpack.c.bf16 %v262_v10, %v261_v9  ;;  %v9416_v13 = vshrl.u32 %v549_v6, 7  ;;  %v8264_v23 = vld [vmem:[#allocation15 + $0x8] sm:$0xff]   ;;  %v8265_v26 = vld [vmem:[#allocation15 + $0x18] sm:$0xff]   ;;  %v8266_v35 = vld [vmem:[#allocation15] sm:$0xff]   ;;  %s10473_s6 = sld [smem:[#allocation48_spill]]  ;;  %vm910_vm2 = vcmask 258048  }
  0xc1   :  { %8254 = vset.pattern.permute.xlu0 %v9193_v1  ;;  %8255 = vset.pattern.permute.xlu1 %v9193_v1  ;;  %v8267_v39 = vld [vmem:[#allocation15 + $0x10] sm:$0xff]   ;;  %v8270_v57 = vld [vmem:[#allocation15 + $0x28] sm:$0xff]   ;;  %v8271_v58 = vld [vmem:[#allocation15 + $0x38] sm:$0xff]   ;;  %vm1889_vm3 = vcmask 253952   ;;  %vm2214_vm4 = vcmask 1041409   ;;  %vm5836_vm5 = vcmask 1043456  }
  0xc2   :  { %v548_v12 = vunpack.c.0.s8 %v547_v5  ;;  %v8272_v60 = vld [vmem:[#allocation15 + $0x20] sm:$0xff]   ;;  %v8273_v61 = vld [vmem:[#allocation15 + $0x30] sm:$0xff]   ;;  %v8282_v9 = vld [vmem:[#allocation17 + $0x8] sm:$0xff]   ;;  %vm5791_vm7 = vcmask 58368   ;;  %vm5832_vm8 = vcmask 64512   ;;  %vm6340_vm12 = vcmask 60416  }
  0xc3   :  { %v8283_v10 = vld [vmem:[#allocation17 + $0x18] sm:$0xff]   ;;  %vm6517_vm14 = vcmask 523264  }
  0xc4   :  { %v8256_v2 = vld [vmem:[%s10471_s10 + $0x8] sm:$0xff]   ;;  %v8257_v3 = vld [vmem:[%s10471_s10 + $0x18] sm:$0xff]   ;;  %v8258_v7 = vld [vmem:[%s10471_s10] sm:$0xff]   ;;  %v9428_v16 = vsub.s32 %v548_v12, %v9416_v13 }
  0xc5   :  { %7631 = vmatpush3.bf16.msra.mxu0 %v8256_v2  ;;  %7639 = vmatpush3.bf16.msra.mxu1 %v8257_v3  ;;  %v8259_v8 = vld [vmem:[%s10471_s10 + $0x10] sm:$0xff]   ;;  %v8260_v14 = vld [vmem:[%s10471_s10 + $0x28] sm:$0xff]   ;;  %v8261_v15 = vld [vmem:[%s10471_s10 + $0x38] sm:$0xff]  }
  0xc6   :  { %7632 = vmatprep.subr.bf16.mxu0 %v9191_v0  ;;  %7640 = vmatprep.subr.bf16.mxu1 %v9191_v0  ;;  %v8262_v17 = vld [vmem:[%s10471_s10 + $0x20] sm:$0xff]   ;;  %v8263_v18 = vld [vmem:[%s10471_s10 + $0x30] sm:$0xff]   ;;  %v542_v20 = vld [vmem:[%s10472_s15 + $0x8] sm:$0x1f] }
  0xc7   :  { %v541_v19 = vld [vmem:[%s10472_s15] sm:$0x1f]  ;;  %v584_v24 = vcombine.high %v542_v20, %v542_v20  ;;  %v591_v25 = vrot.slane %v542_v20, %v9428_v16  ;;  %v8274_v62 = vld [vmem:[%s10473_s6 + $0x8] sm:$0xff]   ;;  %v8275_v63 = vld [vmem:[%s10473_s6 + $0x18] sm:$0xff]  }
  0xc8   :  { %v545_v21 = vcombine.high %v541_v19, %v541_v19  ;;  %v552_v22 = vrot.slane %v541_v19, %v9428_v16  ;;  %v8276_v2 = vld [vmem:[%s10473_s6] sm:$0xff]   ;;  %v8277_v3 = vld [vmem:[%s10473_s6 + $0x10] sm:$0xff]   ;;  %v8278_v4 = vld [vmem:[%s10473_s6 + $0x28] sm:$0xff]  }
  0xc9   :  { %7633 = vmatpush3.bf16.msra.mxu0 %v8258_v7  ;;  %7641 = vmatpush3.bf16.msra.mxu1 %v8259_v8  ;;  %v598_v30 = vrot.slane %v584_v24, %v9428_v16  ;;  %v599_v31 = vcombine.high %v591_v25, %v591_v25  ;;  %v606_v32 = vrot.slane %v591_v25, %v9428_v16  ;;  %v8279_v5 = vld [vmem:[%s10473_s6 + $0x38] sm:$0xff]   ;;  %v8280_v7 = vld [vmem:[%s10473_s6 + $0x20] sm:$0xff]   ;;  %v8281_v8 = vld [vmem:[%s10473_s6 + $0x30] sm:$0xff]  }
  0xca   :  { %7646 = vmatprep.subr.bf16.mxu0 %v9191_v0  ;;  %7654 = vmatprep.subr.bf16.mxu1 %v9191_v0  ;;  %v559_v27 = vrot.slane %v545_v21, %v9428_v16  ;;  %v560_v28 = vcombine.high %v552_v22, %v552_v22  ;;  %v567_v29 = vrot.slane %v552_v22, %v9428_v16  ;;  %v8285_v12 = vld [vmem:[#allocation17 + $0x10] sm:$0xff]   ;;  %v8290_v19 = vld [vmem:[%s10473_s6 + $0x8] sm:$0xff]   ;;  %v8291_v20 = vld [vmem:[%s10473_s6 + $0x18] sm:$0xff]  }
  0xcb   :  { %v613_v36 = vrot.slane %v598_v30, %v9428_v16  ;;  %v620_v37 = vrot.slane %v599_v31, %v9428_v16  ;;  %v621_v38 = vcombine.high %v606_v32, %v606_v32  ;;  %v8292_v21 = vld [vmem:[%s10473_s6] sm:$0xff]   ;;  %v8293_v22 = vld [vmem:[%s10473_s6 + $0x10] sm:$0xff]   ;;  %v7004_v24 = vld [vmem:[#allocation14 + $0x1] ss:$0 sm:$0xff] }
  0xcc   :  { %7635 = vmatmul.mubr.msk.bf16.vlgmr.msra.gmra.mxu0 %vm287_vm1, %v263_v11  ;;  %7643 = vmatmul.mubr.msk.bf16.vlgmr.msra.gmra.mxu1 %vm287_vm1, %v263_v11  ;;  %v574_v33 = vrot.slane %v559_v27, %v9428_v16  ;;  %v581_v34 = vrot.slane %v560_v28, %v9428_v16 }
  0xcd   :  { %7647 = vmatpush3.bf16.msra.mxu0 %v8260_v14  ;;  %7655 = vmatpush3.bf16.msra.mxu1 %v8261_v15  ;;  %v622_v43 = vcombine.high %v620_v37, %v620_v37  ;;  %v626_v44 = vcombine.low %v620_v37, %v621_v38  ;;  %v8286_v14 = vld [vmem:[#allocation17 + $0x28] sm:$0xff]   ;;  %v8287_v15 = vld [vmem:[#allocation17 + $0x38] sm:$0xff]  }
  0xce   :  { %7648 = vmatprep.subr.bf16.mxu0 %v9191_v0  ;;  %7656 = vmatprep.subr.bf16.mxu1 %v9191_v0  ;;  %v623_v40 = vcombine.low %v567_v29, %v581_v34  ;;  %v7024_v41 = vcombine.high %v567_v29, %v581_v34  ;;  %v625_v42 = vcombine.low %v574_v33, %v606_v32  ;;  %v7020_v38 = vld [vmem:[#allocation14 + $0x3] ss:$0 sm:$0xff] }
  0xcf   :  { %7650 = vmatprep.mubr.msk.bf16.mxu0 %vm9192_vm0, %v9191_v0  ;;  %7658 = vmatprep.mubr.msk.bf16.mxu1 %vm9192_vm0, %v9191_v0  ;;  %v654_v48 = vrot.slane %v626_v44, %v9428_v16  ;;  %v672_v49 = vcombine.low %v622_v43, %v613_v36  ;;  %v7012_v36 = vld [vmem:[#allocation14 + $0x2] ss:$0 sm:$0xff] }
  0xd0   :  { %v633_v45 = vrot.slane %v623_v40, %v9428_v16  ;;  %v640_v46 = vrot.slane %v7024_v41, %v9428_v16  ;;  %v647_v47 = vrot.slane %v625_v42, %v9428_v16 }
  0xd1   :  { %7649 = vmatpush3.bf16.msra.mxu0 %v8262_v17  ;;  %7657 = vmatpush3.bf16.msra.mxu1 %v8263_v18  ;;  %v679_v52 = vrot.slane %v672_v49, %v9428_v16  ;;  %v8288_v17 = vld [vmem:[#allocation17 + $0x20] sm:$0xff]   ;;  %v8289_v18 = vld [vmem:[#allocation17 + $0x30] sm:$0xff]  }
  0xd2   :  { %7662 = vmatprep.subr.bf16.mxu0 %v9191_v0  ;;  %7670 = vmatprep.subr.bf16.mxu1 %v9191_v0  ;;  %v655_v50 = vcombine.low %v633_v45, %v640_v46  ;;  %v656_v51 = vcombine.low %v647_v47, %v654_v48 }
  0xd3   :  { %v686_v55 = vrot.slane %v679_v52, %v9428_v16  ;;  %v7030_v52 = vld [vmem:[#allocation18 + $0x1] ss:$0 sm:$0xff] }
  0xd4   :  { %7651 = vmatmul.mubr.msk.bf16.vlgmr.msra.gmra.mxu0 %vm287_vm1, %v263_v11  ;;  %7659 = vmatmul.mubr.msk.bf16.vlgmr.msra.gmra.mxu1 %vm287_vm1, %v263_v11  ;;  %v663_v53 = vrot.slane %v655_v50, %v9428_v16  ;;  %v670_v54 = vrot.slane %v656_v51, %v9428_v16  ;;  %v8284_v11 = vld [vmem:[#allocation17] sm:$0xff]  }
  0xd5   :  { %7663 = vmatpush3.bf16.msra.mxu0 %v8264_v23  ;;  %7671 = vmatpush3.bf16.msra.mxu1 %v8265_v26  ;;  %v6996_v23 = vld [vmem:[#allocation14] ss:$0 sm:$0xff]  ;;  %v7025_v51 = vld [vmem:[#allocation18] ss:$0 sm:$0xff] }
  0xd6   :  { %7664 = vmatprep.subr.bf16.mxu0 %v9191_v0  ;;  %7672 = vmatprep.subr.bf16.mxu1 %v9191_v0  ;;  %v671_v56 = vcombine.low %v663_v53, %v670_v54 }
  0xd7   :  { %7666 = vmatprep.mubr.msk.bf16.mxu0 %vm9192_vm0, %v9191_v0  ;;  %7674 = vmatprep.mubr.msk.bf16.mxu1 %vm9192_vm0, %v9191_v0 }
  0xd8   :  { %v689_v59 = vpack.c.bf16 %v686_v55, %v671_v56 }
  0xd9   :  { %7665 = vmatpush3.bf16.msra.mxu0 %v8266_v35  ;;  %7673 = vmatpush3.bf16.msra.mxu1 %v8267_v39 }
  0xda   :  { %7678 = vmatprep.subr.bf16.mxu0 %v9191_v0  ;;  %7686 = vmatprep.subr.bf16.mxu1 %v9191_v0 }
  0xdc   :  { %7667 = vmatmul.mubr.msk.bf16.vlgmr.msra.gmra.mxu0 %vm287_vm1, %v689_v59  ;;  %7675 = vmatmul.mubr.msk.bf16.vlgmr.msra.gmra.mxu1 %vm287_vm1, %v689_v59 }
  0xdd   :  { %7679 = vmatpush3.bf16.msra.mxu0 %v8270_v57  ;;  %7687 = vmatpush3.bf16.msra.mxu1 %v8271_v58 }
  0xde   :  { %7680 = vmatprep.subr.bf16.mxu0 %v9191_v0  ;;  %7688 = vmatprep.subr.bf16.mxu1 %v9191_v0 }
  0xdf   :  { %7682 = vmatprep.mubr.msk.bf16.mxu0 %vm9192_vm0, %v9191_v0  ;;  %7690 = vmatprep.mubr.msk.bf16.mxu1 %vm9192_vm0, %v9191_v0 }
  0xe1   :  { %7681 = vmatpush3.bf16.msra.mxu0 %v8272_v60  ;;  %7689 = vmatpush3.bf16.msra.mxu1 %v8273_v61 }
  0xe2   :  { %7694 = vmatprep.subr.bf16.mxu0 %v9191_v0  ;;  %7702 = vmatprep.subr.bf16.mxu1 %v9191_v0 }
  0xe4   :  { %7683 = vmatmul.mubr.msk.bf16.vlgmr.msra.gmra.mxu0 %vm287_vm1, %v689_v59  ;;  %7691 = vmatmul.mubr.msk.bf16.vlgmr.msra.gmra.mxu1 %vm287_vm1, %v689_v59 }
  0xe5   :  { %7695 = vmatpush3.bf16.msra.mxu0 %v8274_v62  ;;  %7703 = vmatpush3.bf16.msra.mxu1 %v8275_v63 }
  0xe6   :  { %7696 = vmatprep.subr.bf16.mxu0 %v9191_v0  ;;  %7704 = vmatprep.subr.bf16.mxu1 %v9191_v0 }
  0xe7   :  { %7698 = vmatprep.mubr.msk.bf16.mxu0 %vm9192_vm0, %v9191_v0  ;;  %7706 = vmatprep.mubr.msk.bf16.mxu1 %vm9192_vm0, %v9191_v0 }
  0xe9   :  { %7697 = vmatpush3.bf16.msra.mxu0 %v8276_v2  ;;  %7705 = vmatpush3.bf16.msra.mxu1 %v8277_v3 }
  0xea   :  { %7710 = vmatprep.subr.bf16.mxu0 %v9191_v0  ;;  %7718 = vmatprep.subr.bf16.mxu1 %v9191_v0 }
  0xec   :  { %7699 = vmatmul.mubr.bf16.vlgmr.msra.gmra.mxu0 %v9193_v1  ;;  %7707 = vmatmul.mubr.bf16.vlgmr.msra.gmra.mxu1 %v9193_v1 }
  0xed   :  { %7711 = vmatpush3.bf16.msra.mxu0 %v8278_v4  ;;  %7719 = vmatpush3.bf16.msra.mxu1 %v8279_v5 }
  0xee   :  { %7712 = vmatprep.subr.bf16.mxu0 %v9191_v0  ;;  %7720 = vmatprep.subr.bf16.mxu1 %v9191_v0 }
  0xef   :  { %7714 = vmatprep.mubr.msk.bf16.mxu0 %vm9192_vm0, %v9191_v0  ;;  %7722 = vmatprep.mubr.msk.bf16.mxu1 %vm9192_vm0, %v9191_v0 }
  0xf1   :  { %7713 = vmatpush3.bf16.msra.mxu0 %v8280_v7  ;;  %7721 = vmatpush3.bf16.msra.mxu1 %v8281_v8 }
  0xf2   :  { %7726 = vmatprep.subr.bf16.mxu0 %v9191_v0  ;;  %7734 = vmatprep.subr.bf16.mxu1 %v9191_v0 }
  0xf4   :  { %7715 = vmatmul.mubr.bf16.vlgmr.msra.gmra.mxu0 %v9193_v1  ;;  %7723 = vmatmul.mubr.bf16.vlgmr.msra.gmra.mxu1 %v9193_v1 }
  0xf5   :  { %7727 = vmatpush3.bf16.msra.mxu0 %v8282_v9  ;;  %7735 = vmatpush3.bf16.msra.mxu1 %v8283_v10 }
  0xf6   :  { %7728 = vmatprep.subr.bf16.mxu0 %v9191_v0  ;;  %7736 = vmatprep.subr.bf16.mxu1 %v9191_v0 }
  0xf7   :  { %7730 = vmatprep.mubr.msk.bf16.mxu0 %vm9192_vm0, %v9191_v0  ;;  %7738 = vmatprep.mubr.msk.bf16.mxu1 %vm9192_vm0, %v9191_v0 }
  0xf9   :  { %7729 = vmatpush3.bf16.msra.mxu0 %v8284_v11  ;;  %7737 = vmatpush3.bf16.msra.mxu1 %v8285_v12 }
  0xfa   :  { %7742 = vmatprep.subr.bf16.mxu0 %v9191_v0  ;;  %7750 = vmatprep.subr.bf16.mxu1 %v9191_v0 }
  0xfc   :  { %7731 = vmatmul.mubr.bf16.vlgmr.msra.gmra.mxu0 %v9193_v1  ;;  %7739 = vmatmul.mubr.bf16.vlgmr.msra.gmra.mxu1 %v9193_v1 }
  0xfd   :  { %7743 = vmatpush3.bf16.msra.mxu0 %v8286_v14  ;;  %7751 = vmatpush3.bf16.msra.mxu1 %v8287_v15 }
  0xfe   :  { %7744 = vmatprep.subr.bf16.mxu0 %v9191_v0  ;;  %7752 = vmatprep.subr.bf16.mxu1 %v9191_v0 }
  0xff   :  { %7746 = vmatprep.mubr.msk.bf16.mxu0 %vm9192_vm0, %v9191_v0  ;;  %7754 = vmatprep.mubr.msk.bf16.mxu1 %vm9192_vm0, %v9191_v0 }
 0x101   :  { %7745 = vmatpush3.bf16.msra.mxu0 %v8288_v17  ;;  %7753 = vmatpush3.bf16.msra.mxu1 %v8289_v18 }
 0x102   :  { %7758 = vmatprep.subr.bf16.mxu0 %v9191_v0  ;;  %7766 = vmatprep.subr.bf16.mxu1 %v9191_v0 }
 0x104   :  { %7747 = vmatmul.mubr.bf16.vlgmr.msra.gmra.mxu0 %v9193_v1  ;;  %7755 = vmatmul.mubr.bf16.vlgmr.msra.gmra.mxu1 %v9193_v1 }
 0x105   :  { %7762 = vmatprep.mubr.msk.bf16.mxu0 %vm9192_vm0, %v9191_v0  ;;  %7770 = vmatprep.mubr.msk.bf16.mxu1 %vm9192_vm0, %v9191_v0 }
 0x106   :  { %7759 = vmatpush3.bf16.msra.mxu0 %v8290_v19  ;;  %7767 = vmatpush3.bf16.msra.mxu1 %v8291_v20 }
 0x107   :  { %7760 = vmatprep.subr.bf16.mxu0 %v9191_v0  ;;  %7768 = vmatprep.subr.bf16.mxu1 %v9191_v0 }
 0x10a   :  { %7761 = vmatpush3.bf16.msra.mxu0 %v8292_v21  ;;  %7769 = vmatpush3.bf16.msra.mxu1 %v8293_v22 }
 0x10b   :  { %7774 = vmatprep.subr.bf16.mxu0 %v9191_v0  ;;  %7782 = vmatprep.subr.bf16.mxu1 %v9191_v0 }
 0x18c   :  { %v325_v25 = vpop.f32.mrf.mxu0  ;;  %v393_v27 = vpop.f32.mrf.mxu1 }
 0x18d   :  { %v326_v26 = vadd.f32 %v6996_v23, %v325_v25  ;;  %v394_v28 = vadd.f32 %v7004_v24, %v393_v27 }
 0x18e   :  { %v7636_v29 = vpop.f32.mrf.mxu0  ;;  %v7644_v30 = vpop.f32.mrf.mxu1 }
 0x18f   :  { %332 = vst.msk [vmem:[#allocation4] sm:$0xff] %vm287_vm1, %v326_v26  ;;  %401 = vst.msk [vmem:[#allocation4 + $0x10] sm:$0xff] %vm287_vm1, %v394_v28 }
 0x190   :  { %v328_v31 = vpop.f32.mrf.mxu0  ;;  %v396_v33 = vpop.f32.mrf.mxu1 }
 0x191   :  { %v329_v32 = vadd.f32 %v6996_v23, %v328_v31  ;;  %v397_v34 = vadd.f32 %v7004_v24, %v396_v33 }
 0x192   :  { %v7637_v35 = vpop.f32.mrf.mxu0  ;;  %v7645_v37 = vpop.f32.mrf.mxu1 }
 0x193   :  { %333 = vst.msk [vmem:[#allocation4 + $0x8] sm:$0xff] %vm287_vm1, %v329_v32  ;;  %402 = vst.msk [vmem:[#allocation4 + $0x18] sm:$0xff] %vm287_vm1, %v397_v34 }
 0x194   :  { %v462_v39 = vpop.f32.mrf.mxu0  ;;  %v531_v41 = vpop.f32.mrf.mxu1 }
 0x195   :  { %v463_v40 = vadd.f32 %v7012_v36, %v462_v39  ;;  %v532_v42 = vadd.f32 %v7020_v38, %v531_v41 }
 0x196   :  { %v7652_v43 = vpop.f32.mrf.mxu0  ;;  %v7660_v44 = vpop.f32.mrf.mxu1 }
 0x197   :  { %470 = vst.msk [vmem:[#allocation4 + $0x20] sm:$0xff] %vm287_vm1, %v463_v40  ;;  %539 = vst.msk [vmem:[#allocation4 + $0x30] sm:$0xff] %vm287_vm1, %v532_v42 }
 0x198   :  { %v465_v45 = vpop.f32.mrf.mxu0  ;;  %v534_v47 = vpop.f32.mrf.mxu1 }
 0x199   :  { %v466_v46 = vadd.f32 %v7012_v36, %v465_v45  ;;  %v535_v48 = vadd.f32 %v7020_v38, %v534_v47 }
 0x19a   :  { %v7653_v49 = vpop.f32.mrf.mxu0  ;;  %v7661_v50 = vpop.f32.mrf.mxu1 }
 0x19b   :  { %471 = vst.msk [vmem:[#allocation4 + $0x28] sm:$0xff] %vm287_vm1, %v466_v46  ;;  %540 = vst.msk [vmem:[#allocation4 + $0x38] sm:$0xff] %vm287_vm1, %v535_v48  ;;  %v9608_v50 = vld [vmem:[#allocation18 + $0x2] ss:$0 sm:$0xff] }
 0x19c   :  { %v750_v53 = vpop.f32.mrf.mxu0  ;;  %v972_v54 = vpop.f32.mrf.mxu1 }
 0x19d   :  { %v751_v55 = vadd.f32 %v7025_v51, %v750_v53  ;;  %v973_v56 = vadd.f32 %v7030_v52, %v972_v54 }
 0x19e   :  { %v7668_v57 = vpop.f32.mrf.mxu0  ;;  %v7676_v58 = vpop.f32.mrf.mxu1 }
 0x19f   :  { %v759_v59 = vcombine.high %v751_v55, %v751_v55  ;;  %v766_v60 = vrot.slane %v751_v55, %v9428_v16  ;;  %v981_v61 = vcombine.high %v973_v56, %v973_v56  ;;  %v988_v62 = vrot.slane %v973_v56, %v9428_v16 }
 0x1a0   :  { %v753_v63 = vpop.f32.mrf.mxu0  ;;  %v975_v2 = vpop.f32.mrf.mxu1 }
 0x1a1   :  { %v773_v3 = vrot.slane %v759_v59, %v9428_v16  ;;  %v774_v4 = vcombine.high %v766_v60, %v766_v60  ;;  %v782_v5 = vrot.slane %v766_v60, %v9428_v16  ;;  %v995_v7 = vrot.slane %v981_v61, %v9428_v16 }
 0x1a2   :  { %v996_v8 = vcombine.high %v988_v62, %v988_v62  ;;  %v1004_v9 = vrot.slane %v988_v62, %v9428_v16  ;;  %v754_v10 = vadd.f32 %v7025_v51, %v753_v63  ;;  %v976_v11 = vadd.f32 %v7030_v52, %v975_v2  ;;  %v7669_v12 = vpop.f32.mrf.mxu0  ;;  %v7677_v14 = vpop.f32.mrf.mxu1 }
 0x1a3   :  { %v775_v15 = vcombine.high %v773_v3, %v773_v3  ;;  %v789_v17 = vrot.slane %v773_v3, %v9428_v16  ;;  %v796_v18 = vrot.slane %v774_v4, %v9428_v16  ;;  %v997_v19 = vcombine.high %v995_v7, %v995_v7  ;;  %v9618_v3 = vld [vmem:[#allocation18 + $0x3] ss:$0 sm:$0xff] }
 0x1a4   :  { %v1011_v20 = vrot.slane %v995_v7, %v9428_v16  ;;  %v1018_v21 = vrot.slane %v996_v8, %v9428_v16  ;;  %v814_v22 = vrot.slane %v754_v10, %v9428_v16  ;;  %v1036_v23 = vrot.slane %v976_v11, %v9428_v16  ;;  %v1194_v24 = vpop.f32.mrf.mxu0  ;;  %v1416_v25 = vpop.f32.mrf.mxu1 }
 0x1a5   :  { %v803_v26 = vrot.slane %v775_v15, %v9428_v16  ;;  %v805_v27 = vcombine.high %v789_v17, %v789_v17  ;;  %v830_v28 = vcombine.low %v782_v5, %v796_v18  ;;  %v7029_v29 = vcombine.high %v782_v5, %v796_v18 }
 0x1a6   :  { %v852_v30 = vrot.slane %v789_v17, %v9428_v16  ;;  %v1025_v31 = vrot.slane %v997_v19, %v9428_v16  ;;  %v1027_v32 = vcombine.high %v1011_v20, %v1011_v20  ;;  %v1052_v33 = vcombine.low %v1004_v9, %v1018_v21  ;;  %v7684_v34 = vpop.f32.mrf.mxu0  ;;  %v7692_v35 = vpop.f32.mrf.mxu1 }
 0x1a7   :  { %v838_v36 = vrot.slane %v830_v28, %v9428_v16  ;;  %v845_v37 = vrot.slane %v7029_v29, %v9428_v16  ;;  %v869_v38 = vcombine.low %v803_v26, %v805_v27  ;;  %v7034_v39 = vcombine.high %v1004_v9, %v1018_v21 }
 0x1a8   :  { %v867_v40 = vrot.slane %v852_v30, %v9428_v16  ;;  %v1060_v41 = vrot.slane %v1052_v33, %v9428_v16  ;;  %v1074_v42 = vrot.slane %v1011_v20, %v9428_v16  ;;  %v1091_v43 = vcombine.low %v1025_v31, %v1027_v32  ;;  %v9603_v44 = vpop.f32.mrf.mxu0  ;;  %v9605_v45 = vpop.f32.mrf.mxu1 }
 0x1a9   :  { %v853_v46 = vcombine.low %v838_v36, %v845_v37  ;;  %v1067_v47 = vrot.slane %v7034_v39, %v9428_v16  ;;  %v807_v48 = vcombine.high %v803_v26, %v803_v26  ;;  %v815_v49 = vcombine.high %v814_v22, %v814_v22 }
 0x1aa   :  { %v1089_v51 = vrot.slane %v1074_v42, %v9428_v16  ;;  %v822_v52 = vrot.slane %v814_v22, %v9428_v16  ;;  %v877_v53 = vrot.slane %v869_v38, %v9428_v16  ;;  %v1029_v54 = vcombine.high %v1025_v31, %v1025_v31  ;;  %v7685_v55 = vpop.f32.mrf.mxu0  ;;  %v7693_v56 = vpop.f32.mrf.mxu1 }
 0x1ab   :  { %v860_v57 = vrot.slane %v853_v46, %v9428_v16  ;;  %v1075_v58 = vcombine.low %v1060_v41, %v1067_v47  ;;  %v829_v59 = vrot.slane %v815_v49, %v9428_v16  ;;  %v1037_v60 = vcombine.high %v1036_v23, %v1036_v23 }
 0x1ac   :  { %v870_v61 = vcombine.low %v807_v48, %v822_v52  ;;  %v1044_v62 = vrot.slane %v1036_v23, %v9428_v16  ;;  %v1099_v63 = vrot.slane %v1091_v43, %v9428_v16  ;;  %v1195_v2 = vadd.f32 %v9608_v50, %v1194_v24  ;;  %v9620_v4 = vpop.f32.mrf.mxu0  ;;  %v9622_v5 = vpop.f32.mrf.mxu1 }
 0x1ad   :  { %v868_v7 = vcombine.low %v860_v57, %v867_v40  ;;  %v1082_v8 = vrot.slane %v1075_v58, %v9428_v16  ;;  %v891_v9 = vrot.slane %v829_v59, %v9428_v16  ;;  %v1051_v10 = vrot.slane %v1037_v60, %v9428_v16 }
 0x1ae   :  { %v884_v11 = vrot.slane %v870_v61, %v9428_v16  ;;  %v1092_v12 = vcombine.low %v1029_v54, %v1044_v62  ;;  %v1203_v14 = vcombine.high %v1195_v2, %v1195_v2  ;;  %v1210_v15 = vrot.slane %v1195_v2, %v9428_v16  ;;  %v7700_v17 = vpop.f32.mrf.mxu0  ;;  %v7708_v18 = vpop.f32.mrf.mxu1 }
 0x1af   :  { %911 = vst.msk [vmem:[#allocation5] sm:$0x1f] %vm910_vm2, %v868_v7  ;;  %v1090_v19 = vcombine.low %v1082_v8, %v1089_v51  ;;  %v906_v20 = vrot.slane %v891_v9, %v9428_v16  ;;  %v1113_v21 = vrot.slane %v1051_v10, %v9428_v16  ;;  %v1417_v22 = vadd.f32 %v9618_v3, %v1416_v25 }
 0x1b0   :  { %v892_v23 = vcombine.low %v877_v53, %v884_v11  ;;  %v1106_v24 = vrot.slane %v1092_v12, %v9428_v16  ;;  %v1217_v26 = vrot.slane %v1203_v14, %v9428_v16  ;;  %v1218_v27 = vcombine.high %v1210_v15, %v1210_v15  ;;  %v1637_v28 = vpop.f32.mrf.mxu0  ;;  %v1702_v29 = vpop.f32.mrf.mxu1 }
 0x1b1   :  { %1133 = vst.msk [vmem:[#allocation5 + $0x10] sm:$0x1f] %vm910_vm2, %v1090_v19  ;;  %v1128_v30 = vrot.slane %v1113_v21, %v9428_v16  ;;  %v1226_v31 = vrot.slane %v1210_v15, %v9428_v16  ;;  %v1425_v32 = vcombine.high %v1417_v22, %v1417_v22  ;;  %v1432_v33 = vrot.slane %v1417_v22, %v9428_v16 }
 0x1b2   :  { %v899_v34 = vrot.slane %v892_v23, %v9428_v16  ;;  %v1114_v25 = vcombine.low %v1099_v63, %v1106_v24  ;;  %v1219_v35 = vcombine.high %v1217_v26, %v1217_v26  ;;  %v1233_v36 = vrot.slane %v1217_v26, %v9428_v16  ;;  %v7701_v37 = vpop.f32.mrf.mxu0  ;;  %v7709_v38 = vpop.f32.mrf.mxu1 }
 0x1b3   :  { %v1240_v39 = vrot.slane %v1218_v27, %v9428_v16  ;;  %v1439_v40 = vrot.slane %v1425_v32, %v9428_v16  ;;  %v1440_v41 = vcombine.high %v1432_v33, %v1432_v33  ;;  %v1448_v42 = vrot.slane %v1432_v33, %v9428_v16  ;;  %v1580_v38 = vld [vmem:[#allocation4 + $0x8] sm:$0x1] }
 0x1b4   :  { %v907_v43 = vcombine.low %v899_v34, %v906_v20  ;;  %v1121_v46 = vrot.slane %v1114_v25, %v9428_v16  ;;  %v1247_v47 = vrot.slane %v1219_v35, %v9428_v16  ;;  %v1249_v48 = vcombine.high %v1233_v36, %v1233_v36  ;;  %v9646_v49 = vpop.f32.mrf.mxu0  ;;  %v9648_v51 = vpop.f32.mrf.mxu1 }
 0x1b5   :  { %v1274_v52 = vcombine.low %v1226_v31, %v1240_v39  ;;  %v7039_v53 = vcombine.high %v1226_v31, %v1240_v39  ;;  %v1296_v54 = vrot.slane %v1233_v36, %v9428_v16  ;;  %v1441_v55 = vcombine.high %v1439_v40, %v1439_v40 }
 0x1b6   :  { %912 = vst.msk [vmem:[#allocation5 + $0x8] sm:$0x1f] %vm910_vm2, %v907_v43  ;;  %v1129_v56 = vcombine.low %v1121_v46, %v1128_v30  ;;  %v9652_v57 = vcombine.low %v1247_v47, %v1249_v48  ;;  %v1455_v58 = vrot.slane %v1439_v40, %v9428_v16  ;;  %v1462_v59 = vrot.slane %v1440_v41, %v9428_v16  ;;  %v7716_v60 = vpop.f32.mrf.mxu0  ;;  %v7724_v61 = vpop.f32.mrf.mxu1  ;;  %v1646_v48 = vld [vmem:[#allocation4 + $0x10] sm:$0x1] }
 0x1b7   :  { %v1282_v62 = vrot.slane %v1274_v52, %v9428_v16  ;;  %v1289_v63 = vrot.slane %v7039_v53, %v9428_v16  ;;  %v1469_v2 = vrot.slane %v1441_v55, %v9428_v16  ;;  %v1311_v15 = vrot.slane %v1296_v54, %v9428_v16  ;;  %v1647_v61 = vld [vmem:[#allocation4 + $0x18] sm:$0x1] }
 0x1b8   :  { %1134 = vst.msk [vmem:[#allocation5 + $0x18] sm:$0x1f] %vm910_vm2, %v1129_v56  ;;  %v1471_v7 = vcombine.high %v1455_v58, %v1455_v58  ;;  %v1496_v8 = vcombine.low %v1448_v42, %v1462_v59  ;;  %v7044_v9 = vcombine.high %v1448_v42, %v1462_v59  ;;  %v1518_v10 = vrot.slane %v1455_v58, %v9428_v16  ;;  %v1767_v11 = vpop.f32.mrf.mxu0  ;;  %v1832_v12 = vpop.f32.mrf.mxu1 }
 0x1b9   :  { %v1297_v14 = vcombine.low %v1282_v62, %v1289_v63  ;;  %v1198_v17 = vadd.f32 %v9608_v50, %v9603_v44  ;;  %v1251_v18 = vcombine.high %v1247_v47, %v1247_v47  ;;  %v1321_v22 = vrot.slane %v9652_v57, %v9428_v16  ;;  %v1579_v50 = vld [vmem:[#allocation4] sm:$0x1] }
 0x1ba   :  { %v1504_v19 = vrot.slane %v1496_v8, %v9428_v16  ;;  %v1511_v20 = vrot.slane %v7044_v9, %v9428_v16  ;;  %v1533_v21 = vrot.slane %v1518_v10, %v9428_v16  ;;  %v7717_v23 = vpop.f32.mrf.mxu0  ;;  %v7725_v24 = vpop.f32.mrf.mxu1  ;;  %v1535_v27 = vcombine.low %v1469_v2, %v1471_v7 }
 0x1bb   :  { %v1304_v26 = vrot.slane %v1297_v14, %v9428_v16  ;;  %v1258_v28 = vrot.slane %v1198_v17, %v9428_v16  ;;  %v1420_v44 = vadd.f32 %v9618_v3, %v9605_v45  ;;  %v1473_v30 = vcombine.high %v1469_v2, %v1469_v2  ;;  %v1711_v14 = vld [vmem:[#allocation4 + $0x20] sm:$0x1] }
 0x1bc   :  { %v1519_v29 = vcombine.low %v1504_v19, %v1511_v20  ;;  %v1641_v31 = vrot.slane %v9620_v4, 1  ;;  %v1644_v32 = vadd.f32 %v9620_v4, %v1579_v50  ;;  %v9675_v33 = vpop.f32.mrf.mxu0  ;;  %v9677_v34 = vpop.f32.mrf.mxu1  ;;  %v1706_v40 = vrot.slane %v9622_v5, 1  ;;  %v1892_v23 = vld [vmem:[#allocation5] sm:$0x1] }
 0x1bd   :  { %v1312_v25 = vcombine.low %v1304_v26, %v1311_v15  ;;  %v1259_v35 = vcombine.high %v1258_v28, %v1258_v28  ;;  %v1266_v36 = vrot.slane %v1258_v28, %v9428_v16  ;;  %v1480_v37 = vrot.slane %v1420_v44, %v9428_v16 }
 0x1be   :  { %v1526_v45 = vrot.slane %v1519_v29, %v9428_v16  ;;  %v1645_v3 = vadd.f32 %v1641_v31, %v1580_v38  ;;  %v7065_v39 = vmul.f32 -1.442695, %v1644_v32  ;;  %v7732_v41 = vpop.f32.mrf.mxu0  ;;  %v7740_v42 = vpop.f32.mrf.mxu1  ;;  %v1709_v54 = vadd.f32 %v9622_v5, %v1646_v48  ;;  %v1893_v32 = vld [vmem:[#allocation5 + $0x8] sm:$0x1] }
 0x1bf   :  { %1355 = vst.msk [vmem:[#allocation5 + $0x20] sm:$0x1f] %vm910_vm2, %v1312_v25  ;;  %v1273_v4 = vrot.slane %v1259_v35, %v9428_v16  ;;  %v1314_v43 = vcombine.low %v1251_v18, %v1266_v36  ;;  %v1481_v46 = vcombine.high %v1480_v37, %v1480_v37  ;;  %v1488_v47 = vrot.slane %v1480_v37, %v9428_v16  ;;  %v1776_v25 = vld [vmem:[#allocation4 + $0x30] sm:$0x1]  ;;  %v1957_v42 = vld [vmem:[#allocation5 + $0x18] sm:$0x1] }
 0x1c0   :  { %v1534_v52 = vcombine.low %v1526_v45, %v1533_v21  ;;  %8397 = vpow2.f32 %v7065_v39  ;;  %v7066_v53 = vmul.f32 -1.442695, %v1645_v3  ;;  %v1947_v55 = vpop.f32.mrf.mxu0  ;;  %v2012_v56 = vpop.f32.mrf.mxu1  ;;  %v1710_v62 = vadd.f32 %v1706_v40, %v1647_v61  ;;  %v1712_v21 = vld [vmem:[#allocation4 + $0x28] sm:$0x1]  ;;  %v1956_v36 = vld [vmem:[#allocation5 + $0x10] sm:$0x1] }
 0x1c1   :  { %v1328_v57 = vrot.slane %v1314_v43, %v9428_v16  ;;  %v1335_v58 = vrot.slane %v1273_v4, %v9428_v16  ;;  %v1495_v59 = vrot.slane %v1481_v46, %v9428_v16  ;;  %v1536_v60 = vcombine.low %v1473_v30, %v1488_v47  ;;  %v1777_v40 = vld [vmem:[#allocation4 + $0x38] sm:$0x1] }
 0x1c2   :  { %1577 = vst.msk [vmem:[#allocation5 + $0x30] sm:$0x1f] %vm910_vm2, %v1534_v52  ;;  %8399 = vpow2.f32 %v7066_v53  ;;  %v7067_v63 = vmul.f32 -1.442695, %v1709_v54  ;;  %v1771_v2 = vrot.slane %v9646_v49, 1  ;;  %v7733_v7 = vpop.f32.mrf.mxu0  ;;  %v7741_v8 = vpop.f32.mrf.mxu1  ;;  %v1543_v9 = vrot.slane %v1535_v27, %v9428_v16 }
 0x1c3   :  { %v1336_v5 = vcombine.low %v1321_v22, %v1328_v57  ;;  %v1550_v10 = vrot.slane %v1536_v60, %v9428_v16  ;;  %v1557_v11 = vrot.slane %v1495_v59, %v9428_v16  ;;  %v7068_v12 = vmul.f32 -1.442695, %v1710_v62 }
 0x1c4   :  { %8401 = vpow2.f32 %v7067_v63  ;;  %v9695_v15 = vpop.f32.mrf.mxu0  ;;  %v9697_v17 = vpop.f32.mrf.mxu1  ;;  %v1350_v19 = vrot.slane %v1335_v58, %v9428_v16  ;;  %v1774_v22 = vadd.f32 %v9646_v49, %v1711_v14  ;;  %v1775_v24 = vadd.f32 %v1771_v2, %v1712_v21 }
 0x1c5   :  { %v1343_v18 = vrot.slane %v1336_v5, %v9428_v16  ;;  %v1558_v20 = vcombine.low %v1543_v9, %v1550_v10  ;;  %8403 = vpow2.f32 %v7068_v12  ;;  %v1951_v26 = vrot.slane %v9675_v33, 1 }
 0x1c6   :  { %v1954_v27 = vadd.f32 %v9675_v33, %v1892_v23  ;;  %v7748_v28 = vpop.f32.mrf.mxu0  ;;  %v7756_v44 = vpop.f32.mrf.mxu1  ;;  %v1572_v30 = vrot.slane %v1557_v11, %v9428_v16  ;;  %v1836_v31 = vrot.slane %v9648_v51, 1  ;;  %v1839_v33 = vadd.f32 %v9648_v51, %v1776_v25  ;;  %v2021_v7 = vld [vmem:[#allocation5 + $0x20] sm:$0x1] }
 0x1c7   :  { %v1351_v50 = vcombine.low %v1343_v18, %v1350_v19  ;;  %v1565_v29 = vrot.slane %v1558_v20, %v9428_v16  ;;  %v1955_v35 = vadd.f32 %v1951_v26, %v1893_v32  ;;  %v2016_v3 = vrot.slane %v9677_v34, 1 }
 0x1c8   :  { %v7079_v49 = vmul.f32 -1.442695, %v1954_v27  ;;  %v2077_v37 = vpop.f32.mrf.mxu0  ;;  %v2142_v38 = vpop.f32.mrf.mxu1  ;;  %v2019_v39 = vadd.f32 %v9677_v34, %v1956_v36  ;;  %8405 = vtanh.f32 %v1774_v22  ;;  %v1840_v46 = vadd.f32 %v1836_v31, %v1777_v40 }
 0x1c9   :  { %1356 = vst.msk [vmem:[#allocation5 + $0x28] sm:$0x1f] %vm910_vm2, %v1351_v50  ;;  %v1573_v45 = vcombine.low %v1565_v29, %v1572_v30  ;;  %v7080_v41 = vmul.f32 -1.442695, %v1955_v35  ;;  %8407 = vtanh.f32 %v1775_v24  ;;  %v2020_v47 = vadd.f32 %v2016_v3, %v1957_v42  ;;  %v2086_v60 = vld [vmem:[#allocation5 + $0x30] sm:$0x1] }
 0x1ca   :  { %v7749_v4 = vpop.f32.mrf.mxu0  ;;  %v7757_v43 = vpop.f32.mrf.mxu1  ;;  %v7081_v48 = vmul.f32 -1.442695, %v2019_v39  ;;  %8409 = vpow2.f32 %v7079_v49  ;;  %v7069_v53 = vmul.f32 -1.442695, %v1839_v33  ;;  %v7070_v55 = vmul.f32 -1.442695, %v1840_v46 }
 0x1cb   :  { %1578 = vst.msk [vmem:[#allocation5 + $0x38] sm:$0x1f] %vm910_vm2, %v1573_v45  ;;  %8411 = vpow2.f32 %v7080_v41  ;;  %v7082_v51 = vmul.f32 -1.442695, %v2020_v47  ;;  %v2146_v56 = vrot.slane %v9697_v17, 1  ;;  %v2081_v59 = vrot.slane %v9695_v15, 1 }
 0x1cc   :  { %8413 = vpow2.f32 %v7081_v48  ;;  %v2149_v63 = vadd.f32 %v9697_v17, %v2086_v60  ;;  %v2084_v10 = vadd.f32 %v9695_v15, %v2021_v7 }
 0x1cd   :  { %v8398_v52 = vpop.eup %8397  ;;  %8415 = vpow2.f32 %v7082_v51 }
 0x1ce   :  { %v1847_v54 = vadd.f32 1.0, %v8398_v52  ;;  %v7083_v12 = vmul.f32 -1.442695, %v2149_v63 }
 0x1cf   :  { %v8400_v34 = vpop.eup %8399 }
 0x1d0   :  { %v1848_v57 = vadd.f32 1.0, %v8400_v34  ;;  %8417 = vrcp.f32 %v1847_v54  ;;  %v2022_v9 = vld [vmem:[#allocation5 + $0x28] sm:$0x1] }
 0x1d1   :  { %v8402_v58 = vpop.eup %8401  ;;  %8419 = vpow2.f32 %v7069_v53  ;;  %v2085_v11 = vadd.f32 %v2081_v59, %v2022_v9 }
 0x1d2   :  { %8421 = vrcp.f32 %v1848_v57  ;;  %v1859_v61 = vadd.f32 1.0, %v8402_v58  ;;  %v2087_v62 = vld [vmem:[#allocation5 + $0x38] sm:$0x1]  ;;  %v8404_v2 = vpop.eup %8403 }
 0x1d3   :  { %8423 = vpow2.f32 %v7070_v55  ;;  %v2150_v8 = vadd.f32 %v2146_v56, %v2087_v62  ;;  %v1860_v5 = vadd.f32 1.0, %v8404_v2 }
 0x1d4   :  { %8425 = vrcp.f32 %v1859_v61 }
 0x1d5   :  { %8427 = vrcp.f32 %v1860_v5  ;;  %v8406_v14 = vpop.eup %8405  ;;  %v7084_v18 = vmul.f32 -1.442695, %v2150_v8 }
 0x1d6   :  { %v8408_v19 = vpop.eup %8407  ;;  %8429 = vtanh.f32 %v2084_v10 }
 0x1d7   :  { %v8410_v20 = vpop.eup %8409  ;;  %8431 = vtanh.f32 %v2085_v11  ;;  %v8294_v11 = vld [vmem:[%s10473_s6 + $0x28] sm:$0xff]  }
 0x1d8   :  { %v8412_v21 = vpop.eup %8411  ;;  %v2157_v17 = vadd.f32 1.0, %v8410_v20  ;;  %8433 = vpow2.f32 %v7083_v12  ;;  %v8295_v12 = vld [vmem:[%s10473_s6 + $0x38] sm:$0xff]  }
 0x1d9   :  { %v8414_v22 = vpop.eup %8413  ;;  %v2158_v23 = vadd.f32 1.0, %v8412_v21  ;;  %8435 = vpow2.f32 %v7084_v18  ;;  %v8296_v21 = vld [vmem:[%s10473_s6 + $0x20] sm:$0xff]  }
 0x1da   :  { %v8416_v24 = vpop.eup %8415  ;;  %8437 = vrcp.f32 %v2157_v17  ;;  %v2169_v26 = vadd.f32 1.0, %v8414_v22  ;;  %v8297_v17 = vld [vmem:[%s10473_s6 + $0x30] sm:$0xff]  }
 0x1db   :  { %8439 = vrcp.f32 %v2158_v23  ;;  %v2170_v15 = vadd.f32 1.0, %v8416_v24  ;;  %v8298_v24 = vld [vmem:[#allocation17 + $0x8] sm:$0xff]  }
 0x1dc   :  { %8441 = vrcp.f32 %v2169_v26  ;;  %v8299_v26 = vld [vmem:[#allocation17 + $0x18] sm:$0xff]  }
 0x1dd   :  { %v8418_v27 = vpop.eup %8417  ;;  %8443 = vrcp.f32 %v2170_v15 }
 0x1de   :  { %v8420_v28 = vpop.eup %8419  ;;  %v1881_v29 = vmul.f32 %v8418_v27, %v8406_v14 }
 0x1df   :  { %v8422_v44 = vpop.eup %8421  ;;  %v1873_v31 = vadd.f32 1.0, %v8420_v28  ;;  %v8300_v28 = vld [vmem:[#allocation17] sm:$0xff]  }
 0x1e0   :  { %v8424_v50 = vpop.eup %8423  ;;  %v1882_v25 = vmul.f32 %v8422_v44, %v8408_v19  ;;  %v8301_v44 = vld [vmem:[#allocation17 + $0x10] sm:$0xff]  }
 0x1e1   :  { %v8426_v30 = vpop.eup %8425  ;;  %v1874_v49 = vadd.f32 1.0, %v8424_v50  ;;  %8445 = vrcp.f32 %v1873_v31  ;;  %v8303_v31 = vld [vmem:[#allocation17 + $0x38] sm:$0xff]  }
 0x1e2   :  { %v1879_v32 = vmul.f32 0.0, %v8426_v30  ;;  %v8428_v35 = vpop.eup %8427  ;;  %v8302_v30 = vld [vmem:[#allocation17 + $0x28] sm:$0xff]  }
 0x1e3   :  { %v1880_v36 = vmul.f32 0.0, %v8428_v35  ;;  %v8430_v38 = vpop.eup %8429  ;;  %v8306_v35 = vld [vmem:[%s10473_s6 + $0x8] sm:$0xff]  }
 0x1e4   :  { %v9716_v37 = vadd.f32 %v1881_v29, %v1879_v32  ;;  %v8432_v45 = vpop.eup %8431  ;;  %v8304_v32 = vld [vmem:[#allocation17 + $0x20] sm:$0xff]  }
 0x1e5   :  { %v9718_v33 = vadd.f32 %v1882_v25, %v1880_v36  ;;  %v8434_v3 = vpop.eup %8433  ;;  %v8305_v25 = vld [vmem:[#allocation17 + $0x30] sm:$0xff]   ;;  %v8308_v36 = vld [vmem:[%s10473_s6] sm:$0xff]  }
 0x1e6   :  { %8447 = vtanh.f32 %v9716_v37  ;;  %v8436_v39 = vpop.eup %8435  ;;  %v2183_v4 = vadd.f32 1.0, %v8434_v3 }
 0x1e7   :  { %8449 = vrcp.f32 %v1874_v49  ;;  %v8438_v40 = vpop.eup %8437  ;;  %v2184_v47 = vadd.f32 1.0, %v8436_v39  ;;  %v8307_v49 = vld [vmem:[%s10473_s6 + $0x18] sm:$0xff]   ;;  %v2278_v39 = vld [vmem:[#allocation4 + $0x11] sm:$0x1] }
 0x1e8   :  { %8451 = vtanh.f32 %v9718_v33  ;;  %v8440_v41 = vpop.eup %8439  ;;  %v2191_v42 = vmul.f32 %v8438_v40, %v8430_v38  ;;  %v8309_v38 = vld [vmem:[%s10473_s6 + $0x10] sm:$0xff]  }
 0x1e9   :  { %v8442_v43 = vpop.eup %8441  ;;  %v2192_v46 = vmul.f32 %v8440_v41, %v8432_v45  ;;  %8453 = vrcp.f32 %v2183_v4  ;;  %v2203_v45 = vld [vmem:[#allocation4 + $0x1] sm:$0x1] }
 0x1ea   :  { %v8444_v48 = vpop.eup %8443  ;;  %v2189_v52 = vmul.f32 0.0, %v8442_v43  ;;  %8455 = vrcp.f32 %v2184_v47  ;;  %v2279_v47 = vld [vmem:[#allocation4 + $0x19] sm:$0x1] }
 0x1eb   :  { %v2190_v53 = vmul.f32 0.0, %v8444_v48 }
 0x1ec   :  { %v9722_v51 = vadd.f32 %v2191_v42, %v2189_v52 }
 0x1ed   :  { %v9724_v54 = vadd.f32 %v2192_v46, %v2190_v53  ;;  %v2204_v46 = vld [vmem:[#allocation4 + $0x9] sm:$0x1] }
 0x1ee   :  { %8457 = vtanh.f32 %v9722_v51  ;;  %v8446_v34 = vpop.eup %8445 }
 0x1ef   :  { %8459 = vtanh.f32 %v9724_v54 }
 0x1f3   :  { %v8448_v55 = vpop.eup %8447 }
 0x1f4   :  { %v8450_v56 = vpop.eup %8449  ;;  %v1887_v57 = vmul.f32 %v8448_v55, %v8446_v34 }
 0x1f5   :  { %v8452_v58 = vpop.eup %8451 }
 0x1f6   :  { %v1888_v59 = vmul.f32 %v8452_v58, %v8450_v56  ;;  %1890 = vst.msk [vmem:[#allocation2] sm:$0x1] %vm1889_vm3, %v1887_v57  ;;  %v2201_v60 = vpack.c.bf16 %v1887_v57, %v1887_v57  ;;  %v8454_v63 = vpop.eup %8453 }
 0x1f7   :  { %v8456_v2 = vpop.eup %8455 }
 0x1f8   :  { %1891 = vst.msk [vmem:[#allocation2 + $0x8] sm:$0x1] %vm1889_vm3, %v1888_v59  ;;  %v2202_v61 = vpack.c.bf16 %v1888_v59, %v1888_v59  ;;  %v2211_v7 = vunpack.c.l.b16 %v2201_v60 }
 0x1fa   :  { %v2212_v62 = vunpack.c.l.b16 %v2202_v61 }
 0x1fb   :  { %v8458_v5 = vpop.eup %8457 }
 0x1fc   :  { %v2213_v8 = vrot.slane %v2212_v62, 7  ;;  %v8460_v9 = vpop.eup %8459  ;;  %v2197_v14 = vmul.f32 %v8458_v5, %v8454_v63 }
 0x1fd   :  { %v2198_v19 = vmul.f32 %v8460_v9, %v8456_v2  ;;  %v2406_v2 = vld [vmem:[#allocation4 + $0x31] sm:$0x1]  ;;  %v2407_v9 = vld [vmem:[#allocation4 + $0x39] sm:$0x1] }
 0x1fe   :  { %v2215_v10 = vsel %vm2214_vm4, %v2213_v8, %v2211_v7  ;;  %2199 = vst.msk [vmem:[#allocation3] sm:$0x1] %vm1889_vm3, %v2197_v14  ;;  %v2520_v23 = vpack.c.bf16 %v2197_v14, %v2197_v14 }
 0x1ff   :  { %v2216_v18 = vpack.c.b16 %v2215_v10, %v2215_v10  ;;  %2200 = vst.msk [vmem:[#allocation3 + $0x8] sm:$0x1] %vm1889_vm3, %v2198_v19  ;;  %v2521_v20 = vpack.c.bf16 %v2198_v19, %v2198_v19 }
 0x200   :  { %v2530_v15 = vunpack.c.l.b16 %v2520_v23 }
 0x201   :  { %7763 = vmatmul.mubr.msk.bf16.vlgmr.msra.gmra.mxu0 %vm287_vm1, %v2216_v18  ;;  %7771 = vmatmul.mubr.msk.bf16.vlgmr.msra.gmra.mxu1 %vm287_vm1, %v2216_v18  ;;  %v2531_v22 = vunpack.c.l.b16 %v2521_v20 }
 0x202   :  { %7775 = vmatpush3.bf16.msra.mxu0 %v8294_v11  ;;  %7783 = vmatpush3.bf16.msra.mxu1 %v8295_v12 }
 0x203   :  { %7776 = vmatprep.subr.bf16.mxu0 %v9191_v0  ;;  %7784 = vmatprep.subr.bf16.mxu1 %v9191_v0  ;;  %v2532_v27 = vrot.slane %v2531_v22, 7 }
 0x204   :  { %7778 = vmatprep.mubr.msk.bf16.mxu0 %vm9192_vm0, %v9191_v0  ;;  %7786 = vmatprep.mubr.msk.bf16.mxu1 %vm9192_vm0, %v9191_v0 }
 0x205   :  { %v2533_v50 = vsel %vm2214_vm4, %v2532_v27, %v2530_v15  ;;  %v2522_v15 = vld [vmem:[#allocation5 + $0x1] sm:$0x1] }
 0x206   :  { %7777 = vmatpush3.bf16.msra.mxu0 %v8296_v21  ;;  %7785 = vmatpush3.bf16.msra.mxu1 %v8297_v17  ;;  %v2534_v29 = vpack.c.b16 %v2533_v50, %v2533_v50  ;;  %v2342_v17 = vld [vmem:[#allocation4 + $0x21] sm:$0x1] }
 0x207   :  { %7790 = vmatprep.subr.bf16.mxu0 %v9191_v0  ;;  %7798 = vmatprep.subr.bf16.mxu1 %v9191_v0 }
 0x209   :  { %7779 = vmatmul.mubr.msk.bf16.vlgmr.msra.gmra.mxu0 %vm287_vm1, %v2216_v18  ;;  %7787 = vmatmul.mubr.msk.bf16.vlgmr.msra.gmra.mxu1 %vm287_vm1, %v2216_v18 }
 0x20a   :  { %7791 = vmatpush3.bf16.msra.mxu0 %v8298_v24  ;;  %7799 = vmatpush3.bf16.msra.mxu1 %v8299_v26  ;;  %v2343_v24 = vld [vmem:[#allocation4 + $0x29] sm:$0x1] }
 0x20b   :  { %7792 = vmatprep.subr.bf16.mxu0 %v9191_v0  ;;  %7800 = vmatprep.subr.bf16.mxu1 %v9191_v0 }
 0x20c   :  { %7794 = vmatprep.mubr.msk.bf16.mxu0 %vm9192_vm0, %v9191_v0  ;;  %7802 = vmatprep.mubr.msk.bf16.mxu1 %vm9192_vm0, %v9191_v0 }
 0x20e   :  { %7793 = vmatpush3.bf16.msra.mxu0 %v8300_v28  ;;  %7801 = vmatpush3.bf16.msra.mxu1 %v8301_v44 }
 0x20f   :  { %7806 = vmatprep.subr.bf16.mxu0 %v9191_v0  ;;  %7814 = vmatprep.subr.bf16.mxu1 %v9191_v0 }
 0x211   :  { %7795 = vmatmul.mubr.msk.bf16.vlgmr.msra.gmra.mxu0 %vm287_vm1, %v2534_v29  ;;  %7803 = vmatmul.mubr.msk.bf16.vlgmr.msra.gmra.mxu1 %vm287_vm1, %v2534_v29 }
 0x212   :  { %7807 = vmatpush3.bf16.msra.mxu0 %v8302_v30  ;;  %7815 = vmatpush3.bf16.msra.mxu1 %v8303_v31 }
 0x213   :  { %7808 = vmatprep.subr.bf16.mxu0 %v9191_v0  ;;  %7816 = vmatprep.subr.bf16.mxu1 %v9191_v0 }
 0x214   :  { %7810 = vmatprep.mubr.msk.bf16.mxu0 %vm9192_vm0, %v9191_v0  ;;  %7818 = vmatprep.mubr.msk.bf16.mxu1 %vm9192_vm0, %v9191_v0 }
 0x216   :  { %7809 = vmatpush3.bf16.msra.mxu0 %v8304_v32  ;;  %7817 = vmatpush3.bf16.msra.mxu1 %v8305_v25  ;;  %v2523_v32 = vld [vmem:[#allocation5 + $0x9] sm:$0x1]  ;;  %v2596_v25 = vld [vmem:[#allocation5 + $0x11] sm:$0x1] }
 0x217   :  { %7822 = vmatprep.subr.bf16.mxu0 %v9191_v0  ;;  %7830 = vmatprep.subr.bf16.mxu1 %v9191_v0 }
 0x219   :  { %7811 = vmatmul.mubr.msk.bf16.vlgmr.msra.gmra.mxu0 %vm287_vm1, %v2534_v29  ;;  %7819 = vmatmul.mubr.msk.bf16.vlgmr.msra.gmra.mxu1 %vm287_vm1, %v2534_v29 }
 0x21a   :  { %7826 = vmatprep.mubr.msk.bf16.mxu0 %vm9192_vm0, %v9191_v0  ;;  %7834 = vmatprep.mubr.msk.bf16.mxu1 %vm9192_vm0, %v9191_v0 }
 0x21b   :  { %7823 = vmatpush3.bf16.msra.mxu0 %v8306_v35  ;;  %7831 = vmatpush3.bf16.msra.mxu1 %v8307_v49 }
 0x21c   :  { %7824 = vmatprep.subr.bf16.mxu0 %v9191_v0  ;;  %7832 = vmatprep.subr.bf16.mxu1 %v9191_v0 }
 0x21f   :  { %7825 = vmatpush3.bf16.msra.mxu0 %v8308_v36  ;;  %7833 = vmatpush3.bf16.msra.mxu1 %v8309_v38 }
 0x220   :  { %7838 = vmatprep.subr.bf16.mxu0 %v9191_v0  ;;  %7846 = vmatprep.subr.bf16.mxu1 %v9191_v0 }
 0x2c1   :  { %v2266_v3 = vpop.f32.mrf.mxu0  ;;  %v2330_v40 = vpop.f32.mrf.mxu1 }
 0x2c2   :  { %v2273_v41 = vrot.slane %v2266_v3, 1  ;;  %v2276_v42 = vadd.f32 %v2266_v3, %v2203_v45  ;;  %v2337_v4 = vrot.slane %v2330_v40, 1  ;;  %v2340_v43 = vadd.f32 %v2330_v40, %v2278_v39  ;;  %v2597_v3 = vld [vmem:[#allocation5 + $0x19] sm:$0x1] }
 0x2c3   :  { %v7764_v48 = vpop.f32.mrf.mxu0  ;;  %v7772_v52 = vpop.f32.mrf.mxu1 }
 0x2c4   :  { %v2277_v53 = vadd.f32 %v2273_v41, %v2204_v46  ;;  %v7109_v34 = vmul.f32 -1.442695, %v2276_v42  ;;  %v2341_v55 = vadd.f32 %v2337_v4, %v2279_v47  ;;  %v7111_v56 = vmul.f32 -1.442695, %v2340_v43 }
 0x2c5   :  { %v2269_v57 = vpop.f32.mrf.mxu0  ;;  %v2333_v58 = vpop.f32.mrf.mxu1 }
 0x2c6   :  { %8461 = vpow2.f32 %v7109_v34  ;;  %v7110_v59 = vmul.f32 -1.442695, %v2277_v53  ;;  %v7112_v60 = vmul.f32 -1.442695, %v2341_v55 }
 0x2c7   :  { %8463 = vpow2.f32 %v7111_v56  ;;  %v7765_v61 = vpop.f32.mrf.mxu0  ;;  %v7773_v62 = vpop.f32.mrf.mxu1 }
 0x2c8   :  { %8465 = vpow2.f32 %v7110_v59 }
 0x2c9   :  { %8467 = vpow2.f32 %v7112_v60  ;;  %v2394_v63 = vpop.f32.mrf.mxu0  ;;  %v2458_v7 = vpop.f32.mrf.mxu1 }
 0x2ca   :  { %v2465_v8 = vrot.slane %v2458_v7, 1  ;;  %v2468_v5 = vadd.f32 %v2458_v7, %v2406_v2  ;;  %v2401_v18 = vrot.slane %v2394_v63, 1  ;;  %v2404_v26 = vadd.f32 %v2394_v63, %v2342_v17 }
 0x2cb   :  { %v7780_v10 = vpop.f32.mrf.mxu0  ;;  %v7788_v11 = vpop.f32.mrf.mxu1 }
 0x2cc   :  { %v2469_v12 = vadd.f32 %v2465_v8, %v2407_v9  ;;  %v7113_v14 = vmul.f32 -1.442695, %v2468_v5  ;;  %v2405_v27 = vadd.f32 %v2401_v18, %v2343_v24  ;;  %v2660_v5 = vld [vmem:[#allocation5 + $0x21] sm:$0x1]  ;;  %v2724_v10 = vld [vmem:[#allocation5 + $0x31] sm:$0x1] }
 0x2cd   :  { %v2397_v19 = vpop.f32.mrf.mxu0  ;;  %v2461_v20 = vpop.f32.mrf.mxu1 }
 0x2ce   :  { %v7114_v21 = vmul.f32 -1.442695, %v2469_v12  ;;  %8469 = vpow2.f32 %v7113_v14  ;;  %v2725_v12 = vld [vmem:[#allocation5 + $0x39] sm:$0x1] }
 0x2cf   :  { %v7781_v22 = vpop.f32.mrf.mxu0  ;;  %v7789_v23 = vpop.f32.mrf.mxu1 }
 0x2d0   :  { %8471 = vpow2.f32 %v7114_v21  ;;  %v2661_v23 = vld [vmem:[#allocation5 + $0x29] sm:$0x1] }
 0x2d1   :  { %v2584_v28 = vpop.f32.mrf.mxu0  ;;  %v2648_v44 = vpop.f32.mrf.mxu1  ;;  %8473 = vtanh.f32 %v2404_v26 }
 0x2d2   :  { %v2591_v50 = vrot.slane %v2584_v28, 1  ;;  %v2594_v29 = vadd.f32 %v2584_v28, %v2522_v15  ;;  %v2655_v30 = vrot.slane %v2648_v44, 1  ;;  %v2658_v39 = vadd.f32 %v2648_v44, %v2596_v25 }
 0x2d3   :  { %v8462_v31 = vpop.eup %8461  ;;  %v7796_v35 = vpop.f32.mrf.mxu0  ;;  %8475 = vtanh.f32 %v2405_v27 }
 0x2d4   :  { %v7804_v49 = vpop.f32.mrf.mxu1  ;;  %v8464_v36 = vpop.eup %8463  ;;  %v2476_v38 = vadd.f32 1.0, %v8462_v31  ;;  %v2595_v45 = vadd.f32 %v2591_v50, %v2523_v32  ;;  %v2659_v42 = vadd.f32 %v2655_v30, %v2597_v3  ;;  %v7127_v48 = vmul.f32 -1.442695, %v2594_v29 }
 0x2d5   :  { %v8466_v40 = vpop.eup %8465  ;;  %v2488_v41 = vadd.f32 1.0, %v8464_v36  ;;  %v2587_v4 = vpop.f32.mrf.mxu0  ;;  %v7129_v56 = vmul.f32 -1.442695, %v2658_v39 }
 0x2d6   :  { %v2651_v43 = vpop.f32.mrf.mxu1  ;;  %v8468_v46 = vpop.eup %8467  ;;  %v2477_v47 = vadd.f32 1.0, %v8466_v40  ;;  %8477 = vrcp.f32 %v2476_v38  ;;  %v7128_v53 = vmul.f32 -1.442695, %v2595_v45  ;;  %v7130_v57 = vmul.f32 -1.442695, %v2659_v42 }
 0x2d7   :  { %v2489_v52 = vadd.f32 1.0, %v8468_v46  ;;  %8479 = vrcp.f32 %v2488_v41  ;;  %v7797_v34 = vpop.f32.mrf.mxu0 }
 0x2d8   :  { %v7805_v55 = vpop.f32.mrf.mxu1  ;;  %8481 = vrcp.f32 %v2477_v47 }
 0x2d9   :  { %8483 = vrcp.f32 %v2489_v52  ;;  %v2712_v58 = vpop.f32.mrf.mxu0 }
 0x2da   :  { %v2776_v59 = vpop.f32.mrf.mxu1  ;;  %8485 = vpow2.f32 %v7127_v48  ;;  %v2719_v9 = vrot.slane %v2712_v58, 1  ;;  %v2722_v11 = vadd.f32 %v2712_v58, %v2660_v5 }
 0x2db   :  { %8487 = vpow2.f32 %v7128_v53  ;;  %v7812_v60 = vpop.f32.mrf.mxu0  ;;  %v2783_v62 = vrot.slane %v2776_v59, 1  ;;  %v8470_v63 = vpop.eup %8469  ;;  %v2786_v14 = vadd.f32 %v2776_v59, %v2724_v10 }
 0x2dc   :  { %v7820_v61 = vpop.f32.mrf.mxu1  ;;  %8489 = vpow2.f32 %v7129_v56  ;;  %v2502_v20 = vadd.f32 1.0, %v8470_v63  ;;  %v2723_v26 = vadd.f32 %v2719_v9, %v2661_v23 }
 0x2dd   :  { %8491 = vpow2.f32 %v7130_v57  ;;  %v2715_v2 = vpop.f32.mrf.mxu0  ;;  %v8472_v8 = vpop.eup %8471  ;;  %v2787_v21 = vadd.f32 %v2783_v62, %v2725_v12  ;;  %v7131_v15 = vmul.f32 -1.442695, %v2786_v14  ;;  %v8310_v14 = vld [vmem:[%s10473_s6 + $0x28] sm:$0xff]  }
 0x2de   :  { %v2779_v7 = vpop.f32.mrf.mxu1  ;;  %v8474_v17 = vpop.eup %8473  ;;  %v2503_v22 = vadd.f32 1.0, %v8472_v8  ;;  %8493 = vtanh.f32 %v2722_v11 }
 0x2df   :  { %v7813_v18 = vpop.f32.mrf.mxu0  ;;  %8495 = vrcp.f32 %v2502_v20  ;;  %v7132_v50 = vmul.f32 -1.442695, %v2787_v21  ;;  %v8313_v20 = vld [vmem:[%s10473_s6 + $0x30] sm:$0xff]   ;;  %v8314_v21 = vld [vmem:[#allocation17 + $0x8] sm:$0xff]  }
 0x2e0   :  { %v7821_v19 = vpop.f32.mrf.mxu1  ;;  %v8476_v24 = vpop.eup %8475  ;;  %8497 = vrcp.f32 %v2503_v22 }
 0x2e1   :  { %8499 = vtanh.f32 %v2723_v26  ;;  %v8312_v19 = vld [vmem:[%s10473_s6 + $0x20] sm:$0xff]  }
 0x2e2   :  { %8501 = vpow2.f32 %v7131_v15  ;;  %v8317_v15 = vld [vmem:[#allocation17 + $0x10] sm:$0xff]  }
 0x2e3   :  { %v8478_v27 = vpop.eup %8477  ;;  %8503 = vpow2.f32 %v7132_v50 }
 0x2e4   :  { %v8480_v28 = vpop.eup %8479  ;;  %v2510_v44 = vmul.f32 %v8478_v27, %v8474_v17  ;;  %v8315_v17 = vld [vmem:[#allocation17 + $0x18] sm:$0xff]   ;;  %v8316_v27 = vld [vmem:[#allocation17] sm:$0xff]  }
 0x2e5   :  { %v8482_v29 = vpop.eup %8481  ;;  %v2508_v30 = vmul.f32 %v8480_v28, %v9716_v37 }
 0x2e6   :  { %v8484_v31 = vpop.eup %8483  ;;  %v2511_v32 = vmul.f32 %v8482_v29, %v8476_v24 }
 0x2e7   :  { %v8486_v25 = vpop.eup %8485  ;;  %v2509_v35 = vmul.f32 %v8484_v31, %v9718_v33  ;;  %v9800_v49 = vadd.f32 %v2510_v44, %v2508_v30 }
 0x2e8   :  { %v8488_v36 = vpop.eup %8487  ;;  %v2794_v38 = vadd.f32 1.0, %v8486_v25 }
 0x2e9   :  { %v8490_v45 = vpop.eup %8489  ;;  %v9802_v3 = vadd.f32 %v2511_v32, %v2509_v35  ;;  %8505 = vtanh.f32 %v9800_v49  ;;  %v2795_v39 = vadd.f32 1.0, %v8488_v36  ;;  %v8318_v35 = vld [vmem:[#allocation17 + $0x28] sm:$0xff]   ;;  %v8319_v36 = vld [vmem:[#allocation17 + $0x38] sm:$0xff]  }
 0x2ea   :  { %v8492_v37 = vpop.eup %8491  ;;  %8507 = vrcp.f32 %v2794_v38  ;;  %v2806_v40 = vadd.f32 1.0, %v8490_v45  ;;  %v8320_v45 = vld [vmem:[#allocation17 + $0x20] sm:$0xff]  }
 0x2eb   :  { %8509 = vtanh.f32 %v9802_v3  ;;  %v2807_v41 = vadd.f32 1.0, %v8492_v37  ;;  %v8494_v33 = vpop.eup %8493  ;;  %v8322_v37 = vld [vmem:[%s10473_s6 + $0x8] sm:$0xff]  }
 0x2ec   :  { %8511 = vrcp.f32 %v2795_v39  ;;  %v8496_v42 = vpop.eup %8495  ;;  %v8321_v39 = vld [vmem:[#allocation17 + $0x30] sm:$0xff]  }
 0x2ed   :  { %8513 = vrcp.f32 %v2806_v40  ;;  %v8498_v4 = vpop.eup %8497  ;;  %v8323_v40 = vld [vmem:[%s10473_s6 + $0x18] sm:$0xff]  }
 0x2ee   :  { %8515 = vrcp.f32 %v2807_v41  ;;  %v8500_v43 = vpop.eup %8499  ;;  %v8324_v41 = vld [vmem:[%s10473_s6] sm:$0xff]  }
 0x2ef   :  { %v8502_v46 = vpop.eup %8501 }
 0x2f0   :  { %v8504_v47 = vpop.eup %8503  ;;  %v2820_v57 = vadd.f32 1.0, %v8502_v46 }
 0x2f1   :  { %v2821_v61 = vadd.f32 1.0, %v8504_v47 }
 0x2f2   :  { %8517 = vrcp.f32 %v2820_v57 }
 0x2f3   :  { %8519 = vrcp.f32 %v2821_v61 }
 0x2f6   :  { %v8506_v48 = vpop.eup %8505 }
 0x2f7   :  { %v8508_v52 = vpop.eup %8507  ;;  %v2516_v53 = vmul.f32 %v8506_v48, %v8496_v42  ;;  %v2840_v42 = vld [vmem:[#allocation4 + $0x2] sm:$0x1] }
 0x2f8   :  { %v8510_v34 = vpop.eup %8509  ;;  %v2828_v56 = vmul.f32 %v8508_v52, %v8494_v33  ;;  %v8325_v33 = vld [vmem:[%s10473_s6 + $0x10] sm:$0xff]  }
 0x2f9   :  { %v8512_v55 = vpop.eup %8511  ;;  %v2517_v58 = vmul.f32 %v8510_v34, %v8498_v4  ;;  %2518 = vst.msk [vmem:[#allocation2 + $0x1] sm:$0x1] %vm1889_vm3, %v2516_v53  ;;  %v2838_v2 = vpack.c.bf16 %v2516_v53, %v2516_v53  ;;  %v2841_v34 = vld [vmem:[#allocation4 + $0xa] sm:$0x1] }
 0x2fa   :  { %v8514_v59 = vpop.eup %8513  ;;  %v2829_v60 = vmul.f32 %v8512_v55, %v8500_v43  ;;  %v2914_v43 = vld [vmem:[#allocation4 + $0x12] sm:$0x1]  ;;  %v2915_v55 = vld [vmem:[#allocation4 + $0x1a] sm:$0x1] }
 0x2fb   :  { %v8516_v62 = vpop.eup %8515  ;;  %v2826_v63 = vmul.f32 %v8514_v59, %v9722_v51  ;;  %2519 = vst.msk [vmem:[#allocation2 + $0x9] sm:$0x1] %vm1889_vm3, %v2517_v58  ;;  %v2839_v7 = vpack.c.bf16 %v2517_v58, %v2517_v58  ;;  %v2848_v11 = vunpack.c.l.b16 %v2838_v2 }
 0x2fc   :  { %v2827_v8 = vmul.f32 %v8516_v62, %v9724_v54  ;;  %v8311_v54 = vld [vmem:[%s10473_s6 + $0x38] sm:$0xff]  }
 0x2fd   :  { %v9810_v5 = vadd.f32 %v2828_v56, %v2826_v63  ;;  %v2849_v9 = vunpack.c.l.b16 %v2839_v7 }
 0x2fe   :  { %v9812_v10 = vadd.f32 %v2829_v60, %v2827_v8 }
 0x2ff   :  { %8521 = vtanh.f32 %v9810_v5  ;;  %v2850_v12 = vrot.slane %v2849_v9, 7  ;;  %v8518_v22 = vpop.eup %8517 }
 0x300   :  { %8523 = vtanh.f32 %v9812_v10  ;;  %v8520_v23 = vpop.eup %8519 }
 0x301   :  { %v2851_v51 = vsel %vm2214_vm4, %v2850_v12, %v2848_v11  ;;  %v3042_v12 = vld [vmem:[#allocation4 + $0x32] sm:$0x1] }
 0x302   :  { %v2852_v18 = vpack.c.b16 %v2851_v51, %v2851_v51 }
 0x304   :  { %7827 = vmatmul.mubr.msk.bf16.vlgmr.msra.gmra.mxu0 %vm287_vm1, %v2852_v18  ;;  %7835 = vmatmul.mubr.msk.bf16.vlgmr.msra.gmra.mxu1 %vm287_vm1, %v2852_v18 }
 0x305   :  { %7839 = vmatpush3.bf16.msra.mxu0 %v8310_v14  ;;  %7847 = vmatpush3.bf16.msra.mxu1 %v8311_v54 }
 0x306   :  { %7840 = vmatprep.subr.bf16.mxu0 %v9191_v0  ;;  %7848 = vmatprep.subr.bf16.mxu1 %v9191_v0 }
 0x307   :  { %7842 = vmatprep.mubr.msk.bf16.mxu0 %vm9192_vm0, %v9191_v0  ;;  %7850 = vmatprep.mubr.msk.bf16.mxu1 %vm9192_vm0, %v9191_v0 }
 0x309   :  { %7841 = vmatpush3.bf16.msra.mxu0 %v8312_v19  ;;  %7849 = vmatpush3.bf16.msra.mxu1 %v8313_v20 }
 0x30a   :  { %7854 = vmatprep.subr.bf16.mxu0 %v9191_v0  ;;  %7862 = vmatprep.subr.bf16.mxu1 %v9191_v0 }
 0x30c   :  { %v8522_v24 = vpop.eup %8521  ;;  %7843 = vmatmul.mubr.msk.bf16.vlgmr.msra.gmra.mxu0 %vm287_vm1, %v2852_v18  ;;  %7851 = vmatmul.mubr.msk.bf16.vlgmr.msra.gmra.mxu1 %vm287_vm1, %v2852_v18  ;;  %v3043_v18 = vld [vmem:[#allocation4 + $0x3a] sm:$0x1] }
 0x30d   :  { %v8524_v26 = vpop.eup %8523  ;;  %7855 = vmatpush3.bf16.msra.mxu0 %v8314_v21  ;;  %7863 = vmatpush3.bf16.msra.mxu1 %v8315_v17  ;;  %v2834_v28 = vmul.f32 %v8522_v24, %v8518_v22 }
 0x30e   :  { %7856 = vmatprep.subr.bf16.mxu0 %v9191_v0  ;;  %7864 = vmatprep.subr.bf16.mxu1 %v9191_v0  ;;  %v2835_v44 = vmul.f32 %v8524_v26, %v8520_v23 }
 0x30f   :  { %7858 = vmatprep.mubr.msk.bf16.mxu0 %vm9192_vm0, %v9191_v0  ;;  %7866 = vmatprep.mubr.msk.bf16.mxu1 %vm9192_vm0, %v9191_v0  ;;  %2836 = vst.msk [vmem:[#allocation3 + $0x1] sm:$0x1] %vm1889_vm3, %v2834_v28  ;;  %v3156_v50 = vpack.c.bf16 %v2834_v28, %v2834_v28 }
 0x310   :  { %2837 = vst.msk [vmem:[#allocation3 + $0x9] sm:$0x1] %vm1889_vm3, %v2835_v44  ;;  %v3157_v29 = vpack.c.bf16 %v2835_v44, %v2835_v44  ;;  %v2979_v44 = vld [vmem:[#allocation4 + $0x2a] sm:$0x1] }
 0x311   :  { %7857 = vmatpush3.bf16.msra.mxu0 %v8316_v27  ;;  %7865 = vmatpush3.bf16.msra.mxu1 %v8317_v15  ;;  %v3166_v31 = vunpack.c.l.b16 %v3156_v50  ;;  %v2978_v27 = vld [vmem:[#allocation4 + $0x22] sm:$0x1] }
 0x312   :  { %v3167_v30 = vunpack.c.l.b16 %v3157_v29  ;;  %7870 = vmatprep.subr.bf16.mxu0 %v9191_v0  ;;  %7878 = vmatprep.subr.bf16.mxu1 %v9191_v0 }
 0x314   :  { %v3168_v32 = vrot.slane %v3167_v30, 7 }
 0x316   :  { %v3169_v25 = vsel %vm2214_vm4, %v3168_v32, %v3166_v31 }
 0x317   :  { %v3170_v38 = vpack.c.b16 %v3169_v25, %v3169_v25 }
 0x319   :  { %7859 = vmatmul.mubr.msk.bf16.vlgmr.msra.gmra.mxu0 %vm287_vm1, %v3170_v38  ;;  %7867 = vmatmul.mubr.msk.bf16.vlgmr.msra.gmra.mxu1 %vm287_vm1, %v3170_v38 }
 0x31a   :  { %7871 = vmatpush3.bf16.msra.mxu0 %v8318_v35  ;;  %7879 = vmatpush3.bf16.msra.mxu1 %v8319_v36 }
 0x31b   :  { %7872 = vmatprep.subr.bf16.mxu0 %v9191_v0  ;;  %7880 = vmatprep.subr.bf16.mxu1 %v9191_v0 }
 0x31c   :  { %7874 = vmatprep.mubr.msk.bf16.mxu0 %vm9192_vm0, %v9191_v0  ;;  %7882 = vmatprep.mubr.msk.bf16.mxu1 %vm9192_vm0, %v9191_v0 }
 0x31e   :  { %7873 = vmatpush3.bf16.msra.mxu0 %v8320_v45  ;;  %7881 = vmatpush3.bf16.msra.mxu1 %v8321_v39  ;;  %v3158_v45 = vld [vmem:[#allocation5 + $0x2] sm:$0x1] }
 0x31f   :  { %7886 = vmatprep.subr.bf16.mxu0 %v9191_v0  ;;  %7894 = vmatprep.subr.bf16.mxu1 %v9191_v0 }
 0x321   :  { %7875 = vmatmul.mubr.msk.bf16.vlgmr.msra.gmra.mxu0 %vm287_vm1, %v3170_v38  ;;  %7883 = vmatmul.mubr.msk.bf16.vlgmr.msra.gmra.mxu1 %vm287_vm1, %v3170_v38 }
 0x322   :  { %7890 = vmatprep.mubr.msk.bf16.mxu0 %vm9192_vm0, %v9191_v0  ;;  %7898 = vmatprep.mubr.msk.bf16.mxu1 %vm9192_vm0, %v9191_v0 }
 0x323   :  { %7887 = vmatpush3.bf16.msra.mxu0 %v8322_v37  ;;  %7895 = vmatpush3.bf16.msra.mxu1 %v8323_v40 }
 0x324   :  { %7888 = vmatprep.subr.bf16.mxu0 %v9191_v0  ;;  %7896 = vmatprep.subr.bf16.mxu1 %v9191_v0 }
 0x327   :  { %7889 = vmatpush3.bf16.msra.mxu0 %v8324_v41  ;;  %7897 = vmatpush3.bf16.msra.mxu1 %v8325_v33 }
 0x328   :  { %7902 = vmatprep.subr.bf16.mxu0 %v9191_v0  ;;  %7910 = vmatprep.subr.bf16.mxu1 %v9191_v0 }
 0x3c4   :  { %v2902_v4 = vpop.f32.mrf.mxu0  ;;  %v2966_v46 = vpop.f32.mrf.mxu1 }
 0x3c5   :  { %v2909_v47 = vrot.slane %v2902_v4, 1  ;;  %v2912_v48 = vadd.f32 %v2902_v4, %v2840_v42  ;;  %v2973_v52 = vrot.slane %v2966_v46, 1  ;;  %v2976_v53 = vadd.f32 %v2966_v46, %v2914_v43  ;;  %v3232_v42 = vld [vmem:[#allocation5 + $0x12] sm:$0x1]  ;;  %v3159_v4 = vld [vmem:[#allocation5 + $0xa] sm:$0x1] }
 0x3c6   :  { %v7828_v56 = vpop.f32.mrf.mxu0  ;;  %v7836_v57 = vpop.f32.mrf.mxu1 }
 0x3c7   :  { %v2913_v58 = vadd.f32 %v2909_v47, %v2841_v34  ;;  %v7157_v59 = vmul.f32 -1.442695, %v2912_v48  ;;  %v2977_v60 = vadd.f32 %v2973_v52, %v2915_v55  ;;  %v7159_v61 = vmul.f32 -1.442695, %v2976_v53  ;;  %v3233_v34 = vld [vmem:[#allocation5 + $0x1a] sm:$0x1] }
 0x3c8   :  { %v2905_v62 = vpop.f32.mrf.mxu0  ;;  %v2969_v63 = vpop.f32.mrf.mxu1 }
 0x3c9   :  { %8525 = vpow2.f32 %v7157_v59  ;;  %v7158_v2 = vmul.f32 -1.442695, %v2913_v58  ;;  %v7160_v7 = vmul.f32 -1.442695, %v2977_v60 }
 0x3ca   :  { %8527 = vpow2.f32 %v7159_v61  ;;  %v7829_v8 = vpop.f32.mrf.mxu0  ;;  %v7837_v9 = vpop.f32.mrf.mxu1 }
 0x3cb   :  { %8529 = vpow2.f32 %v7158_v2 }
 0x3cc   :  { %8531 = vpow2.f32 %v7160_v7  ;;  %v3030_v11 = vpop.f32.mrf.mxu0  ;;  %v3094_v51 = vpop.f32.mrf.mxu1 }
 0x3cd   :  { %v3101_v14 = vrot.slane %v3094_v51, 1  ;;  %v3104_v54 = vadd.f32 %v3094_v51, %v3042_v12  ;;  %v3037_v22 = vrot.slane %v3030_v11, 1  ;;  %v3040_v50 = vadd.f32 %v3030_v11, %v2978_v27  ;;  %v3360_v11 = vld [vmem:[#allocation5 + $0x32] sm:$0x1] }
 0x3ce   :  { %v7844_v19 = vpop.f32.mrf.mxu0  ;;  %v7852_v20 = vpop.f32.mrf.mxu1 }
 0x3cf   :  { %v3105_v21 = vadd.f32 %v3101_v14, %v3043_v18  ;;  %v7161_v17 = vmul.f32 -1.442695, %v3104_v54  ;;  %v3041_v29 = vadd.f32 %v3037_v22, %v2979_v44 }
 0x3d0   :  { %v3033_v23 = vpop.f32.mrf.mxu0  ;;  %v3097_v24 = vpop.f32.mrf.mxu1 }
 0x3d1   :  { %v7162_v26 = vmul.f32 -1.442695, %v3105_v21  ;;  %8533 = vpow2.f32 %v7161_v17  ;;  %v3296_v21 = vld [vmem:[#allocation5 + $0x22] sm:$0x1]  ;;  %v3361_v17 = vld [vmem:[#allocation5 + $0x3a] sm:$0x1] }
 0x3d2   :  { %v7845_v15 = vpop.f32.mrf.mxu0  ;;  %v7853_v28 = vpop.f32.mrf.mxu1  ;;  %v3297_v23 = vld [vmem:[#allocation5 + $0x2a] sm:$0x1] }
 0x3d3   :  { %8535 = vpow2.f32 %v7162_v26 }
 0x3d4   :  { %8537 = vtanh.f32 %v3040_v50 }
 0x3d5   :  { %8539 = vtanh.f32 %v3041_v29 }
 0x3d6   :  { %v8526_v30 = vpop.eup %8525 }
 0x3d7   :  { %v8528_v31 = vpop.eup %8527  ;;  %v3112_v32 = vadd.f32 1.0, %v8526_v30 }
 0x3d8   :  { %v8530_v25 = vpop.eup %8529  ;;  %v3124_v35 = vadd.f32 1.0, %v8528_v31 }
 0x3d9   :  { %v8532_v36 = vpop.eup %8531  ;;  %v3113_v38 = vadd.f32 1.0, %v8530_v25  ;;  %8541 = vrcp.f32 %v3112_v32  ;;  %v3220_v39 = vpop.f32.mrf.mxu0 }
 0x3da   :  { %v3284_v37 = vpop.f32.mrf.mxu1  ;;  %v3125_v40 = vadd.f32 1.0, %v8532_v36  ;;  %8543 = vrcp.f32 %v3124_v35  ;;  %v3227_v41 = vrot.slane %v3220_v39, 1  ;;  %v3230_v33 = vadd.f32 %v3220_v39, %v3158_v45 }
 0x3db   :  { %8545 = vrcp.f32 %v3113_v38  ;;  %v3291_v43 = vrot.slane %v3284_v37, 1  ;;  %v3294_v46 = vadd.f32 %v3284_v37, %v3232_v42  ;;  %v7860_v47 = vpop.f32.mrf.mxu0 }
 0x3dc   :  { %v7868_v48 = vpop.f32.mrf.mxu1  ;;  %8547 = vrcp.f32 %v3125_v40  ;;  %v3231_v52 = vadd.f32 %v3227_v41, %v3159_v4  ;;  %v7175_v53 = vmul.f32 -1.442695, %v3230_v33 }
 0x3dd   :  { %v3295_v55 = vadd.f32 %v3291_v43, %v3233_v34  ;;  %v7177_v56 = vmul.f32 -1.442695, %v3294_v46  ;;  %v3223_v57 = vpop.f32.mrf.mxu0 }
 0x3de   :  { %v3287_v58 = vpop.f32.mrf.mxu1  ;;  %8549 = vpow2.f32 %v7175_v53  ;;  %v7176_v59 = vmul.f32 -1.442695, %v3231_v52  ;;  %v8534_v63 = vpop.eup %8533 }
 0x3df   :  { %8551 = vpow2.f32 %v7177_v56  ;;  %v7178_v60 = vmul.f32 -1.442695, %v3295_v55  ;;  %v7861_v61 = vpop.f32.mrf.mxu0  ;;  %v3138_v51 = vadd.f32 1.0, %v8534_v63 }
 0x3e0   :  { %v7869_v62 = vpop.f32.mrf.mxu1  ;;  %8553 = vpow2.f32 %v7176_v59  ;;  %v8536_v2 = vpop.eup %8535 }
 0x3e1   :  { %8555 = vpow2.f32 %v7178_v60  ;;  %v3348_v7 = vpop.f32.mrf.mxu0  ;;  %v8538_v19 = vpop.eup %8537  ;;  %v3139_v20 = vadd.f32 1.0, %v8536_v2 }
 0x3e2   :  { %v3412_v8 = vpop.f32.mrf.mxu1  ;;  %v3355_v9 = vrot.slane %v3348_v7, 1  ;;  %v8540_v22 = vpop.eup %8539  ;;  %v3358_v24 = vadd.f32 %v3348_v7, %v3296_v21  ;;  %8557 = vrcp.f32 %v3138_v51 }
 0x3e3   :  { %v3419_v12 = vrot.slane %v3412_v8, 1  ;;  %v3422_v14 = vadd.f32 %v3412_v8, %v3360_v11  ;;  %v7876_v54 = vpop.f32.mrf.mxu0  ;;  %8559 = vrcp.f32 %v3139_v20 }
 0x3e4   :  { %v7884_v18 = vpop.f32.mrf.mxu1  ;;  %v3359_v44 = vadd.f32 %v3355_v9, %v3297_v23  ;;  %8561 = vtanh.f32 %v3358_v24  ;;  %v8328_v23 = vld [vmem:[%s10473_s6 + $0x20] sm:$0xff]   ;;  %v8329_v24 = vld [vmem:[%s10473_s6 + $0x30] sm:$0xff]  }
 0x3e5   :  { %v3423_v26 = vadd.f32 %v3419_v12, %v3361_v17  ;;  %v3351_v27 = vpop.f32.mrf.mxu0  ;;  %v7179_v30 = vmul.f32 -1.442695, %v3422_v14 }
 0x3e6   :  { %v3415_v15 = vpop.f32.mrf.mxu1  ;;  %v8542_v28 = vpop.eup %8541  ;;  %8563 = vtanh.f32 %v3359_v44  ;;  %v8331_v27 = vld [vmem:[#allocation17 + $0x18] sm:$0xff]  }
 0x3e7   :  { %v8544_v50 = vpop.eup %8543  ;;  %v3146_v29 = vmul.f32 %v8542_v28, %v8538_v19  ;;  %v7877_v31 = vpop.f32.mrf.mxu0  ;;  %v7180_v45 = vmul.f32 -1.442695, %v3423_v26  ;;  %8565 = vpow2.f32 %v7179_v30  ;;  %v8330_v26 = vld [vmem:[#allocation17 + $0x8] sm:$0xff]  }
 0x3e8   :  { %v7885_v32 = vpop.f32.mrf.mxu1  ;;  %v8546_v25 = vpop.eup %8545  ;;  %v3144_v35 = vmul.f32 %v8544_v50, %v9800_v49  ;;  %v8332_v50 = vld [vmem:[#allocation17] sm:$0xff]  }
 0x3e9   :  { %v8548_v36 = vpop.eup %8547  ;;  %v3147_v38 = vmul.f32 %v8546_v25, %v8540_v22 }
 0x3ea   :  { %v3145_v39 = vmul.f32 %v8548_v36, %v9802_v3  ;;  %v9886_v37 = vadd.f32 %v3146_v29, %v3144_v35  ;;  %v8333_v29 = vld [vmem:[#allocation17 + $0x10] sm:$0xff]  }
 0x3eb   :  { %v8550_v40 = vpop.eup %8549 }
 0x3ec   :  { %v8552_v41 = vpop.eup %8551  ;;  %v9888_v33 = vadd.f32 %v3147_v38, %v3145_v39  ;;  %8567 = vtanh.f32 %v9886_v37  ;;  %v3430_v42 = vadd.f32 1.0, %v8550_v40  ;;  %v8334_v40 = vld [vmem:[#allocation17 + $0x28] sm:$0xff]  }
 0x3ed   :  { %v8554_v4 = vpop.eup %8553  ;;  %v3442_v49 = vadd.f32 1.0, %v8552_v41  ;;  %8569 = vpow2.f32 %v7180_v45  ;;  %v8335_v41 = vld [vmem:[#allocation17 + $0x38] sm:$0xff]  }
 0x3ee   :  { %v8556_v43 = vpop.eup %8555  ;;  %8571 = vtanh.f32 %v9888_v33  ;;  %v3431_v46 = vadd.f32 1.0, %v8554_v4  ;;  %v8336_v4 = vld [vmem:[#allocation17 + $0x20] sm:$0xff]  }
 0x3ef   :  { %8573 = vrcp.f32 %v3430_v42  ;;  %v3443_v3 = vadd.f32 1.0, %v8556_v43  ;;  %v8558_v47 = vpop.eup %8557  ;;  %v8338_v43 = vld [vmem:[%s10473_s6 + $0x8] sm:$0xff]  }
 0x3f0   :  { %8575 = vrcp.f32 %v3431_v46  ;;  %v8560_v48 = vpop.eup %8559  ;;  %v8339_v46 = vld [vmem:[%s10473_s6 + $0x18] sm:$0xff]  }
 0x3f1   :  { %8577 = vrcp.f32 %v3442_v49  ;;  %v8562_v52 = vpop.eup %8561  ;;  %v8337_v49 = vld [vmem:[#allocation17 + $0x30] sm:$0xff]  }
 0x3f2   :  { %8579 = vrcp.f32 %v3443_v3  ;;  %v8340_v3 = vld [vmem:[%s10473_s6] sm:$0xff]  }
 0x3f3   :  { %v8564_v53 = vpop.eup %8563 }
 0x3f4   :  { %v8566_v34 = vpop.eup %8565 }
 0x3f5   :  { %v3456_v63 = vadd.f32 1.0, %v8566_v34 }
 0x3f7   :  { %8581 = vrcp.f32 %v3456_v63 }
 0x3f9   :  { %v8568_v55 = vpop.eup %8567 }
 0x3fa   :  { %v8570_v56 = vpop.eup %8569  ;;  %v3152_v57 = vmul.f32 %v8568_v55, %v8558_v47  ;;  %v8341_v47 = vld [vmem:[%s10473_s6 + $0x10] sm:$0xff]  }
 0x3fb   :  { %v8572_v58 = vpop.eup %8571  ;;  %v3457_v8 = vadd.f32 1.0, %v8570_v56 }
 0x3fc   :  { %v8574_v59 = vpop.eup %8573  ;;  %v3153_v60 = vmul.f32 %v8572_v58, %v8560_v48  ;;  %3154 = vst.msk [vmem:[#allocation2 + $0x2] sm:$0x1] %vm1889_vm3, %v3152_v57  ;;  %v3474_v9 = vpack.c.bf16 %v3152_v57, %v3152_v57  ;;  %v3476_v48 = vld [vmem:[#allocation4 + $0x3] sm:$0x1] }
 0x3fd   :  { %v8576_v61 = vpop.eup %8575  ;;  %v3464_v62 = vmul.f32 %v8574_v59, %v8562_v52  ;;  %8583 = vrcp.f32 %v3457_v8  ;;  %v3477_v59 = vld [vmem:[#allocation4 + $0xb] sm:$0x1] }
 0x3fe   :  { %v8578_v2 = vpop.eup %8577  ;;  %v3465_v7 = vmul.f32 %v8576_v61, %v8564_v53  ;;  %3155 = vst.msk [vmem:[#allocation2 + $0xa] sm:$0x1] %vm1889_vm3, %v3153_v60  ;;  %v3475_v11 = vpack.c.bf16 %v3153_v60, %v3153_v60  ;;  %v3484_v20 = vunpack.c.l.b16 %v3474_v9  ;;  %v3550_v53 = vld [vmem:[#allocation4 + $0x13] sm:$0x1]  ;;  %v3551_v60 = vld [vmem:[#allocation4 + $0x1b] sm:$0x1] }
 0x3ff   :  { %v8580_v12 = vpop.eup %8579  ;;  %v3462_v51 = vmul.f32 %v8578_v2, %v9810_v5  ;;  %v8326_v5 = vld [vmem:[%s10473_s6 + $0x28] sm:$0xff]  }
 0x400   :  { %v3463_v14 = vmul.f32 %v8580_v12, %v9812_v10  ;;  %v3485_v54 = vunpack.c.l.b16 %v3475_v11  ;;  %v8327_v10 = vld [vmem:[%s10473_s6 + $0x38] sm:$0xff]  }
 0x401   :  { %v9896_v18 = vadd.f32 %v3464_v62, %v3462_v51 }
 0x402   :  { %v9898_v19 = vadd.f32 %v3465_v7, %v3463_v14  ;;  %v3486_v21 = vrot.slane %v3485_v54, 7 }
 0x403   :  { %8585 = vtanh.f32 %v9896_v18 }
 0x404   :  { %8587 = vtanh.f32 %v9898_v19  ;;  %v3487_v17 = vsel %vm2214_vm4, %v3486_v21, %v3484_v20  ;;  %v8582_v15 = vpop.eup %8581  ;;  %v3678_v21 = vld [vmem:[#allocation4 + $0x33] sm:$0x1] }
 0x405   :  { %v3488_v22 = vpack.c.b16 %v3487_v17, %v3487_v17 }
 0x407   :  { %7891 = vmatmul.mubr.msk.bf16.vlgmr.msra.gmra.mxu0 %vm287_vm1, %v3488_v22  ;;  %7899 = vmatmul.mubr.msk.bf16.vlgmr.msra.gmra.mxu1 %vm287_vm1, %v3488_v22 }
 0x408   :  { %7903 = vmatpush3.bf16.msra.mxu0 %v8326_v5  ;;  %7911 = vmatpush3.bf16.msra.mxu1 %v8327_v10 }
 0x409   :  { %7904 = vmatprep.subr.bf16.mxu0 %v9191_v0  ;;  %7912 = vmatprep.subr.bf16.mxu1 %v9191_v0 }
 0x40a   :  { %7906 = vmatprep.mubr.msk.bf16.mxu0 %vm9192_vm0, %v9191_v0  ;;  %7914 = vmatprep.mubr.msk.bf16.mxu1 %vm9192_vm0, %v9191_v0  ;;  %v8584_v28 = vpop.eup %8583 }
 0x40c   :  { %7905 = vmatpush3.bf16.msra.mxu0 %v8328_v23  ;;  %7913 = vmatpush3.bf16.msra.mxu1 %v8329_v24 }
 0x40d   :  { %7918 = vmatprep.subr.bf16.mxu0 %v9191_v0  ;;  %7926 = vmatprep.subr.bf16.mxu1 %v9191_v0 }
 0x40f   :  { %7907 = vmatmul.mubr.msk.bf16.vlgmr.msra.gmra.mxu0 %vm287_vm1, %v3488_v22  ;;  %7915 = vmatmul.mubr.msk.bf16.vlgmr.msra.gmra.mxu1 %vm287_vm1, %v3488_v22  ;;  %v3679_v22 = vld [vmem:[#allocation4 + $0x3b] sm:$0x1] }
 0x410   :  { %v8586_v44 = vpop.eup %8585  ;;  %7919 = vmatpush3.bf16.msra.mxu0 %v8330_v26  ;;  %7927 = vmatpush3.bf16.msra.mxu1 %v8331_v27 }
 0x411   :  { %v8588_v30 = vpop.eup %8587  ;;  %7920 = vmatprep.subr.bf16.mxu0 %v9191_v0  ;;  %7928 = vmatprep.subr.bf16.mxu1 %v9191_v0  ;;  %v3470_v31 = vmul.f32 %v8586_v44, %v8582_v15 }
 0x412   :  { %7922 = vmatprep.mubr.msk.bf16.mxu0 %vm9192_vm0, %v9191_v0  ;;  %7930 = vmatprep.mubr.msk.bf16.mxu1 %vm9192_vm0, %v9191_v0  ;;  %v3471_v32 = vmul.f32 %v8588_v30, %v8584_v28 }
 0x413   :  { %3472 = vst.msk [vmem:[#allocation3 + $0x2] sm:$0x1] %vm1889_vm3, %v3470_v31  ;;  %v3792_v25 = vpack.c.bf16 %v3470_v31, %v3470_v31 }
 0x414   :  { %7921 = vmatpush3.bf16.msra.mxu0 %v8332_v50  ;;  %7929 = vmatpush3.bf16.msra.mxu1 %v8333_v29  ;;  %3473 = vst.msk [vmem:[#allocation3 + $0xa] sm:$0x1] %vm1889_vm3, %v3471_v32  ;;  %v3793_v35 = vpack.c.bf16 %v3471_v32, %v3471_v32  ;;  %v3614_v29 = vld [vmem:[#allocation4 + $0x23] sm:$0x1]  ;;  %v3615_v32 = vld [vmem:[#allocation4 + $0x2b] sm:$0x1] }
 0x415   :  { %7934 = vmatprep.subr.bf16.mxu0 %v9191_v0  ;;  %7942 = vmatprep.subr.bf16.mxu1 %v9191_v0  ;;  %v3802_v38 = vunpack.c.l.b16 %v3792_v25 }
 0x416   :  { %v3803_v36 = vunpack.c.l.b16 %v3793_v35 }
 0x418   :  { %v3804_v45 = vrot.slane %v3803_v36, 7 }
 0x41a   :  { %v3805_v39 = vsel %vm2214_vm4, %v3804_v45, %v3802_v38 }
 0x41b   :  { %v3806_v42 = vpack.c.b16 %v3805_v39, %v3805_v39 }
 0x41d   :  { %7923 = vmatmul.mubr.msk.bf16.vlgmr.msra.gmra.mxu0 %vm287_vm1, %v3806_v42  ;;  %7931 = vmatmul.mubr.msk.bf16.vlgmr.msra.gmra.mxu1 %vm287_vm1, %v3806_v42 }
 0x41e   :  { %7935 = vmatpush3.bf16.msra.mxu0 %v8334_v40  ;;  %7943 = vmatpush3.bf16.msra.mxu1 %v8335_v41 }
 0x41f   :  { %7936 = vmatprep.subr.bf16.mxu0 %v9191_v0  ;;  %7944 = vmatprep.subr.bf16.mxu1 %v9191_v0 }
 0x420   :  { %7938 = vmatprep.mubr.msk.bf16.mxu0 %vm9192_vm0, %v9191_v0  ;;  %7946 = vmatprep.mubr.msk.bf16.mxu1 %vm9192_vm0, %v9191_v0 }
 0x422   :  { %7937 = vmatpush3.bf16.msra.mxu0 %v8336_v4  ;;  %7945 = vmatpush3.bf16.msra.mxu1 %v8337_v49  ;;  %v3794_v49 = vld [vmem:[#allocation5 + $0x3] sm:$0x1] }
 0x423   :  { %7950 = vmatprep.subr.bf16.mxu0 %v9191_v0  ;;  %7958 = vmatprep.subr.bf16.mxu1 %v9191_v0 }
 0x425   :  { %7939 = vmatmul.mubr.msk.bf16.vlgmr.msra.gmra.mxu0 %vm287_vm1, %v3806_v42  ;;  %7947 = vmatmul.mubr.msk.bf16.vlgmr.msra.gmra.mxu1 %vm287_vm1, %v3806_v42 }
 0x426   :  { %7954 = vmatprep.mubr.msk.bf16.mxu0 %vm9192_vm0, %v9191_v0  ;;  %7962 = vmatprep.mubr.msk.bf16.mxu1 %vm9192_vm0, %v9191_v0 }
 0x427   :  { %7951 = vmatpush3.bf16.msra.mxu0 %v8338_v43  ;;  %7959 = vmatpush3.bf16.msra.mxu1 %v8339_v46 }
 0x428   :  { %7952 = vmatprep.subr.bf16.mxu0 %v9191_v0  ;;  %7960 = vmatprep.subr.bf16.mxu1 %v9191_v0 }
 0x42b   :  { %7953 = vmatpush3.bf16.msra.mxu0 %v8340_v3  ;;  %7961 = vmatpush3.bf16.msra.mxu1 %v8341_v47 }
 0x42c   :  { %7966 = vmatprep.subr.bf16.mxu0 %v9191_v0  ;;  %7974 = vmatprep.subr.bf16.mxu1 %v9191_v0 }
 0x4c7   :  { %v3538_v52 = vpop.f32.mrf.mxu0  ;;  %v3602_v34 = vpop.f32.mrf.mxu1 }
 0x4c8   :  { %v3545_v55 = vrot.slane %v3538_v52, 1  ;;  %v3548_v56 = vadd.f32 %v3538_v52, %v3476_v48  ;;  %v3609_v57 = vrot.slane %v3602_v34, 1  ;;  %v3612_v58 = vadd.f32 %v3602_v34, %v3550_v53  ;;  %v3868_v48 = vld [vmem:[#allocation5 + $0x13] sm:$0x1]  ;;  %v3795_v53 = vld [vmem:[#allocation5 + $0xb] sm:$0x1] }
 0x4c9   :  { %v7892_v61 = vpop.f32.mrf.mxu0  ;;  %v7900_v62 = vpop.f32.mrf.mxu1  ;;  %v3869_v34 = vld [vmem:[#allocation5 + $0x1b] sm:$0x1] }
 0x4ca   :  { %v3549_v63 = vadd.f32 %v3545_v55, %v3477_v59  ;;  %v7205_v2 = vmul.f32 -1.442695, %v3548_v56  ;;  %v3613_v7 = vadd.f32 %v3609_v57, %v3551_v60  ;;  %v7207_v8 = vmul.f32 -1.442695, %v3612_v58 }
 0x4cb   :  { %v3541_v9 = vpop.f32.mrf.mxu0  ;;  %v3605_v11 = vpop.f32.mrf.mxu1 }
 0x4cc   :  { %8589 = vpow2.f32 %v7205_v2  ;;  %v7206_v12 = vmul.f32 -1.442695, %v3549_v63  ;;  %v7208_v51 = vmul.f32 -1.442695, %v3613_v7 }
 0x4cd   :  { %8591 = vpow2.f32 %v7207_v8  ;;  %v7893_v14 = vpop.f32.mrf.mxu0  ;;  %v7901_v54 = vpop.f32.mrf.mxu1 }
 0x4ce   :  { %8593 = vpow2.f32 %v7206_v12  ;;  %v3996_v54 = vld [vmem:[#allocation5 + $0x33] sm:$0x1] }
 0x4cf   :  { %8595 = vpow2.f32 %v7208_v51  ;;  %v3666_v20 = vpop.f32.mrf.mxu0  ;;  %v3730_v17 = vpop.f32.mrf.mxu1 }
 0x4d0   :  { %v3737_v5 = vrot.slane %v3730_v17, 1  ;;  %v3740_v10 = vadd.f32 %v3730_v17, %v3678_v21  ;;  %v3673_v27 = vrot.slane %v3666_v20, 1  ;;  %v3676_v25 = vadd.f32 %v3666_v20, %v3614_v29 }
 0x4d1   :  { %v7908_v23 = vpop.f32.mrf.mxu0  ;;  %v7916_v24 = vpop.f32.mrf.mxu1 }
 0x4d2   :  { %v3741_v26 = vadd.f32 %v3737_v5, %v3679_v22  ;;  %v7209_v15 = vmul.f32 -1.442695, %v3740_v10  ;;  %v3677_v35 = vadd.f32 %v3673_v27, %v3615_v32  ;;  %v3997_v5 = vld [vmem:[#allocation5 + $0x3b] sm:$0x1]  ;;  %v3932_v27 = vld [vmem:[#allocation5 + $0x23] sm:$0x1] }
 0x4d3   :  { %v3669_v28 = vpop.f32.mrf.mxu0  ;;  %v3733_v44 = vpop.f32.mrf.mxu1 }
 0x4d4   :  { %v7210_v50 = vmul.f32 -1.442695, %v3741_v26  ;;  %8597 = vpow2.f32 %v7209_v15 }
 0x4d5   :  { %v7909_v30 = vpop.f32.mrf.mxu0  ;;  %v7917_v31 = vpop.f32.mrf.mxu1 }
 0x4d6   :  { %8599 = vpow2.f32 %v7210_v50 }
 0x4d7   :  { %8601 = vtanh.f32 %v3676_v25 }
 0x4d8   :  { %8603 = vtanh.f32 %v3677_v35 }
 0x4d9   :  { %v8590_v36 = vpop.eup %8589 }
 0x4da   :  { %v8592_v38 = vpop.eup %8591  ;;  %v3748_v45 = vadd.f32 1.0, %v8590_v36 }
 0x4db   :  { %v8594_v39 = vpop.eup %8593  ;;  %v3760_v40 = vadd.f32 1.0, %v8592_v38 }
 0x4dc   :  { %v8596_v41 = vpop.eup %8595  ;;  %v3749_v42 = vadd.f32 1.0, %v8594_v39  ;;  %8605 = vrcp.f32 %v3748_v45 }
 0x4dd   :  { %v3761_v4 = vadd.f32 1.0, %v8596_v41  ;;  %8607 = vrcp.f32 %v3760_v40  ;;  %v3856_v43 = vpop.f32.mrf.mxu0  ;;  %v3920_v46 = vpop.f32.mrf.mxu1 }
 0x4de   :  { %8609 = vrcp.f32 %v3749_v42  ;;  %v3863_v3 = vrot.slane %v3856_v43, 1  ;;  %v3866_v47 = vadd.f32 %v3856_v43, %v3794_v49  ;;  %v3927_v52 = vrot.slane %v3920_v46, 1 }
 0x4df   :  { %8611 = vrcp.f32 %v3761_v4  ;;  %v3930_v55 = vadd.f32 %v3920_v46, %v3868_v48  ;;  %v7924_v56 = vpop.f32.mrf.mxu0  ;;  %v7932_v57 = vpop.f32.mrf.mxu1 }
 0x4e0   :  { %v3867_v58 = vadd.f32 %v3863_v3, %v3795_v53  ;;  %v7223_v59 = vmul.f32 -1.442695, %v3866_v47  ;;  %v3931_v60 = vadd.f32 %v3927_v52, %v3869_v34  ;;  %v3933_v3 = vld [vmem:[#allocation5 + $0x2b] sm:$0x1] }
 0x4e1   :  { %v7225_v61 = vmul.f32 -1.442695, %v3930_v55  ;;  %v3859_v62 = vpop.f32.mrf.mxu0  ;;  %v3923_v63 = vpop.f32.mrf.mxu1 }
 0x4e2   :  { %8613 = vpow2.f32 %v7223_v59  ;;  %v7224_v2 = vmul.f32 -1.442695, %v3867_v58  ;;  %v7226_v7 = vmul.f32 -1.442695, %v3931_v60  ;;  %v8598_v11 = vpop.eup %8597 }
 0x4e3   :  { %8615 = vpow2.f32 %v7225_v61  ;;  %v7925_v8 = vpop.f32.mrf.mxu0  ;;  %v7933_v9 = vpop.f32.mrf.mxu1  ;;  %v3774_v17 = vadd.f32 1.0, %v8598_v11 }
 0x4e4   :  { %8617 = vpow2.f32 %v7224_v2  ;;  %v8600_v12 = vpop.eup %8599 }
 0x4e5   :  { %v3984_v51 = vpop.f32.mrf.mxu0  ;;  %v4048_v14 = vpop.f32.mrf.mxu1  ;;  %8619 = vpow2.f32 %v7226_v7  ;;  %v3775_v26 = vadd.f32 1.0, %v8600_v12 }
 0x4e6   :  { %v4055_v20 = vrot.slane %v4048_v14, 1  ;;  %v8602_v21 = vpop.eup %8601  ;;  %v4058_v10 = vadd.f32 %v4048_v14, %v3996_v54  ;;  %v3994_v44 = vadd.f32 %v3984_v51, %v3932_v27  ;;  %8621 = vrcp.f32 %v3774_v17  ;;  %v8342_v27 = vld [vmem:[%s10473_s6 + $0x28] sm:$0xff]  }
 0x4e7   :  { %v7940_v22 = vpop.f32.mrf.mxu0  ;;  %v7948_v23 = vpop.f32.mrf.mxu1  ;;  %8623 = vrcp.f32 %v3775_v26  ;;  %v3991_v4 = vrot.slane %v3984_v51, 1 }
 0x4e8   :  { %v8604_v24 = vpop.eup %8603  ;;  %v4059_v15 = vadd.f32 %v4055_v20, %v3997_v5  ;;  %v7227_v32 = vmul.f32 -1.442695, %v4058_v10  ;;  %8625 = vtanh.f32 %v3994_v44  ;;  %v8345_v44 = vld [vmem:[%s10473_s6 + $0x30] sm:$0xff]  }
 0x4e9   :  { %v8606_v28 = vpop.eup %8605  ;;  %v3987_v50 = vpop.f32.mrf.mxu0  ;;  %v3995_v52 = vadd.f32 %v3991_v4, %v3933_v3  ;;  %v8351_v3 = vld [vmem:[#allocation17 + $0x38] sm:$0xff]  }
 0x4ea   :  { %v4051_v29 = vpop.f32.mrf.mxu1  ;;  %v8608_v30 = vpop.eup %8607  ;;  %v3782_v31 = vmul.f32 %v8606_v28, %v8602_v21  ;;  %v7228_v40 = vmul.f32 -1.442695, %v4059_v15  ;;  %8627 = vpow2.f32 %v7227_v32  ;;  %v8343_v15 = vld [vmem:[%s10473_s6 + $0x38] sm:$0xff]   ;;  %v8346_v50 = vld [vmem:[#allocation17 + $0x8] sm:$0xff]   ;;  %v8348_v32 = vld [vmem:[#allocation17] sm:$0xff]  }
 0x4eb   :  { %v8610_v25 = vpop.eup %8609  ;;  %v3780_v35 = vmul.f32 %v8608_v30, %v9886_v37  ;;  %v7941_v36 = vpop.f32.mrf.mxu0  ;;  %v8347_v29 = vld [vmem:[#allocation17 + $0x18] sm:$0xff]  }
 0x4ec   :  { %v7949_v38 = vpop.f32.mrf.mxu1  ;;  %v8612_v45 = vpop.eup %8611  ;;  %v3783_v39 = vmul.f32 %v8610_v25, %v8604_v24  ;;  %v8349_v25 = vld [vmem:[#allocation17 + $0x10] sm:$0xff]  }
 0x4ed   :  { %v3781_v41 = vmul.f32 %v8612_v45, %v9888_v33  ;;  %v9972_v42 = vadd.f32 %v3782_v31, %v3780_v35 }
 0x4ef   :  { %v8614_v49 = vpop.eup %8613  ;;  %v9974_v43 = vadd.f32 %v3783_v39, %v3781_v41  ;;  %8629 = vtanh.f32 %v9972_v42 }
 0x4f0   :  { %v8616_v37 = vpop.eup %8615  ;;  %v4066_v46 = vadd.f32 1.0, %v8614_v49  ;;  %8631 = vpow2.f32 %v7228_v40 }
 0x4f1   :  { %v8618_v47 = vpop.eup %8617  ;;  %8633 = vtanh.f32 %v9974_v43  ;;  %v4078_v48 = vadd.f32 1.0, %v8616_v37 }
 0x4f2   :  { %v4067_v33 = vadd.f32 1.0, %v8618_v47  ;;  %8635 = vrcp.f32 %v4066_v46  ;;  %v8620_v53 = vpop.eup %8619  ;;  %v8350_v46 = vld [vmem:[#allocation17 + $0x28] sm:$0xff]  }
 0x4f3   :  { %8637 = vrcp.f32 %v4078_v48  ;;  %v4079_v34 = vadd.f32 1.0, %v8620_v53  ;;  %v8622_v55 = vpop.eup %8621  ;;  %v8352_v48 = vld [vmem:[#allocation17 + $0x20] sm:$0xff]   ;;  %v8355_v53 = vld [vmem:[%s10473_s6 + $0x18] sm:$0xff]  }
 0x4f4   :  { %8639 = vrcp.f32 %v4067_v33  ;;  %v8624_v56 = vpop.eup %8623  ;;  %v8354_v33 = vld [vmem:[%s10473_s6 + $0x8] sm:$0xff]  }
 0x4f5   :  { %8641 = vtanh.f32 %v3995_v52  ;;  %v8626_v57 = vpop.eup %8625  ;;  %v8353_v52 = vld [vmem:[#allocation17 + $0x30] sm:$0xff]  }
 0x4f6   :  { %8643 = vrcp.f32 %v4079_v34  ;;  %v8356_v34 = vld [vmem:[%s10473_s6] sm:$0xff]  }
 0x4f7   :  { %v8628_v58 = vpop.eup %8627 }
 0x4f8   :  { %v4092_v9 = vadd.f32 1.0, %v8628_v58  ;;  %v4186_v58 = vld [vmem:[#allocation4 + $0x14] sm:$0x1] }
 0x4fa   :  { %8645 = vrcp.f32 %v4092_v9 }
 0x4fc   :  { %v8630_v59 = vpop.eup %8629 }
 0x4fd   :  { %v8632_v60 = vpop.eup %8631  ;;  %v3788_v61 = vmul.f32 %v8630_v59, %v8622_v55  ;;  %v8357_v55 = vld [vmem:[%s10473_s6 + $0x10] sm:$0xff]  }
 0x4fe   :  { %v8634_v62 = vpop.eup %8633  ;;  %v4093_v10 = vadd.f32 1.0, %v8632_v60 }
 0x4ff   :  { %v8636_v63 = vpop.eup %8635  ;;  %v3789_v2 = vmul.f32 %v8634_v62, %v8624_v56  ;;  %3790 = vst.msk [vmem:[#allocation2 + $0x3] sm:$0x1] %vm1889_vm3, %v3788_v61  ;;  %v4110_v51 = vpack.c.bf16 %v3788_v61, %v3788_v61  ;;  %v4112_v56 = vld [vmem:[#allocation4 + $0x4] sm:$0x1] }
 0x500   :  { %v8638_v7 = vpop.eup %8637  ;;  %v4100_v8 = vmul.f32 %v8636_v63, %v8626_v57 }
 0x501   :  { %v8640_v11 = vpop.eup %8639  ;;  %v4098_v12 = vmul.f32 %v8638_v7, %v9896_v18  ;;  %3791 = vst.msk [vmem:[#allocation2 + $0xb] sm:$0x1] %vm1889_vm3, %v3789_v2  ;;  %v4111_v14 = vpack.c.bf16 %v3789_v2, %v3789_v2  ;;  %v4120_v23 = vunpack.c.l.b16 %v4110_v51  ;;  %v4113_v2 = vld [vmem:[#allocation4 + $0xc] sm:$0x1]  ;;  %v4187_v7 = vld [vmem:[#allocation4 + $0x1c] sm:$0x1] }
 0x502   :  { %v8642_v54 = vpop.eup %8641 }
 0x503   :  { %v4101_v20 = vmul.f32 %v8642_v54, %v8640_v11  ;;  %v9981_v21 = vadd.f32 %v4100_v8, %v4098_v12  ;;  %v4121_v17 = vunpack.c.l.b16 %v4111_v14  ;;  %v8644_v5 = vpop.eup %8643 }
 0x504   :  { %v4099_v22 = vmul.f32 %v8644_v5, %v9898_v19  ;;  %v8344_v19 = vld [vmem:[%s10473_s6 + $0x20] sm:$0xff]  }
 0x505   :  { %8647 = vtanh.f32 %v9981_v21  ;;  %v4122_v24 = vrot.slane %v4121_v17, 7 }
 0x506   :  { %v9985_v26 = vadd.f32 %v4101_v20, %v4099_v22  ;;  %8649 = vrcp.f32 %v4093_v10 }
 0x507   :  { %v4123_v18 = vsel %vm2214_vm4, %v4122_v24, %v4120_v23  ;;  %v8646_v30 = vpop.eup %8645 }
 0x508   :  { %v4124_v28 = vpack.c.b16 %v4123_v18, %v4123_v18  ;;  %8651 = vtanh.f32 %v9985_v26 }
 0x50a   :  { %7955 = vmatmul.mubr.msk.bf16.vlgmr.msra.gmra.mxu0 %vm287_vm1, %v4124_v28  ;;  %7963 = vmatmul.mubr.msk.bf16.vlgmr.msra.gmra.mxu1 %vm287_vm1, %v4124_v28 }
 0x50b   :  { %7967 = vmatpush3.bf16.msra.mxu0 %v8342_v27  ;;  %7975 = vmatpush3.bf16.msra.mxu1 %v8343_v15  ;;  %v4314_v15 = vld [vmem:[#allocation4 + $0x34] sm:$0x1] }
 0x50c   :  { %7968 = vmatprep.subr.bf16.mxu0 %v9191_v0  ;;  %7976 = vmatprep.subr.bf16.mxu1 %v9191_v0 }
 0x50d   :  { %7970 = vmatprep.mubr.msk.bf16.mxu0 %vm9192_vm0, %v9191_v0  ;;  %7978 = vmatprep.mubr.msk.bf16.mxu1 %vm9192_vm0, %v9191_v0 }
 0x50f   :  { %7969 = vmatpush3.bf16.msra.mxu0 %v8344_v19  ;;  %7977 = vmatpush3.bf16.msra.mxu1 %v8345_v44  ;;  %v4315_v44 = vld [vmem:[#allocation4 + $0x3c] sm:$0x1] }
 0x510   :  { %7982 = vmatprep.subr.bf16.mxu0 %v9191_v0  ;;  %7990 = vmatprep.subr.bf16.mxu1 %v9191_v0 }
 0x512   :  { %v8648_v31 = vpop.eup %8647  ;;  %7971 = vmatmul.mubr.msk.bf16.vlgmr.msra.gmra.mxu0 %vm287_vm1, %v4124_v28  ;;  %7979 = vmatmul.mubr.msk.bf16.vlgmr.msra.gmra.mxu1 %vm287_vm1, %v4124_v28 }
 0x513   :  { %7983 = vmatpush3.bf16.msra.mxu0 %v8346_v50  ;;  %7991 = vmatpush3.bf16.msra.mxu1 %v8347_v29  ;;  %v4106_v35 = vmul.f32 %v8648_v31, %v8646_v30  ;;  %v8650_v36 = vpop.eup %8649  ;;  %v4250_v29 = vld [vmem:[#allocation4 + $0x24] sm:$0x1] }
 0x514   :  { %7984 = vmatprep.subr.bf16.mxu0 %v9191_v0  ;;  %7992 = vmatprep.subr.bf16.mxu1 %v9191_v0 }
 0x515   :  { %7986 = vmatprep.mubr.msk.bf16.mxu0 %vm9192_vm0, %v9191_v0  ;;  %7994 = vmatprep.mubr.msk.bf16.mxu1 %vm9192_vm0, %v9191_v0  ;;  %4108 = vst.msk [vmem:[#allocation3 + $0x3] sm:$0x1] %vm1889_vm3, %v4106_v35  ;;  %v8652_v38 = vpop.eup %8651  ;;  %v4428_v39 = vpack.c.bf16 %v4106_v35, %v4106_v35 }
 0x516   :  { %v4107_v45 = vmul.f32 %v8652_v38, %v8650_v36 }
 0x517   :  { %7985 = vmatpush3.bf16.msra.mxu0 %v8348_v32  ;;  %7993 = vmatpush3.bf16.msra.mxu1 %v8349_v25  ;;  %v4438_v4 = vunpack.c.l.b16 %v4428_v39  ;;  %v4251_v25 = vld [vmem:[#allocation4 + $0x2c] sm:$0x1] }
 0x518   :  { %7998 = vmatprep.subr.bf16.mxu0 %v9191_v0  ;;  %8006 = vmatprep.subr.bf16.mxu1 %v9191_v0  ;;  %4109 = vst.msk [vmem:[#allocation3 + $0xb] sm:$0x1] %vm1889_vm3, %v4107_v45  ;;  %v4429_v40 = vpack.c.bf16 %v4107_v45, %v4107_v45 }
 0x51a   :  { %v4439_v41 = vunpack.c.l.b16 %v4429_v40 }
 0x51c   :  { %v4440_v49 = vrot.slane %v4439_v41, 7 }
 0x51e   :  { %v4441_v37 = vsel %vm2214_vm4, %v4440_v49, %v4438_v4 }
 0x51f   :  { %v4442_v47 = vpack.c.b16 %v4441_v37, %v4441_v37 }
 0x521   :  { %7987 = vmatmul.mubr.msk.bf16.vlgmr.msra.gmra.mxu0 %vm287_vm1, %v4442_v47  ;;  %7995 = vmatmul.mubr.msk.bf16.vlgmr.msra.gmra.mxu1 %vm287_vm1, %v4442_v47 }
 0x522   :  { %7999 = vmatpush3.bf16.msra.mxu0 %v8350_v46  ;;  %8007 = vmatpush3.bf16.msra.mxu1 %v8351_v3 }
 0x523   :  { %8000 = vmatprep.subr.bf16.mxu0 %v9191_v0  ;;  %8008 = vmatprep.subr.bf16.mxu1 %v9191_v0 }
 0x524   :  { %8002 = vmatprep.mubr.msk.bf16.mxu0 %vm9192_vm0, %v9191_v0  ;;  %8010 = vmatprep.mubr.msk.bf16.mxu1 %vm9192_vm0, %v9191_v0 }
 0x526   :  { %8001 = vmatpush3.bf16.msra.mxu0 %v8352_v48  ;;  %8009 = vmatpush3.bf16.msra.mxu1 %v8353_v52  ;;  %v4430_v52 = vld [vmem:[#allocation5 + $0x4] sm:$0x1] }
 0x527   :  { %8014 = vmatprep.subr.bf16.mxu0 %v9191_v0  ;;  %8022 = vmatprep.subr.bf16.mxu1 %v9191_v0 }
 0x529   :  { %8003 = vmatmul.mubr.msk.bf16.vlgmr.msra.gmra.mxu0 %vm287_vm1, %v4442_v47  ;;  %8011 = vmatmul.mubr.msk.bf16.vlgmr.msra.gmra.mxu1 %vm287_vm1, %v4442_v47 }
 0x52a   :  { %8018 = vmatprep.mubr.msk.bf16.mxu0 %vm9192_vm0, %v9191_v0  ;;  %8026 = vmatprep.mubr.msk.bf16.mxu1 %vm9192_vm0, %v9191_v0 }
 0x52b   :  { %8015 = vmatpush3.bf16.msra.mxu0 %v8354_v33  ;;  %8023 = vmatpush3.bf16.msra.mxu1 %v8355_v53  ;;  %v4504_v53 = vld [vmem:[#allocation5 + $0x14] sm:$0x1] }
 0x52c   :  { %8016 = vmatprep.subr.bf16.mxu0 %v9191_v0  ;;  %8024 = vmatprep.subr.bf16.mxu1 %v9191_v0 }
 0x52f   :  { %8017 = vmatpush3.bf16.msra.mxu0 %v8356_v34  ;;  %8025 = vmatpush3.bf16.msra.mxu1 %v8357_v55 }
 0x530   :  { %8030 = vmatprep.subr.bf16.mxu0 %v9191_v0  ;;  %8038 = vmatprep.subr.bf16.mxu1 %v9191_v0 }
 0x5ca   :  { %v4174_v57 = vpop.f32.mrf.mxu0  ;;  %v4238_v59 = vpop.f32.mrf.mxu1 }
 0x5cb   :  { %v4181_v60 = vrot.slane %v4174_v57, 1  ;;  %v4184_v61 = vadd.f32 %v4174_v57, %v4112_v56  ;;  %v4245_v62 = vrot.slane %v4238_v59, 1  ;;  %v4248_v63 = vadd.f32 %v4238_v59, %v4186_v58  ;;  %v4431_v59 = vld [vmem:[#allocation5 + $0xc] sm:$0x1] }
 0x5cc   :  { %v7956_v8 = vpop.f32.mrf.mxu0  ;;  %v7964_v9 = vpop.f32.mrf.mxu1 }
 0x5cd   :  { %v4185_v11 = vadd.f32 %v4181_v60, %v4113_v2  ;;  %v7253_v12 = vmul.f32 -1.442695, %v4184_v61  ;;  %v4249_v51 = vadd.f32 %v4245_v62, %v4187_v7  ;;  %v7255_v14 = vmul.f32 -1.442695, %v4248_v63  ;;  %v4505_v60 = vld [vmem:[#allocation5 + $0x1c] sm:$0x1] }
 0x5ce   :  { %v4177_v54 = vpop.f32.mrf.mxu0  ;;  %v4241_v20 = vpop.f32.mrf.mxu1 }
 0x5cf   :  { %8653 = vpow2.f32 %v7253_v12  ;;  %v7254_v17 = vmul.f32 -1.442695, %v4185_v11  ;;  %v7256_v5 = vmul.f32 -1.442695, %v4249_v51 }
 0x5d0   :  { %8655 = vpow2.f32 %v7255_v14  ;;  %v7957_v10 = vpop.f32.mrf.mxu0  ;;  %v7965_v22 = vpop.f32.mrf.mxu1 }
 0x5d1   :  { %8657 = vpow2.f32 %v7254_v17 }
 0x5d2   :  { %8659 = vpow2.f32 %v7256_v5  ;;  %v4302_v23 = vpop.f32.mrf.mxu0  ;;  %v4366_v24 = vpop.f32.mrf.mxu1 }
 0x5d3   :  { %v4373_v18 = vrot.slane %v4366_v24, 1  ;;  %v4309_v27 = vrot.slane %v4302_v23, 1  ;;  %v4376_v50 = vadd.f32 %v4366_v24, %v4314_v15  ;;  %v4312_v35 = vadd.f32 %v4302_v23, %v4250_v29 }
 0x5d4   :  { %v7972_v28 = vpop.f32.mrf.mxu0  ;;  %v7980_v19 = vpop.f32.mrf.mxu1 }
 0x5d5   :  { %v4377_v30 = vadd.f32 %v4373_v18, %v4315_v44  ;;  %v4313_v36 = vadd.f32 %v4309_v27, %v4251_v25  ;;  %v7257_v39 = vmul.f32 -1.442695, %v4376_v50  ;;  %8661 = vtanh.f32 %v4312_v35  ;;  %v4632_v50 = vld [vmem:[#allocation5 + $0x34] sm:$0x1] }
 0x5d6   :  { %v4305_v31 = vpop.f32.mrf.mxu0  ;;  %v4369_v32 = vpop.f32.mrf.mxu1 }
 0x5d7   :  { %v7258_v40 = vmul.f32 -1.442695, %v4377_v30  ;;  %8663 = vtanh.f32 %v4313_v36 }
 0x5d8   :  { %v7973_v38 = vpop.f32.mrf.mxu0  ;;  %v7981_v45 = vpop.f32.mrf.mxu1  ;;  %8665 = vpow2.f32 %v7257_v39 }
 0x5d9   :  { %8667 = vpow2.f32 %v7258_v40  ;;  %v4633_v45 = vld [vmem:[#allocation5 + $0x3c] sm:$0x1] }
 0x5dc   :  { %v8654_v41 = vpop.eup %8653 }
 0x5dd   :  { %v8656_v4 = vpop.eup %8655  ;;  %v4384_v49 = vadd.f32 1.0, %v8654_v41  ;;  %v4568_v41 = vld [vmem:[#allocation5 + $0x24] sm:$0x1] }
 0x5de   :  { %v8658_v37 = vpop.eup %8657  ;;  %v4396_v46 = vadd.f32 1.0, %v8656_v4 }
 0x5df   :  { %v8660_v3 = vpop.eup %8659  ;;  %v4385_v47 = vadd.f32 1.0, %v8658_v37  ;;  %8669 = vrcp.f32 %v4384_v49 }
 0x5e0   :  { %v4397_v48 = vadd.f32 1.0, %v8660_v3  ;;  %8671 = vrcp.f32 %v4396_v46 }
 0x5e1   :  { %8673 = vrcp.f32 %v4385_v47  ;;  %v4492_v33 = vpop.f32.mrf.mxu0  ;;  %v4556_v34 = vpop.f32.mrf.mxu1 }
 0x5e2   :  { %8675 = vrcp.f32 %v4397_v48  ;;  %v4499_v55 = vrot.slane %v4492_v33, 1  ;;  %v4502_v56 = vadd.f32 %v4492_v33, %v4430_v52  ;;  %v4563_v57 = vrot.slane %v4556_v34, 1  ;;  %v8662_v51 = vpop.eup %8661  ;;  %v4569_v52 = vld [vmem:[#allocation5 + $0x2c] sm:$0x1] }
 0x5e3   :  { %v4566_v58 = vadd.f32 %v4556_v34, %v4504_v53  ;;  %v7988_v61 = vpop.f32.mrf.mxu0  ;;  %v7996_v62 = vpop.f32.mrf.mxu1 }
 0x5e4   :  { %v4503_v63 = vadd.f32 %v4499_v55, %v4431_v59  ;;  %v7271_v2 = vmul.f32 -1.442695, %v4502_v56  ;;  %v4567_v7 = vadd.f32 %v4563_v57, %v4505_v60  ;;  %v8664_v17 = vpop.eup %8663 }
 0x5e5   :  { %v4495_v8 = vpop.f32.mrf.mxu0  ;;  %v4559_v9 = vpop.f32.mrf.mxu1  ;;  %v7273_v12 = vmul.f32 -1.442695, %v4566_v58 }
 0x5e6   :  { %8677 = vpow2.f32 %v7271_v2  ;;  %v7272_v11 = vmul.f32 -1.442695, %v4503_v63  ;;  %v7274_v14 = vmul.f32 -1.442695, %v4567_v7  ;;  %v8666_v5 = vpop.eup %8665 }
 0x5e7   :  { %v7989_v54 = vpop.f32.mrf.mxu0  ;;  %v7997_v20 = vpop.f32.mrf.mxu1  ;;  %v4410_v44 = vadd.f32 1.0, %v8666_v5 }
 0x5e8   :  { %8679 = vpow2.f32 %v7272_v11  ;;  %v8668_v23 = vpop.eup %8667 }
 0x5e9   :  { %v4620_v10 = vpop.f32.mrf.mxu0  ;;  %v4684_v22 = vpop.f32.mrf.mxu1  ;;  %8681 = vpow2.f32 %v7273_v12  ;;  %v4411_v38 = vadd.f32 1.0, %v8668_v23 }
 0x5ea   :  { %8683 = vpow2.f32 %v7274_v14  ;;  %v4691_v18 = vrot.slane %v4684_v22, 1  ;;  %v4694_v31 = vadd.f32 %v4684_v22, %v4632_v50  ;;  %v4627_v46 = vrot.slane %v4620_v10, 1  ;;  %v8358_v50 = vld [vmem:[%s10473_s6 + $0x28] sm:$0xff]  }
 0x5eb   :  { %v8004_v27 = vpop.f32.mrf.mxu0  ;;  %v8012_v15 = vpop.f32.mrf.mxu1  ;;  %8685 = vrcp.f32 %v4410_v44  ;;  %v4630_v3 = vadd.f32 %v4620_v10, %v4568_v41  ;;  %v8362_v41 = vld [vmem:[%s10473_s6 + $0x8] sm:$0xff]  }
 0x5ec   :  { %v8670_v24 = vpop.eup %8669  ;;  %v4695_v4 = vadd.f32 %v4691_v18, %v4633_v45  ;;  %v4631_v53 = vadd.f32 %v4627_v46, %v4569_v52  ;;  %v4748_v46 = vld [vmem:[#allocation4 + $0x5] sm:$0x1] }
 0x5ed   :  { %v8672_v28 = vpop.eup %8671  ;;  %v4418_v19 = vmul.f32 %v8670_v24, %v8662_v51  ;;  %v4623_v32 = vpop.f32.mrf.mxu0 }
 0x5ee   :  { %v8674_v29 = vpop.eup %8673  ;;  %v4416_v30 = vmul.f32 %v8672_v28, %v9972_v42  ;;  %v4687_v25 = vpop.f32.mrf.mxu1  ;;  %v7275_v42 = vmul.f32 -1.442695, %v4694_v31 }
 0x5ef   :  { %v8676_v35 = vpop.eup %8675  ;;  %v4419_v36 = vmul.f32 %v8674_v29, %v8664_v17  ;;  %v8005_v49 = vpop.f32.mrf.mxu0  ;;  %v8359_v29 = vld [vmem:[%s10473_s6 + $0x38] sm:$0xff]  }
 0x5f0   :  { %v4417_v39 = vmul.f32 %v8676_v35, %v9974_v43  ;;  %v10058_v40 = vadd.f32 %v4418_v19, %v4416_v30  ;;  %v8013_v37 = vpop.f32.mrf.mxu1  ;;  %v7276_v43 = vmul.f32 -1.442695, %v4695_v4  ;;  %v8363_v4 = vld [vmem:[%s10473_s6 + $0x18] sm:$0xff]   ;;  %v8364_v49 = vld [vmem:[%s10473_s6] sm:$0xff]  }
 0x5f1   :  { %v8365_v37 = vld [vmem:[%s10473_s6 + $0x10] sm:$0xff]  }
 0x5f2   :  { %v10060_v47 = vadd.f32 %v4419_v36, %v4417_v39  ;;  %8687 = vtanh.f32 %v10058_v40 }
 0x5f3   :  { %8689 = vrcp.f32 %v4411_v38  ;;  %v8678_v48 = vpop.eup %8677 }
 0x5f4   :  { %8691 = vtanh.f32 %v10060_v47  ;;  %v4702_v33 = vadd.f32 1.0, %v8678_v48 }
 0x5f5   :  { %8693 = vtanh.f32 %v4630_v3  ;;  %v8680_v34 = vpop.eup %8679 }
 0x5f6   :  { %8695 = vpow2.f32 %v7275_v42  ;;  %v8682_v55 = vpop.eup %8681  ;;  %v4703_v56 = vadd.f32 1.0, %v8680_v34  ;;  %v4822_v42 = vld [vmem:[#allocation4 + $0x15] sm:$0x1]  ;;  %v4749_v34 = vld [vmem:[#allocation4 + $0xd] sm:$0x1] }
 0x5f7   :  { %8697 = vrcp.f32 %v4702_v33  ;;  %v8684_v57 = vpop.eup %8683  ;;  %v4714_v58 = vadd.f32 1.0, %v8682_v55  ;;  %v4823_v55 = vld [vmem:[#allocation4 + $0x1d] sm:$0x1] }
 0x5f8   :  { %8699 = vpow2.f32 %v7276_v43  ;;  %v4715_v59 = vadd.f32 1.0, %v8684_v57  ;;  %v8686_v60 = vpop.eup %8685 }
 0x5f9   :  { %8701 = vtanh.f32 %v4631_v53 }
 0x5fa   :  { %8703 = vrcp.f32 %v4703_v56 }
 0x5fb   :  { %8705 = vrcp.f32 %v4714_v58 }
 0x5fc   :  { %8707 = vrcp.f32 %v4715_v59 }
 0x5ff   :  { %v8688_v61 = vpop.eup %8687 }
 0x600   :  { %v8690_v62 = vpop.eup %8689  ;;  %v4424_v63 = vmul.f32 %v8688_v61, %v8686_v60 }
 0x601   :  { %v8692_v2 = vpop.eup %8691 }
 0x602   :  { %v8694_v7 = vpop.eup %8693  ;;  %v4425_v8 = vmul.f32 %v8692_v2, %v8690_v62  ;;  %4426 = vst.msk [vmem:[#allocation2 + $0x4] sm:$0x1] %vm1889_vm3, %v4424_v63  ;;  %v4746_v12 = vpack.c.bf16 %v4424_v63, %v4424_v63 }
 0x603   :  { %v8696_v9 = vpop.eup %8695 }
 0x604   :  { %v8698_v11 = vpop.eup %8697  ;;  %4427 = vst.msk [vmem:[#allocation2 + $0xc] sm:$0x1] %vm1889_vm3, %v4425_v8  ;;  %v4747_v51 = vpack.c.bf16 %v4425_v8, %v4425_v8  ;;  %v4728_v10 = vadd.f32 1.0, %v8696_v9  ;;  %v4756_v18 = vunpack.c.l.b16 %v4746_v12 }
 0x605   :  { %v8700_v14 = vpop.eup %8699  ;;  %v4736_v5 = vmul.f32 %v8698_v11, %v8694_v7 }
 0x606   :  { %v8702_v54 = vpop.eup %8701  ;;  %v4757_v20 = vunpack.c.l.b16 %v4747_v51  ;;  %v4729_v24 = vadd.f32 1.0, %v8700_v14  ;;  %8709 = vrcp.f32 %v4728_v10 }
 0x607   :  { %v8704_v17 = vpop.eup %8703 }
 0x608   :  { %v8706_v22 = vpop.eup %8705  ;;  %v4737_v23 = vmul.f32 %v8704_v17, %v8702_v54  ;;  %v4758_v27 = vrot.slane %v4757_v20, 7  ;;  %8711 = vrcp.f32 %v4729_v24  ;;  %v4950_v54 = vld [vmem:[#allocation4 + $0x35] sm:$0x1] }
 0x609   :  { %v8708_v15 = vpop.eup %8707  ;;  %v4734_v28 = vmul.f32 %v8706_v22, %v9981_v21  ;;  %v8360_v21 = vld [vmem:[%s10473_s6 + $0x20] sm:$0xff]  }
 0x60a   :  { %v4735_v19 = vmul.f32 %v8708_v15, %v9985_v26  ;;  %v4759_v44 = vsel %vm2214_vm4, %v4758_v27, %v4756_v18  ;;  %v8361_v26 = vld [vmem:[%s10473_s6 + $0x30] sm:$0xff]   ;;  %v4886_v22 = vld [vmem:[#allocation4 + $0x25] sm:$0x1]  ;;  %v4887_v27 = vld [vmem:[#allocation4 + $0x2d] sm:$0x1] }
 0x60b   :  { %v4738_v30 = vadd.f32 %v4736_v5, %v4734_v28  ;;  %v4760_v31 = vpack.c.b16 %v4759_v44, %v4759_v44  ;;  %v4951_v5 = vld [vmem:[#allocation4 + $0x3d] sm:$0x1] }
 0x60c   :  { %v4739_v32 = vadd.f32 %v4737_v23, %v4735_v19 }
 0x60d   :  { %8713 = vtanh.f32 %v4738_v30  ;;  %8019 = vmatmul.mubr.msk.bf16.vlgmr.msra.gmra.mxu0 %vm287_vm1, %v4760_v31  ;;  %8027 = vmatmul.mubr.msk.bf16.vlgmr.msra.gmra.mxu1 %vm287_vm1, %v4760_v31 }
 0x60e   :  { %8715 = vtanh.f32 %v4739_v32  ;;  %8031 = vmatpush3.bf16.msra.mxu0 %v8358_v50  ;;  %8039 = vmatpush3.bf16.msra.mxu1 %v8359_v29 }
 0x60f   :  { %8032 = vmatprep.subr.bf16.mxu0 %v9191_v0  ;;  %8040 = vmatprep.subr.bf16.mxu1 %v9191_v0 }
 0x610   :  { %8034 = vmatprep.mubr.msk.bf16.mxu0 %vm9192_vm0, %v9191_v0  ;;  %8042 = vmatprep.mubr.msk.bf16.mxu1 %vm9192_vm0, %v9191_v0 }
 0x612   :  { %8033 = vmatpush3.bf16.msra.mxu0 %v8360_v21  ;;  %8041 = vmatpush3.bf16.msra.mxu1 %v8361_v26 }
 0x613   :  { %8046 = vmatprep.subr.bf16.mxu0 %v9191_v0  ;;  %8054 = vmatprep.subr.bf16.mxu1 %v9191_v0  ;;  %v8710_v25 = vpop.eup %8709 }
 0x615   :  { %8035 = vmatmul.mubr.msk.bf16.vlgmr.msra.gmra.mxu0 %vm287_vm1, %v4760_v31  ;;  %8043 = vmatmul.mubr.msk.bf16.vlgmr.msra.gmra.mxu1 %vm287_vm1, %v4760_v31  ;;  %v8712_v35 = vpop.eup %8711 }
 0x616   :  { %8050 = vmatprep.mubr.msk.bf16.mxu0 %vm9192_vm0, %v9191_v0  ;;  %8058 = vmatprep.mubr.msk.bf16.mxu1 %vm9192_vm0, %v9191_v0 }
 0x617   :  { %8047 = vmatpush3.bf16.msra.mxu0 %v8362_v41  ;;  %8055 = vmatpush3.bf16.msra.mxu1 %v8363_v4 }
 0x618   :  { %8048 = vmatprep.subr.bf16.mxu0 %v9191_v0  ;;  %8056 = vmatprep.subr.bf16.mxu1 %v9191_v0 }
 0x61a   :  { %v8714_v36 = vpop.eup %8713 }
 0x61b   :  { %v8716_v38 = vpop.eup %8715  ;;  %v4742_v45 = vmul.f32 %v8714_v36, %v8710_v25  ;;  %8049 = vmatpush3.bf16.msra.mxu0 %v8364_v49  ;;  %8057 = vmatpush3.bf16.msra.mxu1 %v8365_v37 }
 0x61c   :  { %v4743_v39 = vmul.f32 %v8716_v38, %v8712_v35  ;;  %8062 = vmatprep.subr.bf16.mxu0 %v9191_v0  ;;  %8070 = vmatprep.subr.bf16.mxu1 %v9191_v0 }
 0x61d   :  { %4744 = vst.msk [vmem:[#allocation3 + $0x4] sm:$0x1] %vm1889_vm3, %v4742_v45 }
 0x61e   :  { %4745 = vst.msk [vmem:[#allocation3 + $0xc] sm:$0x1] %vm1889_vm3, %v4743_v39 }
 0x6cd   :  { %v4810_v3 = vpop.f32.mrf.mxu0  ;;  %v4874_v48 = vpop.f32.mrf.mxu1 }
 0x6ce   :  { %v4817_v52 = vrot.slane %v4810_v3, 1  ;;  %v4820_v43 = vadd.f32 %v4810_v3, %v4748_v46  ;;  %v4881_v33 = vrot.slane %v4874_v48, 1  ;;  %v4884_v53 = vadd.f32 %v4874_v48, %v4822_v42 }
 0x6cf   :  { %v8020_v56 = vpop.f32.mrf.mxu0  ;;  %v8028_v57 = vpop.f32.mrf.mxu1 }
 0x6d0   :  { %v4821_v58 = vadd.f32 %v4817_v52, %v4749_v34  ;;  %v7301_v59 = vmul.f32 -1.442695, %v4820_v43  ;;  %v4885_v60 = vadd.f32 %v4881_v33, %v4823_v55  ;;  %v7303_v61 = vmul.f32 -1.442695, %v4884_v53 }
 0x6d1   :  { %v4813_v62 = vpop.f32.mrf.mxu0  ;;  %v4877_v63 = vpop.f32.mrf.mxu1 }
 0x6d2   :  { %8717 = vpow2.f32 %v7301_v59  ;;  %v7302_v2 = vmul.f32 -1.442695, %v4821_v58  ;;  %v7304_v7 = vmul.f32 -1.442695, %v4885_v60 }
 0x6d3   :  { %8719 = vpow2.f32 %v7303_v61  ;;  %v8021_v8 = vpop.f32.mrf.mxu0  ;;  %v8029_v9 = vpop.f32.mrf.mxu1 }
 0x6d4   :  { %8721 = vpow2.f32 %v7302_v2  ;;  %v8367_v8 = vld [vmem:[%s10473_s6 + $0x38] sm:$0xff]  }
 0x6d5   :  { %8723 = vpow2.f32 %v7304_v7  ;;  %v4938_v11 = vpop.f32.mrf.mxu0  ;;  %v5002_v12 = vpop.f32.mrf.mxu1  ;;  %v8366_v7 = vld [vmem:[%s10473_s6 + $0x28] sm:$0xff]  }
 0x6d6   :  { %v5009_v51 = vrot.slane %v5002_v12, 1  ;;  %v4945_v14 = vrot.slane %v4938_v11, 1  ;;  %v5012_v10 = vadd.f32 %v5002_v12, %v4950_v54  ;;  %v4948_v15 = vadd.f32 %v4938_v11, %v4886_v22  ;;  %v8368_v11 = vld [vmem:[%s10473_s6 + $0x20] sm:$0xff]   ;;  %v8369_v12 = vld [vmem:[%s10473_s6 + $0x30] sm:$0xff]  }
 0x6d7   :  { %v8036_v20 = vpop.f32.mrf.mxu0  ;;  %v8044_v17 = vpop.f32.mrf.mxu1  ;;  %v8372_v54 = vld [vmem:[%s10473_s6] sm:$0xff]  }
 0x6d8   :  { %v5013_v23 = vadd.f32 %v5009_v51, %v4951_v5  ;;  %v4949_v28 = vadd.f32 %v4945_v14, %v4887_v27  ;;  %v7305_v50 = vmul.f32 -1.442695, %v5012_v10  ;;  %8725 = vtanh.f32 %v4948_v15  ;;  %v8370_v51 = vld [vmem:[%s10473_s6 + $0x8] sm:$0xff]   ;;  %v8371_v14 = vld [vmem:[%s10473_s6 + $0x18] sm:$0xff]   ;;  %v8373_v20 = vld [vmem:[%s10473_s6 + $0x10] sm:$0xff]  }
 0x6d9   :  { %v4941_v24 = vpop.f32.mrf.mxu0  ;;  %v5005_v18 = vpop.f32.mrf.mxu1  ;;  %v5066_v17 = vld [vmem:[#allocation4 + $0x6] sm:$0x1]  ;;  %v5140_v10 = vld [vmem:[#allocation4 + $0x16] sm:$0x1]  ;;  %v5067_v15 = vld [vmem:[#allocation4 + $0xe] sm:$0x1] }
 0x6da   :  { %v7306_v29 = vmul.f32 -1.442695, %v5013_v23  ;;  %8727 = vtanh.f32 %v4949_v28  ;;  %v5141_v28 = vld [vmem:[#allocation4 + $0x1e] sm:$0x1] }
 0x6db   :  { %v8037_v19 = vpop.f32.mrf.mxu0  ;;  %v8045_v44 = vpop.f32.mrf.mxu1  ;;  %8729 = vpow2.f32 %v7305_v50 }
 0x6dc   :  { %8731 = vpow2.f32 %v7306_v29 }
 0x6df   :  { %v8718_v30 = vpop.eup %8717 }
 0x6e0   :  { %v8720_v31 = vpop.eup %8719  ;;  %v5020_v32 = vadd.f32 1.0, %v8718_v30 }
 0x6e1   :  { %v8722_v21 = vpop.eup %8721  ;;  %v5032_v26 = vadd.f32 1.0, %v8720_v31 }
 0x6e2   :  { %v8724_v25 = vpop.eup %8723  ;;  %v5021_v35 = vadd.f32 1.0, %v8722_v21  ;;  %8733 = vrcp.f32 %v5020_v32 }
 0x6e3   :  { %v5033_v36 = vadd.f32 1.0, %v8724_v25  ;;  %8735 = vrcp.f32 %v5032_v26 }
 0x6e4   :  { %8737 = vrcp.f32 %v5021_v35 }
 0x6e5   :  { %8739 = vrcp.f32 %v5033_v36  ;;  %v8726_v38 = vpop.eup %8725 }
 0x6e7   :  { %v8728_v45 = vpop.eup %8727 }
 0x6e8   :  { %v8730_v39 = vpop.eup %8729 }
 0x6e9   :  { %v8732_v41 = vpop.eup %8731  ;;  %v5046_v46 = vadd.f32 1.0, %v8730_v39 }
 0x6ea   :  { %v5047_v43 = vadd.f32 1.0, %v8732_v41 }
 0x6eb   :  { %8741 = vrcp.f32 %v5046_v46  ;;  %v5269_v46 = vld [vmem:[#allocation4 + $0x3e] sm:$0x1] }
 0x6ef   :  { %v8734_v4 = vpop.eup %8733 }
 0x6f0   :  { %v8736_v49 = vpop.eup %8735  ;;  %v5054_v37 = vmul.f32 %v8734_v4, %v8726_v38  ;;  %v5268_v4 = vld [vmem:[#allocation4 + $0x36] sm:$0x1] }
 0x6f1   :  { %v8738_v3 = vpop.eup %8737  ;;  %v5052_v42 = vmul.f32 %v8736_v49, %v10058_v40 }
 0x6f2   :  { %v8740_v48 = vpop.eup %8739  ;;  %v5055_v52 = vmul.f32 %v8738_v3, %v8728_v45 }
 0x6f3   :  { %v5053_v33 = vmul.f32 %v8740_v48, %v10060_v47  ;;  %v10117_v53 = vadd.f32 %v5054_v37, %v5052_v42  ;;  %v5204_v42 = vld [vmem:[#allocation4 + $0x26] sm:$0x1] }
 0x6f5   :  { %v10119_v34 = vadd.f32 %v5055_v52, %v5053_v33  ;;  %8743 = vtanh.f32 %v10117_v53  ;;  %v5205_v33 = vld [vmem:[#allocation4 + $0x2e] sm:$0x1] }
 0x6f6   :  { %8745 = vrcp.f32 %v5047_v43 }
 0x6f7   :  { %8747 = vtanh.f32 %v10119_v34 }
 0x6f8   :  { %v8742_v55 = vpop.eup %8741 }
 0x702   :  { %v8744_v56 = vpop.eup %8743 }
 0x703   :  { %v8746_v57 = vpop.eup %8745  ;;  %v5060_v58 = vmul.f32 %v8744_v56, %v8742_v55 }
 0x704   :  { %v8748_v40 = vpop.eup %8747 }
 0x705   :  { %v5061_v59 = vmul.f32 %v8748_v40, %v8746_v57  ;;  %5062 = vst.msk [vmem:[#allocation2 + $0x5] sm:$0x1] %vm1889_vm3, %v5060_v58  ;;  %v5064_v47 = vpack.c.bf16 %v5060_v58, %v5060_v58 }
 0x707   :  { %5063 = vst.msk [vmem:[#allocation2 + $0xd] sm:$0x1] %vm1889_vm3, %v5061_v59  ;;  %v5065_v60 = vpack.c.bf16 %v5061_v59, %v5061_v59  ;;  %v5074_v62 = vunpack.c.l.b16 %v5064_v47 }
 0x709   :  { %v5075_v61 = vunpack.c.l.b16 %v5065_v60 }
 0x70b   :  { %v5076_v63 = vrot.slane %v5075_v61, 7 }
 0x70d   :  { %v5077_v2 = vsel %vm2214_vm4, %v5076_v63, %v5074_v62 }
 0x70e   :  { %v5078_v9 = vpack.c.b16 %v5077_v2, %v5077_v2 }
 0x710   :  { %8051 = vmatmul.mubr.msk.bf16.vlgmr.msra.gmra.mxu0 %vm287_vm1, %v5078_v9  ;;  %8059 = vmatmul.mubr.msk.bf16.vlgmr.msra.gmra.mxu1 %vm287_vm1, %v5078_v9 }
 0x711   :  { %8063 = vmatpush3.bf16.msra.mxu0 %v8366_v7  ;;  %8071 = vmatpush3.bf16.msra.mxu1 %v8367_v8 }
 0x712   :  { %8064 = vmatprep.subr.bf16.mxu0 %v9191_v0  ;;  %8072 = vmatprep.subr.bf16.mxu1 %v9191_v0 }
 0x713   :  { %8066 = vmatprep.mubr.msk.bf16.mxu0 %vm9192_vm0, %v9191_v0  ;;  %8074 = vmatprep.mubr.msk.bf16.mxu1 %vm9192_vm0, %v9191_v0 }
 0x715   :  { %8065 = vmatpush3.bf16.msra.mxu0 %v8368_v11  ;;  %8073 = vmatpush3.bf16.msra.mxu1 %v8369_v12 }
 0x716   :  { %8078 = vmatprep.subr.bf16.mxu0 %v9191_v0  ;;  %8086 = vmatprep.subr.bf16.mxu1 %v9191_v0 }
 0x718   :  { %8067 = vmatmul.mubr.msk.bf16.vlgmr.msra.gmra.mxu0 %vm287_vm1, %v5078_v9  ;;  %8075 = vmatmul.mubr.msk.bf16.vlgmr.msra.gmra.mxu1 %vm287_vm1, %v5078_v9 }
 0x719   :  { %8082 = vmatprep.mubr.msk.bf16.mxu0 %vm9192_vm0, %v9191_v0  ;;  %8090 = vmatprep.mubr.msk.bf16.mxu1 %vm9192_vm0, %v9191_v0 }
 0x71a   :  { %8079 = vmatpush3.bf16.msra.mxu0 %v8370_v51  ;;  %8087 = vmatpush3.bf16.msra.mxu1 %v8371_v14 }
 0x71b   :  { %8080 = vmatprep.subr.bf16.mxu0 %v9191_v0  ;;  %8088 = vmatprep.subr.bf16.mxu1 %v9191_v0 }
 0x71e   :  { %8081 = vmatpush3.bf16.msra.mxu0 %v8372_v54  ;;  %8089 = vmatpush3.bf16.msra.mxu1 %v8373_v20 }
 0x71f   :  { %8094 = vmatprep.subr.bf16.mxu0 %v9191_v0  ;;  %8102 = vmatprep.subr.bf16.mxu1 %v9191_v0 }
 0x7d0   :  { %v5128_v5 = vpop.f32.mrf.mxu0  ;;  %v5192_v22 = vpop.f32.mrf.mxu1 }
 0x7d1   :  { %v5135_v23 = vrot.slane %v5128_v5, 1  ;;  %v5138_v24 = vadd.f32 %v5128_v5, %v5066_v17  ;;  %v5199_v18 = vrot.slane %v5192_v22, 1  ;;  %v5202_v27 = vadd.f32 %v5192_v22, %v5140_v10 }
 0x7d2   :  { %v8052_v19 = vpop.f32.mrf.mxu0  ;;  %v8060_v44 = vpop.f32.mrf.mxu1 }
 0x7d3   :  { %v5139_v50 = vadd.f32 %v5135_v23, %v5067_v15  ;;  %v7331_v29 = vmul.f32 -1.442695, %v5138_v24  ;;  %v5203_v30 = vadd.f32 %v5199_v18, %v5141_v28  ;;  %v7333_v31 = vmul.f32 -1.442695, %v5202_v27 }
 0x7d4   :  { %v5131_v32 = vpop.f32.mrf.mxu0  ;;  %v5195_v21 = vpop.f32.mrf.mxu1 }
 0x7d5   :  { %8749 = vpow2.f32 %v7331_v29  ;;  %v7332_v26 = vmul.f32 -1.442695, %v5139_v50  ;;  %v7334_v25 = vmul.f32 -1.442695, %v5203_v30 }
 0x7d6   :  { %8751 = vpow2.f32 %v7333_v31  ;;  %v8053_v35 = vpop.f32.mrf.mxu0  ;;  %v8061_v36 = vpop.f32.mrf.mxu1 }
 0x7d7   :  { %8753 = vpow2.f32 %v7332_v26  ;;  %v8375_v35 = vld [vmem:[%s10473_s6 + $0x38] sm:$0xff]  }
 0x7d8   :  { %8755 = vpow2.f32 %v7334_v25  ;;  %v5256_v38 = vpop.f32.mrf.mxu0  ;;  %v5320_v45 = vpop.f32.mrf.mxu1  ;;  %v8374_v25 = vld [vmem:[%s10473_s6 + $0x28] sm:$0xff]  }
 0x7d9   :  { %v5327_v39 = vrot.slane %v5320_v45, 1  ;;  %v5263_v41 = vrot.slane %v5256_v38, 1  ;;  %v5330_v3 = vadd.f32 %v5320_v45, %v5268_v4  ;;  %v5266_v55 = vadd.f32 %v5256_v38, %v5204_v42  ;;  %v8376_v38 = vld [vmem:[%s10473_s6 + $0x20] sm:$0xff]   ;;  %v8377_v45 = vld [vmem:[%s10473_s6 + $0x30] sm:$0xff]  }
 0x7da   :  { %v8068_v49 = vpop.f32.mrf.mxu0  ;;  %v8076_v37 = vpop.f32.mrf.mxu1  ;;  %v5384_v4 = vld [vmem:[#allocation4 + $0x7] sm:$0x1] }
 0x7db   :  { %v5331_v48 = vadd.f32 %v5327_v39, %v5269_v46  ;;  %v5267_v56 = vadd.f32 %v5263_v41, %v5205_v33  ;;  %v7335_v40 = vmul.f32 -1.442695, %v5330_v3  ;;  %8757 = vtanh.f32 %v5266_v55  ;;  %v8378_v39 = vld [vmem:[%s10433_s11 + $0x8] sm:$0xff]   ;;  %v8379_v41 = vld [vmem:[%s10433_s11] sm:$0xff]   ;;  %v5458_v37 = vld [vmem:[#allocation4 + $0x17] sm:$0x1] }
 0x7dc   :  { %v5259_v52 = vpop.f32.mrf.mxu0  ;;  %v5323_v43 = vpop.f32.mrf.mxu1  ;;  %v5459_v33 = vld [vmem:[#allocation4 + $0x1f] sm:$0x1] }
 0x7dd   :  { %v7336_v59 = vmul.f32 -1.442695, %v5331_v48  ;;  %8759 = vtanh.f32 %v5267_v56  ;;  %v5385_v43 = vld [vmem:[#allocation4 + $0xf] sm:$0x1] }
 0x7de   :  { %v8069_v57 = vpop.f32.mrf.mxu0  ;;  %v8077_v58 = vpop.f32.mrf.mxu1  ;;  %8761 = vpow2.f32 %v7335_v40 }
 0x7df   :  { %8763 = vpow2.f32 %v7336_v59 }
 0x7e2   :  { %v8750_v47 = vpop.eup %8749 }
 0x7e3   :  { %v8752_v60 = vpop.eup %8751  ;;  %v5338_v61 = vadd.f32 1.0, %v8750_v47 }
 0x7e4   :  { %v8754_v62 = vpop.eup %8753  ;;  %v5350_v63 = vadd.f32 1.0, %v8752_v60 }
 0x7e5   :  { %v8756_v2 = vpop.eup %8755  ;;  %v5339_v7 = vadd.f32 1.0, %v8754_v62  ;;  %8765 = vrcp.f32 %v5338_v61 }
 0x7e6   :  { %v5351_v8 = vadd.f32 1.0, %v8756_v2  ;;  %8767 = vrcp.f32 %v5350_v63 }
 0x7e7   :  { %8769 = vrcp.f32 %v5339_v7 }
 0x7e8   :  { %8771 = vrcp.f32 %v5351_v8  ;;  %v8758_v9 = vpop.eup %8757 }
 0x7ea   :  { %v8760_v11 = vpop.eup %8759 }
 0x7eb   :  { %v8762_v12 = vpop.eup %8761 }
 0x7ec   :  { %v8764_v51 = vpop.eup %8763  ;;  %v5364_v17 = vadd.f32 1.0, %v8762_v12  ;;  %v5586_v12 = vld [vmem:[#allocation4 + $0x37] sm:$0x1] }
 0x7ed   :  { %v5365_v24 = vadd.f32 1.0, %v8764_v51 }
 0x7ee   :  { %8773 = vrcp.f32 %v5364_v17  ;;  %v5522_v17 = vld [vmem:[#allocation4 + $0x27] sm:$0x1] }
 0x7f2   :  { %v8766_v14 = vpop.eup %8765 }
 0x7f3   :  { %v8768_v54 = vpop.eup %8767  ;;  %v5372_v20 = vmul.f32 %v8766_v14, %v8758_v9 }
 0x7f4   :  { %v8770_v5 = vpop.eup %8769  ;;  %v5370_v10 = vmul.f32 %v8768_v54, %v10117_v53  ;;  %v5587_v54 = vld [vmem:[#allocation4 + $0x3f] sm:$0x1] }
 0x7f5   :  { %v8772_v22 = vpop.eup %8771  ;;  %v5373_v23 = vmul.f32 %v8770_v5, %v8760_v11 }
 0x7f6   :  { %v5371_v18 = vmul.f32 %v8772_v22, %v10119_v34  ;;  %v10172_v27 = vadd.f32 %v5372_v20, %v5370_v10 }
 0x7f8   :  { %v10174_v15 = vadd.f32 %v5373_v23, %v5371_v18  ;;  %8775 = vtanh.f32 %v10172_v27  ;;  %v5523_v23 = vld [vmem:[#allocation4 + $0x2f] sm:$0x1] }
 0x7f9   :  { %8777 = vrcp.f32 %v5365_v24 }
 0x7fa   :  { %8779 = vtanh.f32 %v10174_v15 }
 0x7fb   :  { %v8774_v28 = vpop.eup %8773 }
 0x805   :  { %v8776_v19 = vpop.eup %8775 }
 0x806   :  { %v8778_v44 = vpop.eup %8777  ;;  %v5378_v50 = vmul.f32 %v8776_v19, %v8774_v28 }
 0x807   :  { %v8780_v53 = vpop.eup %8779 }
 0x808   :  { %v5379_v29 = vmul.f32 %v8780_v53, %v8778_v44  ;;  %5380 = vst.msk [vmem:[#allocation2 + $0x6] sm:$0x1] %vm1889_vm3, %v5378_v50  ;;  %v5382_v34 = vpack.c.bf16 %v5378_v50, %v5378_v50 }
 0x80a   :  { %5381 = vst.msk [vmem:[#allocation2 + $0xe] sm:$0x1] %vm1889_vm3, %v5379_v29  ;;  %v5383_v30 = vpack.c.bf16 %v5379_v29, %v5379_v29  ;;  %v5392_v32 = vunpack.c.l.b16 %v5382_v34 }
 0x80c   :  { %v5393_v31 = vunpack.c.l.b16 %v5383_v30 }
 0x80e   :  { %v5394_v21 = vrot.slane %v5393_v31, 7 }
 0x810   :  { %v5395_v26 = vsel %vm2214_vm4, %v5394_v21, %v5392_v32 }
 0x811   :  { %v5396_v36 = vpack.c.b16 %v5395_v26, %v5395_v26 }
 0x813   :  { %8083 = vmatmul.mubr.msk.bf16.vlgmr.msra.gmra.mxu0 %vm287_vm1, %v5396_v36  ;;  %8091 = vmatmul.mubr.msk.bf16.vlgmr.msra.gmra.mxu1 %vm287_vm1, %v5396_v36 }
 0x814   :  { %8095 = vmatpush3.bf16.msra.mxu0 %v8374_v25  ;;  %8103 = vmatpush3.bf16.msra.mxu1 %v8375_v35 }
 0x815   :  { %8096 = vmatprep.subr.bf16.mxu0 %v9191_v0  ;;  %8104 = vmatprep.subr.bf16.mxu1 %v9191_v0 }
 0x816   :  { %8098 = vmatprep.mubr.msk.bf16.mxu0 %vm9192_vm0, %v9191_v0  ;;  %8106 = vmatprep.mubr.msk.bf16.mxu1 %vm9192_vm0, %v9191_v0 }
 0x818   :  { %8097 = vmatpush3.bf16.msra.mxu0 %v8376_v38  ;;  %8105 = vmatpush3.bf16.msra.mxu1 %v8377_v45 }
 0x819   :  { %8110 = vmatprep.subr.bf16.mxu0 %v9191_v0  ;;  %8118 = vmatprep.subr.bf16.mxu1 %v9191_v0 }
 0x81b   :  { %8099 = vmatmul.mubr.msk.bf16.vlgmr.msra.gmra.mxu0 %vm287_vm1, %v5396_v36  ;;  %8107 = vmatmul.mubr.msk.bf16.vlgmr.msra.gmra.mxu1 %vm287_vm1, %v5396_v36 }
 0x81c   :  { %8114 = vmatprep.mubr.msk.bf16.mxu0 %vm9192_vm0, %v9191_v0  ;;  %8120 = vmatprep.mubr.msk.bf16.mxu1 %vm9192_vm0, %v9191_v0 }
 0x81d   :  { %8111 = vmatpush3.bf16.msra.mxu0 %v8378_v39 }
 0x81e   :  { %8112 = vmatprep.subr.bf16.mxu0 %v9191_v0 }
 0x821   :  { %8113 = vmatpush3.bf16.msra.mxu0 %v8379_v41 }
 0x822   :  { %8124 = vmatprep.subr.bf16.mxu0 %v9191_v0 }
 0x8d3   :  { %v5446_v49 = vpop.f32.mrf.mxu0  ;;  %v5510_v46 = vpop.f32.mrf.mxu1 }
 0x8d4   :  { %v5453_v3 = vrot.slane %v5446_v49, 1  ;;  %v5456_v42 = vadd.f32 %v5446_v49, %v5384_v4  ;;  %v5517_v48 = vrot.slane %v5510_v46, 1  ;;  %v5520_v52 = vadd.f32 %v5510_v46, %v5458_v37 }
 0x8d5   :  { %v8084_v55 = vpop.f32.mrf.mxu0  ;;  %v8092_v56 = vpop.f32.mrf.mxu1 }
 0x8d6   :  { %v5457_v57 = vadd.f32 %v5453_v3, %v5385_v43  ;;  %v7361_v58 = vmul.f32 -1.442695, %v5456_v42  ;;  %v5521_v40 = vadd.f32 %v5517_v48, %v5459_v33  ;;  %v7363_v59 = vmul.f32 -1.442695, %v5520_v52 }
 0x8d7   :  { %v5449_v47 = vpop.f32.mrf.mxu0  ;;  %v5513_v60 = vpop.f32.mrf.mxu1 }
 0x8d8   :  { %8781 = vpow2.f32 %v7361_v58  ;;  %v7362_v61 = vmul.f32 -1.442695, %v5457_v57  ;;  %v7364_v62 = vmul.f32 -1.442695, %v5521_v40 }
 0x8d9   :  { %8783 = vpow2.f32 %v7363_v59  ;;  %v8085_v63 = vpop.f32.mrf.mxu0  ;;  %v8093_v2 = vpop.f32.mrf.mxu1 }
 0x8da   :  { %8785 = vpow2.f32 %v7362_v61 }
 0x8db   :  { %8787 = vpow2.f32 %v7364_v62  ;;  %v5574_v7 = vpop.f32.mrf.mxu0  ;;  %v5638_v8 = vpop.f32.mrf.mxu1 }
 0x8dc   :  { %v5645_v9 = vrot.slane %v5638_v8, 1  ;;  %v5581_v11 = vrot.slane %v5574_v7, 1  ;;  %v5648_v20 = vadd.f32 %v5638_v8, %v5586_v12  ;;  %v5584_v24 = vadd.f32 %v5574_v7, %v5522_v17 }
 0x8dd   :  { %v8100_v51 = vpop.f32.mrf.mxu0  ;;  %v8108_v14 = vpop.f32.mrf.mxu1 }
 0x8de   :  { %v5649_v5 = vadd.f32 %v5645_v9, %v5587_v54  ;;  %v5585_v18 = vadd.f32 %v5581_v11, %v5523_v23  ;;  %v7365_v44 = vmul.f32 -1.442695, %v5648_v20  ;;  %8789 = vtanh.f32 %v5584_v24  ;;  %v10239_v51 = vld [vmem:[#allocation11] sm:$0x3] }
 0x8df   :  { %v5577_v10 = vpop.f32.mrf.mxu0  ;;  %v5641_v22 = vpop.f32.mrf.mxu1  ;;  %v5779_v9 = vand.u32 127, %v549_v6  ;;  %vm5769_vm6 = vcmp.gt.f32.partialorder %v10239_v51, 0.5 }
 0x8e0   :  { %v7366_v50 = vmul.f32 -1.442695, %v5649_v5  ;;  %8791 = vtanh.f32 %v5585_v18 }
 0x8e1   :  { %v8101_v28 = vpop.f32.mrf.mxu0  ;;  %v8109_v19 = vpop.f32.mrf.mxu1  ;;  %8793 = vpow2.f32 %v7365_v44  ;;  %v10237_v12 = vsub.s32 %v5779_v9, %v9416_v13 }
 0x8e2   :  { %8795 = vpow2.f32 %v7366_v50 }
 0x8e5   :  { %v8782_v53 = vpop.eup %8781 }
 0x8e6   :  { %v8784_v29 = vpop.eup %8783  ;;  %v5656_v34 = vadd.f32 1.0, %v8782_v53 }
 0x8e7   :  { %v8786_v30 = vpop.eup %8785  ;;  %v5668_v31 = vadd.f32 1.0, %v8784_v29 }
 0x8e8   :  { %v8788_v32 = vpop.eup %8787  ;;  %v5657_v21 = vadd.f32 1.0, %v8786_v30  ;;  %8797 = vrcp.f32 %v5656_v34 }
 0x8e9   :  { %v5669_v26 = vadd.f32 1.0, %v8788_v32  ;;  %8799 = vrcp.f32 %v5668_v31 }
 0x8ea   :  { %8801 = vrcp.f32 %v5657_v21 }
 0x8eb   :  { %8803 = vrcp.f32 %v5669_v26  ;;  %v8790_v25 = vpop.eup %8789  ;;  %v8380_v26 = vld [vmem:[#allocation20 + $0x8] sm:$0xff]  }
 0x8ed   :  { %v8792_v35 = vpop.eup %8791 }
 0x8ee   :  { %v8794_v36 = vpop.eup %8793 }
 0x8ef   :  { %v8796_v38 = vpop.eup %8795  ;;  %v5682_v4 = vadd.f32 1.0, %v8794_v36 }
 0x8f0   :  { %v5683_v42 = vadd.f32 1.0, %v8796_v38 }
 0x8f1   :  { %8805 = vrcp.f32 %v5682_v4 }
 0x8f5   :  { %v8798_v45 = vpop.eup %8797 }
 0x8f6   :  { %v8800_v39 = vpop.eup %8799  ;;  %v5690_v41 = vmul.f32 %v8798_v45, %v8790_v25  ;;  %v8381_v25 = vld [vmem:[#allocation20] sm:$0xff]  }
 0x8f7   :  { %v8802_v49 = vpop.eup %8801  ;;  %v5688_v37 = vmul.f32 %v8800_v39, %v10172_v27 }
 0x8f8   :  { %v8804_v46 = vpop.eup %8803  ;;  %v5691_v3 = vmul.f32 %v8802_v49, %v8792_v35 }
 0x8f9   :  { %v5689_v48 = vmul.f32 %v8804_v46, %v10174_v15  ;;  %v5692_v52 = vadd.f32 %v5690_v41, %v5688_v37 }
 0x8fb   :  { %v5693_v43 = vadd.f32 %v5691_v3, %v5689_v48  ;;  %8807 = vtanh.f32 %v5692_v52 }
 0x8fc   :  { %8809 = vrcp.f32 %v5683_v42 }
 0x8fd   :  { %8811 = vtanh.f32 %v5693_v43 }
 0x8fe   :  { %v8806_v33 = vpop.eup %8805 }
 0x908   :  { %v8808_v55 = vpop.eup %8807 }
 0x909   :  { %v8810_v56 = vpop.eup %8809  ;;  %v5696_v57 = vmul.f32 %v8808_v55, %v8806_v33  ;;  %v8382_v33 = vld [vmem:[#allocation24 + $0x8] sm:$0xff]   ;;  %v8383_v55 = vld [vmem:[#allocation24] sm:$0xff]  }
 0x90a   :  { %v8812_v58 = vpop.eup %8811 }
 0x90b   :  { %v5697_v40 = vmul.f32 %v8812_v58, %v8810_v56  ;;  %5698 = vst.msk [vmem:[#allocation2 + $0x7] sm:$0x1] %vm1889_vm3, %v5696_v57  ;;  %v8384_v56 = vld [vmem:[%s10436_s14 + $0x8] sm:$0xff]   ;;  %v8385_v57 = vld [vmem:[#allocation9] sm:$0xff]  }
 0x90c   :  { %v6075_v58 = vpack.c.bf16 %v8385_v57, %v8385_v57 }
 0x90d   :  { %5699 = vst.msk [vmem:[#allocation2 + $0xf] sm:$0x1] %vm1889_vm3, %v5697_v40  ;;  %v8386_v40 = vld [vmem:[%s10436_s14] sm:$0xff]  }
 0x912   :  { %v5700_v27 = vld [vmem:[#allocation2] sm:$0xff] }
 0x913   :  { %v5702_v59 = vpack.c.bf16 %v5700_v27, %v5700_v27 }
 0x914   :  { %v5701_v15 = vld [vmem:[#allocation2 + $0x8] sm:$0xff] }
 0x915   :  { %v10221_v47 = vpack.c.bf16 %v5701_v15, %v5700_v27  ;;  %v10223_v60 = vsel %vm5836_vm5, %v5702_v59, 0  ;;  %v5703_v61 = vpack.c.bf16 %v5701_v15, %v5701_v15  ;;  %v7373_v27 = vld [vmem:[#allocation21] ss:$0 sm:$0xff] }
 0x916   :  { %8119 = vmatpush3.bf16.msra.mxu1 %v10223_v60 }
 0x917   :  { %8115 = vmatmul.mubr.msk.bf16.vlgmr.msra.gmra.mxu0 %vm287_vm1, %v10221_v47  ;;  %v10228_v62 = vsel %vm5836_vm5, %v5703_v61, 0  ;;  %8130 = vmatprep.subr.bf16.mxu1 %v9191_v0 }
 0x918   :  { %8125 = vmatpush3.bf16.msra.mxu0 %v10228_v62  ;;  %8126 = vmatprep.mubr.msk.bf16.mxu0 %vm9192_vm0, %v9191_v0 }
 0x919   :  { %8138 = vmatprep.subr.bf16.mxu0 %v9191_v0 }
 0x9d7   :  { %v5762_v63 = vpop.f32.mrf.mxu0 }
 0x9d8   :  { %5773 = vperm.xlu0 %8254, %v5762_v63  }
 0x9d9   :  { %v8116_v2 = vpop.f32.mrf.mxu0 }
 0x9db   :  { %v5765_v7 = vpop.f32.mrf.mxu0 }
 0x9dc   :  { %5776 = vperm.xlu0 %8254, %v5765_v7  }
 0x9dd   :  { %v8117_v8 = vpop.f32.mrf.mxu0 }
 0x9de   :  { %v8387_v8 = vld [vmem:[%s10440_s18 + $0x8] sm:$0xff]  }
 0xa53   :  { %v5774_v11 = vpop.permute.xlu0 %5773 }
 0xa54   :  { %v5783_v54 = vrot.slane %v5774_v11, %v10237_v12  ;;  %v8388_v11 = vld [vmem:[%s10440_s18] sm:$0xff]   ;;  %s9195_s18 = smov 32  }
 0xa57   :  { %v5777_v14 = vpop.permute.xlu0 %5776 }
 0xa58   :  { %v5787_v20 = vrot.slane %v5777_v14, %v10237_v12 }
 0xa5a   :  { %v5788_v17 = vsel %vm2214_vm4, %v5787_v20, %v5783_v54 }
 0xa5b   :  { %v5790_v5 = vsel %vm5769_vm6, %v5788_v17, -1e+09 }
 0xa5c   :  { %v5792_v10 = vsel %vm5791_vm7, %v5790_v5, -inf }
 0xa5d   :  { %5793 = vmax.xlane.f32.xlu1 %v5792_v10 }
 0xae6   :  { %v5794_v6 = vpop.xlane.xlu1 %5793 }
 0xae7   :  { %v5795_v22 = vsub.f32 %v5790_v5, %v5794_v6  ;;  %v7381_v5 = vld [vmem:[#allocation26] ss:$0 sm:$0xff] }
 0xae9   :  { %v5796_v23 = vmul.f32 1.442695, %v5795_v22 }
 0xaeb   :  { %8813 = vpow2.f32 %v5796_v23 }
 0xaf8   :  { %v8814_v24 = vpop.eup %8813 }
 0xaf9   :  { %v5798_v18 = vmul.f32 %v8814_v24, %v10239_v51 }
 0xafb   :  { %v5799_v28 = vsel %vm5791_vm7, %v5798_v18, 0.0 }
 0xafc   :  { %5800 = vadd.xlane.f32.xlu1 %v5799_v28 }
 0xb85   :  { %v5801_v19 = vpop.xlane.xlu1 %5800 }
 0xb86   :  { %v5802_v44 = vmax.f32 %v5801_v19, 1e-06 }
 0xb88   :  { %8815 = vrcp.f32 %v5802_v44 }
 0xb95   :  { %v8816_v50 = vpop.eup %8815 }
 0xb96   :  { %v5804_v53 = vmul.f32 %v8816_v50, %v5798_v18 }
 0xb98   :  { %v5812_v29 = vrot.slane %v5804_v53, %v9428_v16 }
 0xb9a   :  { %v5813_v34 = vcombine.high %v5812_v29, %v5812_v29  ;;  %v5820_v30 = vrot.slane %v5812_v29, %v9428_v16 }
 0xb9c   :  { %v5830_v31 = vpack.c.bf16 %v5820_v30, %v5820_v30  ;;  %v5827_v32 = vrot.slane %v5813_v34, %v9428_v16 }
 0xb9e   :  { %8121 = vmatmul.mubr.msk.bf16.vlgmr.msra.gmra.mxu1 %vm5832_vm8, %v5830_v31  ;;  %v5831_v21 = vpack.c.bf16 %v5827_v32, %v5827_v32 }
 0xb9f   :  { %8134 = vmatprep.mubr.msk.bf16.mxu1 %vm9192_vm0, %v9191_v0  ;;  %8131 = vmatpush3.bf16.msra.mxu1 %v8380_v26  ;;  %v6306_v26 = vrot.slane %v10239_v51, %v9428_v16 }
 0xba0   :  { %8127 = vmatmul.mubr.msk.bf16.vlgmr.msra.gmra.mxu0 %vm5832_vm8, %v5831_v21  ;;  %8132 = vmatprep.subr.bf16.mxu1 %v9191_v0 }
 0xba1   :  { %8142 = vmatprep.mubr.msk.bf16.mxu0 %vm9192_vm0, %v9191_v0  ;;  %8139 = vmatpush3.bf16.msra.mxu0 %v8384_v56 }
 0xba2   :  { %8140 = vmatprep.subr.bf16.mxu0 %v9191_v0 }
 0xba3   :  { %8133 = vmatpush3.bf16.msra.mxu1 %v8381_v25  ;;  %v6307_v25 = vcombine.high %v6306_v26, %v6306_v26 }
 0xba4   :  { %8146 = vmatprep.subr.bf16.mxu1 %v9191_v0 }
 0xba5   :  { %8141 = vmatpush3.bf16.msra.mxu0 %v8386_v40 }
 0xba6   :  { %8154 = vmatprep.subr.bf16.mxu0 %v9191_v0 }
 0xc5e   :  { %v5874_v35 = vpop.f32.mrf.mxu1 }
 0xc5f   :  { %v5926_v45 = vpack.c.bf16 %v5874_v35, %v5874_v35  ;;  %v6321_v35 = vrot.slane %v6307_v25, %v9428_v16 }
 0xc60   :  { %v8122_v36 = vpop.f32.mrf.mxu1  ;;  %v5920_v38 = vpop.f32.mrf.mxu0 }
 0xc61   :  { %v5927_v39 = vpack.c.bf16 %v5920_v38, %v5920_v38  ;;  %v5941_v3 = vunpack.c.l.b16 %v5926_v45  ;;  %v6330_v36 = vsub.s32 0, %v9416_v13  ;;  %vm6325_vm10 = vcmp.gt.f32.partialorder %v6321_v35, 0.5 }
 0xc62   :  { %v5877_v41 = vpop.f32.mrf.mxu1  ;;  %v8128_v4 = vpop.f32.mrf.mxu0  ;;  %v6327_v45 = vsel %vm6325_vm10, 1, %v9193_v1 }
 0xc63   :  { %v5942_v49 = vunpack.c.l.b16 %v5927_v39  ;;  %v6335_v41 = vrot.slane %v6327_v45, %v6330_v36  ;;  %v8394_v45 = vld [vmem:[%s10443_s21] sm:$0xff]  }
 0xc64   :  { %v8123_v37 = vpop.f32.mrf.mxu1  ;;  %v5923_v46 = vpop.f32.mrf.mxu0 }
 0xc65   :  { %v5943_v42 = vrot.slane %v5942_v49, 7  ;;  %vm10325_vm13 = vcmp.eq.s32.totalorder %v6335_v41, 1  ;;  %v7392_v41 = vld [vmem:[%s10442_s20] ss:$0 sm:$0xff]  ;;  %s9196_s20 = smov 6  }
 0xc66   :  { %v8129_v48 = vpop.f32.mrf.mxu0 }
 0xc67   :  { %v5944_v52 = vsel %vm2214_vm4, %v5943_v42, %v5941_v3 }
 0xc68   :  { %v5945_v43 = vpack.c.b16 %v5944_v52, %v5944_v52 }
 0xc6a   :  { %8135 = vmatmul.mubr.msk.bf16.vlgmr.msra.gmra.mxu1 %vm287_vm1, %v5945_v43 }
 0xc6b   :  { %8150 = vmatprep.mubr.msk.bf16.mxu1 %vm9192_vm0, %v9191_v0  ;;  %8147 = vmatpush3.bf16.msra.mxu1 %v8382_v33 }
 0xc6c   :  { %8148 = vmatprep.subr.bf16.mxu1 %v9191_v0 }
 0xc6f   :  { %8149 = vmatpush3.bf16.msra.mxu1 %v8383_v55 }
 0xc70   :  { %8162 = vmatprep.subr.bf16.mxu1 %v9191_v0 }
 0xc72   :  { %8151 = vmatmul.mubr.msk.bf16.vlgmr.msra.gmra.mxu1 %vm287_vm1, %v6075_v58 }
 0xc73   :  { %8164 = vmatprep.mubr.msk.bf16.mxu1 %vm9192_vm0, %v9191_v0 }
 0xd2a   :  { %v5995_v59 = vpop.f32.mrf.mxu1 }
 0xd2b   :  { %v5996_v15 = vadd.f32 %v7373_v27, %v5995_v59 }
 0xd2c   :  { %v8136_v61 = vpop.f32.mrf.mxu1 }
 0xd2d   :  { %8817 = vtanh.f32 %v5996_v15 }
 0xd2e   :  { %v5998_v63 = vpop.f32.mrf.mxu1 }
 0xd2f   :  { %v6360_v63 = vrot.slane %v6321_v35, %v6330_v36 }
 0xd30   :  { %v8137_v2 = vpop.f32.mrf.mxu1 }
 0xd32   :  { %v6136_v14 = vpop.f32.mrf.mxu1 }
 0xd33   :  { %v6137_v10 = vadd.f32 %v7381_v5, %v6136_v14 }
 0xd34   :  { %v8152_v54 = vpop.f32.mrf.mxu1 }
 0xd35   :  { %8819 = vtanh.f32 %v6137_v10  ;;  %v8389_v10 = vld [vmem:[%s10441_s19 + $0x18] sm:$0xff]  }
 0xd36   :  { %v6139_v20 = vpop.f32.mrf.mxu1 }
 0xd38   :  { %v8153_v17 = vpop.f32.mrf.mxu1 }
 0xd3a   :  { %v8818_v7 = vpop.eup %8817 }
 0xd3b   :  { %v6002_v9 = vpack.c.bf16 %v8818_v7, %v8818_v7 }
 0xd3d   :  { %8143 = vmatmul.mubr.msk.bf16.vlgmr.msra.gmra.mxu0 %vm287_vm1, %v6002_v9 }
 0xd3e   :  { %8155 = vmatpush3.bf16.msra.mxu0 %v8387_v8  ;;  %8158 = vmatprep.mubr.msk.bf16.mxu0 %vm9192_vm0, %v9191_v0 }
 0xd3f   :  { %8156 = vmatprep.subr.bf16.mxu0 %v9191_v0 }
 0xd42   :  { %8157 = vmatpush3.bf16.msra.mxu0 %v8388_v11  ;;  %v10292_v50 = vpop.eup %8819 }
 0xd43   :  { %8168 = vmatprep.subr.bf16.mxu0 %v9191_v0  ;;  %v6203_v31 = vpack.c.bf16 %v10292_v50, %v10292_v50  ;;  %v6144_v32 = vcombine.high %v10292_v50, %v10292_v50 }
 0xd45   :  { %8159 = vmatmul.mubr.msk.bf16.vlgmr.msra.gmra.mxu0 %vm287_vm1, %v10221_v47  ;;  %v6204_v21 = vpack.c.bf16 %v6144_v32, %v6144_v32 }
 0xd46   :  { %8170 = vmatprep.mubr.msk.bf16.mxu0 %vm9192_vm0, %v9191_v0 }
 0xdfd   :  { %v10289_v6 = vpop.f32.mrf.mxu0 }
 0xdff   :  { %v8144_v22 = vpop.f32.mrf.mxu0 }
 0xe01   :  { %v6066_v23 = vpop.f32.mrf.mxu0 }
 0xe03   :  { %v8145_v24 = vpop.f32.mrf.mxu0 }
 0xe05   :  { %v6196_v18 = vpop.f32.mrf.mxu0 }
 0xe06   :  { %v6205_v28 = vpack.c.bf16 %v6196_v18, %v6196_v18  ;;  %v8390_v18 = vld [vmem:[%s10441_s19 + $0x10] sm:$0xff]  }
 0xe07   :  { %v8160_v19 = vpop.f32.mrf.mxu0 }
 0xe08   :  { %v6211_v44 = vsel %vm287_vm1, %v6205_v28, 0  ;;  %v8391_v19 = vld [vmem:[%s10441_s19 + $0x8] sm:$0xff]  }
 0xe09   :  { %v6199_v53 = vpop.f32.mrf.mxu0  ;;  %8163 = vmatpush3.bf16.xpose.msra.mxu1 %v6211_v44  ;;  %v8392_v44 = vld [vmem:[%s10441_s19] sm:$0xff]  }
 0xe0a   :  { %v6206_v29 = vpack.c.bf16 %v6199_v53, %v6199_v53  ;;  %8174 = vmatprep.subr.bf16.mxu1 %v9191_v0 }
 0xe0b   :  { %v8161_v34 = vpop.f32.mrf.mxu0 }
 0xe0c   :  { %v6257_v30 = vsel %vm287_vm1, %v6206_v29, 0 }
 0xe0d   :  { %8169 = vmatpush3.bf16.xpose.msra.mxu0 %v6257_v30 }
 0xe0e   :  { %8180 = vmatprep.subr.bf16.mxu0 %v9191_v0 }
 0xe10   :  { %8165 = vmatmul.mubr.msk.bf16.vlgmr.msra.gmra.mxu1 %vm287_vm1, %v6203_v31 }
 0xe11   :  { %8175 = vmatpush3.bf16.msra.mxu1 %v10223_v60  ;;  %8176 = vmatprep.mubr.msk.bf16.mxu1 %vm9192_vm0, %v9191_v0  ;;  %v6314_v60 = vrot.slane %v6306_v26, %v9428_v16 }
 0xe12   :  { %8186 = vmatprep.subr.bf16.mxu1 %v9191_v0 }
 0xe13   :  { %vm6324_vm9 = vcmp.gt.f32.partialorder %v6314_v60, 0.5  ;;  %v6356_v59 = vrot.slane %v6314_v60, %v6330_v36 }
 0xe14   :  { %8171 = vmatmul.mubr.msk.bf16.vlgmr.msra.gmra.mxu0 %vm287_vm1, %v6204_v21  ;;  %v6326_v38 = vsel %vm6324_vm9, 1, %v9193_v1 }
 0xe15   :  { %8181 = vmatpush3.bf16.msra.mxu0 %v10228_v62  ;;  %8182 = vmatprep.mubr.msk.bf16.mxu0 %vm9192_vm0, %v9191_v0  ;;  %v6331_v62 = vrot.slane %v6326_v38, %v6330_v36 }
 0xe16   :  { %8198 = vmatprep.subr.bf16.mxu0 %v9191_v0 }
 0xe17   :  { %vm10318_vm11 = vcmp.eq.s32.totalorder %v6331_v62, 1  ;;  %v8393_v62 = vld [vmem:[%s10443_s21 + $0x8] sm:$0xff]   ;;  %s9197_s21 = smov [#allocation30]  }
 0xe18   :  { %s6973_s16 = sshll.u32 %s9197_s21, 4  ;;  %s6974_s16 = int_to_ptr.vmem [resolvable:$true] %s6973_s16 }
 0xe19   :  { %s9111_s5 = scalar_lea.vmem %s6974_s16, 256  ;;  %p9116_p1 = scmp.lt.s32.totalorder %s6974_s16, %s6974_s16 }
 0xe1a   :  { %p9112_p0 = scmp.ne.s32.totalorder %s6974_s16, %s9111_s5  ;;  %p9117_p2 = scmp.lt.s32.totalorder %s9111_s5, %s9111_s5 }
 0xe1c   :  { %p9118_p3 = por %p9117_p2, %p9116_p1 }
 0xe1e   :  { %p9119_p4 = pnand %p9118_p3, %p9112_p0 }
 0xed0   :  { %v6247_v51 = vpop.f32.mrf.mxu1 }
 0xed1   :  { %v6338_v4 = vsel %vm10318_vm11, %v6247_v51, -1e+09 }
 0xed2   :  { %v8166_v49 = vpop.f32.mrf.mxu1  ;;  %v6341_v37 = vsel %vm6340_vm12, %v6338_v4, -inf }
 0xed3   :  { %6342 = vmax.xlane.f32.xlu0 %v6341_v37 }
 0xed4   :  { %v6250_v46 = vpop.f32.mrf.mxu1  ;;  %v6293_v1 = vpop.f32.mrf.mxu0 }
 0xed5   :  { %v6339_v3 = vsel %vm10325_vm13, %v6293_v1, -1e+09 }
 0xed6   :  { %v8167_v42 = vpop.f32.mrf.mxu1  ;;  %v8172_v48 = vpop.f32.mrf.mxu0  ;;  %v6344_v52 = vsel %vm6340_vm12, %v6339_v3, -inf }
 0xed7   :  { %6345 = vmax.xlane.f32.xlu1 %v6344_v52  ;;  %v8396_v48 = vld [vmem:[#allocation27] sm:$0xff]  }
 0xed8   :  { %v6296_v43 = vpop.f32.mrf.mxu0 }
 0xeda   :  { %v8173_v33 = vpop.f32.mrf.mxu0 }
 0xf5c   :  { %v6343_v55 = vpop.xlane.xlu0 %6342 }
 0xf5d   :  { %v6347_v56 = vsub.f32 %v6338_v4, %v6343_v55 }
 0xf5f   :  { %v6349_v57 = vmul.f32 1.442695, %v6347_v56 }
 0xf60   :  { %v6346_v58 = vpop.xlane.xlu1 %6345 }
 0xf61   :  { %8821 = vpow2.f32 %v6349_v57  ;;  %v6348_v40 = vsub.f32 %v6339_v3, %v6346_v58  ;;  %v8395_v3 = vld [vmem:[#allocation27 + $0x8] sm:$0xff]  }
 0xf63   :  { %v6351_v27 = vmul.f32 1.442695, %v6348_v40 }
 0xf65   :  { %8823 = vpow2.f32 %v6351_v27 }
 0xf6e   :  { %v8822_v15 = vpop.eup %8821 }
 0xf6f   :  { %v6363_v61 = vmul.f32 %v8822_v15, %v6356_v59 }
 0xf71   :  { %v6365_v2 = vsel %vm6340_vm12, %v6363_v61, 0.0 }
 0xf72   :  { %v8824_v7 = vpop.eup %8823  ;;  %6366 = vadd.xlane.f32.xlu1 %v6365_v2  ;;  %v6643_v2 = vld [vmem:[#allocation3 + $0x8] sm:$0x1f] }
 0xf73   :  { %v6364_v8 = vmul.f32 %v8824_v7, %v6360_v63  ;;  %v6702_v7 = vpack.c.bf16 %v6643_v2, %v6643_v2 }
 0xf75   :  { %v6368_v9 = vsel %vm6340_vm12, %v6364_v8, 0.0 }
 0xf76   :  { %6369 = vadd.xlane.f32.xlu1 %v6368_v9  ;;  %v260_v9 = vld [vmem:[#allocation12] sm:$0x3] }
 0xf77   :  { %vm6624_vm15 = vcmp.gt.f32.partialorder %v260_v9, 0.5 }
 0xf87   :  { %6465 = vrot.lane.b32.xlu1 %v10292_v50, %s9195_s18 }
 0xf8b   :  { %6467 = vrot.lane.b32.xlu1 %v6144_v32, %s9195_s18 }
 0xffb   :  { %v6367_v11 = vpop.xlane.xlu1 %6366 }
 0xffc   :  { %v6371_v14 = vmax.f32 %v6367_v11, 1e-06 }
 0xffe   :  { %8825 = vrcp.f32 %v6371_v14 }
 0xfff   :  { %v6370_v54 = vpop.xlane.xlu1 %6369 }
0x1000   :  { %v6372_v20 = vmax.f32 %v6370_v54, 1e-06 }
0x1002   :  { %8827 = vrcp.f32 %v6372_v20 }
0x1003   :  { %v6466_v50 = vpop.permute.xlu1 %6465 }
0x1007   :  { %v6468_v34 = vpop.permute.xlu1 %6467 }
0x100b   :  { %v8826_v17 = vpop.eup %8825 }
0x100c   :  { %v6374_v5 = vmul.f32 %v8826_v17, %v6363_v61 }
0x100e   :  { %v6377_v22 = vpack.c.bf16 %v6374_v5, %v6374_v5 }
0x100f   :  { %v8828_v23 = vpop.eup %8827 }
0x1010   :  { %v6376_v24 = vmul.f32 %v8828_v23, %v6364_v8  ;;  %8177 = vmatmul.mubr.msk.bf16.vlgmr.msra.gmra.mxu1 %vm5832_vm8, %v6377_v22 }
0x1011   :  { %8187 = vmatpush3.bf16.msra.mxu1 %v8389_v10  ;;  %8194 = vmatprep.mubr.msk.bf16.mxu1 %vm9192_vm0, %v9191_v0 }
0x1012   :  { %v6378_v28 = vpack.c.bf16 %v6376_v24, %v6376_v24  ;;  %8188 = vmatprep.subr.bf16.mxu1 %v9191_v0 }
0x1014   :  { %8183 = vmatmul.mubr.msk.bf16.vlgmr.msra.gmra.mxu0 %vm5832_vm8, %v6378_v28 }
0x1015   :  { %8189 = vmatpush3.bf16.msra.mxu1 %v8390_v18  ;;  %8202 = vmatprep.mubr.msk.bf16.mxu0 %vm9192_vm0, %v9191_v0 }
0x1016   :  { %8190 = vmatprep.subr.bf16.mxu1 %v9191_v0  ;;  %8199 = vmatpush3.bf16.msra.mxu0 %v8393_v62 }
0x1017   :  { %8200 = vmatprep.subr.bf16.mxu0 %v9191_v0 }
0x1019   :  { %8191 = vmatpush3.bf16.msra.mxu1 %v8391_v19 }
0x101a   :  { %8192 = vmatprep.subr.bf16.mxu1 %v9191_v0  ;;  %8201 = vmatpush3.bf16.msra.mxu0 %v8394_v45 }
0x101b   :  { %8206 = vmatprep.subr.bf16.mxu0 %v9191_v0 }
0x101d   :  { %8193 = vmatpush3.bf16.msra.mxu1 %v8392_v44 }
0x101e   :  { %8214 = vmatprep.subr.bf16.mxu1 %v9191_v0 }
0x10d0   :  { %v6416_v53 = vpop.f32.mrf.mxu1 }
0x10d1   :  { %v6471_v32 = vsel %vm287_vm1, %v6416_v53, %v6466_v50 }
0x10d2   :  { %v8178_v29 = vpop.f32.mrf.mxu1 }
0x10d4   :  { %v6419_v30 = vpop.f32.mrf.mxu1  ;;  %v6459_v31 = vpop.f32.mrf.mxu0 }
0x10d5   :  { %v6472_v21 = vsel %vm287_vm1, %v6459_v31, %v6468_v34 }
0x10d6   :  { %v6475_v26 = vcombine.low %v6471_v32, %v6472_v21  ;;  %v8179_v60 = vpop.f32.mrf.mxu1  ;;  %v8184_v25 = vpop.f32.mrf.mxu0 }
0x10d8   :  { %v6477_v35 = vpack.c.bf16 %v6475_v26, %v6475_v26  ;;  %v6462_v36 = vpop.f32.mrf.mxu0 }
0x10da   :  { %v8185_v38 = vpop.f32.mrf.mxu0  ;;  %8195 = vmatmul.mubr.msk.bf16.vlgmr.msra.gmra.mxu1 %vm6517_vm14, %v6477_v35 }
0x10db   :  { %8216 = vmatprep.mubr.msk.bf16.mxu1 %vm9192_vm0, %v9191_v0 }
0x119a   :  { %v6555_v51 = vpop.f32.mrf.mxu1 }
0x119b   :  { %v6556_v4 = vadd.f32 %v7392_v41, %v6555_v51 }
0x119c   :  { %v8196_v49 = vpop.f32.mrf.mxu1 }
0x119d   :  { %8829 = vtanh.f32 %v6556_v4 }
0x119e   :  { %v6558_v37 = vpop.f32.mrf.mxu1 }
0x11a0   :  { %v8197_v46 = vpop.f32.mrf.mxu1 }
0x11aa   :  { %v8830_v1 = vpop.eup %8829 }
0x11ab   :  { %v6562_v42 = vpack.c.bf16 %v8830_v1, %v8830_v1 }
0x11ad   :  { %8203 = vmatmul.mubr.msk.bf16.vlgmr.msra.gmra.mxu0 %vm287_vm1, %v6562_v42 }
0x11ae   :  { %8207 = vmatpush3.bf16.msra.mxu0 %v8395_v3  ;;  %8210 = vmatprep.mubr.msk.bf16.mxu0 %vm9192_vm0, %v9191_v0 }
0x11af   :  { %8208 = vmatprep.subr.bf16.mxu0 %v9191_v0 }
0x11b2   :  { %8209 = vmatpush3.bf16.msra.mxu0 %v8396_v48 }
0x11b3   :  { %8220 = vmatprep.subr.bf16.mxu0 %v9191_v0 }
0x11b5   :  { %8211 = vmatmul.mubr.msk.bf16.vlgmr.msra.gmra.mxu0 %vm287_vm1, %v10221_v47  ;;  %v6642_v47 = vld [vmem:[#allocation3] sm:$0x1f] }
0x11b6   :  { %8222 = vmatprep.mubr.msk.bf16.mxu0 %vm9192_vm0, %v9191_v0  ;;  %v6701_v0 = vpack.c.bf16 %v6642_v47, %v6642_v47 }
0x126d   :  { %v6616_v52 = vpop.f32.mrf.mxu0 }
0x126e   :  { %v6623_v43 = vcombine.high %v6616_v52, %v6616_v52  ;;  %6626 = vperm.xlu0 %8254, %v6616_v52  }
0x126f   :  { %v8204_v33 = vpop.f32.mrf.mxu0 }
0x1270   :  { %6629 = vperm.xlu1 %8255, %v6623_v43  }
0x1271   :  { %v6619_v55 = vpop.f32.mrf.mxu0 }
0x1273   :  { %v8205_v56 = vpop.f32.mrf.mxu0 }
0x1275   :  { %v6694_v57 = vpop.f32.mrf.mxu0 }
0x1276   :  { %v6703_v58 = vpack.c.bf16 %v6694_v57, %v6694_v57 }
0x1277   :  { %v8212_v40 = vpop.f32.mrf.mxu0 }
0x1278   :  { %v6709_v27 = vsel %vm287_vm1, %v6703_v58, 0 }
0x1279   :  { %v6697_v59 = vpop.f32.mrf.mxu0  ;;  %8215 = vmatpush3.bf16.xpose.msra.mxu1 %v6709_v27 }
0x127a   :  { %v6704_v15 = vpack.c.bf16 %v6697_v59, %v6697_v59 }
0x127b   :  { %v8213_v61 = vpop.f32.mrf.mxu0 }
0x127c   :  { %v6755_v63 = vsel %vm287_vm1, %v6704_v15, 0 }
0x127d   :  { %8221 = vmatpush3.bf16.xpose.msra.mxu0 %v6755_v63 }
0x1280   :  { %8217 = vmatmul.mubr.msk.bf16.vlgmr.msra.gmra.mxu1 %vm287_vm1, %v6701_v0 }
0x1284   :  { %8223 = vmatmul.mubr.msk.bf16.vlgmr.msra.gmra.mxu0 %vm287_vm1, %v6702_v7 }
0x12e9   :  { %v6627_v8 = vpop.permute.xlu0 %6626 }
0x12ea   :  { %v6634_v14 = vrot.slane %v6627_v8, %v10237_v12 }
0x12eb   :  { %v6630_v11 = vpop.permute.xlu1 %6629 }
0x12ec   :  { %v6638_v54 = vrot.slane %v6630_v11, %v10237_v12 }
0x12ee   :  { %v6639_v20 = vsel %vm2214_vm4, %v6638_v54, %v6634_v14 }
0x12ef   :  { %v6641_v17 = vsel %vm6624_vm15, %v6639_v20, -1e+09 }
0x12f0   :  { %6800 = vrot.lane.b32.xlu1 %v6641_v17, %s9196_s20 }
0x1340   :  { %v6745_v5 = vpop.f32.mrf.mxu1 }
0x1341   :  { %v6797_v10 = vsel %vm10318_vm11, %v6745_v5, -1e+09 }
0x1342   :  { %v6810_v22 = vcombine.high %v6797_v10, %v6797_v10  ;;  %v6817_v23 = vrot.slane %v6797_v10, %v9428_v16  ;;  %v8218_v24 = vpop.f32.mrf.mxu1 }
0x1344   :  { %v6825_v18 = vcombine.high %v6817_v23, %v6817_v23  ;;  %v6748_v28 = vpop.f32.mrf.mxu1  ;;  %v6791_v19 = vpop.f32.mrf.mxu0  ;;  %v6824_v44 = vrot.slane %v6810_v22, %v9428_v16  ;;  %v6832_v50 = vrot.slane %v6817_v23, %v9428_v16 }
0x1345   :  { %v6798_v12 = vsel %vm10325_vm13, %v6791_v19, -1e+09 }
0x1346   :  { %v6846_v53 = vrot.slane %v6825_v18, %v9428_v16  ;;  %v6849_v29 = vcombine.high %v6798_v12, %v6798_v12  ;;  %v6856_v39 = vrot.slane %v6798_v12, %v9428_v16  ;;  %v8219_v34 = vpop.f32.mrf.mxu1  ;;  %v8224_v30 = vpop.f32.mrf.mxu0  ;;  %v6839_v25 = vrot.slane %v6824_v44, %v9428_v16 }
0x1348   :  { %v6888_v31 = vcombine.low %v6832_v50, %v6846_v53  ;;  %v7406_v32 = vcombine.high %v6832_v50, %v6846_v53  ;;  %v6863_v21 = vrot.slane %v6849_v29, %v9428_v16  ;;  %v6864_v26 = vcombine.high %v6856_v39, %v6856_v39  ;;  %v6794_v60 = vpop.f32.mrf.mxu0 }
0x1349   :  { %v6871_v13 = vrot.slane %v6856_v39, %v9428_v16 }
0x134a   :  { %v6885_v35 = vrot.slane %v6864_v26, %v9428_v16  ;;  %v8225_v36 = vpop.f32.mrf.mxu0  ;;  %v6898_v38 = vrot.slane %v6888_v31, %v9428_v16  ;;  %v6905_v62 = vrot.slane %v7406_v32, %v9428_v16  ;;  %v6878_v51 = vrot.slane %v6863_v21, %v9428_v16 }
0x134b   :  { %v6886_v45 = vcombine.high %v6871_v13, %v6871_v13  ;;  %v6890_v41 = vcombine.low %v6839_v25, %v6871_v13 }
0x134c   :  { %v6887_v4 = vcombine.high %v6885_v35, %v6885_v35  ;;  %v6920_v46 = vcombine.low %v6898_v38, %v6905_v62 }
0x134d   :  { %v6891_v49 = vcombine.low %v6885_v35, %v6886_v45  ;;  %v6912_v1 = vrot.slane %v6890_v41, %v9428_v16 }
0x134e   :  { %v6937_v37 = vcombine.low %v6887_v4, %v6878_v51  ;;  %v6928_v43 = vrot.slane %v6920_v46, %v9428_v16 }
0x134f   :  { %v6919_v3 = vrot.slane %v6891_v49, %v9428_v16 }
0x1350   :  { %v6944_v42 = vrot.slane %v6937_v37, %v9428_v16 }
0x1351   :  { %v6921_v48 = vcombine.low %v6912_v1, %v6919_v3 }
0x1352   :  { %v6951_v52 = vrot.slane %v6944_v42, %v9428_v16 }
0x1353   :  { %v6935_v33 = vrot.slane %v6921_v48, %v9428_v16 }
0x1354   :  { %v6955_v55 = vsel %vm5832_vm8, %v6951_v52, 0.0 }
0x1355   :  { %v6936_v56 = vcombine.low %v6928_v43, %v6935_v33  ;;  %6957 = vst [vmem:[#allocation30 + $0x8] sm:$0x3] %v6955_v55 }
0x1357   :  { %v6954_v57 = vsel %vm5832_vm8, %v6936_v56, 0.0 }
0x1358   :  { %6956 = vst [vmem:[#allocation30] sm:$0xff] %v6954_v57 }
0x1359   :  { %9122 = shalt.err (!%p9119_p4)
}
0x135a   :  { %6979 = dma.vmem_to_hbm [thread:$0]  %s6974_s16, 256, %s10446_s24, [#allocation31], %s9182_s30, %s9182_s30, %s9183_s25   ;;  %v7377_v16 = vld [vmem:[#allocation23] ss:$0 sm:$0xff]  ;;  %vm6803_vm0 = vcmask 48128   ;;  %vm6805_vm1 = vcmask 80896  }
0x135b   :  { %s9198_s8 = smov [#allocation29]   ;;  %v6064_v58 = vadd.f32 %v7377_v16, %v10289_v6 }
0x135c   :  { %s6964_s7 = sshll.u32 %s9198_s8, 4  ;;  %s6965_s7 = int_to_ptr.vmem [resolvable:$true] %s6964_s7 }
0x135d   :  { %s9131_s14 = scalar_lea.vmem %s6965_s7, 32  ;;  %p9136_p6 = scmp.lt.s32.totalorder %s6965_s7, %s6965_s7 }
0x135e   :  { %p9132_p5 = scmp.ne.s32.totalorder %s6965_s7, %s9131_s14  ;;  %p9137_p7 = scmp.lt.s32.totalorder %s9131_s14, %s9131_s14 }
0x1360   :  { %p9138_p8 = por %p9137_p7, %p9136_p6 }
0x1362   :  { %v6801_v40 = vpop.permute.xlu1 %6800  ;;  %p9139_p9 = pnand %p9138_p8, %p9132_p5 }
0x1363   :  { %v6804_v27 = vsel %vm6803_vm0, %v6064_v58, %v6801_v40 }
0x1364   :  { %v6806_v59 = vsel %vm6805_vm1, %v6804_v27, 0.0 }
0x1365   :  { %6807 = vst [vmem:[#allocation29] sm:$0x3] %v6806_v59 }
0x1366   :  { %9142 = shalt.err (!%p9139_p9)
}
0x1367   :  { %6967 = dma.vmem_to_hbm [thread:$0]  %s6965_s7, 32, %s10445_s23, [#allocation8]  }
0x1368   :  { %9167 = dma.done.wait [#allocation8], 32  }
0x1369   :  { %9168 = vsyncadd [#allocation8], 4294967264 }
0x136a   :  { %9169 = dma.done.wait [#allocation31], 256  }
0x136b   :  { %9170 = vsyncadd [#allocation31], 4294967040 }
0x136c   :  { %6986 = vsyncpa [#allocation7], 1 }
0x136d   :  { %6987 = vsyncpa [#allocation10], 1 }
0x136e   :  { %6988 = vsyncpa [#allocation13], 1 }
0x136f   :  { %6989 = vsyncpa [#allocation16], 1 }
0x1370   :  { %6990 = vsyncpa [#allocation19], 1 }
0x1371   :  { %6991 = vsyncpa [#allocation22], 1 }
0x1372   :  { %6992 = vsyncpa [#allocation25], 1 }
0x1373   :  { %6993 = vsyncpa [#allocation28], 1 }
0x1374   :  { %6994 = vsyncpa [#allocation8], 1 }
0x1375   :  { %6995 = vsyncpa [#allocation31], 1 }

</bundles_post_ra>
